<compile_context>
chip_gen: v7x
topology: tpu7x:2x2x1
jax: 0.10.0
libtpu: 0.0.40
codegen_flags: <defaults>
</compile_context>

<pallas_src>
import functools

import numpy as np
import jax
import jax.numpy as jnp
from jax.experimental import pallas as pl
from jax.experimental.pallas import tpu as pltpu


# ---------------------------------------------------------------------------
# Host-side constant matrices (tiny, trace-time numpy -> jit constants)
# ---------------------------------------------------------------------------
def _pool_select(H, W):
    """S (H/2*W/2, H*W): picks the 2x2-block anchor row for MaxPool2d(2,2)."""
    Ho, Wo = H // 2, W // 2
    S = np.zeros((Ho * Wo, H * W), np.float32)
    for p in range(Ho * Wo):
        hp, wp = divmod(p, Wo)
        S[p, (2 * hp) * W + 2 * wp] = 1.0
    return jnp.asarray(S)


def _tconv_scatter(Hin, Win):
    """P (4*Hin*Win, 4*Hin*Win): scatters the (a,b) sub-blocks of a
    ConvTranspose2d(k=2, stride=2) output into row-major (2Hin, 2Win)."""
    Wout = 2 * Win
    HWin = Hin * Win
    P = np.zeros((4 * HWin, 4 * HWin), np.float32)
    for r_in in range(HWin):
        h, w = divmod(r_in, Win)
        for a in range(2):
            for b in range(2):
                blk = a * 2 + b
                r_out = (2 * h + a) * Wout + (2 * w + b)
                P[r_out, blk * HWin + r_in] = 1.0
    return jnp.asarray(P)


def _edge_mask(H, W):
    """E (H*W, 2): col 0 = 1 where w == 0, col 1 = 1 where w == W-1."""
    E = np.zeros((H * W, 2), np.float32)
    for r in range(H * W):
        w = r % W
        if w == 0:
            E[r, 0] = 1.0
        if w == W - 1:
            E[r, 1] = 1.0
    return jnp.asarray(E)


# ---------------------------------------------------------------------------
# Fused forward-pass kernel (one grid step = one batch element)
# ---------------------------------------------------------------------------
def _autoencoder_kernel(x_ref,
                        w1_ref, b1_ref, e1_ref, s1_ref,
                        w2_ref, b2_ref, e2_ref, s2_ref,
                        wt1_ref, bt1_ref, p1_ref,
                        wt2_ref, bt2_ref, p2_ref,
                        out_ref,
                        xpad1_ref, pat1_ref, pp1_ref,
                        xpad2_ref, pat2_ref, pp2_ref,
                        *, W1, W2):
    f32 = jnp.float32

    def conv3x3_relu(xval, xpad_ref, pat_ref, w_ref, b_ref, e_ref, W):
        """3x3 'same' conv + ReLU on a flattened (H*W, Cin) image."""
        HW, Cin = xval.shape
        pad = W + 1
        # zero halo + flattened image in the middle of the padded scratch
        xpad_ref[0:pad, :] = jnp.zeros((pad, Cin), f32)
        xpad_ref[pad:pad + HW, :] = xval
        xpad_ref[pad + HW:pad + HW + pad, :] = jnp.zeros((pad, Cin), f32)
        keep_l = 1.0 - e_ref[:, 0:1]          # kills taps that wrapped past w == 0
        keep_r = 1.0 - e_ref[:, 1:2]          # kills taps that wrapped past w == W-1
        k = 0
        for dh in (-1, 0, 1):
            for dw in (-1, 0, 1):
                ofs = dh * W + dw
                tap = xpad_ref[pad + ofs:pad + ofs + HW, :]
                if dw == 1:
                    tap = tap * keep_r
                elif dw == -1:
                    tap = tap * keep_l
                pat_ref[:, k * Cin:(k + 1) * Cin] = tap
                k += 1
        # single contracted matmul: (HW, 9*Cin) @ (9*Cin, Cout)
        y = jnp.dot(pat_ref[...], w_ref[...], preferred_element_type=f32)
        return jnp.maximum(y + b_ref[...], 0.0)

    def maxpool2x2(yval, pp_ref, s_ref, W):
        """MaxPool2d(2,2) on a flattened (H*W, C) image."""
        HW, C = yval.shape
        pp_ref[0:HW, :] = yval
        pp_ref[HW:HW + W + 1, :] = jnp.zeros((W + 1, C), f32)
        m4 = jnp.maximum(
            jnp.maximum(pp_ref[0:HW, :], pp_ref[1:1 + HW, :]),
            jnp.maximum(pp_ref[W:W + HW, :], pp_ref[W + 1:W + 1 + HW, :]))
        # compact the (2h, 2w) anchor rows: (HW/4, HW) @ (HW, C)
        return jnp.dot(s_ref[...], m4, preferred_element_type=f32)

    def tconv2x2(xval, w_ref, b_ref, p_ref, act):
        """ConvTranspose2d(k=2, stride=2) on a flattened (Hin*Win, Cin) image."""
        HWin, _ = xval.shape
        Cout = b_ref.shape[1]
        HWout = p_ref.shape[0]
        u = jnp.dot(xval, w_ref[...], preferred_element_type=f32)   # (HWin, 4*Cout)
        acc = jnp.zeros((HWout, Cout), f32)
        for blk in range(4):                                         # (a, b) sub-blocks
            acc = acc + jnp.dot(p_ref[:, blk * HWin:(blk + 1) * HWin],
                                u[:, blk * Cout:(blk + 1) * Cout],
                                preferred_element_type=f32)
        return act(acc + b_ref[...])

    relu = lambda v: jnp.maximum(v, 0.0)
    sigmoid = lambda v: 1.0 / (1.0 + jnp.exp(-v))

    x = x_ref[0]                                                        # (H*W, 1)
    h1 = conv3x3_relu(x, xpad1_ref, pat1_ref, w1_ref, b1_ref, e1_ref, W1)   # (HW, 16)
    q1 = maxpool2x2(h1, pp1_ref, s1_ref, W1)                                # (HW/4, 16)
    h2 = conv3x3_relu(q1, xpad2_ref, pat2_ref, w2_ref, b2_ref, e2_ref, W2)  # (HW/4, 4)
    q2 = maxpool2x2(h2, pp2_ref, s2_ref, W2)                                # (HW/16, 4)
    d1 = tconv2x2(q2, wt1_ref, bt1_ref, p1_ref, relu)                       # (HW/4, 16)
    d2 = tconv2x2(d1, wt2_ref, bt2_ref, p2_ref, sigmoid)                    # (HW, 1)
    out_ref[0] = d2


# ---------------------------------------------------------------------------
# Parameters (deterministic, PyTorch-default-style uniform init)
# ---------------------------------------------------------------------------
def init_params(key):
    def uni(k, shape, fan_in):
        bound = 1.0 / np.sqrt(float(fan_in))
        return jax.random.uniform(k, shape, jnp.float32, -bound, bound)

    ks = jax.random.split(key, 8)
    return {
        "conv1_w": uni(ks[0], (16, 1, 3, 3), 1 * 9),
        "conv1_b": uni(ks[1], (16,), 1 * 9),
        "conv2_w": uni(ks[2], (4, 16, 3, 3), 16 * 9),
        "conv2_b": uni(ks[3], (4,), 16 * 9),
        "tconv1_w": uni(ks[4], (4, 16, 2, 2), 16 * 4),
        "tconv1_b": uni(ks[5], (16,), 16 * 4),
        "tconv2_w": uni(ks[6], (16, 1, 2, 2), 1 * 4),
        "tconv2_b": uni(ks[7], (1,), 1 * 4),
    }


# ---------------------------------------------------------------------------
# Full forward pass (mirrors ConvAutoencoder.forward) -- one pallas_call
# ---------------------------------------------------------------------------
@jax.jit
def conv_autoencoder_forward(x_nchw, params):
    N, C, H, W = x_nchw.shape
    assert C == 1 and H % 4 == 0 and W % 4 == 0
    HW = H * W
    H2, W2 = H // 2, W // 2
    HW2 = H2 * W2
    HW4 = (H // 4) * (W // 4)
    f32 = jnp.float32

    x = x_nchw.reshape(N, HW, 1).astype(f32)            # NCHW -> flat rows (bitcast)

    # weights rearranged as matmul operands (tiny; constant-folded per params)
    w1m = jnp.transpose(params["conv1_w"], (2, 3, 1, 0)).reshape(9 * 1, 16).astype(f32)
    b1 = params["conv1_b"].reshape(1, 16).astype(f32)
    w2m = jnp.transpose(params["conv2_w"], (2, 3, 1, 0)).reshape(9 * 16, 4).astype(f32)
    b2 = params["conv2_b"].reshape(1, 4).astype(f32)
    wt1m = jnp.transpose(params["tconv1_w"], (0, 2, 3, 1)).reshape(4, 4 * 16).astype(f32)
    bt1 = params["tconv1_b"].reshape(1, 16).astype(f32)
    wt2m = jnp.transpose(params["tconv2_w"], (0, 2, 3, 1)).reshape(16, 4 * 1).astype(f32)
    bt2 = params["tconv2_b"].reshape(1, 1).astype(f32)

    # constant edge-mask / pooling-selection / tconv-scatter matrices
    e1, s1 = _edge_mask(H, W), _pool_select(H, W)
    e2, s2 = _edge_mask(H2, W2), _pool_select(H2, W2)
    p1 = _tconv_scatter(H // 4, W // 4)                  # (HW2, HW2)
    p2 = _tconv_scatter(H2, W2)                          # (HW,  HW)

    kern = functools.partial(_autoencoder_kernel, W1=W, W2=W2)
    const2 = lambda n: (0, 0)

    grid_spec = pltpu.PrefetchScalarGridSpec(
        num_scalar_prefetch=0,
        grid=(N,),
        in_specs=[
            pl.BlockSpec((1, HW, 1), lambda n: (n, 0, 0)),   # x (per batch element)
            pl.BlockSpec((9, 16), const2),                   # w1m
            pl.BlockSpec((1, 16), const2),                   # b1
            pl.BlockSpec((HW, 2), const2),                   # e1
            pl.BlockSpec((HW2, HW), const2),                 # s1
            pl.BlockSpec((9 * 16, 4), const2),               # w2m
            pl.BlockSpec((1, 4), const2),                    # b2
            pl.BlockSpec((HW2, 2), const2),                  # e2
            pl.BlockSpec((HW4, HW2), const2),                # s2
            pl.BlockSpec((4, 4 * 16), const2),               # wt1m
            pl.BlockSpec((1, 16), const2),                   # bt1
            pl.BlockSpec((HW2, HW2), const2),                # p1
            pl.BlockSpec((16, 4), const2),                   # wt2m
            pl.BlockSpec((1, 1), const2),                    # bt2
            pl.BlockSpec((HW, HW), const2),                  # p2
        ],
        out_specs=pl.BlockSpec((1, HW, 1), lambda n: (n, 0, 0)),
        scratch_shapes=[
            pltpu.VMEM((HW + 2 * (W + 1), 1), f32),          # padded conv1 input
            pltpu.VMEM((HW, 9), f32),                        # conv1 im2col patches
            pltpu.VMEM((HW + W + 1, 16), f32),               # pool1 shift buffer
            pltpu.VMEM((HW2 + 2 * (W2 + 1), 16), f32),       # padded conv2 input
            pltpu.VMEM((HW2, 9 * 16), f32),                  # conv2 im2col patches
            pltpu.VMEM((HW2 + W2 + 1, 4), f32),              # pool2 shift buffer
        ],
    )

    out = pl.pallas_call(
        kern,
        out_shape=jax.ShapeDtypeStruct((N, HW, 1), f32),
        grid_spec=grid_spec,
        compiler_params=pltpu.CompilerParams(
            dimension_semantics=("parallel",)),              # 2 TCs on v7x; no-op v5e/v6e
    )(x, w1m, b1, e1, s1, w2m, b2, e2, s2, wt1m, bt1, p1, wt2m, bt2, p2)

    return out.reshape(N, 1, H, W)                           # flat rows -> NCHW (bitcast)


if __name__ == "__main__":
    key = jax.random.PRNGKey(0)
    k_x, k_p = jax.random.split(key)
    x = jax.random.normal(k_x, (2, 1, 16, 16), dtype=jnp.float32)   # NCHW, Cin=1
    params = init_params(k_p)

    out = conv_autoencoder_forward(x, params)
    out = jax.block_until_ready(out)

    assert out.shape == (2, 1, 16, 16), out.shape
    assert bool(jnp.all(jnp.isfinite(out)))
    assert bool(jnp.all((out >= 0.0) & (out <= 1.0)))  # sigmoid output range
    print("KERNEL_OK")
</pallas_src>

<mosaic_0001>
module attributes {stable_mosaic.version = 11 : i64} {
  func.func @_autoencoder_kernel(%arg0: i32, %arg1: memref<1x256x1xf32, #tpu.memory_space<vmem>>, %arg2: memref<9x16xf32, #tpu.memory_space<vmem>>, %arg3: memref<1x16xf32, #tpu.memory_space<vmem>>, %arg4: memref<256x2xf32, #tpu.memory_space<vmem>>, %arg5: memref<64x256xf32, #tpu.memory_space<vmem>>, %arg6: memref<144x4xf32, #tpu.memory_space<vmem>>, %arg7: memref<1x4xf32, #tpu.memory_space<vmem>>, %arg8: memref<64x2xf32, #tpu.memory_space<vmem>>, %arg9: memref<16x64xf32, #tpu.memory_space<vmem>>, %arg10: memref<4x64xf32, #tpu.memory_space<vmem>>, %arg11: memref<1x16xf32, #tpu.memory_space<vmem>>, %arg12: memref<64x64xf32, #tpu.memory_space<vmem>>, %arg13: memref<16x4xf32, #tpu.memory_space<vmem>>, %arg14: memref<1x1xf32, #tpu.memory_space<vmem>>, %arg15: memref<256x256xf32, #tpu.memory_space<vmem>>, %arg16: memref<1x256x1xf32, #tpu.memory_space<vmem>>, %arg17: memref<290x1xf32, #tpu.memory_space<vmem>>, %arg18: memref<256x9xf32, #tpu.memory_space<vmem>>, %arg19: memref<273x16xf32, #tpu.memory_space<vmem>>, %arg20: memref<82x16xf32, #tpu.memory_space<vmem>>, %arg21: memref<64x144xf32, #tpu.memory_space<vmem>>, %arg22: memref<73x4xf32, #tpu.memory_space<vmem>>) attributes {dimension_semantics = [#tpu.dimension_semantics<parallel>], iteration_bounds = array<i64: 2>, scalar_prefetch = 0 : i64, scratch_operands = 6 : i64, tpu.core_type = #tpu.core_type<tc>, window_params = [{transform_indices = @transform_0, window_bounds = array<i64: 1, 256, 1>}, {pipeline_mode = #tpu.pipeline_mode<synchronous>, transform_indices = @transform_1, window_bounds = array<i64: 9, 16>}, {pipeline_mode = #tpu.pipeline_mode<synchronous>, transform_indices = @transform_2, window_bounds = array<i64: 1, 16>}, {pipeline_mode = #tpu.pipeline_mode<synchronous>, transform_indices = @transform_3, window_bounds = array<i64: 256, 2>}, {pipeline_mode = #tpu.pipeline_mode<synchronous>, transform_indices = @transform_4, window_bounds = array<i64: 64, 256>}, {pipeline_mode = #tpu.pipeline_mode<synchronous>, transform_indices = @transform_5, window_bounds = array<i64: 144, 4>}, {pipeline_mode = #tpu.pipeline_mode<synchronous>, transform_indices = @transform_6, window_bounds = array<i64: 1, 4>}, {pipeline_mode = #tpu.pipeline_mode<synchronous>, transform_indices = @transform_7, window_bounds = array<i64: 64, 2>}, {pipeline_mode = #tpu.pipeline_mode<synchronous>, transform_indices = @transform_8, window_bounds = array<i64: 16, 64>}, {pipeline_mode = #tpu.pipeline_mode<synchronous>, transform_indices = @transform_9, window_bounds = array<i64: 4, 64>}, {pipeline_mode = #tpu.pipeline_mode<synchronous>, transform_indices = @transform_10, window_bounds = array<i64: 1, 16>}, {pipeline_mode = #tpu.pipeline_mode<synchronous>, transform_indices = @transform_11, window_bounds = array<i64: 64, 64>}, {pipeline_mode = #tpu.pipeline_mode<synchronous>, transform_indices = @transform_12, window_bounds = array<i64: 16, 4>}, {pipeline_mode = #tpu.pipeline_mode<synchronous>, transform_indices = @transform_13, window_bounds = array<i64: 1, 1>}, {pipeline_mode = #tpu.pipeline_mode<synchronous>, transform_indices = @transform_14, window_bounds = array<i64: 256, 256>}, {transform_indices = @transform_15, window_bounds = array<i64: 1, 256, 1>}]} {
    %c0 = arith.constant 0 : index
    %c0_0 = arith.constant 0 : index
    %c0_1 = arith.constant 0 : index
    %0 = vector.load %arg1[%c0, %c0_0, %c0_1] : memref<1x256x1xf32, #tpu.memory_space<vmem>>, vector<1x256x1xf32>
    %1 = vector.shape_cast %0 : vector<1x256x1xf32> to vector<256x1xf32>
    %cst = arith.constant 0.000000e+00 : f32
    %2 = vector.broadcast %cst : f32 to vector<17x1xf32>
    %c0_2 = arith.constant 0 : index
    %c0_3 = arith.constant 0 : index
    %3 = vector.load %arg17[%c0_2, %c0_3] : memref<290x1xf32, #tpu.memory_space<vmem>>, vector<17x1xf32>
    tpu.vector_store %arg17[%c0_2, %c0_3], %2 {strides = array<i32>} : memref<290x1xf32, #tpu.memory_space<vmem>>, vector<17x1xf32>,
    %c17 = arith.constant 17 : index
    %c0_4 = arith.constant 0 : index
    %4 = vector.load %arg17[%c17, %c0_4] : memref<290x1xf32, #tpu.memory_space<vmem>>, vector<256x1xf32>
    tpu.vector_store %arg17[%c17, %c0_4], %1 {strides = array<i32>} : memref<290x1xf32, #tpu.memory_space<vmem>>, vector<256x1xf32>,
    %cst_5 = arith.constant 0.000000e+00 : f32
    %5 = vector.broadcast %cst_5 : f32 to vector<17x1xf32>
    %c273 = arith.constant 273 : index
    %c0_6 = arith.constant 0 : index
    %6 = vector.load %arg17[%c273, %c0_6] : memref<290x1xf32, #tpu.memory_space<vmem>>, vector<17x1xf32>
    tpu.vector_store %arg17[%c273, %c0_6], %5 {strides = array<i32>} : memref<290x1xf32, #tpu.memory_space<vmem>>, vector<17x1xf32>,
    %c0_7 = arith.constant 0 : index
    %c0_8 = arith.constant 0 : index
    %7 = vector.load %arg4[%c0_7, %c0_8] : memref<256x2xf32, #tpu.memory_space<vmem>>, vector<256x1xf32>
    %cst_9 = arith.constant 1.000000e+00 : f32
    %8 = vector.broadcast %cst_9 : f32 to vector<256x1xf32>
    %9 = arith.subf %8, %7 : vector<256x1xf32>
    %c0_10 = arith.constant 0 : index
    %c1 = arith.constant 1 : index
    %10 = vector.load %arg4[%c0_10, %c1] : memref<256x2xf32, #tpu.memory_space<vmem>>, vector<256x1xf32>
    %cst_11 = arith.constant 1.000000e+00 : f32
    %11 = vector.broadcast %cst_11 : f32 to vector<256x1xf32>
    %12 = arith.subf %11, %10 : vector<256x1xf32>
    %c0_12 = arith.constant 0 : index
    %c0_13 = arith.constant 0 : index
    %13 = vector.load %arg17[%c0_12, %c0_13] : memref<290x1xf32, #tpu.memory_space<vmem>>, vector<256x1xf32>
    %14 = arith.mulf %13, %9 : vector<256x1xf32>
    %c0_14 = arith.constant 0 : index
    %c0_15 = arith.constant 0 : index
    %15 = vector.load %arg18[%c0_14, %c0_15] : memref<256x9xf32, #tpu.memory_space<vmem>>, vector<256x1xf32>
    tpu.vector_store %arg18[%c0_14, %c0_15], %14 {strides = array<i32>} : memref<256x9xf32, #tpu.memory_space<vmem>>, vector<256x1xf32>,
    %c1_16 = arith.constant 1 : index
    %c0_17 = arith.constant 0 : index
    %16 = vector.load %arg17[%c1_16, %c0_17] : memref<290x1xf32, #tpu.memory_space<vmem>>, vector<256x1xf32>
    %c0_18 = arith.constant 0 : index
    %c1_19 = arith.constant 1 : index
    %17 = vector.load %arg18[%c0_18, %c1_19] : memref<256x9xf32, #tpu.memory_space<vmem>>, vector<256x1xf32>
    tpu.vector_store %arg18[%c0_18, %c1_19], %16 {strides = array<i32>} : memref<256x9xf32, #tpu.memory_space<vmem>>, vector<256x1xf32>,
    %c2 = arith.constant 2 : index
    %c0_20 = arith.constant 0 : index
    %18 = vector.load %arg17[%c2, %c0_20] : memref<290x1xf32, #tpu.memory_space<vmem>>, vector<256x1xf32>
    %19 = arith.mulf %18, %12 : vector<256x1xf32>
    %c0_21 = arith.constant 0 : index
    %c2_22 = arith.constant 2 : index
    %20 = vector.load %arg18[%c0_21, %c2_22] : memref<256x9xf32, #tpu.memory_space<vmem>>, vector<256x1xf32>
    tpu.vector_store %arg18[%c0_21, %c2_22], %19 {strides = array<i32>} : memref<256x9xf32, #tpu.memory_space<vmem>>, vector<256x1xf32>,
    %c16 = arith.constant 16 : index
    %c0_23 = arith.constant 0 : index
    %21 = vector.load %arg17[%c16, %c0_23] : memref<290x1xf32, #tpu.memory_space<vmem>>, vector<256x1xf32>
    %22 = arith.mulf %21, %9 : vector<256x1xf32>
    %c0_24 = arith.constant 0 : index
    %c3 = arith.constant 3 : index
    %23 = vector.load %arg18[%c0_24, %c3] : memref<256x9xf32, #tpu.memory_space<vmem>>, vector<256x1xf32>
    tpu.vector_store %arg18[%c0_24, %c3], %22 {strides = array<i32>} : memref<256x9xf32, #tpu.memory_space<vmem>>, vector<256x1xf32>,
    %c17_25 = arith.constant 17 : index
    %c0_26 = arith.constant 0 : index
    %24 = vector.load %arg17[%c17_25, %c0_26] : memref<290x1xf32, #tpu.memory_space<vmem>>, vector<256x1xf32>
    %c0_27 = arith.constant 0 : index
    %c4 = arith.constant 4 : index
    %25 = vector.load %arg18[%c0_27, %c4] : memref<256x9xf32, #tpu.memory_space<vmem>>, vector<256x1xf32>
    tpu.vector_store %arg18[%c0_27, %c4], %24 {strides = array<i32>} : memref<256x9xf32, #tpu.memory_space<vmem>>, vector<256x1xf32>,
    %c18 = arith.constant 18 : index
    %c0_28 = arith.constant 0 : index
    %26 = vector.load %arg17[%c18, %c0_28] : memref<290x1xf32, #tpu.memory_space<vmem>>, vector<256x1xf32>
    %27 = arith.mulf %26, %12 : vector<256x1xf32>
    %c0_29 = arith.constant 0 : index
    %c5 = arith.constant 5 : index
    %28 = vector.load %arg18[%c0_29, %c5] : memref<256x9xf32, #tpu.memory_space<vmem>>, vector<256x1xf32>
    tpu.vector_store %arg18[%c0_29, %c5], %27 {strides = array<i32>} : memref<256x9xf32, #tpu.memory_space<vmem>>, vector<256x1xf32>,
    %c32 = arith.constant 32 : index
    %c0_30 = arith.constant 0 : index
    %29 = vector.load %arg17[%c32, %c0_30] : memref<290x1xf32, #tpu.memory_space<vmem>>, vector<256x1xf32>
    %30 = arith.mulf %29, %9 : vector<256x1xf32>
    %c0_31 = arith.constant 0 : index
    %c6 = arith.constant 6 : index
    %31 = vector.load %arg18[%c0_31, %c6] : memref<256x9xf32, #tpu.memory_space<vmem>>, vector<256x1xf32>
    tpu.vector_store %arg18[%c0_31, %c6], %30 {strides = array<i32>} : memref<256x9xf32, #tpu.memory_space<vmem>>, vector<256x1xf32>,
    %c33 = arith.constant 33 : index
    %c0_32 = arith.constant 0 : index
    %32 = vector.load %arg17[%c33, %c0_32] : memref<290x1xf32, #tpu.memory_space<vmem>>, vector<256x1xf32>
    %c0_33 = arith.constant 0 : index
    %c7 = arith.constant 7 : index
    %33 = vector.load %arg18[%c0_33, %c7] : memref<256x9xf32, #tpu.memory_space<vmem>>, vector<256x1xf32>
    tpu.vector_store %arg18[%c0_33, %c7], %32 {strides = array<i32>} : memref<256x9xf32, #tpu.memory_space<vmem>>, vector<256x1xf32>,
    %c34 = arith.constant 34 : index
    %c0_34 = arith.constant 0 : index
    %34 = vector.load %arg17[%c34, %c0_34] : memref<290x1xf32, #tpu.memory_space<vmem>>, vector<256x1xf32>
    %35 = arith.mulf %34, %12 : vector<256x1xf32>
    %c0_35 = arith.constant 0 : index
    %c8 = arith.constant 8 : index
    %36 = vector.load %arg18[%c0_35, %c8] : memref<256x9xf32, #tpu.memory_space<vmem>>, vector<256x1xf32>
    tpu.vector_store %arg18[%c0_35, %c8], %35 {strides = array<i32>} : memref<256x9xf32, #tpu.memory_space<vmem>>, vector<256x1xf32>,
    %c0_36 = arith.constant 0 : index
    %c0_37 = arith.constant 0 : index
    %37 = vector.load %arg18[%c0_36, %c0_37] : memref<256x9xf32, #tpu.memory_space<vmem>>, vector<256x9xf32>
    %c0_38 = arith.constant 0 : index
    %c0_39 = arith.constant 0 : index
    %38 = vector.load %arg2[%c0_38, %c0_39] : memref<9x16xf32, #tpu.memory_space<vmem>>, vector<9x16xf32>
    %cst_40 = arith.constant dense<0.000000e+00> : vector<256x16xf32>
    %39 = tpu.matmul %37, %38, %cst_40 {dimension_numbers = #tpu.dot_dimension_numbers<[1], [0], [0], [1], [0, 0, 1, 1], [], []>} : vector<256x9xf32>, vector<9x16xf32>, vector<256x16xf32> -> vector<256x16xf32>
    %c0_41 = arith.constant 0 : index
    %c0_42 = arith.constant 0 : index
    %40 = vector.load %arg3[%c0_41, %c0_42] : memref<1x16xf32, #tpu.memory_space<vmem>>, vector<1x16xf32>
    %41 = vector.broadcast %40 : vector<1x16xf32> to vector<256x16xf32>
    %42 = arith.addf %39, %41 : vector<256x16xf32>
    %cst_43 = arith.constant 0.000000e+00 : f32
    %43 = vector.broadcast %cst_43 : f32 to vector<256x16xf32>
    %44 = arith.maximumf %42, %43 : vector<256x16xf32>
    %c0_44 = arith.constant 0 : index
    %c0_45 = arith.constant 0 : index
    %45 = vector.load %arg19[%c0_44, %c0_45] : memref<273x16xf32, #tpu.memory_space<vmem>>, vector<256x16xf32>
    tpu.vector_store %arg19[%c0_44, %c0_45], %44 {strides = array<i32>} : memref<273x16xf32, #tpu.memory_space<vmem>>, vector<256x16xf32>,
    %cst_46 = arith.constant 0.000000e+00 : f32
    %46 = vector.broadcast %cst_46 : f32 to vector<17x16xf32>
    %c256 = arith.constant 256 : index
    %c0_47 = arith.constant 0 : index
    %47 = vector.load %arg19[%c256, %c0_47] : memref<273x16xf32, #tpu.memory_space<vmem>>, vector<17x16xf32>
    tpu.vector_store %arg19[%c256, %c0_47], %46 {strides = array<i32>} : memref<273x16xf32, #tpu.memory_space<vmem>>, vector<17x16xf32>,
    %c0_48 = arith.constant 0 : index
    %c0_49 = arith.constant 0 : index
    %48 = vector.load %arg19[%c0_48, %c0_49] : memref<273x16xf32, #tpu.memory_space<vmem>>, vector<256x16xf32>
    %c1_50 = arith.constant 1 : index
    %c0_51 = arith.constant 0 : index
    %49 = vector.load %arg19[%c1_50, %c0_51] : memref<273x16xf32, #tpu.memory_space<vmem>>, vector<256x16xf32>
    %50 = arith.maximumf %48, %49 : vector<256x16xf32>
    %c16_52 = arith.constant 16 : index
    %c0_53 = arith.constant 0 : index
    %51 = vector.load %arg19[%c16_52, %c0_53] : memref<273x16xf32, #tpu.memory_space<vmem>>, vector<256x16xf32>
    %c17_54 = arith.constant 17 : index
    %c0_55 = arith.constant 0 : index
    %52 = vector.load %arg19[%c17_54, %c0_55] : memref<273x16xf32, #tpu.memory_space<vmem>>, vector<256x16xf32>
    %53 = arith.maximumf %51, %52 : vector<256x16xf32>
    %54 = arith.maximumf %50, %53 : vector<256x16xf32>
    %c0_56 = arith.constant 0 : index
    %c0_57 = arith.constant 0 : index
    %55 = vector.load %arg5[%c0_56, %c0_57] : memref<64x256xf32, #tpu.memory_space<vmem>>, vector<64x256xf32>
    %cst_58 = arith.constant dense<0.000000e+00> : vector<64x16xf32>
    %56 = tpu.matmul %55, %54, %cst_58 {dimension_numbers = #tpu.dot_dimension_numbers<[1], [0], [0], [1], [0, 0, 1, 1], [], []>} : vector<64x256xf32>, vector<256x16xf32>, vector<64x16xf32> -> vector<64x16xf32>
    %cst_59 = arith.constant 0.000000e+00 : f32
    %57 = vector.broadcast %cst_59 : f32 to vector<9x16xf32>
    %c0_60 = arith.constant 0 : index
    %c0_61 = arith.constant 0 : index
    %58 = vector.load %arg20[%c0_60, %c0_61] : memref<82x16xf32, #tpu.memory_space<vmem>>, vector<9x16xf32>
    tpu.vector_store %arg20[%c0_60, %c0_61], %57 {strides = array<i32>} : memref<82x16xf32, #tpu.memory_space<vmem>>, vector<9x16xf32>,
    %c9 = arith.constant 9 : index
    %c0_62 = arith.constant 0 : index
    %59 = vector.load %arg20[%c9, %c0_62] : memref<82x16xf32, #tpu.memory_space<vmem>>, vector<64x16xf32>
    tpu.vector_store %arg20[%c9, %c0_62], %56 {strides = array<i32>} : memref<82x16xf32, #tpu.memory_space<vmem>>, vector<64x16xf32>,
    %cst_63 = arith.constant 0.000000e+00 : f32
    %60 = vector.broadcast %cst_63 : f32 to vector<9x16xf32>
    %c73 = arith.constant 73 : index
    %c0_64 = arith.constant 0 : index
    %61 = vector.load %arg20[%c73, %c0_64] : memref<82x16xf32, #tpu.memory_space<vmem>>, vector<9x16xf32>
    tpu.vector_store %arg20[%c73, %c0_64], %60 {strides = array<i32>} : memref<82x16xf32, #tpu.memory_space<vmem>>, vector<9x16xf32>,
    %c0_65 = arith.constant 0 : index
    %c0_66 = arith.constant 0 : index
    %62 = vector.load %arg8[%c0_65, %c0_66] : memref<64x2xf32, #tpu.memory_space<vmem>>, vector<64x1xf32>
    %cst_67 = arith.constant 1.000000e+00 : f32
    %63 = vector.broadcast %cst_67 : f32 to vector<64x1xf32>
    %64 = arith.subf %63, %62 : vector<64x1xf32>
    %c0_68 = arith.constant 0 : index
    %c1_69 = arith.constant 1 : index
    %65 = vector.load %arg8[%c0_68, %c1_69] : memref<64x2xf32, #tpu.memory_space<vmem>>, vector<64x1xf32>
    %cst_70 = arith.constant 1.000000e+00 : f32
    %66 = vector.broadcast %cst_70 : f32 to vector<64x1xf32>
    %67 = arith.subf %66, %65 : vector<64x1xf32>
    %c0_71 = arith.constant 0 : index
    %c0_72 = arith.constant 0 : index
    %68 = vector.load %arg20[%c0_71, %c0_72] : memref<82x16xf32, #tpu.memory_space<vmem>>, vector<64x16xf32>
    %69 = vector.broadcast %64 : vector<64x1xf32> to vector<64x16xf32>
    %70 = arith.mulf %68, %69 : vector<64x16xf32>
    %c0_73 = arith.constant 0 : index
    %c0_74 = arith.constant 0 : index
    %71 = vector.load %arg21[%c0_73, %c0_74] : memref<64x144xf32, #tpu.memory_space<vmem>>, vector<64x16xf32>
    tpu.vector_store %arg21[%c0_73, %c0_74], %70 {strides = array<i32>} : memref<64x144xf32, #tpu.memory_space<vmem>>, vector<64x16xf32>,
    %c1_75 = arith.constant 1 : index
    %c0_76 = arith.constant 0 : index
    %72 = vector.load %arg20[%c1_75, %c0_76] : memref<82x16xf32, #tpu.memory_space<vmem>>, vector<64x16xf32>
    %c0_77 = arith.constant 0 : index
    %c16_78 = arith.constant 16 : index
    %73 = vector.load %arg21[%c0_77, %c16_78] : memref<64x144xf32, #tpu.memory_space<vmem>>, vector<64x16xf32>
    tpu.vector_store %arg21[%c0_77, %c16_78], %72 {strides = array<i32>} : memref<64x144xf32, #tpu.memory_space<vmem>>, vector<64x16xf32>,
    %c2_79 = arith.constant 2 : index
    %c0_80 = arith.constant 0 : index
    %74 = vector.load %arg20[%c2_79, %c0_80] : memref<82x16xf32, #tpu.memory_space<vmem>>, vector<64x16xf32>
    %75 = vector.broadcast %67 : vector<64x1xf32> to vector<64x16xf32>
    %76 = arith.mulf %74, %75 : vector<64x16xf32>
    %c0_81 = arith.constant 0 : index
    %c32_82 = arith.constant 32 : index
    %77 = vector.load %arg21[%c0_81, %c32_82] : memref<64x144xf32, #tpu.memory_space<vmem>>, vector<64x16xf32>
    tpu.vector_store %arg21[%c0_81, %c32_82], %76 {strides = array<i32>} : memref<64x144xf32, #tpu.memory_space<vmem>>, vector<64x16xf32>,
    %c8_83 = arith.constant 8 : index
    %c0_84 = arith.constant 0 : index
    %78 = vector.load %arg20[%c8_83, %c0_84] : memref<82x16xf32, #tpu.memory_space<vmem>>, vector<64x16xf32>
    %79 = vector.broadcast %64 : vector<64x1xf32> to vector<64x16xf32>
    %80 = arith.mulf %78, %79 : vector<64x16xf32>
    %c0_85 = arith.constant 0 : index
    %c48 = arith.constant 48 : index
    %81 = vector.load %arg21[%c0_85, %c48] : memref<64x144xf32, #tpu.memory_space<vmem>>, vector<64x16xf32>
    tpu.vector_store %arg21[%c0_85, %c48], %80 {strides = array<i32>} : memref<64x144xf32, #tpu.memory_space<vmem>>, vector<64x16xf32>,
    %c9_86 = arith.constant 9 : index
    %c0_87 = arith.constant 0 : index
    %82 = vector.load %arg20[%c9_86, %c0_87] : memref<82x16xf32, #tpu.memory_space<vmem>>, vector<64x16xf32>
    %c0_88 = arith.constant 0 : index
    %c64 = arith.constant 64 : index
    %83 = vector.load %arg21[%c0_88, %c64] : memref<64x144xf32, #tpu.memory_space<vmem>>, vector<64x16xf32>
    tpu.vector_store %arg21[%c0_88, %c64], %82 {strides = array<i32>} : memref<64x144xf32, #tpu.memory_space<vmem>>, vector<64x16xf32>,
    %c10 = arith.constant 10 : index
    %c0_89 = arith.constant 0 : index
    %84 = vector.load %arg20[%c10, %c0_89] : memref<82x16xf32, #tpu.memory_space<vmem>>, vector<64x16xf32>
    %85 = vector.broadcast %67 : vector<64x1xf32> to vector<64x16xf32>
    %86 = arith.mulf %84, %85 : vector<64x16xf32>
    %c0_90 = arith.constant 0 : index
    %c80 = arith.constant 80 : index
    %87 = vector.load %arg21[%c0_90, %c80] : memref<64x144xf32, #tpu.memory_space<vmem>>, vector<64x16xf32>
    tpu.vector_store %arg21[%c0_90, %c80], %86 {strides = array<i32>} : memref<64x144xf32, #tpu.memory_space<vmem>>, vector<64x16xf32>,
    %c16_91 = arith.constant 16 : index
    %c0_92 = arith.constant 0 : index
    %88 = vector.load %arg20[%c16_91, %c0_92] : memref<82x16xf32, #tpu.memory_space<vmem>>, vector<64x16xf32>
    %89 = vector.broadcast %64 : vector<64x1xf32> to vector<64x16xf32>
    %90 = arith.mulf %88, %89 : vector<64x16xf32>
    %c0_93 = arith.constant 0 : index
    %c96 = arith.constant 96 : index
    %91 = vector.load %arg21[%c0_93, %c96] : memref<64x144xf32, #tpu.memory_space<vmem>>, vector<64x16xf32>
    tpu.vector_store %arg21[%c0_93, %c96], %90 {strides = array<i32>} : memref<64x144xf32, #tpu.memory_space<vmem>>, vector<64x16xf32>,
    %c17_94 = arith.constant 17 : index
    %c0_95 = arith.constant 0 : index
    %92 = vector.load %arg20[%c17_94, %c0_95] : memref<82x16xf32, #tpu.memory_space<vmem>>, vector<64x16xf32>
    %c0_96 = arith.constant 0 : index
    %c112 = arith.constant 112 : index
    %93 = vector.load %arg21[%c0_96, %c112] : memref<64x144xf32, #tpu.memory_space<vmem>>, vector<64x16xf32>
    tpu.vector_store %arg21[%c0_96, %c112], %92 {strides = array<i32>} : memref<64x144xf32, #tpu.memory_space<vmem>>, vector<64x16xf32>,
    %c18_97 = arith.constant 18 : index
    %c0_98 = arith.constant 0 : index
    %94 = vector.load %arg20[%c18_97, %c0_98] : memref<82x16xf32, #tpu.memory_space<vmem>>, vector<64x16xf32>
    %95 = vector.broadcast %67 : vector<64x1xf32> to vector<64x16xf32>
    %96 = arith.mulf %94, %95 : vector<64x16xf32>
    %c0_99 = arith.constant 0 : index
    %c128 = arith.constant 128 : index
    %97 = vector.load %arg21[%c0_99, %c128] : memref<64x144xf32, #tpu.memory_space<vmem>>, vector<64x16xf32>
    tpu.vector_store %arg21[%c0_99, %c128], %96 {strides = array<i32>} : memref<64x144xf32, #tpu.memory_space<vmem>>, vector<64x16xf32>,
    %c0_100 = arith.constant 0 : index
    %c0_101 = arith.constant 0 : index
    %98 = vector.load %arg21[%c0_100, %c0_101] : memref<64x144xf32, #tpu.memory_space<vmem>>, vector<64x144xf32>
    %c0_102 = arith.constant 0 : index
    %c0_103 = arith.constant 0 : index
    %99 = vector.load %arg6[%c0_102, %c0_103] : memref<144x4xf32, #tpu.memory_space<vmem>>, vector<144x4xf32>
    %cst_104 = arith.constant dense<0.000000e+00> : vector<64x4xf32>
    %100 = tpu.matmul %98, %99, %cst_104 {dimension_numbers = #tpu.dot_dimension_numbers<[1], [0], [0], [1], [0, 0, 1, 1], [], []>} : vector<64x144xf32>, vector<144x4xf32>, vector<64x4xf32> -> vector<64x4xf32>
    %c0_105 = arith.constant 0 : index
    %c0_106 = arith.constant 0 : index
    %101 = vector.load %arg7[%c0_105, %c0_106] : memref<1x4xf32, #tpu.memory_space<vmem>>, vector<1x4xf32>
    %102 = vector.broadcast %101 : vector<1x4xf32> to vector<64x4xf32>
    %103 = arith.addf %100, %102 : vector<64x4xf32>
    %cst_107 = arith.constant 0.000000e+00 : f32
    %104 = vector.broadcast %cst_107 : f32 to vector<64x4xf32>
    %105 = arith.maximumf %103, %104 : vector<64x4xf32>
    %c0_108 = arith.constant 0 : index
    %c0_109 = arith.constant 0 : index
    %106 = vector.load %arg22[%c0_108, %c0_109] : memref<73x4xf32, #tpu.memory_space<vmem>>, vector<64x4xf32>
    tpu.vector_store %arg22[%c0_108, %c0_109], %105 {strides = array<i32>} : memref<73x4xf32, #tpu.memory_space<vmem>>, vector<64x4xf32>,
    %cst_110 = arith.constant 0.000000e+00 : f32
    %107 = vector.broadcast %cst_110 : f32 to vector<9x4xf32>
    %c64_111 = arith.constant 64 : index
    %c0_112 = arith.constant 0 : index
    %108 = vector.load %arg22[%c64_111, %c0_112] : memref<73x4xf32, #tpu.memory_space<vmem>>, vector<9x4xf32>
    tpu.vector_store %arg22[%c64_111, %c0_112], %107 {strides = array<i32>} : memref<73x4xf32, #tpu.memory_space<vmem>>, vector<9x4xf32>,
    %c0_113 = arith.constant 0 : index
    %c0_114 = arith.constant 0 : index
    %109 = vector.load %arg22[%c0_113, %c0_114] : memref<73x4xf32, #tpu.memory_space<vmem>>, vector<64x4xf32>
    %c1_115 = arith.constant 1 : index
    %c0_116 = arith.constant 0 : index
    %110 = vector.load %arg22[%c1_115, %c0_116] : memref<73x4xf32, #tpu.memory_space<vmem>>, vector<64x4xf32>
    %111 = arith.maximumf %109, %110 : vector<64x4xf32>
    %c8_117 = arith.constant 8 : index
    %c0_118 = arith.constant 0 : index
    %112 = vector.load %arg22[%c8_117, %c0_118] : memref<73x4xf32, #tpu.memory_space<vmem>>, vector<64x4xf32>
    %c9_119 = arith.constant 9 : index
    %c0_120 = arith.constant 0 : index
    %113 = vector.load %arg22[%c9_119, %c0_120] : memref<73x4xf32, #tpu.memory_space<vmem>>, vector<64x4xf32>
    %114 = arith.maximumf %112, %113 : vector<64x4xf32>
    %115 = arith.maximumf %111, %114 : vector<64x4xf32>
    %c0_121 = arith.constant 0 : index
    %c0_122 = arith.constant 0 : index
    %116 = vector.load %arg9[%c0_121, %c0_122] : memref<16x64xf32, #tpu.memory_space<vmem>>, vector<16x64xf32>
    %cst_123 = arith.constant dense<0.000000e+00> : vector<16x4xf32>
    %117 = tpu.matmul %116, %115, %cst_123 {dimension_numbers = #tpu.dot_dimension_numbers<[1], [0], [0], [1], [0, 0, 1, 1], [], []>} : vector<16x64xf32>, vector<64x4xf32>, vector<16x4xf32> -> vector<16x4xf32>
    %c0_124 = arith.constant 0 : index
    %c0_125 = arith.constant 0 : index
    %118 = vector.load %arg10[%c0_124, %c0_125] : memref<4x64xf32, #tpu.memory_space<vmem>>, vector<4x64xf32>
    %cst_126 = arith.constant dense<0.000000e+00> : vector<16x64xf32>
    %119 = tpu.matmul %117, %118, %cst_126 {dimension_numbers = #tpu.dot_dimension_numbers<[1], [0], [0], [1], [0, 0, 1, 1], [], []>} : vector<16x4xf32>, vector<4x64xf32>, vector<16x64xf32> -> vector<16x64xf32>
    %cst_127 = arith.constant 0.000000e+00 : f32
    %120 = vector.broadcast %cst_127 : f32 to vector<64x16xf32>
    %c0_128 = arith.constant 0 : index
    %c0_129 = arith.constant 0 : index
    %121 = vector.load %arg12[%c0_128, %c0_129] : memref<64x64xf32, #tpu.memory_space<vmem>>, vector<64x16xf32>
    %122 = vector.extract_strided_slice %119 {offsets = [0, 0], sizes = [16, 16], strides = [1, 1]} : vector<16x64xf32> to vector<16x16xf32>
    %cst_130 = arith.constant dense<0.000000e+00> : vector<64x16xf32>
    %123 = tpu.matmul %121, %122, %cst_130 {dimension_numbers = #tpu.dot_dimension_numbers<[1], [0], [0], [1], [0, 0, 1, 1], [], []>} : vector<64x16xf32>, vector<16x16xf32>, vector<64x16xf32> -> vector<64x16xf32>
    %124 = arith.addf %120, %123 : vector<64x16xf32>
    %c0_131 = arith.constant 0 : index
    %c16_132 = arith.constant 16 : index
    %125 = vector.load %arg12[%c0_131, %c16_132] : memref<64x64xf32, #tpu.memory_space<vmem>>, vector<64x16xf32>
    %126 = vector.extract_strided_slice %119 {offsets = [0, 16], sizes = [16, 16], strides = [1, 1]} : vector<16x64xf32> to vector<16x16xf32>
    %cst_133 = arith.constant dense<0.000000e+00> : vector<64x16xf32>
    %127 = tpu.matmul %125, %126, %cst_133 {dimension_numbers = #tpu.dot_dimension_numbers<[1], [0], [0], [1], [0, 0, 1, 1], [], []>} : vector<64x16xf32>, vector<16x16xf32>, vector<64x16xf32> -> vector<64x16xf32>
    %128 = arith.addf %124, %127 : vector<64x16xf32>
    %c0_134 = arith.constant 0 : index
    %c32_135 = arith.constant 32 : index
    %129 = vector.load %arg12[%c0_134, %c32_135] : memref<64x64xf32, #tpu.memory_space<vmem>>, vector<64x16xf32>
    %130 = vector.extract_strided_slice %119 {offsets = [0, 32], sizes = [16, 16], strides = [1, 1]} : vector<16x64xf32> to vector<16x16xf32>
    %cst_136 = arith.constant dense<0.000000e+00> : vector<64x16xf32>
    %131 = tpu.matmul %129, %130, %cst_136 {dimension_numbers = #tpu.dot_dimension_numbers<[1], [0], [0], [1], [0, 0, 1, 1], [], []>} : vector<64x16xf32>, vector<16x16xf32>, vector<64x16xf32> -> vector<64x16xf32>
    %132 = arith.addf %128, %131 : vector<64x16xf32>
    %c0_137 = arith.constant 0 : index
    %c48_138 = arith.constant 48 : index
    %133 = vector.load %arg12[%c0_137, %c48_138] : memref<64x64xf32, #tpu.memory_space<vmem>>, vector<64x16xf32>
    %134 = vector.extract_strided_slice %119 {offsets = [0, 48], sizes = [16, 16], strides = [1, 1]} : vector<16x64xf32> to vector<16x16xf32>
    %cst_139 = arith.constant dense<0.000000e+00> : vector<64x16xf32>
    %135 = tpu.matmul %133, %134, %cst_139 {dimension_numbers = #tpu.dot_dimension_numbers<[1], [0], [0], [1], [0, 0, 1, 1], [], []>} : vector<64x16xf32>, vector<16x16xf32>, vector<64x16xf32> -> vector<64x16xf32>
    %136 = arith.addf %132, %135 : vector<64x16xf32>
    %c0_140 = arith.constant 0 : index
    %c0_141 = arith.constant 0 : index
    %137 = vector.load %arg11[%c0_140, %c0_141] : memref<1x16xf32, #tpu.memory_space<vmem>>, vector<1x16xf32>
    %138 = vector.broadcast %137 : vector<1x16xf32> to vector<64x16xf32>
    %139 = arith.addf %136, %138 : vector<64x16xf32>
    %cst_142 = arith.constant 0.000000e+00 : f32
    %140 = vector.broadcast %cst_142 : f32 to vector<64x16xf32>
    %141 = arith.maximumf %139, %140 : vector<64x16xf32>
    %c0_143 = arith.constant 0 : index
    %c0_144 = arith.constant 0 : index
    %142 = vector.load %arg13[%c0_143, %c0_144] : memref<16x4xf32, #tpu.memory_space<vmem>>, vector<16x4xf32>
    %cst_145 = arith.constant dense<0.000000e+00> : vector<64x4xf32>
    %143 = tpu.matmul %141, %142, %cst_145 {dimension_numbers = #tpu.dot_dimension_numbers<[1], [0], [0], [1], [0, 0, 1, 1], [], []>} : vector<64x16xf32>, vector<16x4xf32>, vector<64x4xf32> -> vector<64x4xf32>
    %cst_146 = arith.constant 0.000000e+00 : f32
    %144 = vector.broadcast %cst_146 : f32 to vector<256x1xf32>
    %c0_147 = arith.constant 0 : index
    %c0_148 = arith.constant 0 : index
    %145 = vector.load %arg15[%c0_147, %c0_148] : memref<256x256xf32, #tpu.memory_space<vmem>>, vector<256x64xf32>
    %146 = vector.extract_strided_slice %143 {offsets = [0, 0], sizes = [64, 1], strides = [1, 1]} : vector<64x4xf32> to vector<64x1xf32>
    %cst_149 = arith.constant dense<0.000000e+00> : vector<256x1xf32>
    %147 = tpu.matmul %145, %146, %cst_149 {dimension_numbers = #tpu.dot_dimension_numbers<[1], [0], [0], [1], [0, 0, 1, 1], [], []>} : vector<256x64xf32>, vector<64x1xf32>, vector<256x1xf32> -> vector<256x1xf32>
    %148 = arith.addf %144, %147 : vector<256x1xf32>
    %c0_150 = arith.constant 0 : index
    %c64_151 = arith.constant 64 : index
    %149 = vector.load %arg15[%c0_150, %c64_151] : memref<256x256xf32, #tpu.memory_space<vmem>>, vector<256x64xf32>
    %150 = vector.extract_strided_slice %143 {offsets = [0, 1], sizes = [64, 1], strides = [1, 1]} : vector<64x4xf32> to vector<64x1xf32>
    %cst_152 = arith.constant dense<0.000000e+00> : vector<256x1xf32>
    %151 = tpu.matmul %149, %150, %cst_152 {dimension_numbers = #tpu.dot_dimension_numbers<[1], [0], [0], [1], [0, 0, 1, 1], [], []>} : vector<256x64xf32>, vector<64x1xf32>, vector<256x1xf32> -> vector<256x1xf32>
    %152 = arith.addf %148, %151 : vector<256x1xf32>
    %c0_153 = arith.constant 0 : index
    %c128_154 = arith.constant 128 : index
    %153 = vector.load %arg15[%c0_153, %c128_154] : memref<256x256xf32, #tpu.memory_space<vmem>>, vector<256x64xf32>
    %154 = vector.extract_strided_slice %143 {offsets = [0, 2], sizes = [64, 1], strides = [1, 1]} : vector<64x4xf32> to vector<64x1xf32>
    %cst_155 = arith.constant dense<0.000000e+00> : vector<256x1xf32>
    %155 = tpu.matmul %153, %154, %cst_155 {dimension_numbers = #tpu.dot_dimension_numbers<[1], [0], [0], [1], [0, 0, 1, 1], [], []>} : vector<256x64xf32>, vector<64x1xf32>, vector<256x1xf32> -> vector<256x1xf32>
    %156 = arith.addf %152, %155 : vector<256x1xf32>
    %c0_156 = arith.constant 0 : index
    %c192 = arith.constant 192 : index
    %157 = vector.load %arg15[%c0_156, %c192] : memref<256x256xf32, #tpu.memory_space<vmem>>, vector<256x64xf32>
    %158 = vector.extract_strided_slice %143 {offsets = [0, 3], sizes = [64, 1], strides = [1, 1]} : vector<64x4xf32> to vector<64x1xf32>
    %cst_157 = arith.constant dense<0.000000e+00> : vector<256x1xf32>
    %159 = tpu.matmul %157, %158, %cst_157 {dimension_numbers = #tpu.dot_dimension_numbers<[1], [0], [0], [1], [0, 0, 1, 1], [], []>} : vector<256x64xf32>, vector<64x1xf32>, vector<256x1xf32> -> vector<256x1xf32>
    %160 = arith.addf %156, %159 : vector<256x1xf32>
    %c0_158 = arith.constant 0 : index
    %c0_159 = arith.constant 0 : index
    %161 = vector.load %arg14[%c0_158, %c0_159] : memref<1x1xf32, #tpu.memory_space<vmem>>, vector<1x1xf32>
    %162 = vector.broadcast %161 : vector<1x1xf32> to vector<256x1xf32>
    %163 = arith.addf %160, %162 : vector<256x1xf32>
    %cst_160 = arith.constant 0.000000e+00 : f32
    %164 = vector.broadcast %cst_160 : f32 to vector<256x1xf32>
    %165 = arith.subf %164, %163 : vector<256x1xf32>
    %166 = math.exp %165 : vector<256x1xf32>
    %cst_161 = arith.constant 1.000000e+00 : f32
    %167 = vector.broadcast %cst_161 : f32 to vector<256x1xf32>
    %168 = arith.addf %167, %166 : vector<256x1xf32>
    %cst_162 = arith.constant 1.000000e+00 : f32
    %169 = vector.broadcast %cst_162 : f32 to vector<256x1xf32>
    %170 = arith.divf %169, %168 : vector<256x1xf32>
    %c0_163 = arith.constant 0 : index
    %c0_164 = arith.constant 0 : index
    %c0_165 = arith.constant 0 : index
    %171 = vector.load %arg16[%c0_163, %c0_164, %c0_165] : memref<1x256x1xf32, #tpu.memory_space<vmem>>, vector<1x256x1xf32>
    %172 = vector.shape_cast %171 : vector<1x256x1xf32> to vector<256x1xf32>
    %173 = vector.shape_cast %170 : vector<256x1xf32> to vector<1x256x1xf32>
    tpu.vector_store %arg16[%c0_163, %c0_164, %c0_165], %173 {strides = array<i32>} : memref<1x256x1xf32, #tpu.memory_space<vmem>>, vector<1x256x1xf32>,
    return
  }
  func.func @transform_0(%arg0: i32) -> (i32, i32, i32) {
    %c0_i32 = arith.constant 0 : i32
    %c0_i32_0 = arith.constant 0 : i32
    %c0_i32_1 = arith.constant 0 : i32
    return %arg0, %c0_i32, %c0_i32_0 : i32, i32, i32
  }
  func.func @transform_1(%arg0: i32) -> (i32, i32) {
    %c0_i32 = arith.constant 0 : i32
    %c0_i32_0 = arith.constant 0 : i32
    %c0_i32_1 = arith.constant 0 : i32
    return %c0_i32, %c0_i32_0 : i32, i32
  }
  func.func @transform_2(%arg0: i32) -> (i32, i32) {
    %c0_i32 = arith.constant 0 : i32
    %c0_i32_0 = arith.constant 0 : i32
    %c0_i32_1 = arith.constant 0 : i32
    return %c0_i32, %c0_i32_0 : i32, i32
  }
  func.func @transform_3(%arg0: i32) -> (i32, i32) {
    %c0_i32 = arith.constant 0 : i32
    %c0_i32_0 = arith.constant 0 : i32
    %c0_i32_1 = arith.constant 0 : i32
    return %c0_i32, %c0_i32_0 : i32, i32
  }
  func.func @transform_4(%arg0: i32) -> (i32, i32) {
    %c0_i32 = arith.constant 0 : i32
    %c0_i32_0 = arith.constant 0 : i32
    %c0_i32_1 = arith.constant 0 : i32
    return %c0_i32, %c0_i32_0 : i32, i32
  }
  func.func @transform_5(%arg0: i32) -> (i32, i32) {
    %c0_i32 = arith.constant 0 : i32
    %c0_i32_0 = arith.constant 0 : i32
    %c0_i32_1 = arith.constant 0 : i32
    return %c0_i32, %c0_i32_0 : i32, i32
  }
  func.func @transform_6(%arg0: i32) -> (i32, i32) {
    %c0_i32 = arith.constant 0 : i32
    %c0_i32_0 = arith.constant 0 : i32
    %c0_i32_1 = arith.constant 0 : i32
    return %c0_i32, %c0_i32_0 : i32, i32
  }
  func.func @transform_7(%arg0: i32) -> (i32, i32) {
    %c0_i32 = arith.constant 0 : i32
    %c0_i32_0 = arith.constant 0 : i32
    %c0_i32_1 = arith.constant 0 : i32
    return %c0_i32, %c0_i32_0 : i32, i32
  }
  func.func @transform_8(%arg0: i32) -> (i32, i32) {
    %c0_i32 = arith.constant 0 : i32
    %c0_i32_0 = arith.constant 0 : i32
    %c0_i32_1 = arith.constant 0 : i32
    return %c0_i32, %c0_i32_0 : i32, i32
  }
  func.func @transform_9(%arg0: i32) -> (i32, i32) {
    %c0_i32 = arith.constant 0 : i32
    %c0_i32_0 = arith.constant 0 : i32
    %c0_i32_1 = arith.constant 0 : i32
    return %c0_i32, %c0_i32_0 : i32, i32
  }
  func.func @transform_10(%arg0: i32) -> (i32, i32) {
    %c0_i32 = arith.constant 0 : i32
    %c0_i32_0 = arith.constant 0 : i32
    %c0_i32_1 = arith.constant 0 : i32
    return %c0_i32, %c0_i32_0 : i32, i32
  }
  func.func @transform_11(%arg0: i32) -> (i32, i32) {
    %c0_i32 = arith.constant 0 : i32
    %c0_i32_0 = arith.constant 0 : i32
    %c0_i32_1 = arith.constant 0 : i32
    return %c0_i32, %c0_i32_0 : i32, i32
  }
  func.func @transform_12(%arg0: i32) -> (i32, i32) {
    %c0_i32 = arith.constant 0 : i32
    %c0_i32_0 = arith.constant 0 : i32
    %c0_i32_1 = arith.constant 0 : i32
    return %c0_i32, %c0_i32_0 : i32, i32
  }
  func.func @transform_13(%arg0: i32) -> (i32, i32) {
    %c0_i32 = arith.constant 0 : i32
    %c0_i32_0 = arith.constant 0 : i32
    %c0_i32_1 = arith.constant 0 : i32
    return %c0_i32, %c0_i32_0 : i32, i32
  }
  func.func @transform_14(%arg0: i32) -> (i32, i32) {
    %c0_i32 = arith.constant 0 : i32
    %c0_i32_0 = arith.constant 0 : i32
    %c0_i32_1 = arith.constant 0 : i32
    return %c0_i32, %c0_i32_0 : i32, i32
  }
  func.func @transform_15(%arg0: i32) -> (i32, i32, i32) {
    %c0_i32 = arith.constant 0 : i32
    %c0_i32_0 = arith.constant 0 : i32
    %c0_i32_1 = arith.constant 0 : i32
    return %arg0, %c0_i32, %c0_i32_0 : i32, i32, i32
  }
}

</mosaic_0001>

<bundles_post_ra>
// kernel: conv_autoencoder_forward.1
= control target key start
LH: loop header
LB: loop body
LE: loop exit
PB: predicated region body
PF: predicated region fallthrough
CT: control target
= control target key end

     0   :  { %s11342_s0 = inlined_call_operand.vmem [shape: f32[2,256,1], index: 0, kind: input, shape index: {}]   ;;  %s11343_s1 = inlined_call_operand.vmem [shape: f32[9,16], index: 1, kind: input, shape index: {}]   ;;  %s11344_s2 = inlined_call_operand.vmem [shape: f32[1,16], index: 2, kind: input, shape index: {}]   ;;  %s11345_s3 = inlined_call_operand.vmem [shape: f32[256,2], index: 3, kind: input, shape index: {}]   ;;  %s11346_s4 = inlined_call_operand.vmem [shape: f32[64,256], index: 4, kind: input, shape index: {}]   ;;  %s11347_s5 = inlined_call_operand.vmem [shape: f32[144,4], index: 5, kind: input, shape index: {}]   ;;  %s11348_s6 = inlined_call_operand.vmem [shape: f32[1,4], index: 6, kind: input, shape index: {}]   ;;  %s11349_s7 = inlined_call_operand.hbm [shape: f32[64,2], index: 7, kind: input, shape index: {}]   ;;  %s11350_s8 = inlined_call_operand.hbm [shape: f32[16,64], index: 8, kind: input, shape index: {}]   ;;  %s11351_s9 = inlined_call_operand.vmem [shape: f32[4,64], index: 9, kind: input, shape index: {}]   ;;  %s11352_s10 = inlined_call_operand.vmem [shape: f32[1,16], index: 10, kind: input, shape index: {}]   ;;  %s11353_s11 = inlined_call_operand.hbm [shape: f32[64,64], index: 11, kind: input, shape index: {}]   ;;  %s11354_s12 = inlined_call_operand.vmem [shape: f32[16,4], index: 12, kind: input, shape index: {}]   ;;  %s11355_s13 = inlined_call_operand.<no memory space> [shape: f32[1,1], index: 13, kind: input, shape index: {}]   ;;  %s11356_s14 = inlined_call_operand.vmem [shape: f32[256,256], index: 14, kind: input, shape index: {}]   ;;  %s11357_s15 = inlined_call_operand.vmem [shape: f32[2,256,1], index: 15, kind: output, shape index: {}]  }
   0x1   :  { %11375 = sst [smem:[#allocation25_spill]] %s11352_s10  ;;  %v20_v0 = vstv %s11355_s13 }
   0x2   :  { %11376 = sst [smem:[#allocation26_spill]] %s11357_s15  ;;  %21 = vst [vmem:[#allocation8] sm:$0x1] %v20_v0 }
   0x3   :  { %22 = vsyncpa [#allocation10], 0 }
   0x4   :  { %23 = vsyncpa [#allocation12], 0  ;;  %s8600_s20 = smov 0  }
   0x5 LB: > { %11377 = sst [smem:[#allocation16_spill]] %s8487_s20  ;;  %s8606_s21 = sadd.s32 4294967295, %s8487_s20   ;;  %s8487_s20 = sphi %s8600_s20, %s29_s20  }
   0x6   : > { %p6859_p0 = scmp.ge.s32.totalorder %s8487_s20, 1  ;;  %p380_p1 = scmp.lt.s32.totalorder %s8487_s20, 3 }
   0x7   : > { %p11358_p2 = scmp.eq.s32.totalorder %s8606_s21, 0  ;;  %s8489_s22 = smov [#allocation11]  }
   0x8   : > { %p8611_p3 = pnand %p6859_p0, %p380_p1  ;;  %s423_s23 = sshll.u32 %s8489_s22, 4  ;;  %s424_s23 = int_to_ptr.vmem [resolvable:$true] %s423_s23 }
   0x9   : > { %s8490_s24 = smov [#allocation9]   ;;  %s8491_s27 = smov [#allocation13]  }
   0xa   : > { %s11378_s13 = scalar_select %p8611_p3, 1, 0 }
   0xb   : > { %p8124_p4 = pneg %p8611_p3  ;;  %s410_s25 = sshll.u32 %s8490_s24, 4  ;;  %s8623_s25 = int_to_ptr.vmem [resolvable:$true] %s410_s25 }
   0xc   : > { %s442_s28 = sshll.u32 %s8491_s27, 4  ;;  %s8389_s16 = scalar_lea.hbm %s11350_s8, 256  ;;  %s8625_s28 = int_to_ptr.vmem [resolvable:$true] %s442_s28 }
   0xd   : > { %p8619_p5 = pnand %p11358_p2, %p8124_p4  ;;  %p8390_p6 = scmp.ne.s32.totalorder %s11350_s8, %s8389_s16 }
   0xe   : > { %p8396_p10 = scmp.lt.u32.totalorder %s8389_s16, %s11350_s8 }
   0xf   : > { %p8635_p7 = pneg %p8619_p5 }
  0x11   : > { %p8392_p8 = pnand %p8635_p7, %p8390_p6 }
  0x13   : > { %p8393_p9 = pneg %p8392_p8 }
  0x15   : > { %p8398_p11 = pnand %p8396_p10, %p8393_p9 }
  0x17   : > { %8401 = shalt.err (!%p8398_p11)
}
  0x18   : > { %s8402_s27 = scalar_lea.vmem %s424_s23, 256  ;;  %p8410_p1 = scmp.lt.s32.totalorder %s424_s23, %s424_s23 }
  0x19   : > { %p8403_p12 = scmp.ne.s32.totalorder %s424_s23, %s8402_s27  ;;  %p8411_p4 = scmp.lt.s32.totalorder %s8402_s27, %s8402_s27 }
  0x1b   : > { %p8405_p13 = pnand %p8403_p12, %p8635_p7  ;;  %p8412_p2 = por %p8411_p4, %p8410_p1 }
  0x1d   : > { %p8406_p0 = pneg %p8405_p13 }
  0x1f   : > { %p8413_p3 = pnand %p8412_p2, %p8406_p0 }
  0x21   : > { %8416 = shalt.err (!%p8413_p3)
}
  0x22   : > { %s8492_s29 = smov 128   ;;  %s8493_s30 = smov 8  }
  0x23   : > { %8130 = dma.hbm_to_vmem [thread:$0]  (!%p8619_p5), %s11350_s8, 256, %s424_s23, [#allocation12], %s8492_s29, %s8492_s29, %s8493_s30  }
  0x24   : > { %s8417_s24 = scalar_lea.hbm %s11349_s7, 1024 }
  0x25   : > { %p8418_p2 = scmp.ne.s32.totalorder %s11349_s7, %s8417_s24  ;;  %p8424_p8 = scmp.lt.u32.totalorder %s8417_s24, %s11349_s7 }
  0x27   : > { %p8420_p3 = pnand %p8418_p2, %p8635_p7 }
  0x29   : > { %p8421_p6 = pneg %p8420_p3 }
  0x2b   : > { %p8426_p9 = pnand %p8424_p8, %p8421_p6 }
  0x2d   : > { %8429 = shalt.err (!%p8426_p9)
}
  0x2e   : > { %s8430_s23 = scalar_lea.vmem %s8623_s25, 1024  ;;  %p8438_p13 = scmp.lt.s32.totalorder %s8623_s25, %s8623_s25 }
  0x2f   : > { %p8431_p10 = scmp.ne.s32.totalorder %s8623_s25, %s8430_s23  ;;  %p8439_p0 = scmp.lt.s32.totalorder %s8430_s23, %s8430_s23 }
  0x31   : > { %p8433_p11 = pnand %p8431_p10, %p8635_p7  ;;  %p8440_p1 = por %p8439_p0, %p8438_p13 }
  0x33   : > { %p8434_p12 = pneg %p8433_p11 }
  0x35   : > { %p8441_p4 = pnand %p8440_p1, %p8434_p12 }
  0x37   : > { %8444 = shalt.err (!%p8441_p4)
}
  0x38   : > { %8127 = dma.hbm_to_vmem [thread:$0]  (!%p8619_p5), %s11349_s7, 1024, %s8623_s25, [#allocation10], %s8492_s29, %s8492_s29, %s8493_s30  }
  0x39   : > { %s8445_s17 = scalar_lea.hbm %s11353_s11, 1024 }
  0x3a   : > { %p8446_p2 = scmp.ne.s32.totalorder %s11353_s11, %s8445_s17  ;;  %p8452_p8 = scmp.lt.u32.totalorder %s8445_s17, %s11353_s11 }
  0x3c   : > { %p8448_p3 = pnand %p8446_p2, %p8635_p7 }
  0x3e   : > { %p8449_p6 = pneg %p8448_p3 }
  0x40   : > { %p8454_p9 = pnand %p8452_p8, %p8449_p6 }
  0x42   : > { %8457 = shalt.err (!%p8454_p9)
}
  0x43   : > { %s8458_s25 = scalar_lea.vmem %s8625_s28, 1024  ;;  %p8466_p13 = scmp.lt.s32.totalorder %s8625_s28, %s8625_s28 }
  0x44   : > { %p8459_p10 = scmp.ne.s32.totalorder %s8625_s28, %s8458_s25  ;;  %p8467_p0 = scmp.lt.s32.totalorder %s8458_s25, %s8458_s25 }
  0x46   : > { %p8461_p11 = pnand %p8459_p10, %p8635_p7  ;;  %p8468_p1 = por %p8467_p0, %p8466_p13 }
  0x48   : > { %p8462_p12 = pneg %p8461_p11 }
  0x4a   : > { %p8469_p4 = pnand %p8468_p1, %p8462_p12 }
  0x4c   : > { %8472 = shalt.err (!%p8469_p4)
}
  0x4d   : > { %8133 = dma.hbm_to_vmem [thread:$0]  (!%p8619_p5), %s11353_s11, 1024, %s8625_s28, [#allocation12], %s8492_s29, %s8492_s29, %s8493_s30  }
  0x4e   : > { %p11381_p2 = scmp.ne.s32.totalorder %s11378_s13, 0 }
  0x50   : > { %475 = sbr.rel (%p11381_p2) target bundleno = 3288 (0xcd8), region = 80 }
  0x57   : > { %p11382_p7 = scmp.eq.s32.totalorder %s8606_s21, 0 }
  0x59   : > { %8478 = dma.done.wait (%p11382_p7), [#allocation10], 1024   ;;  %p11383_p3 = pmov %p11382_p7 }
  0x5b   : > { %8480 = vsyncadd (%p11383_p3), [#allocation10], 4294966272  ;;  %p11384_p6 = pmov %p11383_p3 }
  0x5c   : > { %p11385_p8 = pmov %p11383_p3 }
  0x5d   : > { %8482 = dma.done.wait (%p11384_p6), [#allocation12], 1280  }
  0x5e   : > { %8484 = vsyncadd (%p11385_p8), [#allocation12], 4294966016  ;;  %vm573_vm0 = vcmask 7168   ;;  %v11361_v1 = vmov 0.0   ;;  %vm576_vm1 = vcmask 0   ;;  %p531_p5 = scmp.lt.s32.totalorder %s8606_s21, 1 }
  0x5f   : > { %574 = vst.msk [vmem:[#allocation2] sm:$0xff] %vm573_vm0, %v11361_v1  ;;  %575 = vst.msk [vmem:[#allocation2 + $0x8] sm:$0xff] %vm573_vm0, %v11361_v1  ;;  %v613_v2 = vld [vmem:[%s11345_s3] sm:$0xff]  ;;  %v615_v3 = vld [vmem:[%s11345_s3 + $0x10] sm:$0xff]  ;;  %s8495_s16 = smov 127   ;;  %s8496_s20 = smov 1  }
  0x60   : > { %610 = vst.msk [vmem:[#allocation2 + $0x111] sm:$0xff] %vm573_vm0, %v11361_v1  ;;  %611 = vst.msk [vmem:[#allocation2 + $0x119] sm:$0xff] %vm573_vm0, %v11361_v1  ;;  %v614_v4 = vld [vmem:[%s11345_s3 + $0x8] sm:$0xff]  ;;  %v8736_v5 = vsub.f32 1.0, %v613_v2  ;;  %v8738_v6 = vsub.f32 1.0, %v615_v3  ;;  %v616_v7 = vld [vmem:[%s11345_s3 + $0x18] sm:$0xff] }
  0x61   : > { %577 = vst.msk [vmem:[#allocation2 + $0x10] sm:$0x1] %vm576_vm1, %v11361_v1  ;;  %612 = vst.msk [vmem:[#allocation2 + $0x121] sm:$0x1] %vm576_vm1, %v11361_v1  ;;  %s11407_s21 = smov (!%p531_p5, %s8606_s21), 1  ;;  %v8750_v8 = vsub.f32 1.0, %v614_v4 }
  0x62   : > { %1030 = vrot.lane.b32.xlu0 %v8736_v5, %s8495_s16  ;;  %1034 = vrot.lane.b32.xlu1 %v8738_v6, %s8495_s16  ;;  %v8752_v9 = vsub.f32 1.0, %v616_v7  ;;  %v618_v10 = vld [vmem:[%s11345_s3 + $0x28] sm:$0xff]  ;;  %v617_v11 = vld [vmem:[%s11345_s3 + $0x20] sm:$0xff]  ;;  %s7092_s27 = sshll.u32 %s11407_s21, 8  ;;  %s8497_s22 = smov 3   ;;  %vm2743_vm2 = vcmask 1040384  }
  0x63   : > { %v8765_v12 = vsub.f32 1.0, %v618_v10  ;;  %v8767_v13 = vsub.f32 1.0, %v617_v11  ;;  %v619_v14 = vld [vmem:[%s11345_s3 + $0x30] sm:$0xff]  ;;  %v620_v15 = vld [vmem:[%s11345_s3 + $0x38] sm:$0xff]  ;;  %s8780_s19 = scalar_lea.vmem %s11342_s0, %s7092_s27  ;;  %v621_v16 = vld [vmem:[%s11345_s3 + $0x40] sm:$0xff]  ;;  %s8498_s24 = smov 6  }
  0x64   : > { %v8789_v17 = vsub.f32 1.0, %v619_v14  ;;  %v8791_v18 = vsub.f32 1.0, %v620_v15  ;;  %v622_v19 = vld [vmem:[%s11345_s3 + $0x48] sm:$0xff]  ;;  %v541_v20 = vld [vmem:[%s8780_s19] sm:$0xff]  ;;  %v543_v22 = vld [vmem:[%s8780_s19 + $0x10] sm:$0xff]  ;;  %v8817_v30 = vsub.f32 1.0, %v621_v16 }
  0x65   : > { %v542_v21 = vld [vmem:[%s8780_s19 + $0x8] sm:$0xff]  ;;  %578 = vst.msk [vmem:[#allocation2 + $0x11] sm:$0xff] %vm573_vm0, %v541_v20  ;;  %v544_v23 = vld [vmem:[%s8780_s19 + $0x18] sm:$0xff]  ;;  %580 = vst.msk [vmem:[#allocation2 + $0x21] sm:$0xff] %vm573_vm0, %v543_v22  ;;  %v8819_v31 = vsub.f32 1.0, %v622_v19  ;;  %s8499_s25 = smov 4  }
  0x66   : > { %1032 = vrot.lane.b32.xlu0 %v8750_v8, %s8495_s16  ;;  %1036 = vrot.lane.b32.xlu1 %v8752_v9, %s8495_s16  ;;  %579 = vst.msk [vmem:[#allocation2 + $0x19] sm:$0xff] %vm573_vm0, %v542_v21  ;;  %581 = vst.msk [vmem:[#allocation2 + $0x29] sm:$0xff] %vm573_vm0, %v544_v23  ;;  %v545_v24 = vld [vmem:[%s8780_s19 + $0x20] sm:$0xff]  ;;  %v550_v26 = vld [vmem:[%s8780_s19 + $0x48] sm:$0xff]  ;;  %s8500_s23 = smov 7   ;;  %s8501_s10 = smov 2  }
  0x67   : > { %v549_v25 = vld [vmem:[%s8780_s19 + $0x40] sm:$0xff]  ;;  %582 = vst.msk [vmem:[#allocation2 + $0x31] sm:$0xff] %vm573_vm0, %v545_v24  ;;  %587 = vst.msk [vmem:[#allocation2 + $0x59] sm:$0xff] %vm573_vm0, %v550_v26  ;;  %v546_v27 = vld [vmem:[%s8780_s19 + $0x28] sm:$0xff]  ;;  %s8502_s13 = smov 5   ;;  %vm8503_vm3 = vmmov 1  }
  0x68   : > { %586 = vst.msk [vmem:[#allocation2 + $0x51] sm:$0xff] %vm573_vm0, %v549_v25  ;;  %v551_v28 = vld [vmem:[%s8780_s19 + $0x50] sm:$0xff]  ;;  %v552_v29 = vld [vmem:[%s8780_s19 + $0x58] sm:$0xff]  ;;  %583 = vst.msk [vmem:[#allocation2 + $0x39] sm:$0xff] %vm573_vm0, %v546_v27  ;;  %vm933_vm5 = vcmask 15368   ;;  %vm1286_vm6 = vcmask 23568  }
  0x69   : > { %588 = vst.msk [vmem:[#allocation2 + $0x61] sm:$0xff] %vm573_vm0, %v551_v28  ;;  %589 = vst.msk [vmem:[#allocation2 + $0x69] sm:$0xff] %vm573_vm0, %v552_v29  ;;  %v553_v32 = vld [vmem:[%s8780_s19 + $0x60] sm:$0xff]  ;;  %v547_v33 = vld [vmem:[%s8780_s19 + $0x30] sm:$0xff]  ;;  %vm1511_vm7 = vcmask 31768   ;;  %vm1704_vm8 = vcmask 39968  }
  0x6a   : > { %1040 = vrot.lane.b32.xlu1 %v8765_v12, %s8495_s16  ;;  %1038 = vrot.lane.b32.xlu0 %v8767_v13, %s8495_s16  ;;  %v623_v34 = vld [vmem:[%s11345_s3 + $0x50] sm:$0xff]  ;;  %v624_v35 = vld [vmem:[%s11345_s3 + $0x58] sm:$0xff]  ;;  %590 = vst.msk [vmem:[#allocation2 + $0x71] sm:$0xff] %vm573_vm0, %v553_v32  ;;  %584 = vst.msk [vmem:[#allocation2 + $0x41] sm:$0xff] %vm573_vm0, %v547_v33  ;;  %vm1929_vm9 = vcmask 48168   ;;  %vm2154_vm10 = vcmask 56368  }
  0x6b   : > { %v548_v36 = vld [vmem:[%s8780_s19 + $0x38] sm:$0xff]  ;;  %v554_v37 = vld [vmem:[%s8780_s19 + $0x68] sm:$0xff]  ;;  %v8841_v38 = vsub.f32 1.0, %v623_v34  ;;  %v8843_v39 = vsub.f32 1.0, %v624_v35  ;;  %v625_v40 = vld [vmem:[%s11345_s3 + $0x60] sm:$0xff]  ;;  %vm2347_vm11 = vcmask 64568  }
  0x6c   : > { %585 = vst.msk [vmem:[#allocation2 + $0x49] sm:$0xff] %vm573_vm0, %v548_v36  ;;  %591 = vst.msk [vmem:[#allocation2 + $0x79] sm:$0xff] %vm573_vm0, %v554_v37  ;;  %v626_v41 = vld [vmem:[%s11345_s3 + $0x68] sm:$0xff]  ;;  %v8856_v42 = vsub.f32 1.0, %v625_v40  ;;  %v627_v44 = vld [vmem:[%s11345_s3 + $0x70] sm:$0xff]  ;;  %vm2572_vm12 = vcmask 72768  }
  0x6d   : > { %v8858_v43 = vsub.f32 1.0, %v626_v41  ;;  %v628_v45 = vld [vmem:[%s11345_s3 + $0x78] sm:$0xff]  ;;  %v555_v46 = vld [vmem:[%s8780_s19 + $0x70] sm:$0xff]  ;;  %v8872_v48 = vsub.f32 1.0, %v627_v44  ;;  %v557_v50 = vld [vmem:[%s8780_s19 + $0x80] sm:$0xff]  ;;  %vm2646_vm13 = vcmask 72704  }
  0x6e   : > { %1042 = vrot.lane.b32.xlu0 %v8789_v17, %s8495_s16  ;;  %1044 = vrot.lane.b32.xlu1 %v8791_v18, %s8495_s16  ;;  %v556_v47 = vld [vmem:[%s8780_s19 + $0x78] sm:$0xff]  ;;  %v8874_v49 = vsub.f32 1.0, %v628_v45  ;;  %592 = vst.msk [vmem:[#allocation2 + $0x81] sm:$0xff] %vm573_vm0, %v555_v46  ;;  %v558_v51 = vld [vmem:[%s8780_s19 + $0x88] sm:$0xff]  ;;  %594 = vst.msk [vmem:[#allocation2 + $0x91] sm:$0xff] %vm573_vm0, %v557_v50  ;;  %vm3004_vm14 = vcmask 130048  }
  0x6f   : > { %593 = vst.msk [vmem:[#allocation2 + $0x89] sm:$0xff] %vm573_vm0, %v556_v47  ;;  %v629_v52 = vld [vmem:[%s11345_s3 + $0x80] sm:$0xff]  ;;  %v630_v53 = vld [vmem:[%s11345_s3 + $0x88] sm:$0xff]  ;;  %595 = vst.msk [vmem:[#allocation2 + $0x99] sm:$0xff] %vm573_vm0, %v558_v51  ;;  %vm3039_vm15 = vcmask 122880   ;;  %vm3428_vm1 = vcmask 261248  }
  0x70   : > { %v559_v54 = vld [vmem:[%s8780_s19 + $0x90] sm:$0xff]  ;;  %v560_v55 = vld [vmem:[%s8780_s19 + $0x98] sm:$0xff]  ;;  %v8895_v56 = vsub.f32 1.0, %v629_v52  ;;  %v8897_v57 = vsub.f32 1.0, %v630_v53  ;;  %v561_v58 = vld [vmem:[%s8780_s19 + $0xa0] sm:$0xff]  ;;  %s8509_s30 = smov 64  }
  0x71   : > { %596 = vst.msk [vmem:[#allocation2 + $0xa1] sm:$0xff] %vm573_vm0, %v559_v54  ;;  %597 = vst.msk [vmem:[#allocation2 + $0xa9] sm:$0xff] %vm573_vm0, %v560_v55  ;;  %v631_v59 = vld [vmem:[%s11345_s3 + $0x90] sm:$0xff]  ;;  %v632_v60 = vld [vmem:[%s11345_s3 + $0x98] sm:$0xff]  ;;  %s8510_s18 = smov 32   ;;  %s8512_s26 = smov 112  }
  0x72   : > { %1046 = vrot.lane.b32.xlu0 %v8817_v30, %s8495_s16  ;;  %1048 = vrot.lane.b32.xlu1 %v8819_v31, %s8495_s16  ;;  %598 = vst.msk [vmem:[#allocation2 + $0xb1] sm:$0xff] %vm573_vm0, %v561_v58  ;;  %v562_v61 = vld [vmem:[%s8780_s19 + $0xa8] sm:$0xff]  ;;  %v8913_v62 = vsub.f32 1.0, %v631_v59  ;;  %v8915_v63 = vsub.f32 1.0, %v632_v60  ;;  %v563_v0 = vld [vmem:[%s8780_s19 + $0xb0] sm:$0xff]  ;;  %v1320_v50 = vld [vmem:[#allocation2 + $0x18] sm:$0xff] }
  0x73   : > { %599 = vst.msk [vmem:[#allocation2 + $0xb9] sm:$0xff] %vm573_vm0, %v562_v61  ;;  %v633_v2 = vld [vmem:[%s11345_s3 + $0xa0] sm:$0xff]  ;;  %v634_v3 = vld [vmem:[%s11345_s3 + $0xa8] sm:$0xff]  ;;  %600 = vst.msk [vmem:[#allocation2 + $0xc1] sm:$0xff] %vm573_vm0, %v563_v0  ;;  %v1352_v54 = vmul.f32 %v1320_v50, %v8750_v8  ;;  %s8516_s29 = smov 125  }
  0x74   : > { %v564_v4 = vld [vmem:[%s8780_s19 + $0xb8] sm:$0xff]  ;;  %v8931_v7 = vsub.f32 1.0, %v633_v2  ;;  %v8933_v10 = vsub.f32 1.0, %v634_v3  ;;  %v565_v11 = vld [vmem:[%s8780_s19 + $0xc0] sm:$0xff]  ;;  %v635_v14 = vld [vmem:[%s11345_s3 + $0xb0] sm:$0xff] }
  0x75   : > { %601 = vst.msk [vmem:[#allocation2 + $0xc9] sm:$0xff] %vm573_vm0, %v564_v4  ;;  %v636_v15 = vld [vmem:[%s11345_s3 + $0xb8] sm:$0xff]  ;;  %602 = vst.msk [vmem:[#allocation2 + $0xd1] sm:$0xff] %vm573_vm0, %v565_v11  ;;  %v566_v16 = vld [vmem:[%s8780_s19 + $0xc8] sm:$0xff]  ;;  %v8949_v19 = vsub.f32 1.0, %v635_v14 }
  0x76   : > { %1050 = vrot.lane.b32.xlu0 %v8841_v38, %s8495_s16  ;;  %1052 = vrot.lane.b32.xlu1 %v8843_v39, %s8495_s16  ;;  %v8951_v20 = vsub.f32 1.0, %v636_v15  ;;  %603 = vst.msk [vmem:[#allocation2 + $0xd9] sm:$0xff] %vm573_vm0, %v566_v16  ;;  %v567_v21 = vld [vmem:[%s8780_s19 + $0xd0] sm:$0xff]  ;;  %v637_v22 = vld [vmem:[%s11345_s3 + $0xc0] sm:$0xff]  ;;  %v678_v58 = vld [vmem:[#allocation2 + $0x8] sm:$0xff] }
  0x77   : > { %v638_v23 = vld [vmem:[%s11345_s3 + $0xc8] sm:$0xff]  ;;  %604 = vst.msk [vmem:[#allocation2 + $0xe1] sm:$0xff] %vm573_vm0, %v567_v21  ;;  %v568_v24 = vld [vmem:[%s8780_s19 + $0xd8] sm:$0xff]  ;;  %v8967_v25 = vsub.f32 1.0, %v637_v22  ;;  %v569_v27 = vld [vmem:[%s8780_s19 + $0xe0] sm:$0xff]  ;;  %v710_v59 = vmul.f32 %v678_v58, %v8750_v8  ;;  %v712_v21 = vmul.f32 %v1320_v50, %v8752_v9 }
  0x78   : > { %v8969_v26 = vsub.f32 1.0, %v638_v23  ;;  %605 = vst.msk [vmem:[#allocation2 + $0xe9] sm:$0xff] %vm573_vm0, %v568_v24  ;;  %v639_v28 = vld [vmem:[%s11345_s3 + $0xd0] sm:$0xff]  ;;  %v640_v29 = vld [vmem:[%s11345_s3 + $0xd8] sm:$0xff]  ;;  %606 = vst.msk [vmem:[#allocation2 + $0xf1] sm:$0xff] %vm573_vm0, %v569_v27 }
  0x79   : > { %v570_v32 = vld [vmem:[%s8780_s19 + $0xe8] sm:$0xff]  ;;  %v8985_v33 = vsub.f32 1.0, %v639_v28  ;;  %v8987_v34 = vsub.f32 1.0, %v640_v29  ;;  %v571_v35 = vld [vmem:[%s8780_s19 + $0xf0] sm:$0xff]  ;;  %v641_v36 = vld [vmem:[%s11345_s3 + $0xe0] sm:$0xff]  ;;  %742 = vst.msk [vmem:[#allocation3 + $0x8] sm:$0xff] %vm573_vm0, %v710_v59 }
  0x7a   : > { %1054 = vrot.lane.b32.xlu0 %v8856_v42, %s8495_s16  ;;  %1056 = vrot.lane.b32.xlu1 %v8858_v43, %s8495_s16  ;;  %607 = vst.msk [vmem:[#allocation2 + $0xf9] sm:$0xff] %vm573_vm0, %v570_v32  ;;  %v642_v37 = vld [vmem:[%s11345_s3 + $0xe8] sm:$0xff]  ;;  %608 = vst.msk [vmem:[#allocation2 + $0x101] sm:$0xff] %vm573_vm0, %v571_v35  ;;  %v572_v40 = vld [vmem:[%s8780_s19 + $0xf8] sm:$0xff]  ;;  %v9003_v41 = vsub.f32 1.0, %v641_v36  ;;  %s8504_s19 = smov 8  }
  0x7b   : > { %v9005_v44 = vsub.f32 1.0, %v642_v37  ;;  %609 = vst.msk [vmem:[#allocation2 + $0x109] sm:$0xff] %vm573_vm0, %v572_v40  ;;  %v773_v45 = vld [vmem:[#allocation2 + $0x1] sm:$0xff]  ;;  %v774_v46 = vld [vmem:[#allocation2 + $0x9] sm:$0xff]  ;;  %v644_v55 = vld [vmem:[%s11345_s3 + $0xf8] sm:$0xff] }
  0x7c   : > { %11386 = vst [vmem:[#allocation17_spill] sm:$0xff] %v9003_v41  ;;  %v643_v47 = vld [vmem:[%s11345_s3 + $0xf0] sm:$0xff]  ;;  %v677_v51 = vld [vmem:[#allocation2] sm:$0xff]  ;;  %v9028_v60 = vsub.f32 1.0, %v644_v55  ;;  %744 = vst.msk [vmem:[#allocation3 + $0x18] sm:$0xff] %vm573_vm0, %v712_v21 }
  0x7d   : > { %11387 = vst [vmem:[#allocation18_spill] sm:$0xff] %v9005_v44  ;;  %v709_v52 = vmul.f32 %v677_v51, %v8736_v5  ;;  %v9018_v53 = vsub.f32 1.0, %v643_v47  ;;  %v1319_v61 = vld [vmem:[#allocation2 + $0x10] sm:$0xff]  ;;  %v1962_v2 = vld [vmem:[#allocation2 + $0x20] sm:$0xff]  ;;  %vm7820_vm4 = vmpackc.low %vm2743_vm2, %vm8503_vm3  ;;  %vm3517_vm2 = vcmask 392448   ;;  %vm3574_vm3 = vcmask 523648  }
  0x7e   : > { %1058 = vrot.lane.b32.xlu0 %v8872_v48, %s8495_s16  ;;  %1060 = vrot.lane.b32.xlu1 %v8874_v49, %s8495_s16  ;;  %11389 = vst [vmem:[#allocation20_spill] sm:$0xff] %v9028_v60  ;;  %v775_v0 = vld [vmem:[#allocation2 + $0x11] sm:$0xff]  ;;  %v1351_v3 = vmul.f32 %v1319_v61, %v8736_v5  ;;  %v1994_v4 = vmul.f32 %v1962_v2, %v8736_v5  ;;  %v1545_v15 = vld [vmem:[#allocation2 + $0x19] sm:$0xff]  ;;  %v2187_v16 = vld [vmem:[#allocation2 + $0x21] sm:$0xff] }
  0x7f   : > { %11388 = vst [vmem:[#allocation19_spill] sm:$0xff] %v9018_v53  ;;  %741 = vst.msk [vmem:[#allocation3] sm:$0xff] %vm573_vm0, %v709_v52  ;;  %v711_v11 = vmul.f32 %v1319_v61, %v8738_v6  ;;  %v1353_v14 = vmul.f32 %v1962_v2, %v8738_v6  ;;  %v1963_v5 = vld [vmem:[#allocation2 + $0x28] sm:$0xff]  ;;  %v1964_v24 = vld [vmem:[#allocation2 + $0x30] sm:$0xff] }
  0x80   : > { %v1995_v22 = vmul.f32 %v1963_v5, %v8750_v8  ;;  %v1547_v23 = vld [vmem:[#allocation2 + $0x29] sm:$0xff]  ;;  %v1354_v27 = vmul.f32 %v1963_v5, %v8752_v9  ;;  %v1996_v28 = vmul.f32 %v1964_v24, %v8738_v6  ;;  %v1355_v29 = vmul.f32 %v1964_v24, %v8767_v13  ;;  %v1738_v40 = vld [vmem:[#allocation2 + $0x1a] sm:$0xff]  ;;  %v1737_v52 = vld [vmem:[#allocation2 + $0x12] sm:$0xff] }
  0x81   : > { %743 = vst.msk [vmem:[#allocation3 + $0x10] sm:$0xff] %vm573_vm0, %v711_v11  ;;  %v713_v8 = vmul.f32 %v1962_v2, %v8767_v13  ;;  %v714_v32 = vmul.f32 %v1963_v5, %v8765_v12  ;;  %v966_v6 = vld [vmem:[#allocation2 + $0x2] sm:$0xff] }
  0x82   : > { %1062 = vrot.lane.b32.xlu0 %v8895_v56, %s8495_s16  ;;  %1064 = vrot.lane.b32.xlu1 %v8897_v57, %s8495_s16  ;;  %v1739_v61 = vld [vmem:[#allocation2 + $0x22] sm:$0xff] }
  0x83   : > { %745 = vst.msk [vmem:[#allocation3 + $0x20] sm:$0xff] %vm573_vm0, %v713_v8  ;;  %746 = vst.msk [vmem:[#allocation3 + $0x28] sm:$0xff] %vm573_vm0, %v714_v32 }
  0x86   : > { %1066 = vrot.lane.b32.xlu0 %v8913_v62, %s8495_s16  ;;  %1068 = vrot.lane.b32.xlu1 %v8915_v63, %s8495_s16 }
  0x8a   : > { %1070 = vrot.lane.b32.xlu0 %v8931_v7, %s8495_s16  ;;  %1072 = vrot.lane.b32.xlu1 %v8933_v10, %s8495_s16 }
  0x8e   : > { %1074 = vrot.lane.b32.xlu0 %v8949_v19, %s8495_s16  ;;  %1076 = vrot.lane.b32.xlu1 %v8951_v20, %s8495_s16 }
  0x92   : > { %1078 = vrot.lane.b32.xlu0 %v8967_v25, %s8495_s16  ;;  %1080 = vrot.lane.b32.xlu1 %v8969_v26, %s8495_s16 }
  0x96   : > { %1082 = vrot.lane.b32.xlu0 %v8985_v33, %s8495_s16  ;;  %1084 = vrot.lane.b32.xlu1 %v8987_v34, %s8495_s16 }
  0x9a   : > { %1086 = vrot.lane.b32.xlu0 %v9003_v41, %s8495_s16  ;;  %1088 = vrot.lane.b32.xlu1 %v9005_v44, %s8495_s16 }
  0x9e   : > { %837 = vrot.lane.b32.xlu0 %v773_v45, %s8496_s20  ;;  %839 = vrot.lane.b32.xlu1 %v774_v46, %s8496_s20  ;;  %v967_v45 = vld [vmem:[#allocation2 + $0xa] sm:$0xff] }
  0xa2   : > { %1090 = vrot.lane.b32.xlu0 %v9018_v53, %s8495_s16  ;;  %1417 = vrot.lane.b32.xlu1 %v1352_v54, %s8497_s22 }
  0xa6   : > { %1092 = vrot.lane.b32.xlu0 %v9028_v60, %s8495_s16  ;;  %841 = vrot.lane.b32.xlu1 %v775_v0, %s8496_s20 }
  0xaa   : > { %1415 = vrot.lane.b32.xlu0 %v1351_v3, %s8497_s22  ;;  %2058 = vrot.lane.b32.xlu1 %v1994_v4, %s8498_s24  ;;  %v2637_v3 = vld [vmem:[%s11343_s1] sm:$0xff]  ;;  %v2638_v4 = vld [vmem:[%s11343_s1 + $0x8] sm:$0x1] }
  0xae   : > { %1608 = vrot.lane.b32.xlu0 %v775_v0, %s8499_s25  ;;  %1419 = vrot.lane.b32.xlu1 %v1353_v14, %s8497_s22 }
  0xb2   : > { %1610 = vrot.lane.b32.xlu0 %v1545_v15, %s8499_s25  ;;  %2251 = vrot.lane.b32.xlu1 %v2187_v16, %s8500_s23 }
  0xb6   : > { %843 = vrot.lane.b32.xlu0 %v1545_v15, %s8496_s20  ;;  %1612 = vrot.lane.b32.xlu1 %v2187_v16, %s8499_s25  ;;  %v7819_v15 = vpack.c.bf16 %v2638_v4, %v2637_v3  ;;  %v2382_v3 = vld [vmem:[#allocation2 + $0x32] sm:$0xff] }
  0xb8   : > { %7821 = vmatprep.subr.msk.bf16.mxu0 %vm7820_vm4, %v7819_v15 }
  0xb9   : > { %7824 = vmatpush3.bf16.msk.msra.mxu0 %vm7820_vm4, %v7819_v15  ;;  %vm3623_vm4 = vcmask 654848  }
  0xba   : > { %2060 = vrot.lane.b32.xlu0 %v1995_v22, %s8498_s24  ;;  %1614 = vrot.lane.b32.xlu1 %v1547_v23, %s8499_s25 }
  0xbe   : > { %1421 = vrot.lane.b32.xlu0 %v1354_v27, %s8497_s22  ;;  %2062 = vrot.lane.b32.xlu1 %v1996_v28, %s8498_s24  ;;  %v1965_v27 = vld [vmem:[#allocation2 + $0x38] sm:$0xff] }
  0xbf   : > { %v1997_v32 = vmul.f32 %v1965_v27, %v8752_v9 }
  0xc2   : > { %2253 = vrot.lane.b32.xlu0 %v1547_v23, %s8500_s23  ;;  %1423 = vrot.lane.b32.xlu1 %v1355_v29, %s8497_s22 }
  0xc6   : > { %845 = vrot.lane.b32.xlu0 %v2187_v16, %s8496_s20  ;;  %v1740_v16 = vld [vmem:[#allocation2 + $0x2a] sm:$0xff] }
  0xca   : > { %847 = vrot.lane.b32.xlu0 %v1547_v23, %s8496_s20 }
  0xd4   : > { %v1031_v35 = vpop.permute.xlu0 %1030  ;;  %v9066_v36 = vpop.permute.xlu1 %1034 }
  0xd5   : > { %v1126_v37 = vmul.f32 %v1031_v35, %v966_v6  ;;  %v1769_v59 = vmul.f32 %v1737_v52, %v1031_v35  ;;  %v1771_v11 = vmul.f32 %v1739_v61, %v9066_v36  ;;  %v1128_v14 = vmul.f32 %v1737_v52, %v9066_v36 }
  0xd6   : > { %v2412_v23 = vmul.f32 %v1739_v61, %v1031_v35  ;;  %v683_v35 = vld [vmem:[#allocation2 + $0x30] sm:$0xff]  ;;  %v716_v52 = vmul.f32 %v1965_v27, %v8791_v18 }
  0xd7   : > { %1190 = vrot.lane.b32.xlu1 %v1126_v37, %s8501_s10 }
  0xd8   : > { %v1033_v46 = vpop.permute.xlu0 %1032  ;;  %v9069_v47 = vpop.permute.xlu1 %1036  ;;  %748 = vst.msk [vmem:[#allocation3 + $0x38] sm:$0xff] %vm573_vm0, %v716_v52 }
  0xd9   : > { %v1770_v50 = vmul.f32 %v1738_v40, %v1033_v46  ;;  %v1127_v51 = vmul.f32 %v1033_v46, %v967_v45  ;;  %v1129_v54 = vmul.f32 %v1738_v40, %v9069_v47  ;;  %v1772_v22 = vmul.f32 %v1740_v16, %v9069_v47 }
  0xda   : > { %v2413_v8 = vmul.f32 %v1740_v16, %v1033_v46  ;;  %v715_v45 = vmul.f32 %v683_v35, %v8789_v17  ;;  %v1356_v46 = vmul.f32 %v1965_v27, %v8765_v12 }
  0xdb   : > { %1835 = vrot.lane.b32.xlu0 %v1770_v50, %s8502_s13  ;;  %1192 = vrot.lane.b32.xlu1 %v1127_v51, %s8501_s10  ;;  %v2189_v50 = vld [vmem:[#allocation2 + $0x31] sm:$0xff] }
  0xdc   : > { %v9074_v55 = vpop.permute.xlu1 %1040  ;;  %v9076_v58 = vpop.permute.xlu0 %1038  ;;  %747 = vst.msk [vmem:[#allocation3 + $0x30] sm:$0xff] %vm573_vm0, %v715_v45 }
  0xdd   : > { %v1131_v24 = vmul.f32 %v1740_v16, %v9074_v55  ;;  %v1130_v6 = vmul.f32 %v1739_v61, %v9076_v58 }
  0xdf   : > { %1196 = vrot.lane.b32.xlu0 %v1129_v54, %s8501_s10  ;;  %1833 = vrot.lane.b32.xlu1 %v1769_v59, %s8502_s13  ;;  %v2190_v54 = vld [vmem:[#allocation2 + $0x39] sm:$0xff] }
  0xe0   : > { %v9080_v0 = vpop.permute.xlu0 %1042  ;;  %v9082_v2 = vpop.permute.xlu1 %1044 }
  0xe1   : > { %v1132_v45 = vmul.f32 %v2382_v3, %v9080_v0 }
  0xe3   : > { %1837 = vrot.lane.b32.xlu0 %v1771_v11, %s8502_s13  ;;  %1194 = vrot.lane.b32.xlu1 %v1128_v14, %s8501_s10  ;;  %v2414_v14 = vmul.f32 %v2382_v3, %v9066_v36 }
  0xe4   : > { %v9094_v5 = vpop.permute.xlu0 %1046  ;;  %v9096_v21 = vpop.permute.xlu1 %1048 }
  0xe7   : > { %1839 = vrot.lane.b32.xlu0 %v1772_v22, %s8502_s13  ;;  %2476 = vrot.lane.b32.xlu1 %v2412_v23, %s8504_s19  ;;  %v1773_v22 = vmul.f32 %v2382_v3, %v9076_v58  ;;  %v2383_v23 = vld [vmem:[#allocation2 + $0x3a] sm:$0xff] }
  0xe8   : > { %v9102_v28 = vpop.permute.xlu0 %1050  ;;  %v9104_v29 = vpop.permute.xlu1 %1052  ;;  %v2415_v36 = vmul.f32 %v2383_v23, %v9069_v47  ;;  %v1774_v35 = vmul.f32 %v2383_v23, %v9074_v55  ;;  %v1967_v47 = vld [vmem:[#allocation2 + $0x48] sm:$0xff] }
  0xeb   : > { %1200 = vrot.lane.b32.xlu0 %v1131_v24, %s8501_s10  ;;  %2478 = vrot.lane.b32.xlu1 %v2413_v8, %s8504_s19  ;;  %v1966_v8 = vld [vmem:[#allocation2 + $0x40] sm:$0xff] }
  0xec   : > { %v9110_v37 = vpop.permute.xlu0 %1054  ;;  %v9112_v40 = vpop.permute.xlu1 %1056  ;;  %v1357_v3 = vmul.f32 %v1966_v8, %v8789_v17 }
  0xef   : > { %2064 = vrot.lane.b32.xlu0 %v1997_v32, %s8498_s24  ;;  %1198 = vrot.lane.b32.xlu1 %v1130_v6, %s8501_s10 }
  0xf0   : > { %v9119_v51 = vpop.permute.xlu0 %1058  ;;  %v9121_v9 = vpop.permute.xlu1 %1060 }
  0xf3   : > { %1425 = vrot.lane.b32.xlu0 %v1356_v46, %s8497_s22  ;;  %2255 = vrot.lane.b32.xlu1 %v2189_v50, %s8500_s23  ;;  %v1998_v46 = vmul.f32 %v1966_v8, %v8767_v13 }
  0xf4   : > { %v9126_v59 = vpop.permute.xlu0 %1062  ;;  %v9128_v61 = vpop.permute.xlu1 %1064 }
  0xf7   : > { %2257 = vrot.lane.b32.xlu0 %v2190_v54, %s8500_s23  ;;  %1616 = vrot.lane.b32.xlu1 %v2189_v50, %s8499_s25 }
  0xf8   : > { %v9133_v4 = vpop.permute.xlu0 %1066  ;;  %v9135_v11 = vpop.permute.xlu1 %1068 }
  0xfb   : > { %849 = vrot.lane.b32.xlu0 %v2189_v50, %s8496_s20  ;;  %2480 = vrot.lane.b32.xlu1 %v2414_v14, %s8504_s19  ;;  %v1999_v14 = vmul.f32 %v1967_v47, %v8765_v12 }
  0xfc   : > { %v9140_v15 = vpop.permute.xlu0 %1070  ;;  %v9142_v16 = vpop.permute.xlu1 %1072 }
  0xff   : > { %1841 = vrot.lane.b32.xlu0 %v1773_v22, %s8502_s13  ;;  %1618 = vrot.lane.b32.xlu1 %v2190_v54, %s8499_s25  ;;  %v717_v22 = vmul.f32 %v1966_v8, %v8817_v30  ;;  %v718_v8 = vmul.f32 %v1967_v47, %v8819_v31 }
 0x100   : > { %v9147_v24 = vpop.permute.xlu0 %1074  ;;  %v9149_v27 = vpop.permute.xlu1 %1076 }
 0x101   : > { %749 = vst.msk [vmem:[#allocation3 + $0x40] sm:$0xff] %vm573_vm0, %v717_v22  ;;  %750 = vst.msk [vmem:[#allocation3 + $0x48] sm:$0xff] %vm573_vm0, %v718_v8  ;;  %v2385_v8 = vld [vmem:[#allocation2 + $0x4a] sm:$0xff] }
 0x103   : > { %851 = vrot.lane.b32.xlu0 %v2190_v54, %s8496_s20  ;;  %2482 = vrot.lane.b32.xlu1 %v2415_v36, %s8504_s19  ;;  %v1133_v54 = vmul.f32 %v2383_v23, %v9082_v2  ;;  %v1358_v23 = vmul.f32 %v1967_v47, %v8791_v18 }
 0x104   : > { %v9154_v32 = vpop.permute.xlu0 %1078  ;;  %v9156_v6 = vpop.permute.xlu1 %1080 }
 0x107   : > { %1843 = vrot.lane.b32.xlu0 %v1774_v35, %s8502_s13  ;;  %1202 = vrot.lane.b32.xlu1 %v1132_v45, %s8501_s10  ;;  %v2191_v35 = vld [vmem:[#allocation2 + $0x41] sm:$0xff] }
 0x108   : > { %v9163_v50 = vpop.permute.xlu0 %1082  ;;  %v9165_v52 = vpop.permute.xlu1 %1084 }
 0x10b   : > { %1204 = vrot.lane.b32.xlu0 %v1133_v54, %s8501_s10  ;;  %2066 = vrot.lane.b32.xlu1 %v1998_v46, %s8498_s24  ;;  %v2192_v46 = vld [vmem:[#allocation2 + $0x49] sm:$0xff] }
 0x10c   : > { %v9173_v36 = vpop.permute.xlu0 %1086  ;;  %v9175_v13 = vpop.permute.xlu1 %1088 }
 0x10d   : > { %11390 = vst [vmem:[#allocation21_spill] sm:$0xff] %v9173_v36  ;;  %11391 = vst [vmem:[#allocation22_spill] sm:$0xff] %v9175_v13 }
 0x10f   : > { %2068 = vrot.lane.b32.xlu0 %v1999_v14, %s8498_s24  ;;  %1427 = vrot.lane.b32.xlu1 %v1357_v3, %s8497_s22  ;;  %v2384_v3 = vld [vmem:[#allocation2 + $0x42] sm:$0xff] }
 0x110   : > { %v838_v45 = vpop.permute.xlu0 %837  ;;  %v840_v12 = vpop.permute.xlu1 %839 }
 0x111   : > { %934 = vst.msk [vmem:[#allocation3] sm:$0xff] %vm933_vm5, %v838_v45  ;;  %935 = vst.msk [vmem:[#allocation3 + $0x8] sm:$0xff] %vm933_vm5, %v840_v12  ;;  %v1775_v12 = vmul.f32 %v2384_v3, %v9080_v0 }
 0x113   : > { %1429 = vrot.lane.b32.xlu0 %v1358_v23, %s8497_s22  ;;  %2259 = vrot.lane.b32.xlu1 %v2191_v35, %s8500_s23  ;;  %v2416_v23 = vmul.f32 %v2384_v3, %v9076_v58  ;;  %v2417_v58 = vmul.f32 %v2385_v8, %v9074_v55  ;;  %v1969_v55 = vld [vmem:[#allocation2 + $0x58] sm:$0xff] }
 0x114   : > { %v9186_v54 = vpop.permute.xlu0 %1090  ;;  %v9188_v14 = vpop.permute.xlu1 %1417 }
 0x115   : > { %11392 = vst [vmem:[#allocation23_spill] sm:$0xff] %v9186_v54  ;;  %v1134_v54 = vmul.f32 %v2384_v3, %v9094_v5  ;;  %v2001_v3 = vmul.f32 %v1969_v55, %v8791_v18 }
 0x117   : > { %2261 = vrot.lane.b32.xlu0 %v2192_v46, %s8500_s23  ;;  %1620 = vrot.lane.b32.xlu1 %v2191_v35, %s8499_s25 }
 0x118   : > { %v9193_v22 = vpop.permute.xlu0 %1092  ;;  %v842_v45 = vpop.permute.xlu1 %841 }
 0x119   : > { %11393 = vst [vmem:[#allocation24_spill] sm:$0xff] %v9193_v22  ;;  %936 = vst.msk [vmem:[#allocation3 + $0x10] sm:$0xff] %vm933_vm5, %v842_v45 }
 0x11b   : > { %853 = vrot.lane.b32.xlu0 %v2191_v35, %s8496_s20  ;;  %2484 = vrot.lane.b32.xlu1 %v2416_v23, %s8504_s19  ;;  %v1968_v35 = vld [vmem:[#allocation2 + $0x50] sm:$0xff]  ;;  %v1776_v23 = vmul.f32 %v2385_v8, %v9082_v2 }
 0x11c   : > { %v9199_v47 = vpop.permute.xlu0 %1415  ;;  %v9204_v1 = vpop.permute.xlu1 %2058  ;;  %v2000_v60 = vmul.f32 %v1968_v35, %v8789_v17  ;;  %v1360_v17 = vmul.f32 %v1969_v55, %v8819_v31 }
 0x11f   : > { %1845 = vrot.lane.b32.xlu0 %v1775_v12, %s8502_s13  ;;  %1622 = vrot.lane.b32.xlu1 %v2192_v46, %s8499_s25 }
 0x120   : > { %v9206_v22 = vpop.permute.xlu0 %1608  ;;  %v9215_v12 = vpop.permute.xlu1 %1419 }
 0x123   : > { %855 = vrot.lane.b32.xlu0 %v2192_v46, %s8496_s20  ;;  %2486 = vrot.lane.b32.xlu1 %v2417_v58, %s8504_s19  ;;  %v1135_v46 = vmul.f32 %v2385_v8, %v9096_v21  ;;  %v1359_v58 = vmul.f32 %v1968_v35, %v8817_v30  ;;  %v720_v8 = vmul.f32 %v1969_v55, %v8843_v39 }
 0x124   : > { %v9211_v45 = vpop.permute.xlu0 %1610  ;;  %v9226_v13 = vpop.permute.xlu1 %2251 }
 0x125   : > { %752 = vst.msk [vmem:[#allocation3 + $0x58] sm:$0xff] %vm573_vm0, %v720_v8  ;;  %v2387_v8 = vld [vmem:[#allocation2 + $0x5a] sm:$0xff] }
 0x127   : > { %1847 = vrot.lane.b32.xlu0 %v1776_v23, %s8502_s13  ;;  %1206 = vrot.lane.b32.xlu1 %v1134_v54, %s8501_s10  ;;  %v719_v54 = vmul.f32 %v1968_v35, %v8841_v38  ;;  %v2194_v35 = vld [vmem:[#allocation2 + $0x59] sm:$0xff] }
 0x128   : > { %v844_v53 = vpop.permute.xlu0 %843  ;;  %v9237_v18 = vpop.permute.xlu1 %1612 }
 0x129   : > { %937 = vst.msk [vmem:[#allocation3 + $0x18] sm:$0xff] %vm933_vm5, %v844_v53  ;;  %v2193_v53 = vld [vmem:[#allocation2 + $0x51] sm:$0xff] }
 0x12a   : > { %751 = vst.msk [vmem:[#allocation3 + $0x50] sm:$0xff] %vm573_vm0, %v719_v54 }
 0x12b   : > { %1208 = vrot.lane.b32.xlu0 %v1135_v46, %s8501_s10  ;;  %2070 = vrot.lane.b32.xlu1 %v2000_v60, %s8498_s24 }
 0x12c   : > { %v9229_v23 = vpop.permute.xlu0 %2060 }
 0x12f   : > { %2072 = vrot.lane.b32.xlu0 %v2001_v3, %s8498_s24  ;;  %1431 = vrot.lane.b32.xlu1 %v1359_v58, %s8497_s22  ;;  %v2386_v3 = vld [vmem:[#allocation2 + $0x52] sm:$0xff]  ;;  %v1615_v58 = vpop.permute.xlu1 %1614 }
 0x130   : > { %v9235_v60 = vpop.permute.xlu0 %1421  ;;  %v2418_v36 = vmul.f32 %v2386_v3, %v9080_v0  ;;  %v2419_v0 = vmul.f32 %v2387_v8, %v9082_v2  ;;  %v1136_v41 = vmul.f32 %v2386_v3, %v9102_v28  ;;  %v1971_v2 = vld [vmem:[#allocation2 + $0x68] sm:$0xff] }
 0x133   : > { %1433 = vrot.lane.b32.xlu0 %v1360_v17, %s8497_s22  ;;  %2263 = vrot.lane.b32.xlu1 %v2193_v53, %s8500_s23  ;;  %v1777_v17 = vmul.f32 %v2386_v3, %v9094_v5  ;;  %v9252_v44 = vpop.permute.xlu1 %2062 }
 0x134   : > { %v9242_v46 = vpop.permute.xlu0 %2253 }
 0x137   : > { %2265 = vrot.lane.b32.xlu0 %v2194_v35, %s8500_s23  ;;  %1624 = vrot.lane.b32.xlu1 %v2193_v53, %s8499_s25 }
 0x138   : > { %v846_v54 = vpop.permute.xlu0 %845 }
 0x139   : > { %938 = vst.msk [vmem:[#allocation3 + $0x20] sm:$0xff] %vm933_vm5, %v846_v54  ;;  %v1778_v54 = vmul.f32 %v2387_v8, %v9096_v21 }
 0x13b   : > { %857 = vrot.lane.b32.xlu0 %v2193_v53, %s8496_s20  ;;  %2488 = vrot.lane.b32.xlu1 %v2418_v36, %s8504_s19  ;;  %v9260_v53 = vpop.permute.xlu1 %1423  ;;  %v1970_v36 = vld [vmem:[#allocation2 + $0x60] sm:$0xff] }
 0x13c   : > { %v848_v55 = vpop.permute.xlu0 %847  ;;  %v1361_v3 = vmul.f32 %v1970_v36, %v8841_v38 }
 0x13d   : > { %939 = vst.msk [vmem:[#allocation3 + $0x28] sm:$0xff] %vm933_vm5, %v848_v55  ;;  %v2002_v55 = vmul.f32 %v1970_v36, %v8817_v30  ;;  %v721_v30 = vmul.f32 %v1970_v36, %v8856_v42 }
 0x13f   : > { %1849 = vrot.lane.b32.xlu0 %v1777_v17, %s8502_s13  ;;  %1626 = vrot.lane.b32.xlu1 %v2194_v35, %s8499_s25  ;;  %753 = vst.msk [vmem:[#allocation3 + $0x60] sm:$0xff] %vm573_vm0, %v721_v30 }
 0x143   : > { %859 = vrot.lane.b32.xlu0 %v2194_v35, %s8496_s20  ;;  %2490 = vrot.lane.b32.xlu1 %v2419_v0, %s8504_s19  ;;  %v1137_v35 = vmul.f32 %v2387_v8, %v9104_v29 }
 0x147   : > { %1851 = vrot.lane.b32.xlu0 %v1778_v54, %s8502_s13  ;;  %1210 = vrot.lane.b32.xlu1 %v1136_v41, %s8501_s10  ;;  %v2003_v41 = vmul.f32 %v1971_v2, %v8819_v31  ;;  %v1362_v31 = vmul.f32 %v1971_v2, %v8843_v39 }
 0x149   : > { %v1191_v17 = vpop.permute.xlu1 %1190 }
 0x14a   : > { %1287 = vst.msk [vmem:[#allocation3] sm:$0xff] %vm1286_vm6, %v1191_v17  ;;  %v1972_v17 = vld [vmem:[#allocation2 + $0x70] sm:$0xff] }
 0x14b   : > { %1512 = vst.msk [vmem:[#allocation3] sm:$0xff] %vm1511_vm7, %v9199_v47  ;;  %1212 = vrot.lane.b32.xlu0 %v1137_v35, %s8501_s10  ;;  %2074 = vrot.lane.b32.xlu1 %v2002_v55, %s8498_s24 }
 0x14c   : > { %1705 = vst.msk [vmem:[#allocation3] sm:$0xff] %vm1704_vm8, %v9206_v22  ;;  %v2195_v22 = vld [vmem:[#allocation2 + $0x61] sm:$0xff] }
 0x14d   : > { %v1836_v8 = vpop.permute.xlu0 %1835  ;;  %v1193_v0 = vpop.permute.xlu1 %1192 }
 0x14e   : > { %1288 = vst.msk [vmem:[#allocation3 + $0x8] sm:$0xff] %vm1286_vm6, %v1193_v0  ;;  %v1973_v0 = vld [vmem:[#allocation2 + $0x78] sm:$0xff] }
 0x14f   : > { %1513 = vst.msk [vmem:[#allocation3 + $0x8] sm:$0xff] %vm1511_vm7, %v9188_v14  ;;  %2076 = vrot.lane.b32.xlu0 %v2003_v41, %s8498_s24  ;;  %1435 = vrot.lane.b32.xlu1 %v1361_v3, %s8497_s22  ;;  %v722_v14 = vmul.f32 %v1971_v2, %v8858_v43 }
 0x150   : > { %1706 = vst.msk [vmem:[#allocation3 + $0x8] sm:$0xff] %vm1704_vm8, %v9211_v45  ;;  %v2196_v45 = vld [vmem:[#allocation2 + $0x69] sm:$0xff] }
 0x151   : > { %v1197_v47 = vpop.permute.xlu0 %1196  ;;  %v1834_v36 = vpop.permute.xlu1 %1833  ;;  %1931 = vst.msk [vmem:[#allocation3 + $0x8] sm:$0xff] %vm1929_vm9, %v1836_v8 }
 0x152   : > { %1290 = vst.msk [vmem:[#allocation3 + $0x18] sm:$0xff] %vm1286_vm6, %v1197_v47 }
 0x153   : > { %1930 = vst.msk [vmem:[#allocation3] sm:$0xff] %vm1929_vm9, %v1834_v36  ;;  %1437 = vrot.lane.b32.xlu0 %v1362_v31, %s8497_s22  ;;  %2267 = vrot.lane.b32.xlu1 %v2195_v22, %s8500_s23  ;;  %v2005_v36 = vmul.f32 %v1973_v0, %v8843_v39 }
 0x154   : > { %2156 = vst.msk [vmem:[#allocation3 + $0x8] sm:$0xff] %vm2154_vm10, %v9229_v23  ;;  %2155 = vst.msk [vmem:[#allocation3] sm:$0xff] %vm2154_vm10, %v9204_v1  ;;  %v2388_v1 = vld [vmem:[#allocation2 + $0x62] sm:$0xff] }
 0x155   : > { %1515 = vst.msk [vmem:[#allocation3 + $0x18] sm:$0xff] %vm1511_vm7, %v9235_v60  ;;  %v1838_v23 = vpop.permute.xlu0 %1837  ;;  %v1195_v60 = vpop.permute.xlu1 %1194 }
 0x156   : > { %2349 = vst.msk [vmem:[#allocation3 + $0x8] sm:$0xff] %vm2347_vm11, %v9242_v46  ;;  %2348 = vst.msk [vmem:[#allocation3] sm:$0xff] %vm2347_vm11, %v9226_v13  ;;  %v2420_v13 = vmul.f32 %v2388_v1, %v9094_v5  ;;  %v2389_v5 = vld [vmem:[#allocation2 + $0x6a] sm:$0xff] }
 0x157   : > { %1708 = vst.msk [vmem:[#allocation3 + $0x18] sm:$0xff] %vm1704_vm8, %v1615_v58  ;;  %2269 = vrot.lane.b32.xlu0 %v2196_v45, %s8500_s23  ;;  %1628 = vrot.lane.b32.xlu1 %v2195_v22, %s8499_s25  ;;  %v1780_v41 = vmul.f32 %v2389_v5, %v9104_v29  ;;  %v1139_v31 = vmul.f32 %v2389_v5, %v9112_v40 }
 0x158   : > { %754 = vst.msk [vmem:[#allocation3 + $0x68] sm:$0xff] %vm573_vm0, %v722_v14  ;;  %v1363_v14 = vmul.f32 %v1972_v17, %v8856_v42 }
 0x159   : > { %1289 = vst.msk [vmem:[#allocation3 + $0x10] sm:$0xff] %vm1286_vm6, %v1195_v60  ;;  %v1840_v46 = vpop.permute.xlu0 %1839  ;;  %v2477_v58 = vpop.permute.xlu1 %2476  ;;  %v1364_v60 = vmul.f32 %v1973_v0, %v8858_v43 }
 0x15a   : > { %1514 = vst.msk [vmem:[#allocation3 + $0x10] sm:$0xff] %vm1511_vm7, %v9215_v12  ;;  %v1779_v12 = vmul.f32 %v2388_v1, %v9102_v28 }
 0x15b   : > { %1707 = vst.msk [vmem:[#allocation3 + $0x10] sm:$0xff] %vm1704_vm8, %v9237_v18  ;;  %861 = vrot.lane.b32.xlu0 %v2195_v22, %s8496_s20  ;;  %2492 = vrot.lane.b32.xlu1 %v2420_v13, %s8504_s19 }
 0x15c   : > { %1932 = vst.msk [vmem:[#allocation3 + $0x10] sm:$0xff] %vm1929_vm9, %v1838_v23  ;;  %1933 = vst.msk [vmem:[#allocation3 + $0x18] sm:$0xff] %vm1929_vm9, %v1840_v46  ;;  %v724_v46 = vmul.f32 %v1973_v0, %v8874_v49 }
 0x15d   : > { %2157 = vst.msk [vmem:[#allocation3 + $0x10] sm:$0xff] %vm2154_vm10, %v9252_v44  ;;  %v1201_v18 = vpop.permute.xlu0 %1200  ;;  %v2479_v54 = vpop.permute.xlu1 %2478  ;;  %v2421_v44 = vmul.f32 %v2389_v5, %v9096_v21  ;;  %v1138_v21 = vmul.f32 %v2388_v1, %v9110_v37  ;;  %v2197_v1 = vld [vmem:[#allocation2 + $0x71] sm:$0xff] }
 0x15e   : > { %2573 = vst.msk [vmem:[#allocation3] sm:$0xff] %vm2572_vm12, %v2477_v58  ;;  %2574 = vst.msk [vmem:[#allocation3 + $0x8] sm:$0xff] %vm2572_vm12, %v2479_v54  ;;  %v2198_v58 = vld [vmem:[#allocation2 + $0x79] sm:$0xff] }
 0x15f   : > { %1292 = vst.msk [vmem:[#allocation3 + $0x28] sm:$0xff] %vm1286_vm6, %v1201_v18  ;;  %1853 = vrot.lane.b32.xlu0 %v1779_v12, %s8502_s13  ;;  %1630 = vrot.lane.b32.xlu1 %v2196_v45, %s8499_s25  ;;  %v2390_v5 = vld [vmem:[#allocation2 + $0x72] sm:$0xff] }
 0x160   : > { %756 = vst.msk [vmem:[#allocation3 + $0x78] sm:$0xff] %vm573_vm0, %v724_v46  ;;  %v2199_v46 = vld [vmem:[#allocation2 + $0x81] sm:$0xff] }
 0x161   : > { %v2065_v55 = vpop.permute.xlu0 %2064  ;;  %v1199_v2 = vpop.permute.xlu1 %1198 }
 0x162   : > { %2158 = vst.msk [vmem:[#allocation3 + $0x18] sm:$0xff] %vm2154_vm10, %v2065_v55 }
 0x163   : > { %1291 = vst.msk [vmem:[#allocation3 + $0x20] sm:$0xff] %vm1286_vm6, %v1199_v2  ;;  %863 = vrot.lane.b32.xlu0 %v2196_v45, %s8496_s20  ;;  %2494 = vrot.lane.b32.xlu1 %v2421_v44, %s8504_s19  ;;  %v723_v45 = vmul.f32 %v1972_v17, %v8872_v48  ;;  %v2422_v44 = vmul.f32 %v2390_v5, %v9102_v28 }
 0x164   : > { %1516 = vst.msk [vmem:[#allocation3 + $0x20] sm:$0xff] %vm1511_vm7, %v9260_v53  ;;  %v2004_v53 = vmul.f32 %v1972_v17, %v8841_v38 }
 0x165   : > { %v2605_v35 = vld [vmem:[#allocation3] sm:$0xff]  ;;  %v1426_v3 = vpop.permute.xlu0 %1425  ;;  %v2256_v30 = vpop.permute.xlu1 %2255  ;;  %v2606_v8 = vld [vmem:[#allocation3 + $0x8] sm:$0xff]  ;;  %755 = vst.msk [vmem:[#allocation3 + $0x70] sm:$0xff] %vm573_vm0, %v723_v45 }
 0x166   : > { %7411 = vmatprep.mubr.msk.f32.mxu0 %vm2646_vm13, %v2605_v35  ;;  %1517 = vst.msk [vmem:[#allocation3 + $0x28] sm:$0xff] %vm1511_vm7, %v1426_v3  ;;  %v1781_v35 = vmul.f32 %v2390_v5, %v9110_v37  ;;  %v2391_v3 = vld [vmem:[#allocation2 + $0x7a] sm:$0xff] }
 0x167   : > { %2350 = vst.msk [vmem:[#allocation3 + $0x10] sm:$0xff] %vm2347_vm11, %v2256_v30  ;;  %7412 = vmatmul.mubr.msk.f32.vlgmr.msra.gmra.mrb[0].mxu0 %vm2646_vm13, %v2606_v8  ;;  %1855 = vrot.lane.b32.xlu0 %v1780_v41, %s8502_s13  ;;  %v2423_v28 = vmul.f32 %v2391_v3, %v9104_v29  ;;  %v1782_v0 = vmul.f32 %v2391_v3, %v9112_v40 }
 0x168   : > { %1214 = vrot.lane.b32.xlu1 %v1138_v21, %s8501_s10 }
 0x169   : > { %v2258_v22 = vpop.permute.xlu0 %2257  ;;  %v1617_v47 = vpop.permute.xlu1 %1616 }
 0x16a   : > { %2351 = vst.msk [vmem:[#allocation3 + $0x18] sm:$0xff] %vm2347_vm11, %v2258_v22 }
 0x16b   : > { %1709 = vst.msk [vmem:[#allocation3 + $0x20] sm:$0xff] %vm1704_vm8, %v1617_v47  ;;  %1216 = vrot.lane.b32.xlu0 %v1139_v31, %s8501_s10  ;;  %v1140_v31 = vmul.f32 %v2390_v5, %v9119_v51 }
 0x16c   : > { %2078 = vrot.lane.b32.xlu1 %v2004_v53, %s8498_s24  ;;  %v1974_v53 = vld [vmem:[#allocation2 + $0x80] sm:$0xff] }
 0x16d   : > { %v850_v38 = vpop.permute.xlu0 %849  ;;  %v2481_v23 = vpop.permute.xlu1 %2480  ;;  %v2006_v29 = vmul.f32 %v1974_v53, %v8856_v42 }
 0x16e   : > { %940 = vst.msk [vmem:[#allocation3 + $0x30] sm:$0xff] %vm933_vm5, %v850_v38 }
 0x16f   : > { %2575 = vst.msk [vmem:[#allocation3 + $0x10] sm:$0xff] %vm2572_vm12, %v2481_v23  ;;  %2080 = vrot.lane.b32.xlu0 %v2005_v36, %s8498_s24  ;;  %v1975_v36 = vld [vmem:[#allocation2 + $0x88] sm:$0xff] }
 0x170   : > { %1439 = vrot.lane.b32.xlu1 %v1363_v14, %s8497_s22  ;;  %v1141_v14 = vmul.f32 %v2391_v3, %v9121_v9  ;;  %v2007_v23 = vmul.f32 %v1975_v36, %v8858_v43 }
 0x171   : > { %v1842_v39 = vpop.permute.xlu0 %1841  ;;  %v1619_v13 = vpop.permute.xlu1 %1618 }
 0x172   : > { %1934 = vst.msk [vmem:[#allocation3 + $0x20] sm:$0xff] %vm1929_vm9, %v1842_v39 }
 0x173   : > { %1710 = vst.msk [vmem:[#allocation3 + $0x28] sm:$0xff] %vm1704_vm8, %v1619_v13  ;;  %1441 = vrot.lane.b32.xlu0 %v1364_v60, %s8497_s22  ;;  %v1365_v60 = vmul.f32 %v1974_v53, %v8872_v48  ;;  %v1366_v13 = vmul.f32 %v1975_v36, %v8874_v49 }
 0x174   : > { %2271 = vrot.lane.b32.xlu1 %v2197_v1, %s8500_s23 }
 0x175   : > { %v852_v12 = vpop.permute.xlu0 %851  ;;  %v2483_v18 = vpop.permute.xlu1 %2482 }
 0x176   : > { %v2607_v54 = vld [vmem:[#allocation3 + $0x10] sm:$0xff]  ;;  %941 = vst.msk [vmem:[#allocation3 + $0x38] sm:$0xff] %vm933_vm5, %v852_v12  ;;  %v726_v12 = vmul.f32 %v1975_v36, %v8897_v57 }
 0x177   : > { %2576 = vst.msk [vmem:[#allocation3 + $0x18] sm:$0xff] %vm2572_vm12, %v2483_v18  ;;  %7414 = vmatprep.mubr.msk.f32.mxu0 %vm2646_vm13, %v2607_v54  ;;  %2273 = vrot.lane.b32.xlu0 %v2198_v58, %s8500_s23  ;;  %v2200_v18 = vld [vmem:[#allocation2 + $0x89] sm:$0xff]  ;;  %v1977_v36 = vld [vmem:[#allocation2 + $0x98] sm:$0xff] }
 0x178   : > { %1632 = vrot.lane.b32.xlu1 %v2197_v1, %s8499_s25  ;;  %758 = vst.msk [vmem:[#allocation3 + $0x88] sm:$0xff] %vm573_vm0, %v726_v12 }
 0x179   : > { %v1844_v55 = vpop.permute.xlu0 %1843  ;;  %v1203_v2 = vpop.permute.xlu1 %1202 }
 0x17a   : > { %1935 = vst.msk [vmem:[#allocation3 + $0x28] sm:$0xff] %vm1929_vm9, %v1844_v55  ;;  %v2392_v55 = vld [vmem:[#allocation2 + $0x82] sm:$0xff] }
 0x17b   : > { %1293 = vst.msk [vmem:[#allocation3 + $0x30] sm:$0xff] %vm1286_vm6, %v1203_v2  ;;  %865 = vrot.lane.b32.xlu0 %v2197_v1, %s8496_s20  ;;  %v725_v1 = vmul.f32 %v1974_v53, %v8895_v56  ;;  %v2424_v2 = vmul.f32 %v2392_v55, %v9110_v37 }
 0x17c   : > { %2496 = vrot.lane.b32.xlu1 %v2422_v44, %s8504_s19 }
 0x17d   : > { %v1205_v17 = vpop.permute.xlu0 %1204  ;;  %v2067_v41 = vpop.permute.xlu1 %2066  ;;  %757 = vst.msk [vmem:[#allocation3 + $0x80] sm:$0xff] %vm573_vm0, %v725_v1 }
 0x17e   : > { %v2608_v21 = vld [vmem:[#allocation3 + $0x18] sm:$0xff]  ;;  %1294 = vst.msk [vmem:[#allocation3 + $0x38] sm:$0xff] %vm1286_vm6, %v1205_v17 }
 0x17f   : > { %2159 = vst.msk [vmem:[#allocation3 + $0x20] sm:$0xff] %vm2154_vm10, %v2067_v41  ;;  %7415 = vmatmul.mubr.msk.f32.gmra.mrb[2].mxu0 %vm2646_vm13, %v2608_v21  ;;  %1857 = vrot.lane.b32.xlu0 %v1781_v35, %s8502_s13  ;;  %v1783_v41 = vmul.f32 %v2392_v55, %v9119_v51 }
 0x180   : > { %1634 = vrot.lane.b32.xlu1 %v2198_v58, %s8499_s25 }
 0x181   : > { %v2069_v30 = vpop.permute.xlu0 %2068  ;;  %v1428_v8 = vpop.permute.xlu1 %1427 }
 0x182   : > { %2160 = vst.msk [vmem:[#allocation3 + $0x28] sm:$0xff] %vm2154_vm10, %v2069_v30  ;;  %v2393_v30 = vld [vmem:[#allocation2 + $0x8a] sm:$0xff] }
 0x183   : > { %1518 = vst.msk [vmem:[#allocation3 + $0x30] sm:$0xff] %vm1511_vm7, %v1428_v8  ;;  %867 = vrot.lane.b32.xlu0 %v2198_v58, %s8496_s20  ;;  %v2425_v37 = vmul.f32 %v2393_v30, %v9112_v40 }
 0x184   : > { %2498 = vrot.lane.b32.xlu1 %v2423_v28, %s8504_s19 }
 0x185   : > { %v1430_v22 = vpop.permute.xlu0 %1429  ;;  %v2260_v47 = vpop.permute.xlu1 %2259 }
 0x186   : > { %1519 = vst.msk [vmem:[#allocation3 + $0x38] sm:$0xff] %vm1511_vm7, %v1430_v22  ;;  %v1142_v22 = vmul.f32 %v2392_v55, %v9126_v59 }
 0x187   : > { %2352 = vst.msk [vmem:[#allocation3 + $0x20] sm:$0xff] %vm2347_vm11, %v2260_v47  ;;  %1859 = vrot.lane.b32.xlu0 %v1782_v0, %s8502_s13  ;;  %v1976_v0 = vld [vmem:[#allocation2 + $0x90] sm:$0xff] }
 0x188   : > { %1218 = vrot.lane.b32.xlu1 %v1140_v31, %s8501_s10  ;;  %v1784_v31 = vmul.f32 %v2393_v30, %v9121_v9  ;;  %v2008_v40 = vmul.f32 %v1976_v0, %v8872_v48  ;;  %v727_v1 = vmul.f32 %v1976_v0, %v8913_v62 }
 0x189   : > { %v2262_v45 = vpop.permute.xlu0 %2261  ;;  %v1621_v38 = vpop.permute.xlu1 %1620 }
 0x18a   : > { %2353 = vst.msk [vmem:[#allocation3 + $0x28] sm:$0xff] %vm2347_vm11, %v2262_v45 }
 0x18b   : > { %1711 = vst.msk [vmem:[#allocation3 + $0x30] sm:$0xff] %vm1704_vm8, %v1621_v38  ;;  %1220 = vrot.lane.b32.xlu0 %v1141_v14, %s8501_s10  ;;  %v1143_v14 = vmul.f32 %v2393_v30, %v9128_v61 }
 0x18c   : > { %2082 = vrot.lane.b32.xlu1 %v2006_v29, %s8498_s24  ;;  %759 = vst.msk [vmem:[#allocation3 + $0x90] sm:$0xff] %vm573_vm0, %v727_v1  ;;  %v2203_v1 = vld [vmem:[#allocation2 + $0xa1] sm:$0xff] }
 0x18d   : > { %v854_v42 = vpop.permute.xlu0 %853  ;;  %v2485_v39 = vpop.permute.xlu1 %2484 }
 0x18e   : > { %942 = vst.msk [vmem:[#allocation3 + $0x40] sm:$0xff] %vm933_vm5, %v854_v42 }
 0x18f   : > { %2577 = vst.msk [vmem:[#allocation3 + $0x20] sm:$0xff] %vm2572_vm12, %v2485_v39  ;;  %2084 = vrot.lane.b32.xlu0 %v2007_v23, %s8498_s24  ;;  %v2009_v23 = vmul.f32 %v1977_v36, %v8874_v49  ;;  %v1368_v39 = vmul.f32 %v1977_v36, %v8897_v57 }
 0x190   : > { %1443 = vrot.lane.b32.xlu1 %v1365_v60, %s8497_s22  ;;  %v1367_v60 = vmul.f32 %v1976_v0, %v8895_v56 }
 0x191   : > { %v1846_v43 = vpop.permute.xlu0 %1845  ;;  %v1623_v58 = vpop.permute.xlu1 %1622 }
 0x192   : > { %1936 = vst.msk [vmem:[#allocation3 + $0x30] sm:$0xff] %vm1929_vm9, %v1846_v43  ;;  %v728_v43 = vmul.f32 %v1977_v36, %v8915_v63 }
 0x193   : > { %1712 = vst.msk [vmem:[#allocation3 + $0x38] sm:$0xff] %vm1704_vm8, %v1623_v58  ;;  %1445 = vrot.lane.b32.xlu0 %v1366_v13, %s8497_s22  ;;  %v2201_v13 = vld [vmem:[#allocation2 + $0x91] sm:$0xff]  ;;  %v2202_v58 = vld [vmem:[#allocation2 + $0x99] sm:$0xff] }
 0x194   : > { %2275 = vrot.lane.b32.xlu1 %v2199_v46, %s8500_s23  ;;  %760 = vst.msk [vmem:[#allocation3 + $0x98] sm:$0xff] %vm573_vm0, %v728_v43 }
 0x195   : > { %v856_v54 = vpop.permute.xlu0 %855  ;;  %v2487_v5 = vpop.permute.xlu1 %2486 }
 0x196   : > { %v2609_v44 = vld [vmem:[#allocation3 + $0x20] sm:$0xff]  ;;  %943 = vst.msk [vmem:[#allocation3 + $0x48] sm:$0xff] %vm933_vm5, %v856_v54 }
 0x197   : > { %2578 = vst.msk [vmem:[#allocation3 + $0x28] sm:$0xff] %vm2572_vm12, %v2487_v5  ;;  %7417 = vmatprep.mubr.msk.f32.mxu0 %vm2646_vm13, %v2609_v44  ;;  %2277 = vrot.lane.b32.xlu0 %v2200_v18, %s8500_s23  ;;  %v2394_v5 = vld [vmem:[#allocation2 + $0x92] sm:$0xff] }
 0x198   : > { %1636 = vrot.lane.b32.xlu1 %v2199_v46, %s8499_s25  ;;  %v2426_v44 = vmul.f32 %v2394_v5, %v9119_v51  ;;  %v2395_v51 = vld [vmem:[#allocation2 + $0x9a] sm:$0xff]  ;;  %v1144_v0 = vmul.f32 %v2394_v5, %v9133_v4 }
 0x199   : > { %v1848_v35 = vpop.permute.xlu0 %1847  ;;  %v1207_v17 = vpop.permute.xlu1 %1206 }
 0x19a   : > { %1937 = vst.msk [vmem:[#allocation3 + $0x38] sm:$0xff] %vm1929_vm9, %v1848_v35  ;;  %v1785_v35 = vmul.f32 %v2394_v5, %v9126_v59 }
 0x19b   : > { %1295 = vst.msk [vmem:[#allocation3 + $0x40] sm:$0xff] %vm1286_vm6, %v1207_v17  ;;  %869 = vrot.lane.b32.xlu0 %v2199_v46, %s8496_s20 }
 0x19c   : > { %2500 = vrot.lane.b32.xlu1 %v2424_v2, %s8504_s19 }
 0x19d   : > { %v1209_v21 = vpop.permute.xlu0 %1208  ;;  %v2071_v3 = vpop.permute.xlu1 %2070 }
 0x19e   : > { %v2610_v28 = vld [vmem:[#allocation3 + $0x28] sm:$0xff]  ;;  %1296 = vst.msk [vmem:[#allocation3 + $0x48] sm:$0xff] %vm1286_vm6, %v1209_v21 }
 0x19f   : > { %2161 = vst.msk [vmem:[#allocation3 + $0x30] sm:$0xff] %vm2154_vm10, %v2071_v3  ;;  %7418 = vmatmul.mubr.msk.f32.gmra.mrb[4].mxu0 %vm2646_vm13, %v2610_v28  ;;  %1861 = vrot.lane.b32.xlu0 %v1783_v41, %s8502_s13  ;;  %v11394_v3 = vmov 0.0   ;;  %v2427_v28 = vmul.f32 %v2395_v51, %v9121_v9 }
 0x1a0   : > { %1638 = vrot.lane.b32.xlu1 %v2200_v18, %s8499_s25  ;;  %3037 = vst.msk [vmem:[#allocation4 + $0x100] sm:$0xff] %vm3004_vm14, %v11394_v3  ;;  %3038 = vst.msk [vmem:[#allocation4 + $0x108] sm:$0xff] %vm3004_vm14, %v11394_v3 }
 0x1a1   : > { %v2073_v8 = vpop.permute.xlu0 %2072  ;;  %v1432_v53 = vpop.permute.xlu1 %1431  ;;  %3296 = vst.msk [vmem:[#allocation5] sm:$0xff] %vm3004_vm14, %v11394_v3  ;;  %3306 = vst.msk [vmem:[#allocation5 + $0x49] sm:$0xff] %vm3004_vm14, %v11394_v3 }
 0x1a2   : > { %2162 = vst.msk [vmem:[#allocation3 + $0x38] sm:$0xff] %vm2154_vm10, %v2073_v8  ;;  %v1978_v8 = vld [vmem:[#allocation2 + $0xa0] sm:$0xff] }
 0x1a3   : > { %1520 = vst.msk [vmem:[#allocation3 + $0x40] sm:$0xff] %vm1511_vm7, %v1432_v53  ;;  %871 = vrot.lane.b32.xlu0 %v2200_v18, %s8496_s20  ;;  %v1786_v53 = vmul.f32 %v2395_v51, %v9128_v61  ;;  %v2010_v9 = vmul.f32 %v1978_v8, %v8895_v56 }
 0x1a4   : > { %2502 = vrot.lane.b32.xlu1 %v2425_v37, %s8504_s19  ;;  %3040 = vst.msk [vmem:[#allocation4 + $0x110] sm:$0x1] %vm3039_vm15, %v11394_v3  ;;  %3297 = vst.msk [vmem:[#allocation5 + $0x8] sm:$0x1] %vm3039_vm15, %v11394_v3 }
 0x1a5   : > { %v1434_v47 = vpop.permute.xlu0 %1433  ;;  %v2264_v29 = vpop.permute.xlu1 %2263  ;;  %3307 = vst.msk [vmem:[#allocation5 + $0x51] sm:$0x1] %vm3039_vm15, %v11394_v3 }
 0x1a6   : > { %1521 = vst.msk [vmem:[#allocation3 + $0x48] sm:$0xff] %vm1511_vm7, %v1434_v47  ;;  %v1979_v47 = vld [vmem:[#allocation2 + $0xa8] sm:$0xff] }
 0x1a7   : > { %2354 = vst.msk [vmem:[#allocation3 + $0x30] sm:$0xff] %vm2347_vm11, %v2264_v29  ;;  %1863 = vrot.lane.b32.xlu0 %v1784_v31, %s8502_s13  ;;  %v1145_v29 = vmul.f32 %v2395_v51, %v9135_v11  ;;  %v730_v43 = vmul.f32 %v1979_v47, %v8933_v10 }
 0x1a8   : > { %1222 = vrot.lane.b32.xlu1 %v1142_v22, %s8501_s10 }
 0x1a9   : > { %v2266_v45 = vpop.permute.xlu0 %2265  ;;  %v1625_v38 = vpop.permute.xlu1 %1624  ;;  %762 = vst.msk [vmem:[#allocation3 + $0xa8] sm:$0xff] %vm573_vm0, %v730_v43 }
 0x1aa   : > { %2355 = vst.msk [vmem:[#allocation3 + $0x38] sm:$0xff] %vm2347_vm11, %v2266_v45  ;;  %v1369_v45 = vmul.f32 %v1978_v8, %v8913_v62 }
 0x1ab   : > { %1713 = vst.msk [vmem:[#allocation3 + $0x40] sm:$0xff] %vm1704_vm8, %v1625_v38  ;;  %1224 = vrot.lane.b32.xlu0 %v1143_v14, %s8501_s10  ;;  %v2011_v14 = vmul.f32 %v1979_v47, %v8897_v57  ;;  %v729_v38 = vmul.f32 %v1978_v8, %v8931_v7 }
 0x1ac   : > { %2086 = vrot.lane.b32.xlu1 %v2008_v40, %s8498_s24 }
 0x1ad   : > { %v858_v48 = vpop.permute.xlu0 %857  ;;  %v2489_v42 = vpop.permute.xlu1 %2488  ;;  %761 = vst.msk [vmem:[#allocation3 + $0xa0] sm:$0xff] %vm573_vm0, %v729_v38 }
 0x1ae   : > { %944 = vst.msk [vmem:[#allocation3 + $0x50] sm:$0xff] %vm933_vm5, %v858_v48 }
 0x1af   : > { %2579 = vst.msk [vmem:[#allocation3 + $0x30] sm:$0xff] %vm2572_vm12, %v2489_v42  ;;  %2088 = vrot.lane.b32.xlu0 %v2009_v23, %s8498_s24  ;;  %v2204_v42 = vld [vmem:[#allocation2 + $0xa9] sm:$0xff] }
 0x1b0   : > { %1447 = vrot.lane.b32.xlu1 %v1367_v60, %s8497_s22  ;;  %v1370_v60 = vmul.f32 %v1979_v47, %v8915_v63 }
 0x1b1   : > { %v1850_v49 = vpop.permute.xlu0 %1849  ;;  %v1627_v46 = vpop.permute.xlu1 %1626 }
 0x1b2   : > { %1938 = vst.msk [vmem:[#allocation3 + $0x40] sm:$0xff] %vm1929_vm9, %v1850_v49 }
 0x1b3   : > { %1714 = vst.msk [vmem:[#allocation3 + $0x48] sm:$0xff] %vm1704_vm8, %v1627_v46  ;;  %1449 = vrot.lane.b32.xlu0 %v1368_v39, %s8497_s22  ;;  %v2396_v46 = vld [vmem:[#allocation2 + $0xa2] sm:$0xff] }
 0x1b4   : > { %2279 = vrot.lane.b32.xlu1 %v2201_v13, %s8500_s23  ;;  %v1146_v51 = vmul.f32 %v2396_v46, %v9140_v15 }
 0x1b5   : > { %v860_v12 = vpop.permute.xlu0 %859  ;;  %v2491_v18 = vpop.permute.xlu1 %2490 }
 0x1b6   : > { %v2611_v54 = vld [vmem:[#allocation3 + $0x30] sm:$0xff]  ;;  %945 = vst.msk [vmem:[#allocation3 + $0x58] sm:$0xff] %vm933_vm5, %v860_v12 }
 0x1b7   : > { %2580 = vst.msk [vmem:[#allocation3 + $0x38] sm:$0xff] %vm2572_vm12, %v2491_v18  ;;  %7420 = vmatprep.mubr.msk.f32.mxu0 %vm2646_vm13, %v2611_v54  ;;  %2281 = vrot.lane.b32.xlu0 %v2202_v58, %s8500_s23  ;;  %v1787_v54 = vmul.f32 %v2396_v46, %v9133_v4 }
 0x1b8   : > { %1640 = vrot.lane.b32.xlu1 %v2201_v13, %s8499_s25 }
 0x1b9   : > { %v1852_v55 = vpop.permute.xlu0 %1851  ;;  %v1211_v2 = vpop.permute.xlu1 %1210 }
 0x1ba   : > { %1939 = vst.msk [vmem:[#allocation3 + $0x48] sm:$0xff] %vm1929_vm9, %v1852_v55 }
 0x1bb   : > { %1297 = vst.msk [vmem:[#allocation3 + $0x50] sm:$0xff] %vm1286_vm6, %v1211_v2  ;;  %873 = vrot.lane.b32.xlu0 %v2201_v13, %s8496_s20  ;;  %v2397_v2 = vld [vmem:[#allocation2 + $0xaa] sm:$0xff] }
 0x1bc   : > { %2504 = vrot.lane.b32.xlu1 %v2426_v44, %s8504_s19  ;;  %v1147_v8 = vmul.f32 %v2397_v2, %v9142_v16 }
 0x1bd   : > { %v1213_v17 = vpop.permute.xlu0 %1212  ;;  %v2075_v41 = vpop.permute.xlu1 %2074 }
 0x1be   : > { %v2612_v21 = vld [vmem:[#allocation3 + $0x38] sm:$0xff]  ;;  %1298 = vst.msk [vmem:[#allocation3 + $0x58] sm:$0xff] %vm1286_vm6, %v1213_v17 }
 0x1bf   : > { %2163 = vst.msk [vmem:[#allocation3 + $0x40] sm:$0xff] %vm2154_vm10, %v2075_v41  ;;  %7421 = vmatmul.mubr.msk.f32.gmra.mrb[6].mxu0 %vm2646_vm13, %v2612_v21  ;;  %1865 = vrot.lane.b32.xlu0 %v1785_v35, %s8502_s13  ;;  %v1980_v41 = vld [vmem:[#allocation2 + $0xb0] sm:$0xff]  ;;  %v1788_v21 = vmul.f32 %v2397_v2, %v9135_v11 }
 0x1c0   : > { %1642 = vrot.lane.b32.xlu1 %v2202_v58, %s8499_s25 }
 0x1c1   : > { %v2077_v30 = vpop.permute.xlu0 %2076  ;;  %v1436_v37 = vpop.permute.xlu1 %1435 }
 0x1c2   : > { %2164 = vst.msk [vmem:[#allocation3 + $0x48] sm:$0xff] %vm2154_vm10, %v2077_v30 }
 0x1c3   : > { %1522 = vst.msk [vmem:[#allocation3 + $0x50] sm:$0xff] %vm1511_vm7, %v1436_v37  ;;  %875 = vrot.lane.b32.xlu0 %v2202_v58, %s8496_s20  ;;  %v2428_v58 = vmul.f32 %v2396_v46, %v9126_v59  ;;  %v2429_v59 = vmul.f32 %v2397_v2, %v9128_v61  ;;  %v2012_v61 = vmul.f32 %v1980_v41, %v8913_v62  ;;  %v1981_v37 = vld [vmem:[#allocation2 + $0xb8] sm:$0xff] }
 0x1c4   : > { %2506 = vrot.lane.b32.xlu1 %v2427_v28, %s8504_s19  ;;  %v2399_v46 = vld [vmem:[#allocation2 + $0xba] sm:$0xff] }
 0x1c5   : > { %v1438_v31 = vpop.permute.xlu0 %1437  ;;  %v2268_v22 = vpop.permute.xlu1 %2267  ;;  %v1149_v2 = vmul.f32 %v2399_v46, %v9149_v27 }
 0x1c6   : > { %1523 = vst.msk [vmem:[#allocation3 + $0x58] sm:$0xff] %vm1511_vm7, %v1438_v31  ;;  %v2013_v31 = vmul.f32 %v1981_v37, %v8915_v63 }
 0x1c7   : > { %2356 = vst.msk [vmem:[#allocation3 + $0x40] sm:$0xff] %vm2347_vm11, %v2268_v22  ;;  %1867 = vrot.lane.b32.xlu0 %v1786_v53, %s8502_s13  ;;  %v1371_v22 = vmul.f32 %v1980_v41, %v8931_v7 }
 0x1c8   : > { %1226 = vrot.lane.b32.xlu1 %v1144_v0, %s8501_s10 }
 0x1c9   : > { %v2270_v40 = vpop.permute.xlu0 %2269  ;;  %v1629_v36 = vpop.permute.xlu1 %1628 }
 0x1ca   : > { %2357 = vst.msk [vmem:[#allocation3 + $0x48] sm:$0xff] %vm2347_vm11, %v2270_v40  ;;  %v2205_v40 = vld [vmem:[#allocation2 + $0xb1] sm:$0xff] }
 0x1cb   : > { %1715 = vst.msk [vmem:[#allocation3 + $0x50] sm:$0xff] %vm1704_vm8, %v1629_v36  ;;  %1228 = vrot.lane.b32.xlu0 %v1145_v29, %s8501_s10  ;;  %v1372_v29 = vmul.f32 %v1981_v37, %v8933_v10 }
 0x1cc   : > { %2090 = vrot.lane.b32.xlu1 %v2010_v9, %s8498_s24  ;;  %v731_v9 = vmul.f32 %v1980_v41, %v8949_v19 }
 0x1cd   : > { %v862_v56 = vpop.permute.xlu0 %861  ;;  %v2493_v23 = vpop.permute.xlu1 %2492 }
 0x1ce   : > { %946 = vst.msk [vmem:[#allocation3 + $0x60] sm:$0xff] %vm933_vm5, %v862_v56 }
 0x1cf   : > { %2581 = vst.msk [vmem:[#allocation3 + $0x40] sm:$0xff] %vm2572_vm12, %v2493_v23  ;;  %2092 = vrot.lane.b32.xlu0 %v2011_v14, %s8498_s24  ;;  %v2206_v14 = vld [vmem:[#allocation2 + $0xb9] sm:$0xff] }
 0x1d0   : > { %1451 = vrot.lane.b32.xlu1 %v1369_v45, %s8497_s22  ;;  %763 = vst.msk [vmem:[#allocation3 + $0xb0] sm:$0xff] %vm573_vm0, %v731_v9  ;;  %v2398_v23 = vld [vmem:[#allocation2 + $0xb2] sm:$0xff] }
 0x1d1   : > { %v1854_v57 = vpop.permute.xlu0 %1853  ;;  %v1631_v48 = vpop.permute.xlu1 %1630 }
 0x1d2   : > { %1940 = vst.msk [vmem:[#allocation3 + $0x50] sm:$0xff] %vm1929_vm9, %v1854_v57 }
 0x1d3   : > { %1716 = vst.msk [vmem:[#allocation3 + $0x58] sm:$0xff] %vm1704_vm8, %v1631_v48  ;;  %1453 = vrot.lane.b32.xlu0 %v1370_v60, %s8497_s22  ;;  %v732_v60 = vmul.f32 %v1981_v37, %v8951_v20  ;;  %v2208_v37 = vld [vmem:[#allocation2 + $0xc9] sm:$0xff] }
 0x1d4   : > { %2283 = vrot.lane.b32.xlu1 %v2203_v1, %s8500_s23 }
 0x1d5   : > { %v864_v39 = vpop.permute.xlu0 %863  ;;  %v2495_v13 = vpop.permute.xlu1 %2494  ;;  %764 = vst.msk [vmem:[#allocation3 + $0xb8] sm:$0xff] %vm573_vm0, %v732_v60 }
 0x1d6   : > { %v2613_v49 = vld [vmem:[#allocation3 + $0x40] sm:$0xff]  ;;  %947 = vst.msk [vmem:[#allocation3 + $0x68] sm:$0xff] %vm933_vm5, %v864_v39 }
 0x1d7   : > { %2582 = vst.msk [vmem:[#allocation3 + $0x48] sm:$0xff] %vm2572_vm12, %v2495_v13  ;;  %7423 = vmatprep.mubr.msk.f32.mxu0 %vm2646_vm13, %v2613_v49  ;;  %2285 = vrot.lane.b32.xlu0 %v2204_v42, %s8500_s23 }
 0x1d8   : > { %1644 = vrot.lane.b32.xlu1 %v2203_v1, %s8499_s25 }
 0x1d9   : > { %v1856_v12 = vpop.permute.xlu0 %1855 }
 0x1da   : > { %v1215_v18 = vpop.permute.xlu1 %1214  ;;  %1941 = vst.msk [vmem:[#allocation3 + $0x58] sm:$0xff] %vm1929_vm9, %v1856_v12  ;;  %v1982_v12 = vld [vmem:[#allocation2 + $0xc0] sm:$0xff] }
 0x1db   : > { %1299 = vst.msk [vmem:[#allocation3 + $0x60] sm:$0xff] %vm1286_vm6, %v1215_v18  ;;  %877 = vrot.lane.b32.xlu0 %v2203_v1, %s8496_s20  ;;  %v2430_v1 = vmul.f32 %v2398_v23, %v9133_v4  ;;  %v2431_v4 = vmul.f32 %v2399_v46, %v9135_v11  ;;  %v1790_v18 = vmul.f32 %v2399_v46, %v9142_v16 }
 0x1dc   : > { %2508 = vrot.lane.b32.xlu1 %v2428_v58, %s8504_s19  ;;  %v2014_v11 = vmul.f32 %v1982_v12, %v8931_v7  ;;  %v1373_v41 = vmul.f32 %v1982_v12, %v8949_v19 }
 0x1dd   : > { %v1217_v5 = vpop.permute.xlu0 %1216 }
 0x1de   : > { %v2079_v44 = vpop.permute.xlu1 %2078  ;;  %v2614_v55 = vld [vmem:[#allocation3 + $0x48] sm:$0xff]  ;;  %1300 = vst.msk [vmem:[#allocation3 + $0x68] sm:$0xff] %vm1286_vm6, %v1217_v5 }
 0x1df   : > { %2165 = vst.msk [vmem:[#allocation3 + $0x50] sm:$0xff] %vm2154_vm10, %v2079_v44  ;;  %7424 = vmatmul.mubr.msk.f32.gmra.mrb[8].mxu0 %vm2646_vm13, %v2614_v55  ;;  %1869 = vrot.lane.b32.xlu0 %v1787_v54, %s8502_s13  ;;  %v1148_v54 = vmul.f32 %v2398_v23, %v9147_v24  ;;  %v1983_v55 = vld [vmem:[#allocation2 + $0xc8] sm:$0xff] }
 0x1e0   : > { %1646 = vrot.lane.b32.xlu1 %v2204_v42, %s8499_s25 }
 0x1e1   : > { %v2081_v35 = vpop.permute.xlu0 %2080 }
 0x1e2   : > { %v1440_v17 = vpop.permute.xlu1 %1439  ;;  %2166 = vst.msk [vmem:[#allocation3 + $0x58] sm:$0xff] %vm2154_vm10, %v2081_v35 }
 0x1e3   : > { %1524 = vst.msk [vmem:[#allocation3 + $0x60] sm:$0xff] %vm1511_vm7, %v1440_v17  ;;  %879 = vrot.lane.b32.xlu0 %v2204_v42, %s8496_s20  ;;  %v1789_v42 = vmul.f32 %v2398_v23, %v9140_v15  ;;  %v2015_v17 = vmul.f32 %v1983_v55, %v8933_v10 }
 0x1e4   : > { %2510 = vrot.lane.b32.xlu1 %v2429_v59, %s8504_s19 }
 0x1e5   : > { %v1442_v28 = vpop.permute.xlu0 %1441 }
 0x1e6   : > { %v2272_v30 = vpop.permute.xlu1 %2271  ;;  %1525 = vst.msk [vmem:[#allocation3 + $0x68] sm:$0xff] %vm1511_vm7, %v1442_v28  ;;  %v1374_v28 = vmul.f32 %v1983_v55, %v8951_v20 }
 0x1e7   : > { %2358 = vst.msk [vmem:[#allocation3 + $0x50] sm:$0xff] %vm2347_vm11, %v2272_v30  ;;  %1871 = vrot.lane.b32.xlu0 %v1788_v21, %s8502_s13  ;;  %v733_v21 = vmul.f32 %v1982_v12, %v8967_v25  ;;  %v2207_v30 = vld [vmem:[#allocation2 + $0xc1] sm:$0xff]  ;;  %v2209_v12 = vld [vmem:[#allocation2 + $0xd1] sm:$0xff] }
 0x1e8   : > { %1230 = vrot.lane.b32.xlu1 %v1146_v51, %s8501_s10 }
 0x1e9   : > { %v2274_v53 = vpop.permute.xlu0 %2273  ;;  %765 = vst.msk [vmem:[#allocation3 + $0xc0] sm:$0xff] %vm573_vm0, %v733_v21 }
 0x1ea   : > { %v1633_v0 = vpop.permute.xlu1 %1632  ;;  %2359 = vst.msk [vmem:[#allocation3 + $0x58] sm:$0xff] %vm2347_vm11, %v2274_v53 }
 0x1eb   : > { %1717 = vst.msk [vmem:[#allocation3 + $0x60] sm:$0xff] %vm1704_vm8, %v1633_v0  ;;  %1232 = vrot.lane.b32.xlu0 %v1147_v8, %s8501_s10 }
 0x1ec   : > { %2094 = vrot.lane.b32.xlu1 %v2012_v61, %s8498_s24 }
 0x1ed   : > { %v866_v62 = vpop.permute.xlu0 %865 }
 0x1ee   : > { %v2497_v47 = vpop.permute.xlu1 %2496  ;;  %948 = vst.msk [vmem:[#allocation3 + $0x70] sm:$0xff] %vm933_vm5, %v866_v62 }
 0x1ef   : > { %2583 = vst.msk [vmem:[#allocation3 + $0x50] sm:$0xff] %vm2572_vm12, %v2497_v47  ;;  %2096 = vrot.lane.b32.xlu0 %v2013_v31, %s8498_s24  ;;  %v2400_v31 = vld [vmem:[#allocation2 + $0xc2] sm:$0xff] }
 0x1f0   : > { %1455 = vrot.lane.b32.xlu1 %v1371_v22, %s8497_s22  ;;  %v734_v22 = vmul.f32 %v1983_v55, %v8969_v26  ;;  %v2432_v9 = vmul.f32 %v2400_v31, %v9140_v15  ;;  %v1150_v60 = vmul.f32 %v2400_v31, %v9154_v32  ;;  %v2402_v55 = vld [vmem:[#allocation2 + $0xd2] sm:$0xff] }
 0x1f1   : > { %v1858_v63 = vpop.permute.xlu0 %1857 }
 0x1f2   : > { %v1635_v36 = vpop.permute.xlu1 %1634  ;;  %1942 = vst.msk [vmem:[#allocation3 + $0x60] sm:$0xff] %vm1929_vm9, %v1858_v63 }
 0x1f3   : > { %1718 = vst.msk [vmem:[#allocation3 + $0x68] sm:$0xff] %vm1704_vm8, %v1635_v36  ;;  %1457 = vrot.lane.b32.xlu0 %v1372_v29, %s8497_s22  ;;  %v1791_v29 = vmul.f32 %v2400_v31, %v9147_v24 }
 0x1f4   : > { %2287 = vrot.lane.b32.xlu1 %v2205_v40, %s8500_s23  ;;  %766 = vst.msk [vmem:[#allocation3 + $0xc8] sm:$0xff] %vm573_vm0, %v734_v22 }
 0x1f5   : > { %v868_v45 = vpop.permute.xlu0 %867 }
 0x1f6   : > { %v2499_v38 = vpop.permute.xlu1 %2498  ;;  %v2615_v56 = vld [vmem:[#allocation3 + $0x50] sm:$0xff]  ;;  %949 = vst.msk [vmem:[#allocation3 + $0x78] sm:$0xff] %vm933_vm5, %v868_v45 }
 0x1f7   : > { %2584 = vst.msk [vmem:[#allocation3 + $0x58] sm:$0xff] %vm2572_vm12, %v2499_v38  ;;  %7426 = vmatprep.mubr.msk.f32.mxu0 %vm2646_vm13, %v2615_v56  ;;  %2289 = vrot.lane.b32.xlu0 %v2206_v14, %s8500_s23  ;;  %v1984_v56 = vld [vmem:[#allocation2 + $0xd0] sm:$0xff] }
 0x1f8   : > { %1648 = vrot.lane.b32.xlu1 %v2205_v40, %s8499_s25  ;;  %v1375_v46 = vmul.f32 %v1984_v56, %v8967_v25 }
 0x1f9   : > { %v1860_v57 = vpop.permute.xlu0 %1859 }
 0x1fa   : > { %v1219_v48 = vpop.permute.xlu1 %1218  ;;  %1943 = vst.msk [vmem:[#allocation3 + $0x68] sm:$0xff] %vm1929_vm9, %v1860_v57 }
 0x1fb   : > { %1301 = vst.msk [vmem:[#allocation3 + $0x70] sm:$0xff] %vm1286_vm6, %v1219_v48  ;;  %881 = vrot.lane.b32.xlu0 %v2205_v40, %s8496_s20  ;;  %v1985_v48 = vld [vmem:[#allocation2 + $0xd8] sm:$0xff] }
 0x1fc   : > { %2512 = vrot.lane.b32.xlu1 %v2430_v1, %s8504_s19 }
 0x1fd   : > { %v1221_v39 = vpop.permute.xlu0 %1220 }
 0x1fe   : > { %v2083_v13 = vpop.permute.xlu1 %2082  ;;  %v2616_v49 = vld [vmem:[#allocation3 + $0x58] sm:$0xff]  ;;  %1302 = vst.msk [vmem:[#allocation3 + $0x78] sm:$0xff] %vm1286_vm6, %v1221_v39 }
 0x1ff   : > { %2167 = vst.msk [vmem:[#allocation3 + $0x60] sm:$0xff] %vm2154_vm10, %v2083_v13  ;;  %7427 = vmatmul.mubr.msk.f32.gmra.mrb[10].mxu0 %vm2646_vm13, %v2616_v49  ;;  %1873 = vrot.lane.b32.xlu0 %v1789_v42, %s8502_s13  ;;  %v2017_v49 = vmul.f32 %v1985_v48, %v8951_v20 }
 0x200   : > { %1650 = vrot.lane.b32.xlu1 %v2206_v14, %s8499_s25 }
 0x201   : > { %v2085_v43 = vpop.permute.xlu0 %2084 }
 0x202   : > { %v1444_v58 = vpop.permute.xlu1 %1443  ;;  %2168 = vst.msk [vmem:[#allocation3 + $0x68] sm:$0xff] %vm2154_vm10, %v2085_v43 }
 0x203   : > { %1526 = vst.msk [vmem:[#allocation3 + $0x70] sm:$0xff] %vm1511_vm7, %v1444_v58  ;;  %883 = vrot.lane.b32.xlu0 %v2206_v14, %s8496_s20  ;;  %v2401_v14 = vld [vmem:[#allocation2 + $0xca] sm:$0xff]  ;;  %v1376_v58 = vmul.f32 %v1985_v48, %v8969_v26 }
 0x204   : > { %2514 = vrot.lane.b32.xlu1 %v2431_v4, %s8504_s19  ;;  %v2433_v15 = vmul.f32 %v2401_v14, %v9142_v16  ;;  %v1792_v23 = vmul.f32 %v2401_v14, %v9149_v27  ;;  %v2016_v16 = vmul.f32 %v1984_v56, %v8949_v19  ;;  %v1151_v42 = vmul.f32 %v2401_v14, %v9156_v6 }
 0x205   : > { %v1446_v5 = vpop.permute.xlu0 %1445  ;;  %v735_v4 = vmul.f32 %v1984_v56, %v8985_v33  ;;  %v11395_v56 = vld [vmem:[#allocation17_spill] sm:$0xff] }
 0x206   : > { %v2276_v44 = vpop.permute.xlu1 %2275  ;;  %1527 = vst.msk [vmem:[#allocation3 + $0x78] sm:$0xff] %vm1511_vm7, %v1446_v5 }
 0x207   : > { %2360 = vst.msk [vmem:[#allocation3 + $0x60] sm:$0xff] %vm2347_vm11, %v2276_v44  ;;  %1875 = vrot.lane.b32.xlu0 %v1790_v18, %s8502_s13 }
 0x208   : > { %1234 = vrot.lane.b32.xlu1 %v1148_v54, %s8501_s10  ;;  %767 = vst.msk [vmem:[#allocation3 + $0xd0] sm:$0xff] %vm573_vm0, %v735_v4  ;;  %v2210_v54 = vld [vmem:[#allocation2 + $0xd9] sm:$0xff] }
 0x209   : > { %v2278_v59 = vpop.permute.xlu0 %2277 }
 0x20a   : > { %v1637_v35 = vpop.permute.xlu1 %1636  ;;  %2361 = vst.msk [vmem:[#allocation3 + $0x68] sm:$0xff] %vm2347_vm11, %v2278_v59  ;;  %v736_v59 = vmul.f32 %v1985_v48, %v8987_v34 }
 0x20b   : > { %1719 = vst.msk [vmem:[#allocation3 + $0x70] sm:$0xff] %vm1704_vm8, %v1637_v35  ;;  %1236 = vrot.lane.b32.xlu0 %v1149_v2, %s8501_s10  ;;  %v9663_v2 = vld [vmem:[%s11344_s2] ss:$0 sm:$0xff]  ;;  %v2434_v35 = vmul.f32 %v2402_v55, %v9147_v24  ;;  %v1793_v24 = vmul.f32 %v2402_v55, %v9154_v32 }
 0x20c   : > { %2098 = vrot.lane.b32.xlu1 %v2014_v11, %s8498_s24  ;;  %768 = vst.msk [vmem:[#allocation3 + $0xd8] sm:$0xff] %vm573_vm0, %v736_v59 }
 0x20d   : > { %v870_v7 = vpop.permute.xlu0 %869 }
 0x20e   : > { %v2501_v51 = vpop.permute.xlu1 %2500  ;;  %950 = vst.msk [vmem:[#allocation3 + $0x80] sm:$0xff] %vm933_vm5, %v870_v7 }
 0x20f   : > { %2585 = vst.msk [vmem:[#allocation3 + $0x60] sm:$0xff] %vm2572_vm12, %v2501_v51  ;;  %2100 = vrot.lane.b32.xlu0 %v2015_v17, %s8498_s24 }
 0x210   : > { %1459 = vrot.lane.b32.xlu1 %v1373_v41, %s8497_s22 }
 0x211   : > { %v1862_v10 = vpop.permute.xlu0 %1861 }
 0x212   : > { %v1639_v61 = vpop.permute.xlu1 %1638  ;;  %1944 = vst.msk [vmem:[#allocation3 + $0x70] sm:$0xff] %vm1929_vm9, %v1862_v10 }
 0x213   : > { %1720 = vst.msk [vmem:[#allocation3 + $0x78] sm:$0xff] %vm1704_vm8, %v1639_v61  ;;  %1461 = vrot.lane.b32.xlu0 %v1374_v28, %s8497_s22 }
 0x214   : > { %2291 = vrot.lane.b32.xlu1 %v2207_v30, %s8500_s23 }
 0x215   : > { %v872_v8 = vpop.permute.xlu0 %871 }
 0x216   : > { %v2503_v53 = vpop.permute.xlu1 %2502  ;;  %v2617_v0 = vld [vmem:[#allocation3 + $0x60] sm:$0xff]  ;;  %951 = vst.msk [vmem:[#allocation3 + $0x88] sm:$0xff] %vm933_vm5, %v872_v8  ;;  %v2403_v8 = vld [vmem:[#allocation2 + $0xda] sm:$0xff] }
 0x217   : > { %2586 = vst.msk [vmem:[#allocation3 + $0x68] sm:$0xff] %vm2572_vm12, %v2503_v53  ;;  %7429 = vmatprep.mubr.msk.f32.mxu0 %vm2646_vm13, %v2617_v0  ;;  %2293 = vrot.lane.b32.xlu0 %v2208_v37, %s8500_s23  ;;  %v2435_v0 = vmul.f32 %v2403_v8, %v9149_v27 }
 0x218   : > { %1652 = vrot.lane.b32.xlu1 %v2207_v30, %s8499_s25 }
 0x219   : > { %v1864_v62 = vpop.permute.xlu0 %1863 }
 0x21a   : > { %v1223_v47 = vpop.permute.xlu1 %1222  ;;  %1945 = vst.msk [vmem:[#allocation3 + $0x78] sm:$0xff] %vm1929_vm9, %v1864_v62  ;;  %v1794_v62 = vmul.f32 %v2403_v8, %v9156_v6 }
 0x21b   : > { %1303 = vst.msk [vmem:[#allocation3 + $0x80] sm:$0xff] %vm1286_vm6, %v1223_v47  ;;  %885 = vrot.lane.b32.xlu0 %v2207_v30, %s8496_s20  ;;  %v1152_v47 = vmul.f32 %v2402_v55, %v9163_v50 }
 0x21c   : > { %2516 = vrot.lane.b32.xlu1 %v2432_v9, %s8504_s19  ;;  %v1986_v9 = vld [vmem:[#allocation2 + $0xe0] sm:$0xff] }
 0x21d   : > { %v1225_v40 = vpop.permute.xlu0 %1224  ;;  %v2018_v27 = vmul.f32 %v1986_v9, %v8967_v25 }
 0x21e   : > { %v2087_v63 = vpop.permute.xlu1 %2086  ;;  %v2618_v36 = vld [vmem:[#allocation3 + $0x68] sm:$0xff]  ;;  %1304 = vst.msk [vmem:[#allocation3 + $0x88] sm:$0xff] %vm1286_vm6, %v1225_v40 }
 0x21f   : > { %2169 = vst.msk [vmem:[#allocation3 + $0x70] sm:$0xff] %vm2154_vm10, %v2087_v63  ;;  %7430 = vmatmul.mubr.msk.f32.gmra.mrb[12].mxu0 %vm2646_vm13, %v2618_v36  ;;  %1877 = vrot.lane.b32.xlu0 %v1791_v29, %s8502_s13  ;;  %v1987_v63 = vld [vmem:[#allocation2 + $0xe8] sm:$0xff]  ;;  %v1153_v36 = vmul.f32 %v2403_v8, %v9165_v52 }
 0x220   : > { %1654 = vrot.lane.b32.xlu1 %v2208_v37, %s8499_s25 }
 0x221   : > { %v2089_v45 = vpop.permute.xlu0 %2088 }
 0x222   : > { %v1448_v38 = vpop.permute.xlu1 %1447  ;;  %2170 = vst.msk [vmem:[#allocation3 + $0x78] sm:$0xff] %vm2154_vm10, %v2089_v45  ;;  %v2019_v45 = vmul.f32 %v1987_v63, %v8969_v26 }
 0x223   : > { %1528 = vst.msk [vmem:[#allocation3 + $0x80] sm:$0xff] %vm1511_vm7, %v1448_v38  ;;  %887 = vrot.lane.b32.xlu0 %v2208_v37, %s8496_s20  ;;  %v1377_v38 = vmul.f32 %v1986_v9, %v8985_v33 }
 0x224   : > { %2518 = vrot.lane.b32.xlu1 %v2433_v15, %s8504_s19 }
 0x225   : > { %v1450_v1 = vpop.permute.xlu0 %1449 }
 0x226   : > { %v2280_v57 = vpop.permute.xlu1 %2279  ;;  %1529 = vst.msk [vmem:[#allocation3 + $0x88] sm:$0xff] %vm1511_vm7, %v1450_v1  ;;  %v1378_v1 = vmul.f32 %v1987_v63, %v8987_v34 }
 0x227   : > { %2362 = vst.msk [vmem:[#allocation3 + $0x70] sm:$0xff] %vm2347_vm11, %v2280_v57  ;;  %1879 = vrot.lane.b32.xlu0 %v1792_v23, %s8502_s13  ;;  %v737_v23 = vmul.f32 %v1986_v9, %v11395_v56  ;;  %v2211_v57 = vld [vmem:[#allocation2 + $0xe1] sm:$0xff] }
 0x228   : > { %1238 = vrot.lane.b32.xlu1 %v1150_v60, %s8501_s10 }
 0x229   : > { %v2282_v39 = vpop.permute.xlu0 %2281  ;;  %769 = vst.msk [vmem:[#allocation3 + $0xe0] sm:$0xff] %vm573_vm0, %v737_v23 }
 0x22a   : > { %v1641_v13 = vpop.permute.xlu1 %1640  ;;  %2363 = vst.msk [vmem:[#allocation3 + $0x78] sm:$0xff] %vm2347_vm11, %v2282_v39 }
 0x22b   : > { %1721 = vst.msk [vmem:[#allocation3 + $0x80] sm:$0xff] %vm1704_vm8, %v1641_v13  ;;  %1240 = vrot.lane.b32.xlu0 %v1151_v42, %s8501_s10 }
 0x22c   : > { %2102 = vrot.lane.b32.xlu1 %v2016_v16, %s8498_s24 }
 0x22d   : > { %v874_v19 = vpop.permute.xlu0 %873 }
 0x22e   : > { %v2505_v43 = vpop.permute.xlu1 %2504  ;;  %952 = vst.msk [vmem:[#allocation3 + $0x90] sm:$0xff] %vm933_vm5, %v874_v19 }
 0x22f   : > { %2587 = vst.msk [vmem:[#allocation3 + $0x70] sm:$0xff] %vm2572_vm12, %v2505_v43  ;;  %2104 = vrot.lane.b32.xlu0 %v2017_v49, %s8498_s24 }
 0x230   : > { %1463 = vrot.lane.b32.xlu1 %v1375_v46, %s8497_s22  ;;  %v2212_v46 = vld [vmem:[#allocation2 + $0xe9] sm:$0xff] }
 0x231   : > { %v1866_v20 = vpop.permute.xlu0 %1865 }
 0x232   : > { %v1643_v18 = vpop.permute.xlu1 %1642  ;;  %1946 = vst.msk [vmem:[#allocation3 + $0x80] sm:$0xff] %vm1929_vm9, %v1866_v20  ;;  %v11396_v20 = vld [vmem:[#allocation18_spill] sm:$0xff] }
 0x233   : > { %1722 = vst.msk [vmem:[#allocation3 + $0x88] sm:$0xff] %vm1704_vm8, %v1643_v18  ;;  %1465 = vrot.lane.b32.xlu0 %v1376_v58, %s8497_s22  ;;  %v738_v18 = vmul.f32 %v1987_v63, %v11396_v20 }
 0x234   : > { %2295 = vrot.lane.b32.xlu1 %v2209_v12, %s8500_s23 }
 0x235   : > { %v876_v5 = vpop.permute.xlu0 %875  ;;  %770 = vst.msk [vmem:[#allocation3 + $0xe8] sm:$0xff] %vm573_vm0, %v738_v18 }
 0x236   : > { %v2507_v44 = vpop.permute.xlu1 %2506  ;;  %v2619_v11 = vld [vmem:[#allocation3 + $0x70] sm:$0xff]  ;;  %953 = vst.msk [vmem:[#allocation3 + $0x98] sm:$0xff] %vm933_vm5, %v876_v5 }
 0x237   : > { %2588 = vst.msk [vmem:[#allocation3 + $0x78] sm:$0xff] %vm2572_vm12, %v2507_v44  ;;  %7432 = vmatprep.mubr.msk.f32.mxu0 %vm2646_vm13, %v2619_v11  ;;  %2297 = vrot.lane.b32.xlu0 %v2210_v54, %s8500_s23 }
 0x238   : > { %1656 = vrot.lane.b32.xlu1 %v2209_v12, %s8499_s25 }
 0x239   : > { %v1868_v17 = vpop.permute.xlu0 %1867 }
 0x23a   : > { %v7413_v41 = vpop.f32.mrb[0].mxu0  ;;  %1947 = vst.msk [vmem:[#allocation3 + $0x88] sm:$0xff] %vm1929_vm9, %v1868_v17  ;;  %v1227_v7 = vpop.permute.xlu1 %1226  ;;  %v2405_v17 = vld [vmem:[#allocation2 + $0xea] sm:$0xff] }
 0x23b   : > { %v2819_v21 = vadd.f32 %v7413_v41, %v9663_v2  ;;  %v2813_v51 = vpop.f32.mrb[1].mxu0  ;;  %1305 = vst.msk [vmem:[#allocation3 + $0x90] sm:$0xff] %vm1286_vm6, %v1227_v7  ;;  %889 = vrot.lane.b32.xlu0 %v2209_v12, %s8496_s20  ;;  %v2404_v12 = vld [vmem:[#allocation2 + $0xe2] sm:$0xff]  ;;  %v2437_v41 = vmul.f32 %v2405_v17, %v9156_v6  ;;  %v1796_v7 = vmul.f32 %v2405_v17, %v9165_v52 }
 0x23c   : > { %v2814_v28 = vadd.f32 %v9663_v2, %v2813_v51  ;;  %2520 = vrot.lane.b32.xlu1 %v2434_v35, %s8504_s19  ;;  %v2436_v5 = vmul.f32 %v2404_v12, %v9154_v32  ;;  %v1795_v11 = vmul.f32 %v2404_v12, %v9163_v50 }
 0x23d   : > { %v2973_v30 = vmax.f32 %v2819_v21, 0.0  ;;  %v1229_v61 = vpop.permute.xlu0 %1228 }
 0x23e   : > { %v2972_v10 = vmax.f32 %v2814_v28, 0.0  ;;  %v2620_v37 = vld [vmem:[#allocation3 + $0x78] sm:$0xff]  ;;  %1306 = vst.msk [vmem:[#allocation3 + $0x98] sm:$0xff] %vm1286_vm6, %v1229_v61  ;;  %v2091_v53 = vpop.permute.xlu1 %2090  ;;  %v1988_v28 = vld [vmem:[#allocation2 + $0xf0] sm:$0xff]  ;;  %v1989_v61 = vld [vmem:[#allocation2 + $0xf8] sm:$0xff] }
 0x23f   : > { %3006 = vst.msk [vmem:[#allocation4 + $0x8] sm:$0xff] %vm3004_vm14, %v2973_v30  ;;  %7433 = vmatmul.mubr.msk.f32.gmra.mrb[14].mxu0 %vm2646_vm13, %v2620_v37  ;;  %1881 = vrot.lane.b32.xlu0 %v1793_v24, %s8502_s13  ;;  %v11397_v30 = vld [vmem:[#allocation21_spill] sm:$0xff]  ;;  %v2020_v6 = vmul.f32 %v1988_v28, %v8985_v33  ;;  %v11398_v37 = vld [vmem:[#allocation22_spill] sm:$0xff] }
 0x240   : > { %3005 = vst.msk [vmem:[#allocation4] sm:$0xff] %vm3004_vm14, %v2972_v10  ;;  %1658 = vrot.lane.b32.xlu1 %v2210_v54, %s8499_s25  ;;  %v1154_v24 = vmul.f32 %v2404_v12, %v11397_v30  ;;  %v1155_v8 = vmul.f32 %v2405_v17, %v11398_v37 }
 0x241   : > { %2171 = vst.msk [vmem:[#allocation3 + $0x80] sm:$0xff] %vm2154_vm10, %v2091_v53  ;;  %v2093_v31 = vpop.permute.xlu0 %2092 }
 0x242   : > { %2172 = vst.msk [vmem:[#allocation3 + $0x88] sm:$0xff] %vm2154_vm10, %v2093_v31  ;;  %v1452_v22 = vpop.permute.xlu1 %1451  ;;  %v2021_v31 = vmul.f32 %v1989_v61, %v8987_v34 }
 0x243   : > { %1530 = vst.msk [vmem:[#allocation3 + $0x90] sm:$0xff] %vm1511_vm7, %v1452_v22  ;;  %891 = vrot.lane.b32.xlu0 %v2210_v54, %s8496_s20  ;;  %v11399_v22 = vld [vmem:[#allocation19_spill] sm:$0xff] }
 0x244   : > { %2522 = vrot.lane.b32.xlu1 %v2435_v0, %s8504_s19  ;;  %v739_v9 = vmul.f32 %v1988_v28, %v11399_v22 }
 0x245   : > { %v1454_v29 = vpop.permute.xlu0 %1453 }
 0x246   : > { %1531 = vst.msk [vmem:[#allocation3 + $0x98] sm:$0xff] %vm1511_vm7, %v1454_v29  ;;  %v2284_v40 = vpop.permute.xlu1 %2283  ;;  %v1380_v29 = vmul.f32 %v1989_v61, %v11396_v20 }
 0x247   : > { %2364 = vst.msk [vmem:[#allocation3 + $0x80] sm:$0xff] %vm2347_vm11, %v2284_v40  ;;  %1883 = vrot.lane.b32.xlu0 %v1794_v62, %s8502_s13  ;;  %v1379_v62 = vmul.f32 %v1988_v28, %v11395_v56 }
 0x248   : > { %1242 = vrot.lane.b32.xlu1 %v1152_v47, %s8501_s10  ;;  %771 = vst.msk [vmem:[#allocation3 + $0xf0] sm:$0xff] %vm573_vm0, %v739_v9 }
 0x249   : > { %v2286_v14 = vpop.permute.xlu0 %2285 }
 0x24a   : > { %2365 = vst.msk [vmem:[#allocation3 + $0x88] sm:$0xff] %vm2347_vm11, %v2286_v14  ;;  %v1645_v15 = vpop.permute.xlu1 %1644 }
 0x24b   : > { %1723 = vst.msk [vmem:[#allocation3 + $0x90] sm:$0xff] %vm1704_vm8, %v1645_v15  ;;  %1244 = vrot.lane.b32.xlu0 %v1153_v36, %s8501_s10 }
 0x24c   : > { %2106 = vrot.lane.b32.xlu1 %v2018_v27, %s8498_s24  ;;  %v2213_v27 = vld [vmem:[#allocation2 + $0xf1] sm:$0xff] }
 0x24d   : > { %v878_v25 = vpop.permute.xlu0 %877 }
 0x24e   : > { %954 = vst.msk [vmem:[#allocation3 + $0xa0] sm:$0xff] %vm933_vm5, %v878_v25  ;;  %v2509_v60 = vpop.permute.xlu1 %2508 }
 0x24f   : > { %2589 = vst.msk [vmem:[#allocation3 + $0x80] sm:$0xff] %vm2572_vm12, %v2509_v60  ;;  %2108 = vrot.lane.b32.xlu0 %v2019_v45, %s8498_s24 }
 0x250   : > { %1467 = vrot.lane.b32.xlu1 %v1377_v38, %s8497_s22  ;;  %v2214_v38 = vld [vmem:[#allocation2 + $0xf9] sm:$0xff] }
 0x251   : > { %v1870_v26 = vpop.permute.xlu0 %1869 }
 0x252   : > { %v7416_v16 = vpop.f32.mrb[2].mxu0  ;;  %1948 = vst.msk [vmem:[#allocation3 + $0x90] sm:$0xff] %vm1929_vm9, %v1870_v26  ;;  %v1647_v48 = vpop.permute.xlu1 %1646  ;;  %v11400_v26 = vld [vmem:[#allocation20_spill] sm:$0xff] }
 0x253   : > { %v2829_v42 = vadd.f32 %v7416_v16, %v9663_v2  ;;  %v2823_v39 = vpop.f32.mrb[3].mxu0  ;;  %1724 = vst.msk [vmem:[#allocation3 + $0x98] sm:$0xff] %vm1704_vm8, %v1647_v48  ;;  %1469 = vrot.lane.b32.xlu0 %v1378_v1, %s8497_s22  ;;  %v740_v16 = vmul.f32 %v1989_v61, %v11400_v26 }
 0x254   : > { %v2824_v13 = vadd.f32 %v9663_v2, %v2823_v39  ;;  %2299 = vrot.lane.b32.xlu1 %v2211_v57, %s8500_s23 }
 0x255   : > { %v2975_v49 = vmax.f32 %v2829_v42, 0.0  ;;  %v880_v19 = vpop.permute.xlu0 %879  ;;  %772 = vst.msk [vmem:[#allocation3 + $0xf8] sm:$0xff] %vm573_vm0, %v740_v16 }
 0x256   : > { %v2974_v4 = vmax.f32 %v2824_v13, 0.0  ;;  %955 = vst.msk [vmem:[#allocation3 + $0xa8] sm:$0xff] %vm933_vm5, %v880_v19  ;;  %v2511_v43 = vpop.permute.xlu1 %2510  ;;  %v2621_v58 = vld [vmem:[#allocation3 + $0x80] sm:$0xff]  ;;  %v2407_v19 = vld [vmem:[#allocation2 + $0xfa] sm:$0xff] }
 0x257   : > { %3008 = vst.msk [vmem:[#allocation4 + $0x18] sm:$0xff] %vm3004_vm14, %v2975_v49  ;;  %7435 = vmatprep.mubr.msk.f32.mxu0 %vm2646_vm13, %v2621_v58  ;;  %2301 = vrot.lane.b32.xlu0 %v2212_v46, %s8500_s23  ;;  %v1798_v12 = vmul.f32 %v2407_v19, %v11398_v37 }
 0x258   : > { %3007 = vst.msk [vmem:[#allocation4 + $0x10] sm:$0xff] %vm3004_vm14, %v2974_v4  ;;  %1660 = vrot.lane.b32.xlu1 %v2211_v57, %s8499_s25 }
 0x259   : > { %2590 = vst.msk [vmem:[#allocation3 + $0x88] sm:$0xff] %vm2572_vm12, %v2511_v43  ;;  %v1872_v54 = vpop.permute.xlu0 %1871  ;;  %v2439_v43 = vmul.f32 %v2407_v19, %v9165_v52 }
 0x25a   : > { %1949 = vst.msk [vmem:[#allocation3 + $0x98] sm:$0xff] %vm1929_vm9, %v1872_v54  ;;  %v1231_v44 = vpop.permute.xlu1 %1230  ;;  %v1990_v54 = vld [vmem:[#allocation2 + $0x100] sm:$0xff] }
 0x25b   : > { %1307 = vst.msk [vmem:[#allocation3 + $0xa0] sm:$0xff] %vm1286_vm6, %v1231_v44  ;;  %893 = vrot.lane.b32.xlu0 %v2211_v57, %s8496_s20  ;;  %v2406_v57 = vld [vmem:[#allocation2 + $0xf2] sm:$0xff]  ;;  %v2022_v52 = vmul.f32 %v1990_v54, %v11395_v56 }
 0x25c   : > { %2524 = vrot.lane.b32.xlu1 %v2436_v5, %s8504_s19  ;;  %v2438_v42 = vmul.f32 %v2406_v57, %v9163_v50  ;;  %v1797_v13 = vmul.f32 %v2406_v57, %v11397_v30  ;;  %v11401_v5 = vld [vmem:[#allocation23_spill] sm:$0xff] }
 0x25d   : > { %v1233_v55 = vpop.permute.xlu0 %1232  ;;  %v1156_v44 = vmul.f32 %v2406_v57, %v11401_v5 }
 0x25e   : > { %1308 = vst.msk [vmem:[#allocation3 + $0xa8] sm:$0xff] %vm1286_vm6, %v1233_v55  ;;  %v2095_v59 = vpop.permute.xlu1 %2094  ;;  %v1991_v55 = vld [vmem:[#allocation2 + $0x108] sm:$0xff] }
 0x25f   : > { %2173 = vst.msk [vmem:[#allocation3 + $0x90] sm:$0xff] %vm2154_vm10, %v2095_v59  ;;  %1885 = vrot.lane.b32.xlu0 %v1795_v11, %s8502_s13  ;;  %v11402_v59 = vld [vmem:[#allocation24_spill] sm:$0xff] }
 0x260   : > { %v2622_v35 = vld [vmem:[#allocation3 + $0x88] sm:$0xff]  ;;  %1662 = vrot.lane.b32.xlu1 %v2212_v46, %s8499_s25 }
 0x261   : > { %7436 = vmatmul.mubr.msk.f32.gmra.mrb[16].mxu0 %vm2646_vm13, %v2622_v35  ;;  %v2097_v32 = vpop.permute.xlu0 %2096  ;;  %v1157_v35 = vmul.f32 %v2407_v19, %v11402_v59 }
 0x262   : > { %2174 = vst.msk [vmem:[#allocation3 + $0x98] sm:$0xff] %vm2154_vm10, %v2097_v32  ;;  %v1456_v21 = vpop.permute.xlu1 %1455 }
 0x263   : > { %1532 = vst.msk [vmem:[#allocation3 + $0xa0] sm:$0xff] %vm1511_vm7, %v1456_v21  ;;  %895 = vrot.lane.b32.xlu0 %v2212_v46, %s8496_s20  ;;  %v1381_v21 = vmul.f32 %v1990_v54, %v11399_v22 }
 0x264   : > { %2526 = vrot.lane.b32.xlu1 %v2437_v41, %s8504_s19  ;;  %v2023_v41 = vmul.f32 %v1991_v55, %v11396_v20 }
 0x265   : > { %v1458_v51 = vpop.permute.xlu0 %1457 }
 0x266   : > { %1533 = vst.msk [vmem:[#allocation3 + $0xa8] sm:$0xff] %vm1511_vm7, %v1458_v51  ;;  %v2288_v10 = vpop.permute.xlu1 %2287  ;;  %v1382_v51 = vmul.f32 %v1991_v55, %v11400_v26 }
 0x267   : > { %2366 = vst.msk [vmem:[#allocation3 + $0x90] sm:$0xff] %vm2347_vm11, %v2288_v10  ;;  %1887 = vrot.lane.b32.xlu0 %v1796_v7, %s8502_s13  ;;  %v2215_v10 = vld [vmem:[#allocation2 + $0x101] sm:$0xff] }
 0x268   : > { %1246 = vrot.lane.b32.xlu1 %v1154_v24, %s8501_s10 }
 0x269   : > { %v2290_v53 = vpop.permute.xlu0 %2289 }
 0x26a   : > { %2367 = vst.msk [vmem:[#allocation3 + $0x98] sm:$0xff] %vm2347_vm11, %v2290_v53  ;;  %v1649_v0 = vpop.permute.xlu1 %1648 }
 0x26b   : > { %1725 = vst.msk [vmem:[#allocation3 + $0xa0] sm:$0xff] %vm1704_vm8, %v1649_v0  ;;  %1248 = vrot.lane.b32.xlu0 %v1155_v8, %s8501_s10  ;;  %v2216_v0 = vld [vmem:[#allocation2 + $0x109] sm:$0xff] }
 0x26c   : > { %2110 = vrot.lane.b32.xlu1 %v2020_v6, %s8498_s24 }
 0x26d   : > { %v882_v33 = vpop.permute.xlu0 %881 }
 0x26e   : > { %956 = vst.msk [vmem:[#allocation3 + $0xb0] sm:$0xff] %vm933_vm5, %v882_v33  ;;  %v2513_v47 = vpop.permute.xlu1 %2512 }
 0x26f   : > { %2591 = vst.msk [vmem:[#allocation3 + $0x90] sm:$0xff] %vm2572_vm12, %v2513_v47  ;;  %2112 = vrot.lane.b32.xlu0 %v2021_v31, %s8498_s24  ;;  %v2408_v47 = vld [vmem:[#allocation2 + $0x102] sm:$0xff] }
 0x270   : > { %1471 = vrot.lane.b32.xlu1 %v1379_v62, %s8497_s22 }
 0x271   : > { %v1874_v34 = vpop.permute.xlu0 %1873 }
 0x272   : > { %v7419_v40 = vpop.f32.mrb[4].mxu0  ;;  %1950 = vst.msk [vmem:[#allocation3 + $0xa0] sm:$0xff] %vm1929_vm9, %v1874_v34  ;;  %v1651_v63 = vpop.permute.xlu1 %1650  ;;  %v2440_v34 = vmul.f32 %v2408_v47, %v11397_v30 }
 0x273   : > { %v2839_v36 = vadd.f32 %v7419_v40, %v9663_v2  ;;  %v2833_v14 = vpop.f32.mrb[5].mxu0  ;;  %1726 = vst.msk [vmem:[#allocation3 + $0xa8] sm:$0xff] %vm1704_vm8, %v1651_v63  ;;  %1473 = vrot.lane.b32.xlu0 %v1380_v29, %s8497_s22  ;;  %v2409_v40 = vld [vmem:[#allocation2 + $0x10a] sm:$0xff] }
 0x274   : > { %v2834_v15 = vadd.f32 %v9663_v2, %v2833_v14  ;;  %2303 = vrot.lane.b32.xlu1 %v2213_v27, %s8500_s23  ;;  %v1992_v63 = vld [vmem:[#allocation2 + $0x110] sm:$0xff] }
 0x275   : > { %v2977_v45 = vmax.f32 %v2839_v36, 0.0  ;;  %v884_v25 = vpop.permute.xlu0 %883  ;;  %v2441_v36 = vmul.f32 %v2409_v40, %v11398_v37  ;;  %v1800_v37 = vmul.f32 %v2409_v40, %v11402_v59 }
 0x276   : > { %v2976_v23 = vmax.f32 %v2834_v15, 0.0  ;;  %957 = vst.msk [vmem:[#allocation3 + $0xb8] sm:$0xff] %vm933_vm5, %v884_v25  ;;  %v2515_v60 = vpop.permute.xlu1 %2514  ;;  %v2623_v1 = vld [vmem:[#allocation3 + $0x90] sm:$0xff]  ;;  %v1799_v15 = vmul.f32 %v2408_v47, %v11401_v5 }
 0x277   : > { %3010 = vst.msk [vmem:[#allocation4 + $0x28] sm:$0xff] %vm3004_vm14, %v2977_v45  ;;  %7438 = vmatprep.mubr.msk.f32.mxu0 %vm2646_vm13, %v2623_v1  ;;  %2305 = vrot.lane.b32.xlu0 %v2214_v38, %s8500_s23  ;;  %v1993_v25 = vld [vmem:[#allocation2 + $0x118] sm:$0xff] }
 0x278   : > { %3009 = vst.msk [vmem:[#allocation4 + $0x20] sm:$0xff] %vm3004_vm14, %v2976_v23  ;;  %1664 = vrot.lane.b32.xlu1 %v2213_v27, %s8499_s25  ;;  %v2217_v1 = vld [vmem:[#allocation2 + $0x111] sm:$0xff]  ;;  %v2025_v57 = vmul.f32 %v1993_v25, %v11400_v26 }
 0x279   : > { %2592 = vst.msk [vmem:[#allocation3 + $0x98] sm:$0xff] %vm2572_vm12, %v2515_v60  ;;  %v1876_v48 = vpop.permute.xlu0 %1875 }
 0x27a   : > { %1951 = vst.msk [vmem:[#allocation3 + $0xa8] sm:$0xff] %vm1929_vm9, %v1876_v48  ;;  %v1235_v39 = vpop.permute.xlu1 %1234 }
 0x27b   : > { %1309 = vst.msk [vmem:[#allocation3 + $0xb0] sm:$0xff] %vm1286_vm6, %v1235_v39  ;;  %897 = vrot.lane.b32.xlu0 %v2213_v27, %s8496_s20 }
 0x27c   : > { %2528 = vrot.lane.b32.xlu1 %v2438_v42, %s8504_s19 }
 0x27d   : > { %v1237_v49 = vpop.permute.xlu0 %1236 }
 0x27e   : > { %1310 = vst.msk [vmem:[#allocation3 + $0xb8] sm:$0xff] %vm1286_vm6, %v1237_v49  ;;  %v2099_v46 = vpop.permute.xlu1 %2098 }
 0x27f   : > { %2175 = vst.msk [vmem:[#allocation3 + $0xa0] sm:$0xff] %vm2154_vm10, %v2099_v46  ;;  %1889 = vrot.lane.b32.xlu0 %v1797_v13, %s8502_s13  ;;  %v2218_v13 = vld [vmem:[#allocation2 + $0x119] sm:$0xff] }
 0x280   : > { %v2624_v4 = vld [vmem:[#allocation3 + $0x98] sm:$0xff]  ;;  %1666 = vrot.lane.b32.xlu1 %v2214_v38, %s8499_s25 }
 0x281   : > { %7439 = vmatmul.mubr.msk.f32.gmra.mrb[18].mxu0 %vm2646_vm13, %v2624_v4  ;;  %v2101_v50 = vpop.permute.xlu0 %2100  ;;  %v2411_v46 = vld [vmem:[#allocation2 + $0x11a] sm:$0xff] }
 0x282   : > { %2176 = vst.msk [vmem:[#allocation3 + $0xa8] sm:$0xff] %vm2154_vm10, %v2101_v50  ;;  %v1460_v58 = vpop.permute.xlu1 %1459  ;;  %v2443_v4 = vmul.f32 %v2411_v46, %v11402_v59 }
 0x283   : > { %1534 = vst.msk [vmem:[#allocation3 + $0xb0] sm:$0xff] %vm1511_vm7, %v1460_v58  ;;  %899 = vrot.lane.b32.xlu0 %v2214_v38, %s8496_s20  ;;  %v2024_v38 = vmul.f32 %v1992_v63, %v11399_v22  ;;  %v2410_v22 = vld [vmem:[#allocation2 + $0x112] sm:$0xff]  ;;  %s8515_s20 = smov 126  }
 0x284   : > { %2530 = vrot.lane.b32.xlu1 %v2439_v43, %s8504_s19  ;;  %v2442_v42 = vmul.f32 %v2410_v22, %v11401_v5 }
 0x285   : > { %v1462_v18 = vpop.permute.xlu0 %1461 }
 0x286   : > { %1535 = vst.msk [vmem:[#allocation3 + $0xb8] sm:$0xff] %vm1511_vm7, %v1462_v18  ;;  %v2292_v11 = vpop.permute.xlu1 %2291 }
 0x287   : > { %2368 = vst.msk [vmem:[#allocation3 + $0xa0] sm:$0xff] %vm2347_vm11, %v2292_v11  ;;  %1891 = vrot.lane.b32.xlu0 %v1798_v12, %s8502_s13 }
 0x288   : > { %1250 = vrot.lane.b32.xlu1 %v1156_v44, %s8501_s10 }
 0x289   : > { %v2294_v17 = vpop.permute.xlu0 %2293 }
 0x28a   : > { %2369 = vst.msk [vmem:[#allocation3 + $0xa8] sm:$0xff] %vm2347_vm11, %v2294_v17  ;;  %v1653_v32 = vpop.permute.xlu1 %1652 }
 0x28b   : > { %1727 = vst.msk [vmem:[#allocation3 + $0xb0] sm:$0xff] %vm1704_vm8, %v1653_v32  ;;  %1252 = vrot.lane.b32.xlu0 %v1157_v35, %s8501_s10  ;;  %s8513_s10 = smov 80  }
 0x28c   : > { %2114 = vrot.lane.b32.xlu1 %v2022_v52, %s8498_s24 }
 0x28d   : > { %v886_v7 = vpop.permute.xlu0 %885 }
 0x28e   : > { %958 = vst.msk [vmem:[#allocation3 + $0xc0] sm:$0xff] %vm933_vm5, %v886_v7  ;;  %v2517_v56 = vpop.permute.xlu1 %2516 }
 0x28f   : > { %2593 = vst.msk [vmem:[#allocation3 + $0xa0] sm:$0xff] %vm2572_vm12, %v2517_v56  ;;  %2116 = vrot.lane.b32.xlu0 %v2023_v41, %s8498_s24 }
 0x290   : > { %1475 = vrot.lane.b32.xlu1 %v1381_v21, %s8497_s22 }
 0x291   : > { %v1878_v28 = vpop.permute.xlu0 %1877 }
 0x292   : > { %v7422_v24 = vpop.f32.mrb[6].mxu0  ;;  %1952 = vst.msk [vmem:[#allocation3 + $0xb0] sm:$0xff] %vm1929_vm9, %v1878_v28  ;;  %v1655_v20 = vpop.permute.xlu1 %1654 }
 0x293   : > { %v2849_v6 = vadd.f32 %v7422_v24, %v9663_v2  ;;  %v2843_v61 = vpop.f32.mrb[7].mxu0  ;;  %1728 = vst.msk [vmem:[#allocation3 + $0xb8] sm:$0xff] %vm1704_vm8, %v1655_v20  ;;  %1477 = vrot.lane.b32.xlu0 %v1382_v51, %s8497_s22  ;;  %s8511_s22 = smov 48  }
 0x294   : > { %v2844_v8 = vadd.f32 %v9663_v2, %v2843_v61  ;;  %2307 = vrot.lane.b32.xlu1 %v2215_v10, %s8500_s23 }
 0x295   : > { %v2979_v53 = vmax.f32 %v2849_v6, 0.0  ;;  %v888_v9 = vpop.permute.xlu0 %887 }
 0x296   : > { %v2978_v31 = vmax.f32 %v2844_v8, 0.0  ;;  %959 = vst.msk [vmem:[#allocation3 + $0xc8] sm:$0xff] %vm933_vm5, %v888_v9  ;;  %v2519_v62 = vpop.permute.xlu1 %2518  ;;  %v2625_v33 = vld [vmem:[#allocation3 + $0xa0] sm:$0xff] }
 0x297   : > { %3012 = vst.msk [vmem:[#allocation4 + $0x38] sm:$0xff] %vm3004_vm14, %v2979_v53  ;;  %7441 = vmatprep.mubr.msk.f32.mxu0 %vm2646_vm13, %v2625_v33  ;;  %2309 = vrot.lane.b32.xlu0 %v2216_v0, %s8500_s23 }
 0x298   : > { %3011 = vst.msk [vmem:[#allocation4 + $0x30] sm:$0xff] %vm3004_vm14, %v2978_v31  ;;  %1668 = vrot.lane.b32.xlu1 %v2215_v10, %s8499_s25 }
 0x299   : > { %2594 = vst.msk [vmem:[#allocation3 + $0xa8] sm:$0xff] %vm2572_vm12, %v2519_v62  ;;  %v1880_v29 = vpop.permute.xlu0 %1879 }
 0x29a   : > { %1953 = vst.msk [vmem:[#allocation3 + $0xb8] sm:$0xff] %vm1929_vm9, %v1880_v29  ;;  %v1239_v27 = vpop.permute.xlu1 %1238 }
 0x29b   : > { %1311 = vst.msk [vmem:[#allocation3 + $0xc0] sm:$0xff] %vm1286_vm6, %v1239_v27  ;;  %1670 = vrot.lane.b32.xlu0 %v2216_v0, %s8499_s25  ;;  %s8507_s25 = smov 16  }
 0x29c   : > { %2532 = vrot.lane.b32.xlu1 %v2440_v34, %s8504_s19 }
 0x29d   : > { %v1241_v14 = vpop.permute.xlu0 %1240 }
 0x29e   : > { %1312 = vst.msk [vmem:[#allocation3 + $0xc8] sm:$0xff] %vm1286_vm6, %v1241_v14  ;;  %v2103_v45 = vpop.permute.xlu1 %2102 }
 0x29f   : > { %2177 = vst.msk [vmem:[#allocation3 + $0xb0] sm:$0xff] %vm2154_vm10, %v2103_v45  ;;  %2534 = vrot.lane.b32.xlu0 %v2441_v36, %s8504_s19 }
 0x2a0   : > { %v2626_v30 = vld [vmem:[#allocation3 + $0xa8] sm:$0xff]  ;;  %1893 = vrot.lane.b32.xlu1 %v1799_v15, %s8502_s13 }
 0x2a1   : > { %7442 = vmatmul.mubr.msk.f32.gmra.mrb[20].mxu0 %vm2646_vm13, %v2626_v30  ;;  %v2105_v23 = vpop.permute.xlu0 %2104 }
 0x2a2   : > { %2178 = vst.msk [vmem:[#allocation3 + $0xb8] sm:$0xff] %vm2154_vm10, %v2105_v23  ;;  %v1464_v60 = vpop.permute.xlu1 %1463 }
 0x2a3   : > { %1536 = vst.msk [vmem:[#allocation3 + $0xc0] sm:$0xff] %vm1511_vm7, %v1464_v60  ;;  %2118 = vrot.lane.b32.xlu0 %v2024_v38, %s8498_s24 }
 0x2a4   : > { %1895 = vrot.lane.b32.xlu1 %v1800_v37, %s8502_s13  ;;  %s8514_s13 = smov 96  }
 0x2a5   : > { %v1466_v16 = vpop.permute.xlu0 %1465 }
 0x2a6   : > { %1537 = vst.msk [vmem:[#allocation3 + $0xc8] sm:$0xff] %vm1511_vm7, %v1466_v16  ;;  %v2296_v48 = vpop.permute.xlu1 %2295 }
 0x2a7   : > { %2370 = vst.msk [vmem:[#allocation3 + $0xb0] sm:$0xff] %vm2347_vm11, %v2296_v48  ;;  %2311 = vrot.lane.b32.xlu0 %v2217_v1, %s8500_s23 }
 0x2a8   : > { %2120 = vrot.lane.b32.xlu1 %v2025_v57, %s8498_s24 }
 0x2a9   : > { %v2298_v39 = vpop.permute.xlu0 %2297 }
 0x2aa   : > { %2371 = vst.msk [vmem:[#allocation3 + $0xb8] sm:$0xff] %vm2347_vm11, %v2298_v39  ;;  %v1657_v49 = vpop.permute.xlu1 %1656 }
 0x2ab   : > { %1729 = vst.msk [vmem:[#allocation3 + $0xc0] sm:$0xff] %vm1704_vm8, %v1657_v49  ;;  %2536 = vrot.lane.b32.xlu0 %v2442_v42, %s8504_s19 }
 0x2ac   : > { %2313 = vrot.lane.b32.xlu1 %v2218_v13, %s8500_s23 }
 0x2ad   : > { %v890_v26 = vpop.permute.xlu0 %889 }
 0x2ae   : > { %960 = vst.msk [vmem:[#allocation3 + $0xd0] sm:$0xff] %vm933_vm5, %v890_v26  ;;  %v2521_v19 = vpop.permute.xlu1 %2520 }
 0x2af   : > { %2595 = vst.msk [vmem:[#allocation3 + $0xb0] sm:$0xff] %vm2572_vm12, %v2521_v19 }
 0x2b0   : > { %2538 = vrot.lane.b32.xlu1 %v2443_v4, %s8504_s19 }
 0x2b1   : > { %v1882_v50 = vpop.permute.xlu0 %1881 }
 0x2b2   : > { %v7425_v43 = vpop.f32.mrb[8].mxu0  ;;  %1954 = vst.msk [vmem:[#allocation3 + $0xc0] sm:$0xff] %vm1929_vm9, %v1882_v50  ;;  %v1659_v58 = vpop.permute.xlu1 %1658 }
 0x2b3   : > { %v2859_v12 = vadd.f32 %v7425_v43, %v9663_v2  ;;  %v2853_v18 = vpop.f32.mrb[9].mxu0  ;;  %1730 = vst.msk [vmem:[#allocation3 + $0xc8] sm:$0xff] %vm1704_vm8, %v1659_v58 }
 0x2b4   : > { %v2854_v54 = vadd.f32 %v9663_v2, %v2853_v18 }
 0x2b5   : > { %v2981_v5 = vmax.f32 %v2859_v12, 0.0  ;;  %v892_v11 = vpop.permute.xlu0 %891 }
 0x2b6   : > { %v2980_v44 = vmax.f32 %v2854_v54, 0.0  ;;  %961 = vst.msk [vmem:[#allocation3 + $0xd8] sm:$0xff] %vm933_vm5, %v892_v11  ;;  %v2523_v52 = vpop.permute.xlu1 %2522  ;;  %v2627_v55 = vld [vmem:[#allocation3 + $0xb0] sm:$0xff] }
 0x2b7   : > { %3014 = vst.msk [vmem:[#allocation4 + $0x48] sm:$0xff] %vm3004_vm14, %v2981_v5  ;;  %7444 = vmatprep.mubr.msk.f32.mxu0 %vm2646_vm13, %v2627_v55 }
 0x2b8   : > { %3013 = vst.msk [vmem:[#allocation4 + $0x40] sm:$0xff] %vm3004_vm14, %v2980_v44 }
 0x2b9   : > { %2596 = vst.msk [vmem:[#allocation3 + $0xb8] sm:$0xff] %vm2572_vm12, %v2523_v52  ;;  %v1884_v59 = vpop.permute.xlu0 %1883 }
 0x2ba   : > { %1955 = vst.msk [vmem:[#allocation3 + $0xc8] sm:$0xff] %vm1929_vm9, %v1884_v59  ;;  %v1243_v35 = vpop.permute.xlu1 %1242 }
 0x2bb   : > { %1313 = vst.msk [vmem:[#allocation3 + $0xd0] sm:$0xff] %vm1286_vm6, %v1243_v35 }
 0x2bd   : > { %v1245_v17 = vpop.permute.xlu0 %1244 }
 0x2be   : > { %1314 = vst.msk [vmem:[#allocation3 + $0xd8] sm:$0xff] %vm1286_vm6, %v1245_v17  ;;  %v2107_v32 = vpop.permute.xlu1 %2106 }
 0x2bf   : > { %2179 = vst.msk [vmem:[#allocation3 + $0xc0] sm:$0xff] %vm2154_vm10, %v2107_v32 }
 0x2c0   : > { %v2628_v41 = vld [vmem:[#allocation3 + $0xb8] sm:$0xff] }
 0x2c1   : > { %7445 = vmatmul.mubr.msk.f32.gmra.mrb[22].mxu0 %vm2646_vm13, %v2628_v41  ;;  %v2109_v21 = vpop.permute.xlu0 %2108 }
 0x2c2   : > { %2180 = vst.msk [vmem:[#allocation3 + $0xc8] sm:$0xff] %vm2154_vm10, %v2109_v21  ;;  %v1468_v7 = vpop.permute.xlu1 %1467 }
 0x2c3   : > { %1538 = vst.msk [vmem:[#allocation3 + $0xd0] sm:$0xff] %vm1511_vm7, %v1468_v7 }
 0x2c5   : > { %v1470_v56 = vpop.permute.xlu0 %1469 }
 0x2c6   : > { %1539 = vst.msk [vmem:[#allocation3 + $0xd8] sm:$0xff] %vm1511_vm7, %v1470_v56  ;;  %v2300_v51 = vpop.permute.xlu1 %2299 }
 0x2c7   : > { %2372 = vst.msk [vmem:[#allocation3 + $0xc0] sm:$0xff] %vm2347_vm11, %v2300_v51 }
 0x2c9   : > { %v2302_v28 = vpop.permute.xlu0 %2301 }
 0x2ca   : > { %2373 = vst.msk [vmem:[#allocation3 + $0xc8] sm:$0xff] %vm2347_vm11, %v2302_v28  ;;  %v1661_v24 = vpop.permute.xlu1 %1660 }
 0x2cb   : > { %1731 = vst.msk [vmem:[#allocation3 + $0xd0] sm:$0xff] %vm1704_vm8, %v1661_v24 }
 0x2cd   : > { %v894_v10 = vpop.permute.xlu0 %893 }
 0x2ce   : > { %962 = vst.msk [vmem:[#allocation3 + $0xe0] sm:$0xff] %vm933_vm5, %v894_v10  ;;  %v2525_v20 = vpop.permute.xlu1 %2524 }
 0x2cf   : > { %2597 = vst.msk [vmem:[#allocation3 + $0xc0] sm:$0xff] %vm2572_vm12, %v2525_v20 }
 0x2d1   : > { %v1886_v6 = vpop.permute.xlu0 %1885 }
 0x2d2   : > { %v7428_v61 = vpop.f32.mrb[10].mxu0  ;;  %1956 = vst.msk [vmem:[#allocation3 + $0xd0] sm:$0xff] %vm1929_vm9, %v1886_v6  ;;  %v1663_v8 = vpop.permute.xlu1 %1662 }
 0x2d3   : > { %v2869_v53 = vadd.f32 %v7428_v61, %v9663_v2  ;;  %v2863_v0 = vpop.f32.mrb[11].mxu0  ;;  %1732 = vst.msk [vmem:[#allocation3 + $0xd8] sm:$0xff] %vm1704_vm8, %v1663_v8 }
 0x2d4   : > { %v2864_v31 = vadd.f32 %v9663_v2, %v2863_v0 }
 0x2d5   : > { %v2983_v9 = vmax.f32 %v2869_v53, 0.0  ;;  %v896_v33 = vpop.permute.xlu0 %895 }
 0x2d6   : > { %v2982_v62 = vmax.f32 %v2864_v31, 0.0  ;;  %963 = vst.msk [vmem:[#allocation3 + $0xe8] sm:$0xff] %vm933_vm5, %v896_v33  ;;  %v2527_v47 = vpop.permute.xlu1 %2526  ;;  %v2629_v29 = vld [vmem:[#allocation3 + $0xc0] sm:$0xff] }
 0x2d7   : > { %3016 = vst.msk [vmem:[#allocation4 + $0x58] sm:$0xff] %vm3004_vm14, %v2983_v9  ;;  %7447 = vmatprep.mubr.msk.f32.mxu0 %vm2646_vm13, %v2629_v29 }
 0x2d8   : > { %3015 = vst.msk [vmem:[#allocation4 + $0x50] sm:$0xff] %vm3004_vm14, %v2982_v62 }
 0x2d9   : > { %2598 = vst.msk [vmem:[#allocation3 + $0xc8] sm:$0xff] %vm2572_vm12, %v2527_v47  ;;  %v1888_v34 = vpop.permute.xlu0 %1887 }
 0x2da   : > { %1957 = vst.msk [vmem:[#allocation3 + $0xd8] sm:$0xff] %vm1929_vm9, %v1888_v34  ;;  %v1247_v40 = vpop.permute.xlu1 %1246 }
 0x2db   : > { %1315 = vst.msk [vmem:[#allocation3 + $0xe0] sm:$0xff] %vm1286_vm6, %v1247_v40 }
 0x2dd   : > { %v1249_v27 = vpop.permute.xlu0 %1248 }
 0x2de   : > { %1316 = vst.msk [vmem:[#allocation3 + $0xe8] sm:$0xff] %vm1286_vm6, %v1249_v27  ;;  %v2111_v63 = vpop.permute.xlu1 %2110 }
 0x2df   : > { %2181 = vst.msk [vmem:[#allocation3 + $0xd0] sm:$0xff] %vm2154_vm10, %v2111_v63 }
 0x2e0   : > { %v2630_v36 = vld [vmem:[#allocation3 + $0xc8] sm:$0xff] }
 0x2e1   : > { %7448 = vmatmul.mubr.msk.f32.gmra.mrb[24].mxu0 %vm2646_vm13, %v2630_v36  ;;  %v2113_v14 = vpop.permute.xlu0 %2112 }
 0x2e2   : > { %2182 = vst.msk [vmem:[#allocation3 + $0xd8] sm:$0xff] %vm2154_vm10, %v2113_v14  ;;  %v1472_v15 = vpop.permute.xlu1 %1471 }
 0x2e3   : > { %1540 = vst.msk [vmem:[#allocation3 + $0xe0] sm:$0xff] %vm1511_vm7, %v1472_v15 }
 0x2e5   : > { %v1474_v45 = vpop.permute.xlu0 %1473 }
 0x2e6   : > { %1541 = vst.msk [vmem:[#allocation3 + $0xe8] sm:$0xff] %vm1511_vm7, %v1474_v45  ;;  %v2304_v30 = vpop.permute.xlu1 %2303 }
 0x2e7   : > { %2374 = vst.msk [vmem:[#allocation3 + $0xd0] sm:$0xff] %vm2347_vm11, %v2304_v30 }
 0x2e9   : > { %v2306_v38 = vpop.permute.xlu0 %2305 }
 0x2ea   : > { %2375 = vst.msk [vmem:[#allocation3 + $0xd8] sm:$0xff] %vm2347_vm11, %v2306_v38  ;;  %v1665_v23 = vpop.permute.xlu1 %1664 }
 0x2eb   : > { %1733 = vst.msk [vmem:[#allocation3 + $0xe0] sm:$0xff] %vm1704_vm8, %v1665_v23 }
 0x2ed   : > { %v898_v25 = vpop.permute.xlu0 %897 }
 0x2ee   : > { %964 = vst.msk [vmem:[#allocation3 + $0xf0] sm:$0xff] %vm933_vm5, %v898_v25  ;;  %v2529_v37 = vpop.permute.xlu1 %2528 }
 0x2ef   : > { %2599 = vst.msk [vmem:[#allocation3 + $0xd0] sm:$0xff] %vm2572_vm12, %v2529_v37 }
 0x2f1   : > { %v1890_v60 = vpop.permute.xlu0 %1889 }
 0x2f2   : > { %v7431_v1 = vpop.f32.mrb[12].mxu0  ;;  %1958 = vst.msk [vmem:[#allocation3 + $0xe0] sm:$0xff] %vm1929_vm9, %v1890_v60  ;;  %v1667_v57 = vpop.permute.xlu1 %1666 }
 0x2f3   : > { %v2879_v16 = vadd.f32 %v7431_v1, %v9663_v2  ;;  %v2873_v22 = vpop.f32.mrb[13].mxu0  ;;  %1734 = vst.msk [vmem:[#allocation3 + $0xe8] sm:$0xff] %vm1704_vm8, %v1667_v57 }
 0x2f4   : > { %v2874_v48 = vadd.f32 %v9663_v2, %v2873_v22 }
 0x2f5   : > { %v2985_v42 = vmax.f32 %v2879_v16, 0.0  ;;  %v900_v13 = vpop.permute.xlu0 %899 }
 0x2f6   : > { %v2984_v39 = vmax.f32 %v2874_v48, 0.0  ;;  %965 = vst.msk [vmem:[#allocation3 + $0xf8] sm:$0xff] %vm933_vm5, %v900_v13  ;;  %v2531_v49 = vpop.permute.xlu1 %2530  ;;  %v2631_v46 = vld [vmem:[#allocation3 + $0xd0] sm:$0xff]  ;;  %vm3680_vm5 = vcmask 786048  }
 0x2f7   : > { %3018 = vst.msk [vmem:[#allocation4 + $0x68] sm:$0xff] %vm3004_vm14, %v2985_v42  ;;  %7450 = vmatprep.mubr.msk.f32.mxu0 %vm2646_vm13, %v2631_v46 }
 0x2f8   : > { %3017 = vst.msk [vmem:[#allocation4 + $0x60] sm:$0xff] %vm3004_vm14, %v2984_v39 }
 0x2f9   : > { %2600 = vst.msk [vmem:[#allocation3 + $0xd8] sm:$0xff] %vm2572_vm12, %v2531_v49  ;;  %v1892_v26 = vpop.permute.xlu0 %1891 }
 0x2fa   : > { %1959 = vst.msk [vmem:[#allocation3 + $0xe8] sm:$0xff] %vm1929_vm9, %v1892_v26  ;;  %v1251_v4 = vpop.permute.xlu1 %1250 }
 0x2fb   : > { %1317 = vst.msk [vmem:[#allocation3 + $0xf0] sm:$0xff] %vm1286_vm6, %v1251_v4 }
 0x2fd   : > { %v1253_v19 = vpop.permute.xlu0 %1252 }
 0x2fe   : > { %1318 = vst.msk [vmem:[#allocation3 + $0xf8] sm:$0xff] %vm1286_vm6, %v1253_v19  ;;  %v2115_v50 = vpop.permute.xlu1 %2114  ;;  %vm3737_vm6 = vcmask 917248  }
 0x2ff   : > { %2183 = vst.msk [vmem:[#allocation3 + $0xe0] sm:$0xff] %vm2154_vm10, %v2115_v50  ;;  %v3076_v50 = vld [vmem:[#allocation4 + $0x19] sm:$0xff] }
 0x300   : > { %v2632_v43 = vld [vmem:[#allocation3 + $0xd8] sm:$0xff] }
 0x301   : > { %7451 = vmatmul.mubr.msk.f32.gmra.mrb[26].mxu0 %vm2646_vm13, %v2632_v43  ;;  %v2117_v58 = vpop.permute.xlu0 %2116 }
 0x302   : > { %2184 = vst.msk [vmem:[#allocation3 + $0xe8] sm:$0xff] %vm2154_vm10, %v2117_v58  ;;  %v1476_v12 = vpop.permute.xlu1 %1475 }
 0x303   : > { %1542 = vst.msk [vmem:[#allocation3 + $0xf0] sm:$0xff] %vm1511_vm7, %v1476_v12  ;;  %v3044_v12 = vld [vmem:[#allocation4 + $0x18] sm:$0xff] }
 0x305   : > { %v1478_v18 = vpop.permute.xlu0 %1477 }
 0x306   : > { %1543 = vst.msk [vmem:[#allocation3 + $0xf8] sm:$0xff] %vm1511_vm7, %v1478_v18  ;;  %v2308_v54 = vpop.permute.xlu1 %2307  ;;  %v3043_v18 = vld [vmem:[#allocation4 + $0x10] sm:$0xff]  ;;  %vm3786_vm7 = vcmask 1048448  }
 0x307   : > { %2376 = vst.msk [vmem:[#allocation3 + $0xe0] sm:$0xff] %vm2347_vm11, %v2308_v54  ;;  %v3074_v54 = vld [vmem:[#allocation4 + $0x9] sm:$0xff] }
 0x309   : > { %v2310_v5 = vpop.permute.xlu0 %2309 }
 0x30a   : > { %2377 = vst.msk [vmem:[#allocation3 + $0xe8] sm:$0xff] %vm2347_vm11, %v2310_v5  ;;  %v1669_v44 = vpop.permute.xlu1 %1668  ;;  %v3075_v5 = vld [vmem:[#allocation4 + $0x11] sm:$0xff] }
 0x30b   : > { %1735 = vst.msk [vmem:[#allocation3 + $0xf0] sm:$0xff] %vm1704_vm8, %v1669_v44  ;;  %v3108_v44 = vmax.f32 %v3044_v12, %v3076_v50  ;;  %v8506_v12 = vmov 0  }
 0x30c   : > { %8177 = vset.pattern.permute.xlu1 %v8506_v12 }
 0x30d   : > { %v1671_v11 = vpop.permute.xlu0 %1670 }
 0x30e   : > { %1736 = vst.msk [vmem:[#allocation3 + $0xf8] sm:$0xff] %vm1704_vm8, %v1671_v11  ;;  %v2533_v52 = vpop.permute.xlu1 %2532  ;;  %vm3997_vm8 = vcmask 31744  }
 0x30f   : > { %2601 = vst.msk [vmem:[#allocation3 + $0xe0] sm:$0xff] %vm2572_vm12, %v2533_v52  ;;  %v3041_v52 = vld [vmem:[#allocation4] sm:$0xff] }
 0x310   : > { %4006 = vst.msk [vmem:[#allocation7 + $0x40] sm:$0xff] %vm3997_vm8, %v11394_v3 }
 0x311   : > { %v2535_v55 = vpop.permute.xlu0 %2534 }
 0x312   : > { %v7434_v59 = vpop.f32.mrb[14].mxu0  ;;  %2602 = vst.msk [vmem:[#allocation3 + $0xe8] sm:$0xff] %vm2572_vm12, %v2535_v55  ;;  %v1894_v35 = vpop.permute.xlu1 %1893  ;;  %v3042_v55 = vld [vmem:[#allocation4 + $0x8] sm:$0xff] }
 0x313   : > { %v2889_v17 = vadd.f32 %v7434_v59, %v9663_v2  ;;  %v2883_v32 = vpop.f32.mrb[15].mxu0  ;;  %1960 = vst.msk [vmem:[#allocation3 + $0xf0] sm:$0xff] %vm1929_vm9, %v1894_v35  ;;  %v3073_v59 = vld [vmem:[#allocation4 + $0x1] sm:$0xff] }
 0x314   : > { %v2884_v41 = vadd.f32 %v9663_v2, %v2883_v32  ;;  %v3107_v32 = vmax.f32 %v3043_v18, %v3075_v5  ;;  %v3309_v18 = vld [vmem:[#allocation9 + $0x8] sm:$0xff]  ;;  %v3048_v5 = vld [vmem:[#allocation4 + $0x38] sm:$0xff] }
 0x315   : > { %v2987_v21 = vmax.f32 %v2889_v17, 0.0  ;;  %v2119_v56 = vpop.permute.xlu0 %2118  ;;  %v3106_v17 = vmax.f32 %v3042_v55, %v3074_v54  ;;  %v3047_v54 = vld [vmem:[#allocation4 + $0x30] sm:$0xff] }
 0x316   : > { %v2986_v7 = vmax.f32 %v2884_v41, 0.0  ;;  %2185 = vst.msk [vmem:[#allocation3 + $0xf0] sm:$0xff] %vm2154_vm10, %v2119_v56  ;;  %v1896_v51 = vpop.permute.xlu1 %1895  ;;  %v2633_v28 = vld [vmem:[#allocation3 + $0xe0] sm:$0xff] }
 0x317   : > { %3020 = vst.msk [vmem:[#allocation4 + $0x78] sm:$0xff] %vm3004_vm14, %v2987_v21  ;;  %7453 = vmatprep.mubr.msk.f32.mxu0 %vm2646_vm13, %v2633_v28  ;;  %v3105_v21 = vmax.f32 %v3041_v52, %v3073_v59  ;;  %v3314_v59 = vld [vmem:[#allocation9 + $0x30] sm:$0xff] }
 0x318   : > { %3019 = vst.msk [vmem:[#allocation4 + $0x70] sm:$0xff] %vm3004_vm14, %v2986_v7  ;;  %v3144_v7 = vmax.f32 %v3106_v17, %v3108_v44 }
 0x319   : > { %1961 = vst.msk [vmem:[#allocation3 + $0xf8] sm:$0xff] %vm1929_vm9, %v1896_v51  ;;  %v2312_v24 = vpop.permute.xlu0 %2311  ;;  %v2634_v10 = vld [vmem:[#allocation3 + $0xe8] sm:$0xff]  ;;  %v3143_v28 = vmax.f32 %v3105_v21, %v3107_v32  ;;  %vm4007_vm9 = vcmask 24576  }
 0x31a   : > { %2378 = vst.msk [vmem:[#allocation3 + $0xf0] sm:$0xff] %vm2347_vm11, %v2312_v24  ;;  %v2121_v20 = vpop.permute.xlu1 %2120  ;;  %7454 = vmatmul.mubr.msk.f32.gmra.mrb[28].mxu0 %vm2646_vm13, %v2634_v10 }
 0x31b   : > { %2186 = vst.msk [vmem:[#allocation3 + $0xf8] sm:$0xff] %vm2154_vm10, %v2121_v20  ;;  %v7827_v10 = vpack.c.bf16 %v3144_v7, %v3143_v28  ;;  %vm4046_vm10 = vcmask 523264  }
 0x31c   : > { %4008 = vst.msk [vmem:[#allocation7 + $0x48] sm:$0x1] %vm4007_vm9, %v11394_v3 }
 0x31d   : > { %v2537_v6 = vpop.permute.xlu0 %2536 }
 0x31e   : > { %2603 = vst.msk [vmem:[#allocation3 + $0xf0] sm:$0xff] %vm2572_vm12, %v2537_v6  ;;  %v2314_v61 = vpop.permute.xlu1 %2313  ;;  %v3056_v1 = vld [vmem:[#allocation4 + $0x78] sm:$0xff] }
 0x31f   : > { %2379 = vst.msk [vmem:[#allocation3 + $0xf8] sm:$0xff] %vm2347_vm11, %v2314_v61  ;;  %v3055_v30 = vld [vmem:[#allocation4 + $0x70] sm:$0xff]  ;;  %v9964_v6 = vld [vmem:[%s11344_s2] ss:$0 sm:$0xff]  ;;  %vm4135_vm11 = vcmask 1043456  }
 0x320   : > { %v3087_v38 = vld [vmem:[#allocation4 + $0x71] sm:$0xff] }
 0x321   : > { %v9946_v16 = vmax.f32 %v3055_v30, %v3087_v38 }
 0x322   : > { %v2539_v8 = vpop.permute.xlu1 %2538 }
 0x323   : > { %2604 = vst.msk [vmem:[#allocation3 + $0xf8] sm:$0xff] %vm2572_vm12, %v2539_v8 }
 0x325   : > { %v2635_v53 = vld [vmem:[#allocation3 + $0xf0] sm:$0xff] }
 0x326   : > { %7456 = vmatprep.mubr.msk.f32.mxu0 %vm2646_vm13, %v2635_v53 }
 0x32a   : > { %v2636_v0 = vld [vmem:[#allocation3 + $0xf8] sm:$0xff] }
 0x32b   : > { %7457 = vmatmul.mubr.msk.f32.gmra.mrb[30].mxu0 %vm2646_vm13, %v2636_v0 }
 0x334   : > { %v7437_v31 = vpop.f32.mrb[16].mxu0 }
 0x335   : > { %v2899_v9 = vadd.f32 %v7437_v31, %v9663_v2  ;;  %v2893_v62 = vpop.f32.mrb[17].mxu0 }
 0x336   : > { %v2894_v33 = vadd.f32 %v9663_v2, %v2893_v62 }
 0x337   : > { %v2989_v47 = vmax.f32 %v2899_v9, 0.0  ;;  %v3078_v9 = vld [vmem:[#allocation4 + $0x29] sm:$0xff] }
 0x338   : > { %v2988_v29 = vmax.f32 %v2894_v33, 0.0 }
 0x339   : > { %3022 = vst.msk [vmem:[#allocation4 + $0x88] sm:$0xff] %vm3004_vm14, %v2989_v47  ;;  %v3176_v47 = vld [vmem:[%s11346_s4 + $0x8] sm:$0xff] }
 0x33a   : > { %3021 = vst.msk [vmem:[#allocation4 + $0x80] sm:$0xff] %vm3004_vm14, %v2988_v29  ;;  %v3045_v29 = vld [vmem:[#allocation4 + $0x20] sm:$0xff]  ;;  %3255 = vmatprep.mubr.f32.mxu1 %v3176_v47 }
 0x340   : > { %v3058_v37 = vld [vmem:[#allocation4 + $0x88] sm:$0xff] }
 0x341   : > { %v3057_v15 = vld [vmem:[#allocation4 + $0x80] sm:$0xff] }
 0x342   : > { %v3089_v45 = vld [vmem:[#allocation4 + $0x81] sm:$0xff]  ;;  %v3088_v23 = vld [vmem:[#allocation4 + $0x79] sm:$0xff] }
 0x343   : > { %v3121_v25 = vmax.f32 %v3057_v15, %v3089_v45  ;;  %v9948_v22 = vmax.f32 %v3056_v1, %v3088_v23 }
 0x345   : > { %v3157_v48 = vmax.f32 %v9946_v16, %v3121_v25 }
 0x354   : > { %v7440_v34 = vpop.f32.mrb[18].mxu0 }
 0x355   : > { %v2909_v40 = vadd.f32 %v7440_v34, %v9663_v2  ;;  %v2903_v27 = vpop.f32.mrb[19].mxu0  ;;  %v3046_v34 = vld [vmem:[#allocation4 + $0x28] sm:$0xff] }
 0x356   : > { %v2904_v63 = vadd.f32 %v9663_v2, %v2903_v27  ;;  %v3110_v27 = vmax.f32 %v3046_v34, %v3078_v9  ;;  %v3313_v9 = vld [vmem:[#allocation9 + $0x28] sm:$0xff] }
 0x357   : > { %v2991_v36 = vmax.f32 %v2909_v40, 0.0  ;;  %v3077_v40 = vld [vmem:[#allocation4 + $0x21] sm:$0xff]  ;;  %v3321_v34 = vsub.f32 1.0, %v3313_v9 }
 0x358   : > { %v2990_v14 = vmax.f32 %v2904_v63, 0.0  ;;  %v3109_v15 = vmax.f32 %v3045_v29, %v3077_v40  ;;  %v3146_v30 = vmax.f32 %v3108_v44, %v3110_v27  ;;  %v3079_v44 = vld [vmem:[#allocation4 + $0x31] sm:$0xff]  ;;  %v3054_v9 = vld [vmem:[#allocation4 + $0x68] sm:$0xff] }
 0x359   : > { %3024 = vst.msk [vmem:[#allocation4 + $0x98] sm:$0xff] %vm3004_vm14, %v2991_v36 }
 0x35a   : > { %3023 = vst.msk [vmem:[#allocation4 + $0x90] sm:$0xff] %vm3004_vm14, %v2990_v14 }
 0x360   : > { %v3060_v35 = vld [vmem:[#allocation4 + $0x98] sm:$0xff] }
 0x361   : > { %v3090_v60 = vld [vmem:[#allocation4 + $0x89] sm:$0xff]  ;;  %v3091_v58 = vld [vmem:[#allocation4 + $0x91] sm:$0xff] }
 0x362   : > { %v3122_v57 = vmax.f32 %v3058_v37, %v3090_v60  ;;  %v3059_v43 = vld [vmem:[#allocation4 + $0x90] sm:$0xff] }
 0x363   : > { %v3123_v11 = vmax.f32 %v3059_v43, %v3091_v58  ;;  %v8505_v43 = vmov 1  }
 0x364   : > { %v3158_v42 = vmax.f32 %v9948_v22, %v3122_v57  ;;  %8176 = vset.pattern.permute.xlu0 %v8505_v43 }
 0x365   : > { %v3159_v56 = vmax.f32 %v3121_v25, %v3123_v11  ;;  %v3145_v25 = vmax.f32 %v3107_v32, %v3109_v15  ;;  %v9983_v32 = vmax.f32 %v3047_v54, %v3079_v44  ;;  %v3051_v44 = vld [vmem:[#allocation4 + $0x50] sm:$0xff] }
 0x366   : > { %v9952_v39 = vpack.c.bf16 %v3158_v42, %v3157_v48 }
 0x367   : > { %v7831_v60 = vpack.c.bf16 %v3146_v30, %v3145_v25  ;;  %v3081_v30 = vld [vmem:[#allocation4 + $0x41] sm:$0xff] }
 0x374   : > { %v7443_v13 = vpop.f32.mrb[20].mxu0 }
 0x375   : > { %v2919_v49 = vadd.f32 %v7443_v13, %v9663_v2  ;;  %v2913_v46 = vpop.f32.mrb[21].mxu0 }
 0x376   : > { %v2914_v26 = vadd.f32 %v9663_v2, %v2913_v46  ;;  %v3080_v46 = vld [vmem:[#allocation4 + $0x39] sm:$0xff] }
 0x377   : > { %v2993_v4 = vmax.f32 %v2919_v49, 0.0 }
 0x378   : > { %v2992_v19 = vmax.f32 %v2914_v26, 0.0  ;;  %v3308_v26 = vld [vmem:[#allocation9] sm:$0xff] }
 0x379   : > { %3026 = vst.msk [vmem:[#allocation4 + $0xa8] sm:$0xff] %vm3004_vm14, %v2993_v4  ;;  %v3311_v4 = vld [vmem:[#allocation9 + $0x18] sm:$0xff]  ;;  %v3316_v58 = vsub.f32 1.0, %v3308_v26 }
 0x37a   : > { %3025 = vst.msk [vmem:[#allocation4 + $0xa0] sm:$0xff] %vm3004_vm14, %v2992_v19  ;;  %v3319_v52 = vsub.f32 1.0, %v3311_v4 }
 0x37b   : > { %3446 = vperm.xlu0 %8176, %v3316_v58   ;;  %3334 = vperm.xlu1 %8177, %v3316_v58  }
 0x37f   : > { %3458 = vperm.xlu0 %8176, %v3319_v52   ;;  %8178 = vset.pattern.permute.xlu1 %v8505_v43 }
 0x380   : > { %v3062_v36 = vld [vmem:[#allocation4 + $0xa8] sm:$0xff] }
 0x381   : > { %v3092_v2 = vld [vmem:[#allocation4 + $0x99] sm:$0xff]  ;;  %v3093_v33 = vld [vmem:[#allocation4 + $0xa1] sm:$0xff] }
 0x382   : > { %v3124_v41 = vmax.f32 %v3060_v35, %v3092_v2  ;;  %v3061_v62 = vld [vmem:[#allocation4 + $0xa0] sm:$0xff]  ;;  %v3317_v35 = vsub.f32 1.0, %v3309_v18 }
 0x383   : > { %v3125_v63 = vmax.f32 %v3061_v62, %v3093_v33  ;;  %v3084_v18 = vld [vmem:[#allocation4 + $0x59] sm:$0xff] }
 0x384   : > { %v3160_v51 = vmax.f32 %v3122_v57, %v3124_v41  ;;  %3450 = vperm.xlu1 %8178, %v3317_v35  }
 0x385   : > { %v3161_v38 = vmax.f32 %v3123_v11, %v3125_v63  ;;  %v9979_v11 = vmax.f32 %v3048_v5, %v3080_v46 }
 0x386   : > { %v7825_v24 = vpack.c.bf16 %v3160_v51, %v3159_v56  ;;  %v3322_v56 = vsub.f32 1.0, %v3314_v59 }
 0x387   : > { %v3148_v7 = vmax.f32 %v3110_v27, %v9979_v11 }
 0x388   : > { %7826 = vmatprep.subr.bf16.mxu1 %v7825_v24  ;;  %3470 = vperm.xlu0 %8176, %v3322_v56  }
 0x389   : > { %7828 = vmatpush3.bf16.msra.mxu1 %v7827_v10  ;;  %v3147_v10 = vmax.f32 %v3109_v15, %v9983_v32  ;;  %v3049_v15 = vld [vmem:[#allocation4 + $0x40] sm:$0xff] }
 0x38c   : > { %8182 = vset.pattern.permute.xlu0 %v8506_v12 }
 0x38d   : > { %3339 = vperm.xlu0 %8182, %v3317_v35  }
 0x394   : > { %v7446_v20 = vpop.f32.mrb[22].mxu0 }
 0x395   : > { %v2929_v61 = vadd.f32 %v9964_v6, %v7446_v20  ;;  %v2923_v8 = vpop.f32.mrb[23].mxu0 }
 0x396   : > { %v2924_v53 = vadd.f32 %v9964_v6, %v2923_v8  ;;  %v3312_v8 = vld [vmem:[#allocation9 + $0x20] sm:$0xff] }
 0x397   : > { %v2995_v0 = vmax.f32 %v2929_v61, 0.0  ;;  %v7835_v61 = vpack.c.bf16 %v3148_v7, %v3147_v10 }
 0x398   : > { %v2994_v31 = vmax.f32 %v2924_v53, 0.0  ;;  %v3320_v53 = vsub.f32 1.0, %v3312_v8 }
 0x399   : > { %3028 = vst.msk [vmem:[#allocation4 + $0xb8] sm:$0xff] %vm3004_vm14, %v2995_v0  ;;  %v3315_v0 = vld [vmem:[#allocation9 + $0x38] sm:$0xff] }
 0x39a   : > { %3027 = vst.msk [vmem:[#allocation4 + $0xb0] sm:$0xff] %vm3004_vm14, %v2994_v31  ;;  %3354 = vperm.xlu0 %8182, %v3320_v53   ;;  %v3323_v31 = vsub.f32 1.0, %v3315_v0 }
 0x39e   : > { %3369 = vperm.xlu0 %8182, %v3323_v31  }
 0x3a0   : > { %v3064_v2 = vld [vmem:[#allocation4 + $0xb8] sm:$0xff] }
 0x3a1   : > { %v3094_v14 = vld [vmem:[#allocation4 + $0xa9] sm:$0xff]  ;;  %v3095_v50 = vld [vmem:[#allocation4 + $0xb1] sm:$0xff] }
 0x3a2   : > { %v3126_v45 = vmax.f32 %v3062_v36, %v3094_v14  ;;  %v3063_v19 = vld [vmem:[#allocation4 + $0xb0] sm:$0xff]  ;;  %8259 = vset.pattern.permute.xlu0 %v8505_v43 }
 0x3a3   : > { %v9981_v55 = vmax.f32 %v3063_v19, %v3095_v50 }
 0x3a4   : > { %v3162_v23 = vmax.f32 %v3124_v41, %v3126_v45  ;;  %v3310_v41 = vld [vmem:[#allocation9 + $0x10] sm:$0xff] }
 0x3a5   : > { %v3163_v51 = vmax.f32 %v3125_v63, %v9981_v55  ;;  %v3318_v24 = vsub.f32 1.0, %v3310_v41  ;;  %v3082_v63 = vld [vmem:[#allocation4 + $0x49] sm:$0xff] }
 0x3a6   : > { %v7829_v37 = vpack.c.bf16 %v3162_v23, %v3161_v38 }
 0x3a7   : > { %3454 = vperm.xlu1 %8178, %v3318_v24  }
 0x3a8   : > { %7830 = vmatprep.subr.bf16.mxu1 %v7829_v37 }
 0x3a9   : > { %7832 = vmatpush3.bf16.msra.mxu1 %v7831_v60  ;;  %v3113_v60 = vmax.f32 %v3049_v15, %v3081_v30 }
 0x3ab   : > { %8179 = vset.pattern.permute.xlu1 %v8506_v12 }
 0x3ac   : > { %3344 = vperm.xlu1 %8179, %v3318_v24  }
 0x3b0   : > { %3349 = vperm.xlu1 %8179, %v3319_v52  }
 0x3b4   : > { %v7449_v1 = vpop.f32.mrb[24].mxu0  ;;  %8180 = vset.pattern.permute.xlu1 %v8505_v43 }
 0x3b5   : > { %v2939_v57 = vadd.f32 %v9964_v6, %v7449_v1  ;;  %v2933_v48 = vpop.f32.mrb[25].mxu0  ;;  %3462 = vperm.xlu1 %8180, %v3320_v53   ;;  %v3086_v53 = vld [vmem:[#allocation4 + $0x69] sm:$0xff] }
 0x3b6   : > { %v2934_v42 = vadd.f32 %v9964_v6, %v2933_v48 }
 0x3b7   : > { %v2997_v13 = vmax.f32 %v2939_v57, 0.0 }
 0x3b8   : > { %v2996_v49 = vmax.f32 %v2934_v42, 0.0 }
 0x3b9   : > { %3030 = vst.msk [vmem:[#allocation4 + $0xc8] sm:$0xff] %vm3004_vm14, %v2997_v13  ;;  %3466 = vperm.xlu1 %8180, %v3321_v34   ;;  %v3149_v13 = vmax.f32 %v9983_v32, %v3113_v60 }
 0x3ba   : > { %3029 = vst.msk [vmem:[#allocation4 + $0xc0] sm:$0xff] %vm3004_vm14, %v2996_v49 }
 0x3bd   : > { %8181 = vset.pattern.permute.xlu1 %v8506_v12 }
 0x3be   : > { %3359 = vperm.xlu1 %8181, %v3321_v34   ;;  %v3137_v34 = vld [vmem:[#allocation4 + $0x100] sm:$0xff] }
 0x3c0   : > { %v3066_v25 = vld [vmem:[#allocation4 + $0xc8] sm:$0xff] }
 0x3c1   : > { %v3096_v17 = vld [vmem:[#allocation4 + $0xb9] sm:$0xff]  ;;  %v3097_v14 = vld [vmem:[#allocation4 + $0xc1] sm:$0xff] }
 0x3c2   : > { %v3128_v21 = vmax.f32 %v3064_v2, %v3096_v17  ;;  %v3065_v36 = vld [vmem:[#allocation4 + $0xc0] sm:$0xff]  ;;  %3364 = vperm.xlu1 %8181, %v3322_v56  }
 0x3c3   : > { %v3129_v23 = vmax.f32 %v3065_v36, %v3097_v14 }
 0x3c4   : > { %v3164_v28 = vmax.f32 %v3126_v45, %v3128_v21  ;;  %v3050_v45 = vld [vmem:[#allocation4 + $0x48] sm:$0xff] }
 0x3c5   : > { %v3114_v38 = vmax.f32 %v3050_v45, %v3082_v63  ;;  %v3165_v48 = vmax.f32 %v9981_v55, %v3129_v23 }
 0x3c6   : > { %v7833_v20 = vpack.c.bf16 %v3164_v28, %v3163_v51  ;;  %8183 = vset.pattern.permute.xlu1 %v8505_v43  ;;  %v3052_v43 = vld [vmem:[#allocation4 + $0x58] sm:$0xff] }
 0x3c7   : > { %v3150_v57 = vmax.f32 %v9979_v11, %v3114_v38  ;;  %3474 = vperm.xlu1 %8183, %v3323_v31   ;;  %v3083_v11 = vld [vmem:[#allocation4 + $0x51] sm:$0xff]  ;;  %v3116_v52 = vmax.f32 %v3052_v43, %v3084_v18  ;;  %v3180_v43 = vld [vmem:[%s11346_s4 + $0x28] sm:$0xff] }
 0x3c8   : > { %7834 = vmatprep.subr.bf16.mxu1 %v7833_v20  ;;  %v3115_v2 = vmax.f32 %v3051_v44, %v3083_v11  ;;  %v3175_v44 = vld [vmem:[%s11346_s4] sm:$0xff]  ;;  %v3182_v11 = vld [vmem:[%s11346_s4 + $0x38] sm:$0xff] }
 0x3c9   : > { %7836 = vmatpush3.bf16.msra.mxu1 %v7835_v61  ;;  %v7839_v46 = vpack.c.bf16 %v3150_v57, %v3149_v13  ;;  %v3152_v32 = vmax.f32 %v3114_v38, %v3116_v52 }
 0x3ca   : > { %v3151_v56 = vmax.f32 %v3113_v60, %v3115_v2 }
 0x3cc   : > { %v7843_v20 = vpack.c.bf16 %v3152_v32, %v3151_v56  ;;  %v3187_v32 = vld [vmem:[%s11346_s4 + $0x60] sm:$0xff] }
 0x3d4   : > { %v7452_v62 = vpop.f32.mrb[26].mxu0 }
 0x3d5   : > { %v2949_v33 = vadd.f32 %v9964_v6, %v7452_v62  ;;  %v2943_v47 = vpop.f32.mrb[27].mxu0  ;;  %v3053_v62 = vld [vmem:[#allocation4 + $0x60] sm:$0xff] }
 0x3d6   : > { %v2944_v29 = vadd.f32 %v9964_v6, %v2943_v47  ;;  %v3138_v47 = vld [vmem:[#allocation4 + $0x108] sm:$0xff] }
 0x3d7   : > { %v2999_v40 = vmax.f32 %v2949_v33, 0.0  ;;  %v3085_v33 = vld [vmem:[#allocation4 + $0x61] sm:$0xff] }
 0x3d8   : > { %v2998_v27 = vmax.f32 %v2944_v29, 0.0  ;;  %v3118_v29 = vmax.f32 %v3054_v9, %v3086_v53  ;;  %v3117_v45 = vmax.f32 %v3053_v62, %v3085_v33  ;;  %v3802_v9 = vld [vmem:[#allocation5 + $0x4a] sm:$0xff] }
 0x3d9   : > { %3032 = vst.msk [vmem:[#allocation4 + $0xd8] sm:$0xff] %vm3004_vm14, %v2999_v40  ;;  %v3139_v40 = vld [vmem:[#allocation4 + $0x101] sm:$0xff] }
 0x3da   : > { %3031 = vst.msk [vmem:[#allocation4 + $0xd0] sm:$0xff] %vm3004_vm14, %v2998_v27  ;;  %v3154_v60 = vmax.f32 %v3116_v52, %v3118_v29  ;;  %v3155_v18 = vmax.f32 %v3117_v45, %v9946_v16  ;;  %v3177_v16 = vld [vmem:[%s11346_s4 + $0x10] sm:$0xff] }
 0x3db   : > { %v3181_v52 = vld [vmem:[%s11346_s4 + $0x30] sm:$0xff] }
 0x3e0   : > { %v3068_v59 = vld [vmem:[#allocation4 + $0xd8] sm:$0xff] }
 0x3e1   : > { %v3098_v37 = vld [vmem:[#allocation4 + $0xc9] sm:$0xff]  ;;  %v3099_v5 = vld [vmem:[#allocation4 + $0xd1] sm:$0xff] }
 0x3e2   : > { %v3130_v1 = vmax.f32 %v3066_v25, %v3098_v37  ;;  %v3067_v54 = vld [vmem:[#allocation4 + $0xd0] sm:$0xff] }
 0x3e3   : > { %v3131_v55 = vmax.f32 %v3067_v54, %v3099_v5 }
 0x3e4   : > { %v3166_v42 = vmax.f32 %v3128_v21, %v3130_v1 }
 0x3e5   : > { %v3167_v41 = vmax.f32 %v3129_v23, %v3131_v55 }
 0x3e6   : > { %v7837_v49 = vpack.c.bf16 %v3166_v42, %v3165_v48 }
 0x3e8   : > { %7838 = vmatprep.subr.bf16.mxu1 %v7837_v49 }
 0x3e9   : > { %7840 = vmatpush3.bf16.msra.mxu1 %v7839_v46  ;;  %v3153_v46 = vmax.f32 %v3115_v2, %v3117_v45  ;;  %v3185_v2 = vld [vmem:[%s11346_s4 + $0x50] sm:$0xff]  ;;  %v3839_v45 = vld [vmem:[%s11347_s5 + $0x20] sm:$0xff] }
 0x3ed   : > { %v7455_v26 = vpop.f32.mrb[28].mxu0 }
 0x3ee   : > { %v2959_v4 = vadd.f32 %v9964_v6, %v7455_v26  ;;  %v2953_v19 = vpop.f32.mrb[29].mxu0 }
 0x3ef   : > { %v2954_v50 = vadd.f32 %v9964_v6, %v2953_v19  ;;  %v3156_v19 = vmax.f32 %v3118_v29, %v9948_v22  ;;  %v3178_v22 = vld [vmem:[%s11346_s4 + $0x18] sm:$0xff] }
 0x3f0   : > { %v3001_v58 = vmax.f32 %v2959_v4, 0.0  ;;  %v7847_v4 = vpack.c.bf16 %v3154_v60, %v3153_v46  ;;  %v3843_v46 = vld [vmem:[%s11347_s5 + $0x40] sm:$0xff] }
 0x3f1   : > { %v3000_v12 = vmax.f32 %v2954_v50, 0.0  ;;  %v7851_v54 = vpack.c.bf16 %v3156_v19, %v3155_v18 }
 0x3f2   : > { %3034 = vst.msk [vmem:[#allocation4 + $0xe8] sm:$0xff] %vm3004_vm14, %v3001_v58 }
 0x3f3   : > { %3033 = vst.msk [vmem:[#allocation4 + $0xe0] sm:$0xff] %vm3004_vm14, %v3000_v12 }
 0x3f9   : > { %v3070_v27 = vld [vmem:[#allocation4 + $0xe8] sm:$0xff] }
 0x3fa   : > { %v3100_v35 = vld [vmem:[#allocation4 + $0xd9] sm:$0xff]  ;;  %v3101_v31 = vld [vmem:[#allocation4 + $0xe1] sm:$0xff]  ;;  %v10058_v56 = vpop.permute.xlu1 %3334  ;;  %v10084_v29 = vpop.permute.xlu0 %3446 }
 0x3fb   : > { %v3132_v17 = vmax.f32 %v3068_v59, %v3100_v35  ;;  %v3069_v0 = vld [vmem:[#allocation4 + $0xe0] sm:$0xff]  ;;  %v3183_v59 = vld [vmem:[%s11346_s4 + $0x40] sm:$0xff]  ;;  %v3186_v35 = vld [vmem:[%s11346_s4 + $0x58] sm:$0xff] }
 0x3fc   : > { %v3133_v63 = vmax.f32 %v3069_v0, %v3101_v31 }
 0x3fd   : > { %v3168_v21 = vmax.f32 %v3130_v1, %v3132_v17  ;;  %v3141_v1 = vmax.f32 %v3137_v34, %v3139_v40  ;;  %v3835_v34 = vld [vmem:[%s11347_s5] sm:$0xff]  ;;  %v3836_v40 = vld [vmem:[%s11347_s5 + $0x8] sm:$0xff] }
 0x3fe   : > { %v7458_v7 = vpop.f32.mrb[30].mxu0  ;;  %v3169_v48 = vmax.f32 %v3131_v55, %v3133_v63  ;;  %v3184_v55 = vld [vmem:[%s11346_s4 + $0x48] sm:$0xff] }
 0x3ff   : > { %v2969_v51 = vadd.f32 %v9964_v6, %v7458_v7  ;;  %v2963_v28 = vpop.f32.mrb[31].mxu0  ;;  %v7841_v24 = vpack.c.bf16 %v3168_v21, %v3167_v41  ;;  %v3190_v41 = vld [vmem:[%s11346_s4 + $0x78] sm:$0xff]  ;;  %v3189_v21 = vld [vmem:[%s11346_s4 + $0x70] sm:$0xff]  ;;  %v3324_v7 = vld [vmem:[#allocation5] sm:$0xff] }
 0x400   : > { %v2964_v10 = vadd.f32 %v9964_v6, %v2963_v28  ;;  %v3140_v6 = vld [vmem:[#allocation4 + $0x109] sm:$0xff]  ;;  %v3388_v28 = vld [vmem:[#allocation5 + $0x1] sm:$0xff] }
 0x401   : > { %v3003_v61 = vmax.f32 %v2969_v51, 0.0  ;;  %7842 = vmatprep.subr.bf16.mxu1 %v7841_v24  ;;  %v3142_v57 = vmax.f32 %v3138_v47, %v3140_v6  ;;  %v3372_v51 = vmul.f32 %v10058_v56, %v3324_v7  ;;  %3404 = vrot.lane.b32.xlu1 %v3388_v28, %s8507_s25  ;;  %v8508_v47 = vmov 0.0|0.0  }
 0x402   : > { %v3002_v8 = vmax.f32 %v2964_v10, 0.0  ;;  %7844 = vmatpush3.bf16.msra.mxu1 %v7843_v20  ;;  %7857 = vmatprep.subr.bf16.mxu0 %v8508_v47  ;;  %v7858_v6 = vpack.c.bf16 %v3836_v40, %v3835_v34 }
 0x403   : > { %3036 = vst.msk [vmem:[#allocation4 + $0xf8] sm:$0xff] %vm3004_vm14, %v3003_v61  ;;  %3380 = vst.msk [vmem:[#allocation6] sm:$0xff] %vm3004_vm14, %v3372_v51  ;;  %v10063_v24 = vpop.permute.xlu1 %3450 }
 0x404   : > { %3035 = vst.msk [vmem:[#allocation4 + $0xf0] sm:$0xff] %vm3004_vm14, %v3002_v8  ;;  %7859 = vmatpush1.bf16.msra.mxu0 %v7858_v6 }
 0x405   : > { %7860 = vmatprep.subr.bf16.mxu0 %v8508_v47 }
 0x40a   : > { %v3072_v36 = vld [vmem:[#allocation4 + $0xf8] sm:$0xff] }
 0x40b   : > { %v3104_v14 = vld [vmem:[#allocation4 + $0xf9] sm:$0xff]  ;;  %v3102_v15 = vld [vmem:[#allocation4 + $0xe9] sm:$0xff]  ;;  %v3103_v38 = vld [vmem:[#allocation4 + $0xf1] sm:$0xff] }
 0x40c   : > { %v3071_v30 = vld [vmem:[#allocation4 + $0xf0] sm:$0xff]  ;;  %v3136_v23 = vmax.f32 %v3072_v36, %v3104_v14  ;;  %v3134_v25 = vmax.f32 %v3070_v27, %v3102_v15  ;;  %v3837_v27 = vld [vmem:[%s11347_s5 + $0x10] sm:$0xff]  ;;  %v10100_v15 = vpop.permute.xlu0 %3458 }
 0x40d   : > { %v3135_v37 = vmax.f32 %v3071_v30, %v3103_v38  ;;  %v3840_v30 = vld [vmem:[%s11347_s5 + $0x28] sm:$0xff] }
 0x40e   : > { %v3170_v42 = vmax.f32 %v3132_v17, %v3134_v25  ;;  %v3172_v49 = vmax.f32 %v3134_v25, %v3136_v23  ;;  %v3174_v12 = vmax.f32 %v3136_v23, %v3142_v57  ;;  %v3188_v17 = vld [vmem:[%s11346_s4 + $0x68] sm:$0xff]  ;;  %v7864_v23 = vpack.c.bf16 %v3840_v30, %v3839_v45  ;;  %v3842_v57 = vld [vmem:[%s11347_s5 + $0x38] sm:$0xff] }
 0x40f   : > { %v3171_v13 = vmax.f32 %v3133_v63, %v3135_v37  ;;  %v3173_v58 = vmax.f32 %v3135_v37, %v3141_v1  ;;  %v3838_v63 = vld [vmem:[%s11347_s5 + $0x18] sm:$0xff]  ;;  %v3841_v1 = vld [vmem:[%s11347_s5 + $0x30] sm:$0xff] }
 0x410   : > { %v7845_v26 = vpack.c.bf16 %v3170_v42, %v3169_v48  ;;  %v7861_v14 = vpack.c.bf16 %v3838_v63, %v3837_v27  ;;  %v10109_v60 = vpop.permute.xlu0 %3470  ;;  %v7867_v42 = vpack.c.bf16 %v3842_v57, %v3841_v1  ;;  %v3849_v27 = vld [vmem:[%s11347_s5 + $0x70] sm:$0xff]  ;;  %v3850_v63 = vld [vmem:[%s11347_s5 + $0x78] sm:$0xff] }
 0x411   : > { %v7849_v50 = vpack.c.bf16 %v3172_v49, %v3171_v13  ;;  %v7853_v5 = vpack.c.bf16 %v3174_v12, %v3173_v58  ;;  %v7879_v45 = vpack.c.bf16 %v3850_v63, %v3849_v27 }
 0x412   : > { %7846 = vmatprep.subr.bf16.mxu1 %v7845_v26  ;;  %7862 = vmatpush1.bf16.msra.mxu0 %v7861_v14  ;;  %v3844_v26 = vld [vmem:[%s11347_s5 + $0x48] sm:$0xff] }
 0x413   : > { %7848 = vmatpush3.bf16.msra.mxu1 %v7847_v4  ;;  %7863 = vmatprep.subr.bf16.mxu0 %v8508_v47  ;;  %v7870_v19 = vpack.c.bf16 %v3844_v26, %v3843_v46 }
 0x414   : > { %7850 = vmatprep.subr.bf16.mxu1 %v7849_v50  ;;  %v10127_v58 = vpop.permute.xlu0 %3339 }
 0x416   : > { %7865 = vmatpush1.bf16.msra.mxu0 %v7864_v23 }
 0x417   : > { %7852 = vmatpush3.bf16.msra.mxu1 %v7851_v54  ;;  %7866 = vmatprep.subr.bf16.mxu0 %v8508_v47 }
 0x418   : > { %7854 = vmatprep.subr.bf16.mxu1 %v7853_v5 }
 0x41a   : > { %7868 = vmatpush1.bf16.msra.mxu0 %v7867_v42  ;;  %v3851_v42 = vld [vmem:[%s11347_s5 + $0x80] sm:$0xff] }
 0x41b   : > { %7856 = vmatpush3.bf16.msra.mxu1 %v9952_v39  ;;  %v3179_v39 = vld [vmem:[%s11346_s4 + $0x20] sm:$0xff]  ;;  %7869 = vmatprep.subr.bf16.mxu0 %v8508_v47 }
 0x41e   : > { %3256 = vmatmul.mubr.f32.vlgmr.msra.gmra.mrb[0].mxu1 %v3175_v44  ;;  %7871 = vmatpush1.bf16.msra.mxu0 %v7870_v19 }
 0x41f   : > { %3260 = vmatprep.mubr.f32.mxu1 %v3178_v22  ;;  %7872 = vmatprep.subr.bf16.mxu0 %v8508_v47 }
 0x422   : > { %3261 = vmatmul.mubr.f32.gmra.mrb[2].mxu1 %v3177_v16  ;;  %v3845_v16 = vld [vmem:[%s11347_s5 + $0x50] sm:$0xff] }
 0x423   : > { %3265 = vmatprep.mubr.f32.mxu1 %v3180_v43  ;;  %v3846_v43 = vld [vmem:[%s11347_s5 + $0x58] sm:$0xff] }
 0x426   : > { %3266 = vmatmul.mubr.f32.gmra.mrb[4].mxu1 %v3179_v39  ;;  %v10065_v10 = vpop.permute.xlu1 %3454 }
 0x427   : > { %3270 = vmatprep.mubr.f32.mxu1 %v3182_v11  ;;  %v7873_v11 = vpack.c.bf16 %v3846_v43, %v3845_v16 }
 0x429   : > { %7874 = vmatpush1.bf16.msra.mxu0 %v7873_v11 }
 0x42a   : > { %3271 = vmatmul.mubr.f32.gmra.mrb[6].mxu1 %v3181_v52  ;;  %7875 = vmatprep.subr.bf16.mxu0 %v8508_v47 }
 0x42b   : > { %3275 = vmatprep.mubr.f32.mxu1 %v3184_v55  ;;  %v10067_v20 = vpop.permute.xlu1 %3344 }
 0x42e   : > { %3276 = vmatmul.mubr.f32.gmra.mrb[8].mxu1 %v3183_v59 }
 0x42f   : > { %3280 = vmatprep.mubr.f32.mxu1 %v3186_v35  ;;  %v10069_v61 = vpop.permute.xlu1 %3349 }
 0x432   : > { %3281 = vmatmul.mubr.f32.gmra.mrb[10].mxu1 %v3185_v2 }
 0x433   : > { %3285 = vmatprep.mubr.f32.mxu1 %v3188_v17 }
 0x434   : > { %v10071_v8 = vpop.permute.xlu1 %3462 }
 0x436   : > { %3286 = vmatmul.mubr.f32.gmra.mrb[12].mxu1 %v3187_v32  ;;  %v3847_v32 = vld [vmem:[%s11347_s5 + $0x60] sm:$0xff] }
 0x437   : > { %3290 = vmatprep.mubr.f32.mxu1 %v3190_v41  ;;  %v3848_v41 = vld [vmem:[%s11347_s5 + $0x68] sm:$0xff] }
 0x438   : > { %v10073_v53 = vpop.permute.xlu1 %3466  ;;  %v7876_v51 = vpack.c.bf16 %v3848_v41, %v3847_v32 }
 0x43a   : > { %3291 = vmatmul.mubr.f32.gmra.mrb[14].mxu1 %v3189_v21  ;;  %7877 = vmatpush1.bf16.msra.mxu0 %v7876_v51 }
 0x43b   : > { %7878 = vmatprep.subr.bf16.mxu0 %v8508_v47 }
 0x43d   : > { %v10075_v0 = vpop.permute.xlu1 %3359 }
 0x43e   : > { %7880 = vmatpush1.bf16.msra.mxu0 %v7879_v45 }
 0x43f   : > { %7881 = vmatprep.subr.bf16.mxu0 %v8508_v47 }
 0x441   : > { %v10077_v31 = vpop.permute.xlu1 %3364 }
 0x446   : > { %v10079_v62 = vpop.permute.xlu1 %3474 }
 0x447   : > { %v3810_v33 = vmul.f32 %v3802_v9, %v10079_v62 }
 0x449   : > { %3818 = vst.msk [vmem:[#allocation6 + $0x78] sm:$0xff] %vm3004_vm14, %v3810_v33 }
 0x473   : > { %v3405_v36 = vpop.permute.xlu1 %3404 }
 0x474   : > { %3429 = vst.msk [vmem:[#allocation6] sm:$0xff] %vm3428_vm1, %v3405_v36 }
 0x4f1   : > { %v7160_v38 = vpop.f32.mrb[0].mxu1 }
 0x4f2   : > { %v7161_v25 = vpop.f32.mrb[1].mxu1 }
 0x4f3   : > { %v7162_v37 = vadd.f32 %v7161_v25, %v7160_v38 }
 0x4f5   : > { %3298 = vst.msk [vmem:[#allocation5 + $0x9] sm:$0xff] %vm3004_vm14, %v7162_v37  ;;  %v7163_v48 = vpop.f32.mrb[2].mxu1  ;;  %v10183_v37 = vpop.permute.xlu0 %3354 }
 0x4f6   : > { %v7164_v13 = vpop.f32.mrb[3].mxu1 }
 0x4f7   : > { %v7165_v49 = vadd.f32 %v7164_v13, %v7163_v48  ;;  %v3852_v13 = vld [vmem:[%s11347_s5 + $0x88] sm:$0xff] }
 0x4f8   : > { %v7882_v46 = vpack.c.bf16 %v3852_v13, %v3851_v42 }
 0x4f9   : > { %3299 = vst.msk [vmem:[#allocation5 + $0x11] sm:$0xff] %vm3004_vm14, %v7165_v49  ;;  %v7166_v4 = vpop.f32.mrb[4].mxu1 }
 0x4fa   : > { %v7167_v50 = vpop.f32.mrb[5].mxu1  ;;  %7883 = vmatpush1.bf16.msra.mxu0 %v7882_v46 }
 0x4fb   : > { %v7168_v12 = vadd.f32 %v7167_v50, %v7166_v4 }
 0x4fc   : > { %v3526_v18 = vld [vmem:[#allocation5 + $0x8] sm:$0xff] }
 0x4fd   : > { %v3583_v54 = vld [vmem:[#allocation5 + $0x9] sm:$0xff]  ;;  %3300 = vst.msk [vmem:[#allocation5 + $0x19] sm:$0xff] %vm3004_vm14, %v7168_v12  ;;  %v3373_v44 = vmul.f32 %v3526_v18, %v10127_v58  ;;  %v7169_v22 = vpop.f32.mrb[6].mxu1  ;;  %v3534_v52 = vmul.f32 %v3526_v18, %v10058_v56 }
 0x4fe   : > { %v3437_v5 = vld [vmem:[#allocation5 + $0x2] sm:$0xff]  ;;  %3599 = vrot.lane.b32.xlu1 %v3583_v54, %s8509_s30  ;;  %3406 = vrot.lane.b32.xlu0 %v3583_v54, %s8507_s25  ;;  %v7170_v39 = vpop.f32.mrb[7].mxu1 }
 0x4ff   : > { %3381 = vst.msk [vmem:[#allocation6 + $0x10] sm:$0xff] %vm3004_vm14, %v3373_v44  ;;  %v7171_v55 = vadd.f32 %v7170_v39, %v7169_v22  ;;  %v3477_v59 = vmul.f32 %v10084_v29, %v3437_v5 }
 0x500   : > { %v10143_v35 = vld [vmem:[#allocation5 + $0x10] sm:$0xff] }
 0x501   : > { %3301 = vst.msk [vmem:[#allocation5 + $0x21] sm:$0xff] %vm3004_vm14, %v7171_v55  ;;  %v3374_v2 = vmul.f32 %v10143_v35, %v10067_v20  ;;  %v7172_v17 = vpop.f32.mrb[8].mxu1  ;;  %v3746_v7 = vld [vmem:[#allocation5 + $0x11] sm:$0xff]  ;;  %v3535_v19 = vmul.f32 %v10143_v35, %v10127_v58  ;;  %v3697_v22 = vmul.f32 %v10143_v35, %v10058_v56 }
 0x502   : > { %3493 = vrot.lane.b32.xlu1 %v3477_v59, %s8510_s18  ;;  %3550 = vrot.lane.b32.xlu0 %v3534_v52, %s8511_s22  ;;  %v7173_v21 = vpop.f32.mrb[9].mxu1  ;;  %v3438_v34 = vld [vmem:[#allocation5 + $0xa] sm:$0xff]  ;;  %v10232_v52 = vpop.permute.xlu0 %3369 }
 0x503   : > { %3382 = vst.msk [vmem:[#allocation6 + $0x20] sm:$0xff] %vm3004_vm14, %v3374_v2  ;;  %v7174_v28 = vadd.f32 %v7173_v21, %v7172_v17  ;;  %v3478_v38 = vmul.f32 %v10063_v24, %v3438_v34  ;;  %v3640_v4 = vmul.f32 %v10084_v29, %v3438_v34 }
 0x504   : > { %v10158_v9 = vld [vmem:[#allocation5 + $0x12] sm:$0xff] }
 0x505   : > { %v10160_v33 = vld [vmem:[#allocation5 + $0x18] sm:$0xff]  ;;  %v3803_v40 = vmul.f32 %v10158_v9, %v10084_v29  ;;  %3302 = vst.msk [vmem:[#allocation5 + $0x29] sm:$0xff] %vm3004_vm14, %v7174_v28  ;;  %v7175_v6 = vpop.f32.mrb[10].mxu1  ;;  %v3479_v17 = vmul.f32 %v10158_v9, %v10065_v10  ;;  %v3641_v41 = vmul.f32 %v10158_v9, %v10063_v24 }
 0x506   : > { %3762 = vrot.lane.b32.xlu1 %v3746_v7, %s8512_s26  ;;  %v3375_v36 = vmul.f32 %v10160_v33, %v10069_v61  ;;  %3601 = vrot.lane.b32.xlu0 %v3746_v7, %s8509_s30  ;;  %v7176_v14 = vpop.f32.mrb[11].mxu1  ;;  %v3747_v16 = vld [vmem:[#allocation5 + $0x19] sm:$0xff]  ;;  %v3536_v28 = vmul.f32 %v10160_v33, %v10067_v20 }
 0x507   : > { %3811 = vst.msk [vmem:[#allocation6 + $0x8] sm:$0xff] %vm3004_vm14, %v3803_v40  ;;  %v7177_v30 = vadd.f32 %v7176_v14, %v7175_v6 }
 0x508   : > { %v10178_v23 = vld [vmem:[#allocation5 + $0x1a] sm:$0xff]  ;;  %3383 = vst.msk [vmem:[#allocation6 + $0x30] sm:$0xff] %vm3004_vm14, %v3375_v36 }
 0x509   : > { %v10180_v25 = vld [vmem:[#allocation5 + $0x20] sm:$0xff]  ;;  %v3804_v1 = vmul.f32 %v10178_v23, %v10063_v24  ;;  %3303 = vst.msk [vmem:[#allocation5 + $0x31] sm:$0xff] %vm3004_vm14, %v7177_v30  ;;  %v7178_v48 = vpop.f32.mrb[12].mxu1  ;;  %v3698_v24 = vmul.f32 %v10160_v33, %v10127_v58  ;;  %v3480_v34 = vmul.f32 %v10178_v23, %v10100_v15  ;;  %v3642_v40 = vmul.f32 %v10178_v23, %v10065_v10 }
 0x50a   : > { %v3376_v57 = vmul.f32 %v10180_v25, %v10183_v37  ;;  %3408 = vrot.lane.b32.xlu1 %v3746_v7, %s8507_s25  ;;  %3495 = vrot.lane.b32.xlu0 %v3478_v38, %s8510_s18  ;;  %v7179_v49 = vpop.f32.mrb[13].mxu1  ;;  %v3748_v9 = vld [vmem:[#allocation5 + $0x21] sm:$0xff]  ;;  %v3537_v58 = vmul.f32 %v10180_v25, %v10069_v61  ;;  %v3699_v33 = vmul.f32 %v10180_v25, %v10067_v20 }
 0x50b   : > { %3812 = vst.msk [vmem:[#allocation6 + $0x18] sm:$0xff] %vm3004_vm14, %v3804_v1  ;;  %v7180_v26 = vadd.f32 %v7179_v49, %v7178_v48  ;;  %v3753_v49 = vld [vmem:[#allocation5 + $0x49] sm:$0xff] }
 0x50c   : > { %3384 = vst.msk [vmem:[#allocation6 + $0x40] sm:$0xff] %vm3004_vm14, %v3376_v57  ;;  %v10204_v50 = vld [vmem:[#allocation5 + $0x22] sm:$0xff] }
 0x50d   : > { %v3805_v12 = vmul.f32 %v10204_v50, %v10065_v10  ;;  %v10208_v18 = vld [vmem:[#allocation5 + $0x28] sm:$0xff]  ;;  %3304 = vst.msk [vmem:[#allocation5 + $0x39] sm:$0xff] %vm3004_vm14, %v7180_v26  ;;  %v7181_v47 = vpop.f32.mrb[14].mxu1  ;;  %v3481_v10 = vmul.f32 %v10204_v50, %v10071_v8  ;;  %v3643_v27 = vmul.f32 %v10204_v50, %v10100_v15 }
 0x50e   : > { %3656 = vrot.lane.b32.xlu1 %v3640_v4, %s8513_s10  ;;  %3552 = vrot.lane.b32.xlu0 %v3535_v19, %s8511_s22  ;;  %v7182_v29 = vpop.f32.mrb[15].mxu1  ;;  %v3820_v54 = vld [vmem:[#allocation6 + $0x8] sm:$0xff]  ;;  %v3377_v5 = vmul.f32 %v10208_v18, %v10075_v0  ;;  %v3749_v6 = vld [vmem:[#allocation5 + $0x29] sm:$0xff]  ;;  %v3538_v20 = vmul.f32 %v10208_v18, %v10183_v37  ;;  %v3700_v63 = vmul.f32 %v10208_v18, %v10069_v61 }
 0x50f   : > { %3813 = vst.msk [vmem:[#allocation6 + $0x28] sm:$0xff] %vm3004_vm14, %v3805_v12  ;;  %v7183_v44 = vadd.f32 %v7182_v29, %v7181_v47  ;;  %6907 = vmatprep.mubr.msk.f32.mxu0 %vm3004_vm14, %v3820_v54 }
 0x510   : > { %v10219_v43 = vld [vmem:[#allocation5 + $0x2a] sm:$0xff]  ;;  %3385 = vst.msk [vmem:[#allocation6 + $0x50] sm:$0xff] %vm3004_vm14, %v3377_v5 }
 0x511   : > { %v3806_v39 = vmul.f32 %v10219_v43, %v10100_v15  ;;  %v10224_v11 = vld [vmem:[#allocation5 + $0x30] sm:$0xff]  ;;  %3305 = vst.msk [vmem:[#allocation5 + $0x41] sm:$0xff] %vm3004_vm14, %v7183_v44  ;;  %v3482_v15 = vmul.f32 %v10219_v43, %v10073_v53  ;;  %v3644_v14 = vmul.f32 %v10219_v43, %v10071_v8 }
 0x512   : > { %3713 = vrot.lane.b32.xlu1 %v3697_v22, %s8514_s13  ;;  %3764 = vrot.lane.b32.xlu0 %v3747_v16, %s8512_s26  ;;  %v3378_v56 = vmul.f32 %v10224_v11, %v10077_v31  ;;  %v3750_v36 = vld [vmem:[#allocation5 + $0x31] sm:$0xff]  ;;  %v3539_v61 = vmul.f32 %v10224_v11, %v10075_v0  ;;  %v3701_v45 = vmul.f32 %v10224_v11, %v10183_v37 }
 0x513   : > { %3814 = vst.msk [vmem:[#allocation6 + $0x38] sm:$0xff] %vm3004_vm14, %v3806_v39  ;;  %v3822_v39 = vld [vmem:[#allocation6 + $0x18] sm:$0xff] }
 0x514   : > { %v10234_v55 = vld [vmem:[#allocation5 + $0x38] sm:$0xff]  ;;  %3386 = vst.msk [vmem:[#allocation6 + $0x60] sm:$0xff] %vm3004_vm14, %v3378_v56 }
 0x515   : > { %v10236_v59 = vld [vmem:[#allocation5 + $0x32] sm:$0xff]  ;;  %v3379_v35 = vmul.f32 %v10232_v52, %v10234_v55  ;;  %v3540_v23 = vmul.f32 %v10077_v31, %v10234_v55  ;;  %v3702_v25 = vmul.f32 %v10075_v0, %v10234_v55 }
 0x516   : > { %3603 = vrot.lane.b32.xlu1 %v3747_v16, %s8509_s30  ;;  %v3807_v2 = vmul.f32 %v10236_v59, %v10071_v8  ;;  %3410 = vrot.lane.b32.xlu0 %v3747_v16, %s8507_s25  ;;  %v3751_v30 = vld [vmem:[#allocation5 + $0x39] sm:$0xff]  ;;  %v3483_v8 = vmul.f32 %v10236_v59, %v10109_v60  ;;  %v3645_v38 = vmul.f32 %v10236_v59, %v10073_v53 }
 0x517   : > { %3387 = vst.msk [vmem:[#allocation6 + $0x70] sm:$0xff] %vm3004_vm14, %v3379_v35 }
 0x518   : > { %3815 = vst.msk [vmem:[#allocation6 + $0x48] sm:$0xff] %vm3004_vm14, %v3807_v2  ;;  %v10249_v32 = vld [vmem:[#allocation5 + $0x42] sm:$0xff]  ;;  %v10253_v21 = vld [vmem:[#allocation5 + $0x3a] sm:$0xff] }
 0x519   : > { %v3809_v7 = vmul.f32 %v10249_v32, %v10109_v60  ;;  %v3808_v51 = vmul.f32 %v10253_v21, %v10073_v53  ;;  %v3752_v37 = vld [vmem:[#allocation5 + $0x41] sm:$0xff]  ;;  %v3646_v53 = vmul.f32 %v10253_v21, %v10109_v60  ;;  %v3484_v1 = vmul.f32 %v10253_v21, %v10079_v62 }
 0x51a   : > { %3497 = vrot.lane.b32.xlu1 %v3479_v17, %s8510_s18  ;;  %3658 = vrot.lane.b32.xlu0 %v3641_v41, %s8513_s10  ;;  %v3695_v57 = vld [vmem:[#allocation5 + $0x40] sm:$0xff]  ;;  %v3696_v42 = vld [vmem:[#allocation5 + $0x48] sm:$0xff]  ;;  %v3647_v60 = vmul.f32 %v10249_v32, %v10079_v62 }
 0x51b   : > { %3817 = vst.msk [vmem:[#allocation6 + $0x68] sm:$0xff] %vm3004_vm14, %v3809_v7  ;;  %3816 = vst.msk [vmem:[#allocation6 + $0x58] sm:$0xff] %vm3004_vm14, %v3808_v51  ;;  %v3703_v0 = vmul.f32 %v3695_v57, %v10077_v31  ;;  %v3541_v48 = vmul.f32 %v3695_v57, %v10232_v52  ;;  %v3704_v13 = vmul.f32 %v3696_v42, %v10232_v52  ;;  %v3824_v17 = vld [vmem:[#allocation6 + $0x28] sm:$0xff] }
 0x51e   : > { %3554 = vrot.lane.b32.xlu1 %v3536_v28, %s8511_s22  ;;  %3715 = vrot.lane.b32.xlu0 %v3698_v24, %s8514_s13 }
 0x522   : > { %3766 = vrot.lane.b32.xlu1 %v3748_v9, %s8512_s26  ;;  %3605 = vrot.lane.b32.xlu0 %v3748_v9, %s8509_s30 }
 0x526   : > { %3412 = vrot.lane.b32.xlu1 %v3748_v9, %s8507_s25  ;;  %3499 = vrot.lane.b32.xlu0 %v3480_v34, %s8510_s18 }
 0x52a   : > { %3660 = vrot.lane.b32.xlu1 %v3642_v40, %s8513_s10  ;;  %3556 = vrot.lane.b32.xlu0 %v3537_v58, %s8511_s22  ;;  %v3826_v40 = vld [vmem:[#allocation6 + $0x38] sm:$0xff] }
 0x52e   : > { %3717 = vrot.lane.b32.xlu1 %v3699_v33, %s8514_s13  ;;  %3768 = vrot.lane.b32.xlu0 %v3749_v6, %s8512_s26 }
 0x532   : > { %3607 = vrot.lane.b32.xlu1 %v3749_v6, %s8509_s30  ;;  %3414 = vrot.lane.b32.xlu0 %v3749_v6, %s8507_s25 }
 0x536   : > { %3501 = vrot.lane.b32.xlu1 %v3481_v10, %s8510_s18  ;;  %3662 = vrot.lane.b32.xlu0 %v3643_v27, %s8513_s10 }
 0x53a   : > { %3558 = vrot.lane.b32.xlu1 %v3538_v20, %s8511_s22  ;;  %3719 = vrot.lane.b32.xlu0 %v3700_v63, %s8514_s13 }
 0x53e   : > { %3770 = vrot.lane.b32.xlu1 %v3750_v36, %s8512_s26  ;;  %3609 = vrot.lane.b32.xlu0 %v3750_v36, %s8509_s30 }
 0x542   : > { %3416 = vrot.lane.b32.xlu1 %v3750_v36, %s8507_s25  ;;  %3503 = vrot.lane.b32.xlu0 %v3482_v15, %s8510_s18  ;;  %v3828_v36 = vld [vmem:[#allocation6 + $0x48] sm:$0xff] }
 0x546   : > { %3664 = vrot.lane.b32.xlu1 %v3644_v14, %s8513_s10  ;;  %3560 = vrot.lane.b32.xlu0 %v3539_v61, %s8511_s22 }
 0x54a   : > { %3721 = vrot.lane.b32.xlu1 %v3701_v45, %s8514_s13  ;;  %3772 = vrot.lane.b32.xlu0 %v3751_v30, %s8512_s26 }
 0x54e   : > { %3611 = vrot.lane.b32.xlu1 %v3751_v30, %s8509_s30  ;;  %3418 = vrot.lane.b32.xlu0 %v3751_v30, %s8507_s25 }
 0x552   : > { %3505 = vrot.lane.b32.xlu1 %v3483_v8, %s8510_s18  ;;  %3666 = vrot.lane.b32.xlu0 %v3645_v38, %s8513_s10 }
 0x556   : > { %3562 = vrot.lane.b32.xlu1 %v3540_v23, %s8511_s22  ;;  %3723 = vrot.lane.b32.xlu0 %v3702_v25, %s8514_s13 }
 0x55a   : > { %3774 = vrot.lane.b32.xlu1 %v3752_v37, %s8512_s26  ;;  %3613 = vrot.lane.b32.xlu0 %v3752_v37, %s8509_s30  ;;  %v3830_v37 = vld [vmem:[#allocation6 + $0x58] sm:$0xff] }
 0x55e   : > { %3668 = vrot.lane.b32.xlu1 %v3646_v53, %s8513_s10  ;;  %3507 = vrot.lane.b32.xlu0 %v3484_v1, %s8510_s18 }
 0x562   : > { %3725 = vrot.lane.b32.xlu1 %v3703_v0, %s8514_s13  ;;  %3564 = vrot.lane.b32.xlu0 %v3541_v48, %s8511_s22 }
 0x566   : > { %3670 = vrot.lane.b32.xlu1 %v3647_v60, %s8513_s10  ;;  %3727 = vrot.lane.b32.xlu0 %v3704_v13, %s8514_s13  ;;  %v3832_v13 = vld [vmem:[#allocation6 + $0x68] sm:$0xff] }
 0x56a   : > { %3776 = vrot.lane.b32.xlu1 %v3753_v49, %s8512_s26 }
 0x570   : > { %v3600_v31 = vpop.permute.xlu1 %3599  ;;  %v3407_v46 = vpop.permute.xlu0 %3406 }
 0x571   : > { %3430 = vst.msk [vmem:[#allocation6 + $0x10] sm:$0xff] %vm3428_vm1, %v3407_v46 }
 0x574   : > { %v3494_v26 = vpop.permute.xlu1 %3493  ;;  %v3551_v4 = vpop.permute.xlu0 %3550 }
 0x575   : > { %3518 = vst.msk [vmem:[#allocation6] sm:$0xff] %vm3517_vm2, %v3494_v26 }
 0x576   : > { %3575 = vst.msk [vmem:[#allocation6] sm:$0xff] %vm3574_vm3, %v3551_v4 }
 0x577   : > { %3624 = vst.msk [vmem:[#allocation6] sm:$0xff] %vm3623_vm4, %v3600_v31 }
 0x578   : > { %v3763_v62 = vpop.permute.xlu1 %3762  ;;  %v3602_v19 = vpop.permute.xlu0 %3601 }
 0x57c   : > { %v3409_v50 = vpop.permute.xlu1 %3408  ;;  %v3496_v12 = vpop.permute.xlu0 %3495 }
 0x57d   : > { %3431 = vst.msk [vmem:[#allocation6 + $0x20] sm:$0xff] %vm3428_vm1, %v3409_v50 }
 0x57e   : > { %3519 = vst.msk [vmem:[#allocation6 + $0x10] sm:$0xff] %vm3517_vm2, %v3496_v12  ;;  %v4044_v12 = vld [vmem:[#allocation11] sm:$0xff] }
 0x57f   : > { %7475 = vmatprep.mubr.msk.f32.mxu1 %vm4046_vm10, %v4044_v12 }
 0x580   : > { %v3657_v18 = vpop.permute.xlu1 %3656  ;;  %v3553_v47 = vpop.permute.xlu0 %3552 }
 0x581   : > { %3681 = vst.msk [vmem:[#allocation6] sm:$0xff] %vm3680_vm5, %v3657_v18  ;;  %v6906_v18 = vld [vmem:[%s11348_s6] ss:$0 sm:$0xff] }
 0x582   : > { %3576 = vst.msk [vmem:[#allocation6 + $0x10] sm:$0xff] %vm3574_vm3, %v3553_v47 }
 0x583   : > { %3625 = vst.msk [vmem:[#allocation6 + $0x10] sm:$0xff] %vm3623_vm4, %v3602_v19  ;;  %v3834_v19 = vld [vmem:[#allocation6 + $0x78] sm:$0xff] }
 0x584   : > { %v3714_v29 = vpop.permute.xlu1 %3713  ;;  %v3765_v54 = vpop.permute.xlu0 %3764 }
 0x585   : > { %3738 = vst.msk [vmem:[#allocation6] sm:$0xff] %vm3737_vm6, %v3714_v29 }
 0x586   : > { %3787 = vst.msk [vmem:[#allocation6] sm:$0xff] %vm3786_vm7, %v3763_v62 }
 0x588   : > { %v3604_v5 = vpop.permute.xlu1 %3603  ;;  %v3411_v44 = vpop.permute.xlu0 %3410 }
 0x589   : > { %3432 = vst.msk [vmem:[#allocation6 + $0x30] sm:$0xff] %vm3428_vm1, %v3411_v44 }
 0x58c   : > { %v3498_v22 = vpop.permute.xlu1 %3497  ;;  %v3659_v16 = vpop.permute.xlu0 %3658 }
 0x58d   : > { %3520 = vst.msk [vmem:[#allocation6 + $0x20] sm:$0xff] %vm3517_vm2, %v3498_v22  ;;  %v3819_v43 = vld [vmem:[#allocation6] sm:$0xff] }
 0x58e   : > { %3682 = vst.msk [vmem:[#allocation6 + $0x10] sm:$0xff] %vm3680_vm5, %v3659_v16  ;;  %3949 = vmatmul.mubr.f32.vlgmr.msra.gmra.mrb[32].mxu0 %v3819_v43 }
 0x58f   : > { %6908 = vmatprep.mubr.msk.f32.mxu0 %vm3004_vm14, %v3822_v39 }
 0x590   : > { %v3555_v11 = vpop.permute.xlu1 %3554  ;;  %v3716_v56 = vpop.permute.xlu0 %3715 }
 0x591   : > { %3577 = vst.msk [vmem:[#allocation6 + $0x20] sm:$0xff] %vm3574_vm3, %v3555_v11 }
 0x592   : > { %3626 = vst.msk [vmem:[#allocation6 + $0x20] sm:$0xff] %vm3623_vm4, %v3604_v5 }
 0x593   : > { %3739 = vst.msk [vmem:[#allocation6 + $0x10] sm:$0xff] %vm3737_vm6, %v3716_v56 }
 0x594   : > { %3788 = vst.msk [vmem:[#allocation6 + $0x10] sm:$0xff] %vm3786_vm7, %v3765_v54  ;;  %v3767_v52 = vpop.permute.xlu1 %3766  ;;  %v3606_v55 = vpop.permute.xlu0 %3605 }
 0x598   : > { %v3413_v59 = vpop.permute.xlu1 %3412  ;;  %v3500_v35 = vpop.permute.xlu0 %3499 }
 0x599   : > { %3433 = vst.msk [vmem:[#allocation6 + $0x40] sm:$0xff] %vm3428_vm1, %v3413_v59 }
 0x59a   : > { %3521 = vst.msk [vmem:[#allocation6 + $0x30] sm:$0xff] %vm3517_vm2, %v3500_v35 }
 0x59b   : > { %v3821_v2 = vld [vmem:[#allocation6 + $0x10] sm:$0xff] }
 0x59c   : > { %3954 = vmatmul.mubr.f32.gmra.mrb[34].mxu0 %v3821_v2  ;;  %v3661_v32 = vpop.permute.xlu1 %3660  ;;  %v3557_v41 = vpop.permute.xlu0 %3556 }
 0x59d   : > { %6909 = vmatprep.mubr.msk.f32.mxu0 %vm3004_vm14, %v3824_v17  ;;  %3683 = vst.msk [vmem:[#allocation6 + $0x20] sm:$0xff] %vm3680_vm5, %v3661_v32 }
 0x59e   : > { %3578 = vst.msk [vmem:[#allocation6 + $0x30] sm:$0xff] %vm3574_vm3, %v3557_v41 }
 0x59f   : > { %3627 = vst.msk [vmem:[#allocation6 + $0x30] sm:$0xff] %vm3623_vm4, %v3606_v55 }
 0x5a0   : > { %v3718_v21 = vpop.permute.xlu1 %3717  ;;  %v3769_v7 = vpop.permute.xlu0 %3768 }
 0x5a1   : > { %3740 = vst.msk [vmem:[#allocation6 + $0x20] sm:$0xff] %vm3737_vm6, %v3718_v21 }
 0x5a2   : > { %3789 = vst.msk [vmem:[#allocation6 + $0x20] sm:$0xff] %vm3786_vm7, %v3767_v52 }
 0x5a4   : > { %v3608_v51 = vpop.permute.xlu1 %3607  ;;  %v3415_v28 = vpop.permute.xlu0 %3414 }
 0x5a5   : > { %3434 = vst.msk [vmem:[#allocation6 + $0x50] sm:$0xff] %vm3428_vm1, %v3415_v28 }
 0x5a8   : > { %v3502_v24 = vpop.permute.xlu1 %3501  ;;  %v3663_v9 = vpop.permute.xlu0 %3662 }
 0x5a9   : > { %3522 = vst.msk [vmem:[#allocation6 + $0x40] sm:$0xff] %vm3517_vm2, %v3502_v24  ;;  %v3823_v34 = vld [vmem:[#allocation6 + $0x20] sm:$0xff] }
 0x5aa   : > { %3684 = vst.msk [vmem:[#allocation6 + $0x30] sm:$0xff] %vm3680_vm5, %v3663_v9  ;;  %3959 = vmatmul.mubr.f32.gmra.mrb[36].mxu0 %v3823_v34 }
 0x5ab   : > { %6910 = vmatprep.mubr.msk.f32.mxu0 %vm3004_vm14, %v3826_v40 }
 0x5ac   : > { %v3559_v58 = vpop.permute.xlu1 %3558  ;;  %v3720_v33 = vpop.permute.xlu0 %3719 }
 0x5ad   : > { %3579 = vst.msk [vmem:[#allocation6 + $0x40] sm:$0xff] %vm3574_vm3, %v3559_v58 }
 0x5ae   : > { %3628 = vst.msk [vmem:[#allocation6 + $0x40] sm:$0xff] %vm3623_vm4, %v3608_v51 }
 0x5af   : > { %3741 = vst.msk [vmem:[#allocation6 + $0x30] sm:$0xff] %vm3737_vm6, %v3720_v33 }
 0x5b0   : > { %3790 = vst.msk [vmem:[#allocation6 + $0x30] sm:$0xff] %vm3786_vm7, %v3769_v7  ;;  %v3771_v6 = vpop.permute.xlu1 %3770  ;;  %v3610_v10 = vpop.permute.xlu0 %3609 }
 0x5b4   : > { %v3417_v27 = vpop.permute.xlu1 %3416  ;;  %v3504_v20 = vpop.permute.xlu0 %3503 }
 0x5b5   : > { %3435 = vst.msk [vmem:[#allocation6 + $0x60] sm:$0xff] %vm3428_vm1, %v3417_v27 }
 0x5b6   : > { %3523 = vst.msk [vmem:[#allocation6 + $0x50] sm:$0xff] %vm3517_vm2, %v3504_v20 }
 0x5b7   : > { %v3825_v63 = vld [vmem:[#allocation6 + $0x30] sm:$0xff] }
 0x5b8   : > { %3964 = vmatmul.mubr.f32.gmra.mrb[38].mxu0 %v3825_v63  ;;  %v3665_v15 = vpop.permute.xlu1 %3664  ;;  %v3561_v14 = vpop.permute.xlu0 %3560 }
 0x5b9   : > { %6911 = vmatprep.mubr.msk.f32.mxu0 %vm3004_vm14, %v3828_v36  ;;  %3685 = vst.msk [vmem:[#allocation6 + $0x40] sm:$0xff] %vm3680_vm5, %v3665_v15 }
 0x5ba   : > { %3580 = vst.msk [vmem:[#allocation6 + $0x50] sm:$0xff] %vm3574_vm3, %v3561_v14 }
 0x5bb   : > { %3629 = vst.msk [vmem:[#allocation6 + $0x50] sm:$0xff] %vm3623_vm4, %v3610_v10 }
 0x5bc   : > { %v3722_v61 = vpop.permute.xlu1 %3721  ;;  %v3773_v45 = vpop.permute.xlu0 %3772 }
 0x5bd   : > { %3742 = vst.msk [vmem:[#allocation6 + $0x40] sm:$0xff] %vm3737_vm6, %v3722_v61 }
 0x5be   : > { %3791 = vst.msk [vmem:[#allocation6 + $0x40] sm:$0xff] %vm3786_vm7, %v3771_v6 }
 0x5c0   : > { %v3612_v30 = vpop.permute.xlu1 %3611  ;;  %v3419_v8 = vpop.permute.xlu0 %3418 }
 0x5c1   : > { %3436 = vst.msk [vmem:[#allocation6 + $0x70] sm:$0xff] %vm3428_vm1, %v3419_v8 }
 0x5c4   : > { %v3506_v38 = vpop.permute.xlu1 %3505  ;;  %v3667_v23 = vpop.permute.xlu0 %3666 }
 0x5c5   : > { %3524 = vst.msk [vmem:[#allocation6 + $0x60] sm:$0xff] %vm3517_vm2, %v3506_v38  ;;  %v3827_v25 = vld [vmem:[#allocation6 + $0x40] sm:$0xff] }
 0x5c6   : > { %3686 = vst.msk [vmem:[#allocation6 + $0x50] sm:$0xff] %vm3680_vm5, %v3667_v23  ;;  %3969 = vmatmul.mubr.f32.gmra.mrb[40].mxu0 %v3827_v25 }
 0x5c7   : > { %6912 = vmatprep.mubr.msk.f32.mxu0 %vm3004_vm14, %v3830_v37 }
 0x5c8   : > { %v3563_v53 = vpop.permute.xlu1 %3562  ;;  %v3724_v1 = vpop.permute.xlu0 %3723 }
 0x5c9   : > { %3581 = vst.msk [vmem:[#allocation6 + $0x60] sm:$0xff] %vm3574_vm3, %v3563_v53 }
 0x5ca   : > { %3630 = vst.msk [vmem:[#allocation6 + $0x60] sm:$0xff] %vm3623_vm4, %v3612_v30 }
 0x5cb   : > { %3743 = vst.msk [vmem:[#allocation6 + $0x50] sm:$0xff] %vm3737_vm6, %v3724_v1 }
 0x5cc   : > { %3792 = vst.msk [vmem:[#allocation6 + $0x50] sm:$0xff] %vm3786_vm7, %v3773_v45  ;;  %v3775_v57 = vpop.permute.xlu1 %3774  ;;  %v3614_v0 = vpop.permute.xlu0 %3613 }
 0x5d0   : > { %v3669_v48 = vpop.permute.xlu1 %3668  ;;  %v3508_v42 = vpop.permute.xlu0 %3507 }
 0x5d1   : > { %3687 = vst.msk [vmem:[#allocation6 + $0x60] sm:$0xff] %vm3680_vm5, %v3669_v48 }
 0x5d2   : > { %3525 = vst.msk [vmem:[#allocation6 + $0x70] sm:$0xff] %vm3517_vm2, %v3508_v42 }
 0x5d3   : > { %v3829_v60 = vld [vmem:[#allocation6 + $0x50] sm:$0xff] }
 0x5d4   : > { %3974 = vmatmul.mubr.f32.gmra.mrb[42].mxu0 %v3829_v60  ;;  %v3726_v49 = vpop.permute.xlu1 %3725  ;;  %v3565_v31 = vpop.permute.xlu0 %3564 }
 0x5d5   : > { %6913 = vmatprep.mubr.msk.f32.mxu0 %vm3004_vm14, %v3832_v13  ;;  %3744 = vst.msk [vmem:[#allocation6 + $0x60] sm:$0xff] %vm3737_vm6, %v3726_v49  ;;  %v4033_v49 = vld [vmem:[#allocation7 + $0x40] sm:$0xff] }
 0x5d6   : > { %3793 = vst.msk [vmem:[#allocation6 + $0x60] sm:$0xff] %vm3786_vm7, %v3775_v57 }
 0x5d7   : > { %3582 = vst.msk [vmem:[#allocation6 + $0x70] sm:$0xff] %vm3574_vm3, %v3565_v31  ;;  %v4034_v31 = vld [vmem:[#allocation7 + $0x41] sm:$0xff] }
 0x5d8   : > { %3631 = vst.msk [vmem:[#allocation6 + $0x70] sm:$0xff] %vm3623_vm4, %v3614_v0  ;;  %v3671_v46 = vpop.permute.xlu1 %3670  ;;  %v3728_v26 = vpop.permute.xlu0 %3727 }
 0x5d9   : > { %3688 = vst.msk [vmem:[#allocation6 + $0x70] sm:$0xff] %vm3680_vm5, %v3671_v46 }
 0x5da   : > { %3745 = vst.msk [vmem:[#allocation6 + $0x70] sm:$0xff] %vm3737_vm6, %v3728_v26 }
 0x5dc   : > { %v3777_v4 = vpop.permute.xlu1 %3776 }
 0x5dd   : > { %3794 = vst.msk [vmem:[#allocation6 + $0x70] sm:$0xff] %vm3786_vm7, %v3777_v4  ;;  %v3831_v62 = vld [vmem:[#allocation6 + $0x60] sm:$0xff] }
 0x5de   : > { %3979 = vmatmul.mubr.f32.gmra.mrb[44].mxu0 %v3831_v62  ;;  %v4035_v62 = vmax.f32 %v4033_v49, %v4034_v31 }
 0x5df   : > { %6914 = vmatprep.mubr.msk.f32.mxu0 %vm3004_vm14, %v3834_v19 }
 0x5e4   : > { %v3833_v50 = vld [vmem:[#allocation6 + $0x70] sm:$0xff] }
 0x5e5   : > { %3984 = vmatmul.mubr.f32.gmra.mrb[46].mxu0 %v3833_v50 }
 0x661   : > { %v3950_v47 = vpop.f32.mrb[32].mxu0 }
 0x662   : > { %v3951_v29 = vadd.f32 %v6906_v18, %v3950_v47  ;;  %v3952_v54 = vpop.f32.mrb[33].mxu0 }
 0x664   : > { %v3989_v5 = vmax.f32 %v3951_v29, 0.0 }
 0x666   : > { %3998 = vst.msk [vmem:[#allocation7] sm:$0xff] %vm3997_vm8, %v3989_v5 }
 0x66d   : > { %v4009_v21 = vld [vmem:[#allocation7] sm:$0xff] }
 0x66f   : > { %v3955_v44 = vpop.f32.mrb[34].mxu0 }
 0x670   : > { %v3956_v22 = vadd.f32 %v6906_v18, %v3955_v44  ;;  %v3957_v16 = vpop.f32.mrb[35].mxu0 }
 0x672   : > { %v3990_v43 = vmax.f32 %v3956_v22, 0.0 }
 0x674   : > { %3999 = vst.msk [vmem:[#allocation7 + $0x8] sm:$0xff] %vm3997_vm8, %v3990_v43  ;;  %v4045_v43 = vld [vmem:[#allocation11 + $0x8] sm:$0xff] }
 0x67b   : > { %v4010_v17 = vld [vmem:[#allocation7 + $0x8] sm:$0xff] }
 0x67c   : > { %v4017_v32 = vld [vmem:[#allocation7 + $0x1] sm:$0xff] }
 0x67d   : > { %v3960_v3 = vpop.f32.mrb[36].mxu0  ;;  %v4025_v28 = vmax.f32 %v4009_v21, %v4017_v32  ;;  %v4215_v21 = vld [vmem:[#allocation13 + $0x8] sm:$0xff] }
 0x67e   : > { %v3961_v39 = vadd.f32 %v6906_v18, %v3960_v3  ;;  %v3962_v11 = vpop.f32.mrb[37].mxu0  ;;  %v4128_v3 = vld [vmem:[%s11351_s9] sm:$0xf] }
 0x67f   : > { %v10432_v11 = vld [vmem:[#allocation13 + $0x10] sm:$0xff] }
 0x680   : > { %v3991_v56 = vmax.f32 %v3961_v39, 0.0  ;;  %v10428_v39 = vld [vmem:[#allocation13] sm:$0xff] }
 0x681   : > { %4230 = vrot.lane.b32.xlu1 %v10428_v39, %s8512_s26 }
 0x682   : > { %4000 = vst.msk [vmem:[#allocation7 + $0x10] sm:$0xff] %vm3997_vm8, %v3991_v56  ;;  %v10436_v56 = vld [vmem:[#allocation13 + $0x20] sm:$0xff] }
 0x685   : > { %4234 = vrot.lane.b32.xlu1 %v10432_v11, %s8512_s26 }
 0x689   : > { %v4018_v2 = vld [vmem:[#allocation7 + $0x9] sm:$0xff]  ;;  %4238 = vrot.lane.b32.xlu1 %v10436_v56, %s8512_s26 }
 0x68a   : > { %v4026_v41 = vmax.f32 %v4010_v17, %v4018_v2  ;;  %v4011_v7 = vld [vmem:[#allocation7 + $0x10] sm:$0xff] }
 0x68b   : > { %v3965_v52 = vpop.f32.mrb[38].mxu0 }
 0x68c   : > { %v3966_v55 = vadd.f32 %v6906_v18, %v3965_v52  ;;  %v3967_v59 = vpop.f32.mrb[39].mxu0  ;;  %v4036_v34 = vmax.f32 %v4025_v28, %v4026_v41  ;;  %v10440_v52 = vld [vmem:[#allocation13 + $0x30] sm:$0xff]  ;;  %v4221_v28 = vld [vmem:[#allocation13 + $0x38] sm:$0xff] }
 0x68d   : > { %4242 = vrot.lane.b32.xlu1 %v10440_v52, %s8512_s26 }
 0x68e   : > { %v3992_v35 = vmax.f32 %v3966_v55, 0.0 }
 0x690   : > { %4001 = vst.msk [vmem:[#allocation7 + $0x18] sm:$0xff] %vm3997_vm8, %v3992_v35 }
 0x697   : > { %v4019_v51 = vld [vmem:[#allocation7 + $0x11] sm:$0xff] }
 0x698   : > { %v4027_v24 = vmax.f32 %v4011_v7, %v4019_v51  ;;  %v4012_v14 = vld [vmem:[#allocation7 + $0x18] sm:$0xff]  ;;  %v4219_v51 = vld [vmem:[#allocation13 + $0x28] sm:$0xff] }
 0x699   : > { %v3970_v9 = vpop.f32.mrb[40].mxu0  ;;  %v4217_v7 = vld [vmem:[#allocation13 + $0x18] sm:$0xff] }
 0x69a   : > { %v4037_v40 = vmax.f32 %v4026_v41, %v4027_v24  ;;  %v3971_v58 = vadd.f32 %v6906_v18, %v3970_v9  ;;  %v3972_v33 = vpop.f32.mrb[41].mxu0 }
 0x69c   : > { %v7884_v6 = vpack.c.bf16 %v4037_v40, %v4036_v34  ;;  %v3993_v10 = vmax.f32 %v3971_v58, 0.0 }
 0x69e   : > { %7885 = vmatprep.subr.bf16.mxu1 %v7884_v6  ;;  %4002 = vst.msk [vmem:[#allocation7 + $0x20] sm:$0xff] %vm3997_vm8, %v3993_v10 }
 0x69f   : > { %7887 = vmatpush3.bf16.msra.mxu1 %v7884_v6 }
 0x6a5   : > { %v4020_v15 = vld [vmem:[#allocation7 + $0x19] sm:$0xff] }
 0x6a6   : > { %v4028_v45 = vmax.f32 %v4012_v14, %v4020_v15  ;;  %v4013_v38 = vld [vmem:[#allocation7 + $0x20] sm:$0xff] }
 0x6a7   : > { %v3975_v27 = vpop.f32.mrb[42].mxu0 }
 0x6a8   : > { %v3976_v20 = vadd.f32 %v6906_v18, %v3975_v27  ;;  %v3977_v63 = vpop.f32.mrb[43].mxu0  ;;  %v4038_v53 = vmax.f32 %v4027_v24, %v4028_v45 }
 0x6aa   : > { %v3994_v36 = vmax.f32 %v3976_v20, 0.0 }
 0x6ac   : > { %4003 = vst.msk [vmem:[#allocation7 + $0x28] sm:$0xff] %vm3997_vm8, %v3994_v36 }
 0x6b1   : > { %v3980_v61 = vpop.f32.mrb[44].mxu0 }
 0x6b2   : > { %v3981_v30 = vadd.f32 %v6906_v18, %v3980_v61  ;;  %v3982_v8 = vpop.f32.mrb[45].mxu0 }
 0x6b3   : > { %v4021_v23 = vld [vmem:[#allocation7 + $0x21] sm:$0xff] }
 0x6b4   : > { %v4029_v25 = vmax.f32 %v4013_v38, %v4021_v23  ;;  %v3995_v37 = vmax.f32 %v3981_v30, 0.0  ;;  %v4014_v46 = vld [vmem:[#allocation7 + $0x28] sm:$0xff] }
 0x6b6   : > { %v4039_v1 = vmax.f32 %v4028_v45, %v4029_v25  ;;  %4004 = vst.msk [vmem:[#allocation7 + $0x30] sm:$0xff] %vm3997_vm8, %v3995_v37 }
 0x6b8   : > { %v7888_v57 = vpack.c.bf16 %v4039_v1, %v4038_v53  ;;  %v3985_v0 = vpop.f32.mrb[46].mxu0 }
 0x6b9   : > { %v3986_v48 = vadd.f32 %v6906_v18, %v3985_v0  ;;  %v3987_v42 = vpop.f32.mrb[47].mxu0 }
 0x6ba   : > { %7889 = vmatprep.subr.bf16.mxu1 %v7888_v57 }
 0x6bb   : > { %7891 = vmatpush3.bf16.msra.mxu1 %v7888_v57  ;;  %v3996_v60 = vmax.f32 %v3986_v48, 0.0 }
 0x6bd   : > { %4005 = vst.msk [vmem:[#allocation7 + $0x38] sm:$0xff] %vm3997_vm8, %v3996_v60  ;;  %v4022_v13 = vld [vmem:[#allocation7 + $0x29] sm:$0xff] }
 0x6be   : > { %v4015_v26 = vld [vmem:[#allocation7 + $0x30] sm:$0xff]  ;;  %v4030_v4 = vmax.f32 %v4014_v46, %v4022_v13 }
 0x6c0   : > { %v4040_v54 = vmax.f32 %v4029_v25, %v4030_v4 }
 0x6c4   : > { %v4023_v19 = vld [vmem:[#allocation7 + $0x31] sm:$0xff]  ;;  %v4024_v12 = vld [vmem:[#allocation7 + $0x39] sm:$0xff] }
 0x6c5   : > { %v4016_v50 = vld [vmem:[#allocation7 + $0x38] sm:$0xff]  ;;  %v4031_v47 = vmax.f32 %v4015_v26, %v4023_v19  ;;  %v4822_v19 = vld [vmem:[%s11354_s12 + $0x8] sm:$0xff] }
 0x6c6   : > { %v4032_v29 = vmax.f32 %v4016_v50, %v4024_v12  ;;  %v4952_v12 = vld [vmem:[%s11356_s14] sm:$0xff] }
 0x6c7   : > { %v4041_v18 = vmax.f32 %v4030_v4, %v4031_v47 }
 0x6c8   : > { %v4042_v5 = vmax.f32 %v4031_v47, %v4032_v29  ;;  %v4043_v44 = vmax.f32 %v4032_v29, %v4035_v62  ;;  %v4821_v62 = vld [vmem:[%s11354_s12] sm:$0xff]  ;;  %v10525_v47 = vld [vmem:[%s11356_s14 + $0x10] sm:$0xff] }
 0x6c9   : > { %v7892_v22 = vpack.c.bf16 %v4041_v18, %v4040_v54  ;;  %v7916_v50 = vpack.c.bf16 %v4822_v19, %v4821_v62  ;;  %v10533_v29 = vld [vmem:[%s11356_s14 + $0x20] sm:$0xff]  ;;  %v10538_v54 = vld [vmem:[%s11356_s14 + $0x30] sm:$0xff] }
 0x6ca   : > { %v7896_v16 = vpack.c.bf16 %v4043_v44, %v4042_v5  ;;  %v10547_v18 = vld [vmem:[%s11356_s14 + $0x40] sm:$0xff]  ;;  %v10552_v5 = vld [vmem:[%s11356_s14 + $0x50] sm:$0xff] }
 0x6cb   : > { %7893 = vmatprep.subr.bf16.mxu1 %v7892_v22  ;;  %7917 = vmatprep.subr.bf16.mxu0 %v7916_v50  ;;  %v10561_v44 = vld [vmem:[%s11356_s14 + $0x60] sm:$0xff]  ;;  %v4973_v19 = vld [vmem:[%s11356_s14 + $0x150] sm:$0xff] }
 0x6cc   : > { %7895 = vmatpush3.bf16.msra.mxu1 %v7892_v22  ;;  %7919 = vmatpush3.bf16.msra.mxu0 %v7916_v50  ;;  %v10566_v22 = vld [vmem:[%s11356_s14 + $0x70] sm:$0xff]  ;;  %v4970_v62 = vld [vmem:[%s11356_s14 + $0x120] sm:$0xff] }
 0x6cd   : > { %7897 = vmatprep.subr.bf16.mxu1 %v7896_v16  ;;  %v4972_v50 = vld [vmem:[%s11356_s14 + $0x140] sm:$0xff] }
 0x6d0   : > { %7899 = vmatpush3.bf16.msra.mxu1 %v7896_v16 }
 0x6d1   : > { %7478 = vmatprep.subr.msk.mxu1 %vm4135_vm11, %v4128_v3 }
 0x6d3   : > { %7476 = vmatmul.mubr.msk.f32.vlgmr.msra.gmra.mrb[16].mxu1 %vm4046_vm10, %v4045_v43 }
 0x6d4   : > { %7479 = vmatpush3.msk.msra.mxu1 %vm4135_vm11, %v4128_v3 }
 0x6f3   : > { %v4231_v35 = vpop.permute.xlu1 %4230 }
 0x6f7   : > { %v4235_v24 = vpop.permute.xlu1 %4234 }
 0x6fb   : > { %v4239_v9 = vpop.permute.xlu1 %4238 }
 0x6ff   : > { %v4243_v34 = vpop.permute.xlu1 %4242 }
 0x7a6   : > { %v7477_v55 = vpop.f32.mrb[16].mxu1 }
 0x7a7   : > { %v4119_v59 = vpop.f32.mrb[17].mxu1 }
 0x7a8   : > { %7480 = vmatprep.mubr.msk.f32.mxu1 %vm3997_vm8, %v4119_v59 }
 0x7a9   : > { %7481 = vmatmul.mubr.msk.f32.vlgmr.msra.gmra.mrb[18].mxu1 %vm3997_vm8, %v7477_v55 }
 0x7aa   : > { %7487 = vmatprep.mubr.msk.f32.mxu1 %vm3004_vm14, %v4231_v35 }
 0x87c   : > { %v7482_v2 = vpop.f32.mrb[18].mxu1 }
 0x87d   : > { %v4205_v17 = vpop.f32.mrb[19].mxu1 }
 0x87e   : > { %v8194_v32 = vpack.i.bf16 %v7482_v2, %v4205_v17  ;;  %v7904_v41 = vpack.c.bf16 %v7482_v2, %v4205_v17 }
 0x880   : > { %8190 = vrot.lane.b32.xlu1 %v8194_v32, %s8514_s13  ;;  %8185 = vrot.lane.b32.xlu0 %v8194_v32, %s8512_s26 }
 0x884   : > { %4232 = vrot.lane.b32.xlu0 %v4215_v21, %s8512_s26  ;;  %4498 = vrot.lane.b32.xlu1 %v4215_v21, %s8514_s13 }
 0x888   : > { %4236 = vrot.lane.b32.xlu0 %v4217_v7, %s8512_s26  ;;  %4502 = vrot.lane.b32.xlu1 %v4217_v7, %s8514_s13 }
 0x88c   : > { %4240 = vrot.lane.b32.xlu0 %v4219_v51, %s8512_s26  ;;  %4506 = vrot.lane.b32.xlu1 %v4219_v51, %s8514_s13 }
 0x890   : > { %4244 = vrot.lane.b32.xlu0 %v4221_v28, %s8512_s26  ;;  %4508 = vrot.lane.b32.xlu1 %v10440_v52, %s8514_s13 }
 0x894   : > { %4496 = vrot.lane.b32.xlu0 %v10428_v39, %s8514_s13  ;;  %4647 = vrot.lane.b32.xlu1 %v10428_v39, %s8513_s10 }
 0x898   : > { %4500 = vrot.lane.b32.xlu0 %v10432_v11, %s8514_s13  ;;  %4651 = vrot.lane.b32.xlu1 %v10432_v11, %s8513_s10 }
 0x89c   : > { %4504 = vrot.lane.b32.xlu0 %v10436_v56, %s8514_s13  ;;  %4655 = vrot.lane.b32.xlu1 %v10436_v56, %s8513_s10 }
 0x8a0   : > { %8195 = vrot.lane.b32.xlu0 %v8194_v32, %s8513_s10  ;;  %4659 = vrot.lane.b32.xlu1 %v10440_v52, %s8513_s10 }
 0x8a4   : > { %4510 = vrot.lane.b32.xlu0 %v4221_v28, %s8514_s13  ;;  %5016 = vrot.lane.b32.xlu1 %v4952_v12, %s8509_s30 }
 0x8a8   : > { %4649 = vrot.lane.b32.xlu0 %v4215_v21, %s8513_s10  ;;  %5020 = vrot.lane.b32.xlu1 %v10533_v29, %s8509_s30 }
 0x8ac   : > { %4653 = vrot.lane.b32.xlu0 %v4217_v7, %s8513_s10  ;;  %5024 = vrot.lane.b32.xlu1 %v10547_v18, %s8509_s30 }
 0x8b0   : > { %4657 = vrot.lane.b32.xlu0 %v4219_v51, %s8513_s10  ;;  %5028 = vrot.lane.b32.xlu1 %v10561_v44, %s8509_s30 }
 0x8b4   : > { %4661 = vrot.lane.b32.xlu0 %v4221_v28, %s8513_s10  ;;  %s11403_s10 = sld [smem:[#allocation25_spill]] }
 0x8b8   : > { %5018 = vrot.lane.b32.xlu0 %v10525_v47, %s8509_s30 }
 0x8ba   : > { %v6952_v16 = vld [vmem:[%s11403_s10] ss:$0 sm:$0xff] }
 0x8bc   : > { %5022 = vrot.lane.b32.xlu0 %v10538_v54, %s8509_s30 }
 0x8c0   : > { %5026 = vrot.lane.b32.xlu0 %v10552_v5, %s8509_s30 }
 0x8c4   : > { %5030 = vrot.lane.b32.xlu0 %v10566_v22, %s8509_s30 }
 0x8f2   : > { %v8186_v40 = vpop.permute.xlu0 %8185  ;;  %v8191_v6 = vpop.permute.xlu1 %8190 }
 0x8f3   : > { %v8188_v58 = vunpack.i.h.bf16 %v8186_v40  ;;  %v8187_v33 = vunpack.i.l.bf16 %v8186_v40  ;;  %v8193_v20 = vunpack.i.h.bf16 %v8191_v6  ;;  %v8192_v63 = vunpack.i.l.bf16 %v8191_v6 }
 0x8f5   : > { %v7900_v10 = vpack.c.bf16 %v8188_v58, %v8187_v33  ;;  %v7908_v15 = vpack.c.bf16 %v8193_v20, %v8192_v63 }
 0x8f6   : > { %v4233_v27 = vpop.permute.xlu0 %4232  ;;  %v4499_v30 = vpop.permute.xlu1 %4498 }
 0x8f7   : > { %7901 = vmatprep.subr.bf16.mxu1 %v7900_v10 }
 0x8f8   : > { %7903 = vmatpush3.bf16.msra.mxu1 %v7900_v10  ;;  %v10587_v10 = vld [vmem:[%s11356_s14 + $0x90] sm:$0xff] }
 0x8f9   : > { %7905 = vmatprep.subr.bf16.mxu1 %v7904_v41  ;;  %5034 = vrot.lane.b32.xlu0 %v10587_v10, %s8509_s30 }
 0x8fa   : > { %v4237_v36 = vpop.permute.xlu0 %4236  ;;  %v4503_v38 = vpop.permute.xlu1 %4502 }
 0x8fb   : > { %7488 = vmatmul.mubr.msk.f32.vlgmr.msra.gmra.mrb[20].mxu1 %vm3004_vm14, %v4233_v27 }
 0x8fc   : > { %7907 = vmatpush3.bf16.msra.mxu1 %v7904_v41  ;;  %7490 = vmatprep.mubr.msk.f32.mxu1 %vm3004_vm14, %v4235_v24 }
 0x8fd   : > { %7909 = vmatprep.subr.bf16.mxu1 %v7908_v15 }
 0x8fe   : > { %v4241_v14 = vpop.permute.xlu0 %4240  ;;  %v4507_v1 = vpop.permute.xlu1 %4506 }
 0x8ff   : > { %7491 = vmatmul.mubr.msk.f32.gmra.mrb[22].mxu1 %vm3004_vm14, %v4237_v36 }
 0x900   : > { %7493 = vmatprep.mubr.msk.f32.mxu1 %vm3004_vm14, %v4239_v9 }
 0x902   : > { %v4245_v61 = vpop.permute.xlu0 %4244  ;;  %v4509_v0 = vpop.permute.xlu1 %4508 }
 0x903   : > { %7494 = vmatmul.mubr.msk.f32.gmra.mrb[24].mxu1 %vm3004_vm14, %v4241_v14 }
 0x904   : > { %7496 = vmatprep.mubr.msk.f32.mxu1 %vm3004_vm14, %v4243_v34 }
 0x906   : > { %v4497_v45 = vpop.permute.xlu0 %4496  ;;  %v4648_v42 = vpop.permute.xlu1 %4647 }
 0x907   : > { %7497 = vmatmul.mubr.msk.f32.gmra.mrb[26].mxu1 %vm3004_vm14, %v4245_v61 }
 0x908   : > { %7503 = vmatprep.mubr.msk.f32.mxu1 %vm3004_vm14, %v10428_v39 }
 0x90a   : > { %v4501_v8 = vpop.permute.xlu0 %4500  ;;  %v4652_v13 = vpop.permute.xlu1 %4651 }
 0x90b   : > { %7504 = vmatmul.mubr.msk.f32.vlgmr.msra.gmra.mrb[20].mxu1 %vm3004_vm14, %v4215_v21 }
 0x90c   : > { %7911 = vmatpush3.bf16.msra.mxu1 %v7908_v15  ;;  %7506 = vmatprep.mubr.msk.f32.mxu1 %vm3004_vm14, %v10432_v11 }
 0x90e   : > { %v4505_v23 = vpop.permute.xlu0 %4504  ;;  %v4656_v31 = vpop.permute.xlu1 %4655 }
 0x90f   : > { %7507 = vmatmul.mubr.msk.f32.gmra.mrb[22].mxu1 %vm3004_vm14, %v4217_v7 }
 0x910   : > { %7509 = vmatprep.mubr.msk.f32.mxu1 %vm3004_vm14, %v10436_v56 }
 0x912   : > { %v8196_v25 = vpop.permute.xlu0 %8195  ;;  %v4660_v26 = vpop.permute.xlu1 %4659 }
 0x913   : > { %v8198_v37 = vunpack.i.h.bf16 %v8196_v25  ;;  %v8197_v53 = vunpack.i.l.bf16 %v8196_v25  ;;  %7510 = vmatmul.mubr.msk.f32.gmra.mrb[24].mxu1 %vm3004_vm14, %v4219_v51  ;;  %v4963_v25 = vld [vmem:[%s11356_s14 + $0xb0] sm:$0xff] }
 0x914   : > { %7512 = vmatprep.mubr.msk.f32.mxu1 %vm3004_vm14, %v10440_v52 }
 0x915   : > { %v7912_v57 = vpack.c.bf16 %v8198_v37, %v8197_v53 }
 0x916   : > { %v4511_v48 = vpop.permute.xlu0 %4510  ;;  %v5017_v27 = vpop.permute.xlu1 %5016 }
 0x917   : > { %7513 = vmatmul.mubr.msk.f32.gmra.mrb[26].mxu1 %vm3004_vm14, %v4221_v28  ;;  %7913 = vmatprep.subr.bf16.mxu1 %v7912_v57 }
 0x918   : > { %7519 = vmatprep.mubr.msk.f32.mxu1 %vm3004_vm14, %v4497_v45  ;;  %v4960_v45 = vld [vmem:[%s11356_s14 + $0x80] sm:$0xff] }
 0x91a   : > { %v4650_v60 = vpop.permute.xlu0 %4649 }
 0x91b   : > { %7520 = vmatmul.mubr.msk.f32.vlgmr.msra.gmra.mrb[20].mxu1 %vm3004_vm14, %v4499_v30 }
 0x91c   : > { %7915 = vmatpush3.bf16.msra.mxu1 %v7912_v57  ;;  %7522 = vmatprep.mubr.msk.f32.mxu1 %vm3004_vm14, %v4501_v8 }
 0x91e   : > { %v4654_v49 = vpop.permute.xlu0 %4653 }
 0x91f   : > { %7523 = vmatmul.mubr.msk.f32.gmra.mrb[22].mxu1 %vm3004_vm14, %v4503_v38 }
 0x920   : > { %7525 = vmatprep.mubr.msk.f32.mxu1 %vm3004_vm14, %v4505_v23 }
 0x922   : > { %v4658_v46 = vpop.permute.xlu0 %4657 }
 0x923   : > { %7526 = vmatmul.mubr.msk.f32.gmra.mrb[24].mxu1 %vm3004_vm14, %v4507_v1 }
 0x924   : > { %7528 = vmatprep.mubr.msk.f32.mxu1 %vm3004_vm14, %v4509_v0  ;;  %v4962_v0 = vld [vmem:[%s11356_s14 + $0xa0] sm:$0xff] }
 0x926   : > { %v4662_v4 = vpop.permute.xlu0 %4661 }
 0x927   : > { %7529 = vmatmul.mubr.msk.f32.gmra.mrb[26].mxu1 %vm3004_vm14, %v4511_v48 }
 0x928   : > { %7535 = vmatprep.mubr.msk.f32.mxu1 %vm3004_vm14, %v4648_v42 }
 0x92b   : > { %7536 = vmatmul.mubr.msk.f32.vlgmr.msra.gmra.mrb[20].mxu1 %vm3004_vm14, %v4650_v60  ;;  %v4964_v60 = vld [vmem:[%s11356_s14 + $0xc0] sm:$0xff] }
 0x92c   : > { %7538 = vmatprep.mubr.msk.f32.mxu1 %vm3004_vm14, %v4652_v13  ;;  %v4965_v13 = vld [vmem:[%s11356_s14 + $0xd0] sm:$0xff] }
 0x92f   : > { %7539 = vmatmul.mubr.msk.f32.gmra.mrb[22].mxu1 %vm3004_vm14, %v4654_v49  ;;  %v4966_v49 = vld [vmem:[%s11356_s14 + $0xe0] sm:$0xff] }
 0x930   : > { %7541 = vmatprep.mubr.msk.f32.mxu1 %vm3004_vm14, %v4656_v31  ;;  %v4967_v31 = vld [vmem:[%s11356_s14 + $0xf0] sm:$0xff] }
 0x933   : > { %7542 = vmatmul.mubr.msk.f32.gmra.mrb[24].mxu1 %vm3004_vm14, %v4658_v46  ;;  %v4968_v46 = vld [vmem:[%s11356_s14 + $0x100] sm:$0xff] }
 0x934   : > { %7544 = vmatprep.mubr.msk.f32.mxu1 %vm3004_vm14, %v4660_v26  ;;  %v4969_v26 = vld [vmem:[%s11356_s14 + $0x110] sm:$0xff] }
 0x937   : > { %7545 = vmatmul.mubr.msk.f32.gmra.mrb[26].mxu1 %vm3004_vm14, %v4662_v4  ;;  %v4971_v4 = vld [vmem:[%s11356_s14 + $0x130] sm:$0xff] }
 0x938   : > { %7579 = vmatprep.mubr.msk.f32.mxu1 %vm4046_vm10, %v5017_v27  ;;  %v10898_v27 = vld [vmem:[%s11356_s14 + $0x188] sm:$0xff] }
 0x9fe   : > { %v7537_v43 = vpop.f32.mrb[20].mxu1 }
 0x9ff   : > { %v4806_v3 = vadd.f32 %v7537_v43, %v6952_v16  ;;  %v4751_v39 = vpop.f32.mrb[21].mxu1  ;;  %v4982_v43 = vld [vmem:[%s11356_s14 + $0x1e0] sm:$0xff] }
 0xa00   : > { %v4805_v11 = vadd.f32 %v6952_v16, %v4751_v39  ;;  %v10758_v39 = vld [vmem:[%s11356_s14 + $0x68] sm:$0xff] }
 0xa01   : > { %v4814_v55 = vmax.f32 %v4806_v3, 0.0  ;;  %v10748_v3 = vld [vmem:[%s11356_s14 + $0x78] sm:$0xff] }
 0xa02   : > { %v4813_v56 = vmax.f32 %v4805_v11, 0.0  ;;  %v7540_v52 = vpop.f32.mrb[22].mxu1  ;;  %v10763_v11 = vld [vmem:[%s11356_s14 + $0x98] sm:$0xff] }
 0xa03   : > { %v4808_v59 = vadd.f32 %v7540_v52, %v6952_v16  ;;  %v4761_v35 = vpop.f32.mrb[23].mxu1  ;;  %v10785_v52 = vld [vmem:[%s11356_s14 + $0xa8] sm:$0xff] }
 0xa04   : > { %v4807_v2 = vadd.f32 %v6952_v16, %v4761_v35  ;;  %7551 = vmatprep.mubr.msk.f32.mxu0 %vm3004_vm14, %v4813_v56  ;;  %v10774_v56 = vld [vmem:[%s11356_s14 + $0x88] sm:$0xff] }
 0xa05   : > { %7552 = vmatmul.mubr.msk.f32.vlgmr.msra.gmra.mrb[48].mxu0 %vm3004_vm14, %v4814_v55  ;;  %v4816_v41 = vmax.f32 %v4808_v59, 0.0  ;;  %v10790_v55 = vld [vmem:[%s11356_s14 + $0xb8] sm:$0xff]  ;;  %v5690_v59 = vld [vmem:[%s11356_s14 + $0x8] sm:$0xff] }
 0xa06   : > { %v4815_v17 = vmax.f32 %v4807_v2, 0.0  ;;  %v7543_v32 = vpop.f32.mrb[24].mxu1  ;;  %v10804_v35 = vld [vmem:[%s11356_s14 + $0xc8] sm:$0xff]  ;;  %v10809_v2 = vld [vmem:[%s11356_s14 + $0xd8] sm:$0xff] }
 0xa07   : > { %v4810_v21 = vadd.f32 %v7543_v32, %v6952_v16  ;;  %v4771_v7 = vpop.f32.mrb[25].mxu1  ;;  %v10823_v32 = vld [vmem:[%s11356_s14 + $0xf8] sm:$0xff] }
 0xa08   : > { %v4809_v51 = vadd.f32 %v6952_v16, %v4771_v7  ;;  %7554 = vmatprep.mubr.msk.f32.mxu0 %vm3004_vm14, %v4815_v17  ;;  %v10818_v17 = vld [vmem:[%s11356_s14 + $0xe8] sm:$0xff]  ;;  %v10839_v7 = vld [vmem:[%s11356_s14 + $0x118] sm:$0xff] }
 0xa09   : > { %7555 = vmatmul.mubr.msk.f32.gmra.mrb[50].mxu0 %vm3004_vm14, %v4816_v41  ;;  %v4818_v9 = vmax.f32 %v4810_v21, 0.0  ;;  %v10829_v41 = vpop.permute.xlu0 %5018  ;;  %v10834_v21 = vld [vmem:[%s11356_s14 + $0x108] sm:$0xff] }
 0xa0a   : > { %v4817_v28 = vmax.f32 %v4809_v51, 0.0  ;;  %v7546_v24 = vpop.f32.mrb[26].mxu1  ;;  %v10848_v51 = vld [vmem:[%s11356_s14 + $0x128] sm:$0xff] }
 0xa0b   : > { %v4812_v34 = vadd.f32 %v7546_v24, %v6952_v16  ;;  %v4781_v40 = vpop.f32.mrb[27].mxu1 }
 0xa0c   : > { %v4811_v58 = vadd.f32 %v6952_v16, %v4781_v40  ;;  %7557 = vmatprep.mubr.msk.f32.mxu0 %vm3004_vm14, %v4817_v28  ;;  %v4983_v16 = vld [vmem:[%s11356_s14 + $0x1f0] sm:$0xff]  ;;  %v10853_v28 = vld [vmem:[%s11356_s14 + $0x138] sm:$0xff] }
 0xa0d   : > { %7558 = vmatmul.mubr.msk.f32.gmra.mrb[52].mxu0 %vm3004_vm14, %v4818_v9  ;;  %v4820_v6 = vmax.f32 %v4812_v34, 0.0  ;;  %v10855_v24 = vpop.permute.xlu0 %5022  ;;  %v10861_v9 = vpop.permute.xlu1 %5020  ;;  %v10866_v34 = vld [vmem:[%s11356_s14 + $0x148] sm:$0xff]  ;;  %v10871_v40 = vld [vmem:[%s11356_s14 + $0x158] sm:$0xff] }
 0xa0e   : > { %v4819_v33 = vmax.f32 %v4811_v58, 0.0 }
 0xa10   : > { %7560 = vmatprep.mubr.msk.f32.mxu0 %vm3004_vm14, %v4819_v33  ;;  %v10882_v33 = vld [vmem:[%s11356_s14 + $0x168] sm:$0xff] }
 0xa11   : > { %7561 = vmatmul.mubr.msk.f32.gmra.mrb[54].mxu0 %vm3004_vm14, %v4820_v6  ;;  %v10877_v58 = vpop.permute.xlu0 %5026  ;;  %v10887_v6 = vld [vmem:[%s11356_s14 + $0x178] sm:$0xff] }
 0xa12   : > { %7643 = vmatprep.mubr.msk.f32.mxu0 %vm4046_vm10, %v4952_v12  ;;  %v4975_v12 = vld [vmem:[%s11356_s14 + $0x170] sm:$0xff] }
 0xad8   : > { %v7553_v20 = vpop.f32.mrb[48].mxu0 }
 0xad9   : > { %v4913_v63 = vpop.f32.mrb[49].mxu0 }
 0xada   : > { %v10592_v36 = vpack.i.bf16 %v7553_v20, %v4913_v63  ;;  %v7936_v15 = vpack.c.bf16 %v7553_v20, %v4913_v63  ;;  %v10903_v20 = vld [vmem:[%s11356_s14 + $0x198] sm:$0xff]  ;;  %v10905_v63 = vpop.permute.xlu0 %5030 }
 0xadc   : > { %8200 = vrot.lane.b32.xlu1 %v10592_v36, %s8495_s16  ;;  %v7556_v14 = vpop.f32.mrb[50].mxu0  ;;  %7937 = vmatprep.subr.bf16.mxu0 %v7936_v15 }
 0xadd   : > { %v4923_v61 = vpop.f32.mrb[51].mxu0  ;;  %7939 = vmatpush3.bf16.msra.mxu0 %v7936_v15  ;;  %v10916_v15 = vld [vmem:[%s11356_s14 + $0x1a8] sm:$0xff] }
 0xade   : > { %v10599_v30 = vpack.i.bf16 %v7556_v14, %v4923_v61  ;;  %v7940_v8 = vpack.c.bf16 %v7556_v14, %v4923_v61  ;;  %v10921_v14 = vpop.permute.xlu0 %5034  ;;  %v10926_v61 = vld [vmem:[%s11356_s14 + $0x18] sm:$0xff] }
 0xae0   : > { %5032 = vrot.lane.b32.xlu1 %v4960_v45, %s8509_s30  ;;  %8205 = vrot.lane.b32.xlu0 %v10599_v30, %s8495_s16  ;;  %v7559_v38 = vpop.f32.mrb[52].mxu0 }
 0xae1   : > { %7941 = vmatprep.subr.bf16.mxu0 %v7940_v8  ;;  %v4933_v23 = vpop.f32.mrb[53].mxu0 }
 0xae2   : > { %v10607_v37 = vpack.i.bf16 %v7559_v38, %v4933_v23  ;;  %7943 = vmatpush3.bf16.msra.mxu0 %v7940_v8  ;;  %v7944_v53 = vpack.c.bf16 %v7559_v38, %v4933_v23 }
 0xae4   : > { %5038 = vrot.lane.b32.xlu0 %v4963_v25, %s8509_s30  ;;  %8210 = vrot.lane.b32.xlu1 %v10607_v37, %s8495_s16  ;;  %v7562_v1 = vpop.f32.mrb[54].mxu0 }
 0xae5   : > { %7945 = vmatprep.subr.bf16.mxu0 %v7944_v53  ;;  %v4943_v57 = vpop.f32.mrb[55].mxu0 }
 0xae6   : > { %v10615_v48 = vpack.i.bf16 %v7562_v1, %v4943_v57  ;;  %7947 = vmatpush3.bf16.msra.mxu0 %v7944_v53  ;;  %v7948_v42 = vpack.c.bf16 %v7562_v1, %v4943_v57  ;;  %v10947_v1 = vld [vmem:[%s11356_s14 + $0x1c8] sm:$0xff] }
 0xae8   : > { %5036 = vrot.lane.b32.xlu1 %v4962_v0, %s8509_s30  ;;  %8220 = vrot.lane.b32.xlu0 %v10615_v48, %s8495_s16  ;;  %s11404_s16 = sld [smem:[#allocation26_spill]] }
 0xae9   : > { %7949 = vmatprep.subr.bf16.mxu0 %v7948_v42 }
 0xaea   : > { %7951 = vmatpush3.bf16.msra.mxu0 %v7948_v42  ;;  %v10956_v42 = vld [vmem:[%s11356_s14 + $0x38] sm:$0xff] }
 0xaec   : > { %8215 = vrot.lane.b32.xlu1 %v10592_v36, %s8515_s20  ;;  %5040 = vrot.lane.b32.xlu0 %v4964_v60, %s8509_s30 }
 0xaed   : > { %7644 = vmatmul.mubr.msk.f32.vlgmr.msra.gmra.mrb[56].mxu0 %vm4046_vm10, %v10525_v47  ;;  %v4974_v47 = vld [vmem:[%s11356_s14 + $0x160] sm:$0xff] }
 0xaee   : > { %7646 = vmatprep.mubr.msk.f32.mxu0 %vm4046_vm10, %v10533_v29  ;;  %v4976_v29 = vld [vmem:[%s11356_s14 + $0x180] sm:$0xff]  ;;  %s11222_s10 = scalar_lea.vmem %s11404_s16, %s7092_s27 }
 0xaf0   : > { %5042 = vrot.lane.b32.xlu1 %v4965_v13, %s8509_s30  ;;  %8225 = vrot.lane.b32.xlu0 %v10599_v30, %s8515_s20 }
 0xaf1   : > { %7647 = vmatmul.mubr.msk.f32.gmra.mrb[58].mxu0 %vm4046_vm10, %v10538_v54  ;;  %v4977_v54 = vld [vmem:[%s11356_s14 + $0x190] sm:$0xff] }
 0xaf2   : > { %7649 = vmatprep.mubr.msk.f32.mxu0 %vm4046_vm10, %v10547_v18  ;;  %v4978_v18 = vld [vmem:[%s11356_s14 + $0x1a0] sm:$0xff] }
 0xaf4   : > { %5044 = vrot.lane.b32.xlu1 %v4966_v49, %s8509_s30  ;;  %5046 = vrot.lane.b32.xlu0 %v4967_v31, %s8509_s30 }
 0xaf5   : > { %7650 = vmatmul.mubr.msk.f32.gmra.mrb[60].mxu0 %vm4046_vm10, %v10552_v5  ;;  %v4979_v5 = vld [vmem:[%s11356_s14 + $0x1b0] sm:$0xff] }
 0xaf6   : > { %7652 = vmatprep.mubr.msk.f32.mxu0 %vm4046_vm10, %v10561_v44  ;;  %v4980_v44 = vld [vmem:[%s11356_s14 + $0x1c0] sm:$0xff] }
 0xaf8   : > { %8230 = vrot.lane.b32.xlu1 %v10607_v37, %s8515_s20  ;;  %5048 = vrot.lane.b32.xlu0 %v4968_v46, %s8509_s30 }
 0xaf9   : > { %7653 = vmatmul.mubr.msk.f32.gmra.mrb[62].mxu0 %vm4046_vm10, %v10566_v22  ;;  %v4981_v22 = vld [vmem:[%s11356_s14 + $0x1d0] sm:$0xff] }
 0xafa   : > { %7655 = vmatprep.mubr.msk.f32.mxu0 %vm4046_vm10, %v4960_v45  ;;  %v10931_v45 = vld [vmem:[%s11356_s14 + $0x1b8] sm:$0xff] }
 0xafc   : > { %5050 = vrot.lane.b32.xlu1 %v4969_v26, %s8509_s30  ;;  %5054 = vrot.lane.b32.xlu0 %v4971_v4, %s8509_s30 }
 0xafd   : > { %7656 = vmatmul.mubr.msk.f32.gmra.mrb[64].mxu0 %vm4046_vm10, %v10587_v10  ;;  %v10889_v10 = vpop.permute.xlu1 %5024 }
 0xafe   : > { %7658 = vmatprep.mubr.msk.f32.mxu0 %vm4046_vm10, %v4962_v0 }
 0xb00   : > { %5052 = vrot.lane.b32.xlu1 %v4970_v62, %s8509_s30  ;;  %5058 = vrot.lane.b32.xlu0 %v4973_v19, %s8509_s30 }
 0xb01   : > { %7659 = vmatmul.mubr.msk.f32.gmra.mrb[66].mxu0 %vm4046_vm10, %v4963_v25  ;;  %v10940_v25 = vld [vmem:[%s11356_s14 + $0x28] sm:$0xff] }
 0xb02   : > { %7661 = vmatprep.mubr.msk.f32.mxu0 %vm4046_vm10, %v4964_v60 }
 0xb04   : > { %5056 = vrot.lane.b32.xlu1 %v4972_v50, %s8509_s30  ;;  %5062 = vrot.lane.b32.xlu0 %v4975_v12, %s8509_s30 }
 0xb05   : > { %7662 = vmatmul.mubr.msk.f32.gmra.mrb[68].mxu0 %vm4046_vm10, %v4965_v13 }
 0xb06   : > { %7664 = vmatprep.mubr.msk.f32.mxu0 %vm4046_vm10, %v4966_v49  ;;  %v10963_v49 = vld [vmem:[%s11356_s14 + $0x1d8] sm:$0xff] }
 0xb08   : > { %5060 = vrot.lane.b32.xlu1 %v4974_v47, %s8509_s30  ;;  %5064 = vrot.lane.b32.xlu0 %v4976_v29, %s8509_s30 }
 0xb09   : > { %7665 = vmatmul.mubr.msk.f32.gmra.mrb[70].mxu0 %vm4046_vm10, %v4967_v31 }
 0xb0a   : > { %7667 = vmatprep.mubr.msk.f32.mxu0 %vm4046_vm10, %v4968_v46 }
 0xb0c   : > { %8235 = vrot.lane.b32.xlu1 %v10592_v36, %s8516_s29  ;;  %8240 = vrot.lane.b32.xlu0 %v10599_v30, %s8516_s29  ;;  %v10911_v36 = vpop.permute.xlu1 %5028 }
 0xb0d   : > { %7668 = vmatmul.mubr.msk.f32.gmra.mrb[72].mxu0 %vm4046_vm10, %v4969_v26 }
 0xb0e   : > { %7670 = vmatprep.mubr.msk.f32.mxu0 %vm4046_vm10, %v4970_v62 }
 0xb10   : > { %5066 = vrot.lane.b32.xlu1 %v4977_v54, %s8509_s30  ;;  %8245 = vrot.lane.b32.xlu0 %v10615_v48, %s8515_s20 }
 0xb11   : > { %7671 = vmatmul.mubr.msk.f32.gmra.mrb[74].mxu0 %vm4046_vm10, %v4971_v4  ;;  %v10972_v4 = vld [vmem:[%s11356_s14 + $0x48] sm:$0xff] }
 0xb12   : > { %7673 = vmatprep.mubr.msk.f32.mxu0 %vm4046_vm10, %v4972_v50  ;;  %v10977_v50 = vld [vmem:[%s11356_s14 + $0x1e8] sm:$0xff] }
 0xb14   : > { %5068 = vrot.lane.b32.xlu1 %v4978_v18, %s8509_s30  ;;  %5070 = vrot.lane.b32.xlu0 %v4979_v5, %s8509_s30 }
 0xb15   : > { %7674 = vmatmul.mubr.msk.f32.gmra.mrb[76].mxu0 %vm4046_vm10, %v4973_v19 }
 0xb16   : > { %7676 = vmatprep.mubr.msk.f32.mxu0 %vm4046_vm10, %v4974_v47 }
 0xb18   : > { %8250 = vrot.lane.b32.xlu1 %v10607_v37, %s8516_s29  ;;  %5072 = vrot.lane.b32.xlu0 %v4980_v44, %s8509_s30 }
 0xb19   : > { %7677 = vmatmul.mubr.msk.f32.gmra.mrb[78].mxu0 %vm4046_vm10, %v4975_v12 }
 0xb1a   : > { %7679 = vmatprep.mubr.msk.f32.mxu0 %vm4046_vm10, %v4976_v29 }
 0xb1c   : > { %5074 = vrot.lane.b32.xlu1 %v4981_v22, %s8509_s30  ;;  %5078 = vrot.lane.b32.xlu0 %v4983_v16, %s8509_s30 }
 0xb1d   : > { %7680 = vmatmul.mubr.msk.f32.gmra.mrb[80].mxu0 %vm4046_vm10, %v4977_v54  ;;  %v10986_v54 = vld [vmem:[%s11356_s14 + $0x58] sm:$0xff] }
 0xb1e   : > { %7682 = vmatprep.mubr.msk.f32.mxu0 %vm4046_vm10, %v4978_v18 }
 0xb20   : > { %5076 = vrot.lane.b32.xlu1 %v4982_v43, %s8509_s30  ;;  %6113 = vrot.lane.b32.xlu0 %v10748_v3, %s8509_s30 }
 0xb21   : > { %7683 = vmatmul.mubr.msk.f32.gmra.mrb[82].mxu0 %vm4046_vm10, %v4979_v5 }
 0xb22   : > { %7685 = vmatprep.mubr.msk.f32.mxu0 %vm4046_vm10, %v4980_v44  ;;  %v10991_v44 = vld [vmem:[%s11356_s14 + $0x1f8] sm:$0xff] }
 0xb24   : > { %6111 = vrot.lane.b32.xlu1 %v10758_v39, %s8509_s30  ;;  %6117 = vrot.lane.b32.xlu0 %v10763_v11, %s8509_s30 }
 0xb25   : > { %7686 = vmatmul.mubr.msk.f32.gmra.mrb[84].mxu0 %vm4046_vm10, %v4981_v22 }
 0xb26   : > { %7688 = vmatprep.mubr.msk.f32.mxu0 %vm4046_vm10, %v4982_v43 }
 0xb28   : > { %6115 = vrot.lane.b32.xlu1 %v10774_v56, %s8509_s30  ;;  %8255 = vrot.lane.b32.xlu0 %v10615_v48, %s8516_s29 }
 0xb29   : > { %7689 = vmatmul.mubr.msk.f32.gmra.mrb[86].mxu0 %vm4046_vm10, %v4983_v16 }
 0xb2a   : > { %7707 = vmatprep.mubr.msk.f32.mxu0 %vm4046_vm10, %v5690_v59 }
 0xb2c   : > { %6119 = vrot.lane.b32.xlu1 %v10785_v52, %s8509_s30  ;;  %6121 = vrot.lane.b32.xlu0 %v10790_v55, %s8509_s30 }
 0xb30   : > { %6123 = vrot.lane.b32.xlu1 %v10804_v35, %s8509_s30  ;;  %6125 = vrot.lane.b32.xlu0 %v10809_v2, %s8509_s30 }
 0xb34   : > { %6127 = vrot.lane.b32.xlu1 %v10818_v17, %s8509_s30  ;;  %6129 = vrot.lane.b32.xlu0 %v10823_v32, %s8509_s30 }
 0xb38   : > { %6131 = vrot.lane.b32.xlu1 %v10834_v21, %s8509_s30  ;;  %6133 = vrot.lane.b32.xlu0 %v10839_v7, %s8509_s30 }
 0xb3c   : > { %6135 = vrot.lane.b32.xlu1 %v10848_v51, %s8509_s30  ;;  %6137 = vrot.lane.b32.xlu0 %v10853_v28, %s8509_s30 }
 0xb40   : > { %6139 = vrot.lane.b32.xlu1 %v10866_v34, %s8509_s30  ;;  %6141 = vrot.lane.b32.xlu0 %v10871_v40, %s8509_s30 }
 0xb44   : > { %6143 = vrot.lane.b32.xlu1 %v10882_v33, %s8509_s30  ;;  %6145 = vrot.lane.b32.xlu0 %v10887_v6, %s8509_s30 }
 0xb48   : > { %6147 = vrot.lane.b32.xlu1 %v10898_v27, %s8509_s30  ;;  %6149 = vrot.lane.b32.xlu0 %v10903_v20, %s8509_s30 }
 0xb4c   : > { %6099 = vrot.lane.b32.xlu1 %v5690_v59, %s8509_s30  ;;  %6151 = vrot.lane.b32.xlu0 %v10916_v15, %s8509_s30 }
 0xb4e   : > { %v8201_v30 = vpop.permute.xlu1 %8200 }
 0xb4f   : > { %v8203_v8 = vunpack.i.h.bf16 %v8201_v30  ;;  %v8202_v38 = vunpack.i.l.bf16 %v8201_v30 }
 0xb50   : > { %6101 = vrot.lane.b32.xlu1 %v10926_v61, %s8509_s30  ;;  %6153 = vrot.lane.b32.xlu0 %v10931_v45, %s8509_s30 }
 0xb51   : > { %v7920_v23 = vpack.c.bf16 %v8203_v8, %v8202_v38 }
 0xb52   : > { %v10942_v37 = vpop.permute.xlu1 %5032  ;;  %v8206_v53 = vpop.permute.xlu0 %8205 }
 0xb53   : > { %v8208_v57 = vunpack.i.h.bf16 %v8206_v53  ;;  %v8207_v0 = vunpack.i.l.bf16 %v8206_v53  ;;  %7921 = vmatprep.subr.bf16.mxu1 %v7920_v23 }
 0xb54   : > { %7923 = vmatpush3.bf16.msra.mxu1 %v7920_v23  ;;  %6103 = vrot.lane.b32.xlu1 %v10940_v25, %s8509_s30 }
 0xb55   : > { %v7924_v48 = vpack.c.bf16 %v8208_v57, %v8207_v0  ;;  %6155 = vrot.lane.b32.xlu0 %v10947_v1, %s8509_s30 }
 0xb56   : > { %v10958_v60 = vpop.permute.xlu0 %5038  ;;  %v8211_v13 = vpop.permute.xlu1 %8210 }
 0xb57   : > { %v8213_v31 = vunpack.i.h.bf16 %v8211_v13  ;;  %v8212_v46 = vunpack.i.l.bf16 %v8211_v13  ;;  %7925 = vmatprep.subr.bf16.mxu1 %v7924_v48 }
 0xb58   : > { %7927 = vmatpush3.bf16.msra.mxu1 %v7924_v48  ;;  %6105 = vrot.lane.b32.xlu1 %v10956_v42, %s8509_s30 }
 0xb59   : > { %v7928_v26 = vpack.c.bf16 %v8213_v31, %v8212_v46  ;;  %6157 = vrot.lane.b32.xlu0 %v10963_v49, %s8509_s30 }
 0xb5a   : > { %v5037_v62 = vpop.permute.xlu1 %5036  ;;  %v8221_v19 = vpop.permute.xlu0 %8220 }
 0xb5b   : > { %v8223_v12 = vunpack.i.h.bf16 %v8221_v19  ;;  %v8222_v47 = vunpack.i.l.bf16 %v8221_v19  ;;  %7929 = vmatprep.subr.bf16.mxu1 %v7928_v26 }
 0xb5c   : > { %6107 = vrot.lane.b32.xlu1 %v10972_v4, %s8509_s30  ;;  %7931 = vmatpush3.bf16.msra.mxu1 %v7928_v26 }
 0xb5d   : > { %v7932_v29 = vpack.c.bf16 %v8223_v12, %v8222_v47  ;;  %6159 = vrot.lane.b32.xlu0 %v10977_v50, %s8509_s30 }
 0xb5e   : > { %v8216_v18 = vpop.permute.xlu1 %8215  ;;  %v5041_v5 = vpop.permute.xlu0 %5040 }
 0xb5f   : > { %v8218_v22 = vunpack.i.h.bf16 %v8216_v18  ;;  %v8217_v16 = vunpack.i.l.bf16 %v8216_v18  ;;  %7933 = vmatprep.subr.bf16.mxu1 %v7932_v29 }
 0xb60   : > { %6109 = vrot.lane.b32.xlu1 %v10986_v54, %s8509_s30  ;;  %7935 = vmatpush3.bf16.msra.mxu1 %v7932_v29 }
 0xb61   : > { %v7952_v43 = vpack.c.bf16 %v8218_v22, %v8217_v16  ;;  %6161 = vrot.lane.b32.xlu0 %v10991_v44, %s8509_s30 }
 0xb62   : > { %v5043_v59 = vpop.permute.xlu1 %5042  ;;  %v8226_v30 = vpop.permute.xlu0 %8225 }
 0xb63   : > { %v8228_v8 = vunpack.i.h.bf16 %v8226_v30  ;;  %v8227_v38 = vunpack.i.l.bf16 %v8226_v30  ;;  %7580 = vmatmul.mubr.msk.f32.vlgmr.msra.gmra.mrb[28].mxu1 %vm4046_vm10, %v10829_v41  ;;  %7953 = vmatprep.subr.bf16.mxu0 %v7952_v43 }
 0xb64   : > { %7582 = vmatprep.mubr.msk.f32.mxu1 %vm4046_vm10, %v10861_v9  ;;  %7955 = vmatpush3.bf16.msra.mxu0 %v7952_v43 }
 0xb65   : > { %v7956_v23 = vpack.c.bf16 %v8228_v8, %v8227_v38 }
 0xb66   : > { %v5045_v53 = vpop.permute.xlu1 %5044  ;;  %v5047_v57 = vpop.permute.xlu0 %5046 }
 0xb67   : > { %7583 = vmatmul.mubr.msk.f32.gmra.mrb[30].mxu1 %vm4046_vm10, %v10855_v24  ;;  %7957 = vmatprep.subr.bf16.mxu0 %v7956_v23 }
 0xb68   : > { %7585 = vmatprep.mubr.msk.f32.mxu1 %vm4046_vm10, %v10889_v10  ;;  %7959 = vmatpush3.bf16.msra.mxu0 %v7956_v23 }
 0xb6a   : > { %v8231_v0 = vpop.permute.xlu1 %8230  ;;  %v5049_v48 = vpop.permute.xlu0 %5048 }
 0xb6b   : > { %v8233_v13 = vunpack.i.h.bf16 %v8231_v0  ;;  %v8232_v41 = vunpack.i.l.bf16 %v8231_v0  ;;  %7586 = vmatmul.mubr.msk.f32.gmra.mrb[32].mxu1 %vm4046_vm10, %v10877_v58 }
 0xb6c   : > { %7588 = vmatprep.mubr.msk.f32.mxu1 %vm4046_vm10, %v10911_v36 }
 0xb6d   : > { %v7960_v9 = vpack.c.bf16 %v8233_v13, %v8232_v41 }
 0xb6e   : > { %v5051_v31 = vpop.permute.xlu1 %5050  ;;  %v5055_v46 = vpop.permute.xlu0 %5054 }
 0xb6f   : > { %7589 = vmatmul.mubr.msk.f32.gmra.mrb[34].mxu1 %vm4046_vm10, %v10905_v63  ;;  %7961 = vmatprep.subr.bf16.mxu0 %v7960_v9 }
 0xb70   : > { %7591 = vmatprep.mubr.msk.f32.mxu1 %vm4046_vm10, %v10942_v37  ;;  %7963 = vmatpush3.bf16.msra.mxu0 %v7960_v9 }
 0xb72   : > { %v5053_v24 = vpop.permute.xlu1 %5052  ;;  %v5059_v10 = vpop.permute.xlu0 %5058 }
 0xb73   : > { %7592 = vmatmul.mubr.msk.f32.gmra.mrb[36].mxu1 %vm4046_vm10, %v10921_v14 }
 0xb74   : > { %7594 = vmatprep.mubr.msk.f32.mxu1 %vm4046_vm10, %v5037_v62 }
 0xb76   : > { %v5057_v58 = vpop.permute.xlu1 %5056  ;;  %v5063_v36 = vpop.permute.xlu0 %5062 }
 0xb77   : > { %7595 = vmatmul.mubr.msk.f32.gmra.mrb[38].mxu1 %vm4046_vm10, %v10958_v60 }
 0xb78   : > { %7597 = vmatprep.mubr.msk.f32.mxu1 %vm4046_vm10, %v5041_v5 }
 0xb7a   : > { %v5061_v63 = vpop.permute.xlu1 %5060  ;;  %v5065_v26 = vpop.permute.xlu0 %5064 }
 0xb7b   : > { %7598 = vmatmul.mubr.msk.f32.gmra.mrb[40].mxu1 %vm4046_vm10, %v5043_v59 }
 0xb7c   : > { %7600 = vmatprep.mubr.msk.f32.mxu1 %vm4046_vm10, %v5045_v53 }
 0xb7e   : > { %v8236_v37 = vpop.permute.xlu1 %8235  ;;  %v8241_v19 = vpop.permute.xlu0 %8240 }
 0xb7f   : > { %v8238_v12 = vunpack.i.h.bf16 %v8236_v37  ;;  %v8237_v47 = vunpack.i.l.bf16 %v8236_v37  ;;  %v8243_v14 = vunpack.i.h.bf16 %v8241_v19  ;;  %v8242_v29 = vunpack.i.l.bf16 %v8241_v19  ;;  %7601 = vmatmul.mubr.msk.f32.gmra.mrb[42].mxu1 %vm4046_vm10, %v5047_v57 }
 0xb80   : > { %7603 = vmatprep.mubr.msk.f32.mxu1 %vm4046_vm10, %v5049_v48 }
 0xb81   : > { %v7968_v62 = vpack.c.bf16 %v8238_v12, %v8237_v47  ;;  %v7972_v5 = vpack.c.bf16 %v8243_v14, %v8242_v29 }
 0xb82   : > { %v5067_v60 = vpop.permute.xlu1 %5066  ;;  %v8246_v18 = vpop.permute.xlu0 %8245 }
 0xb83   : > { %v8248_v22 = vunpack.i.h.bf16 %v8246_v18  ;;  %v8247_v16 = vunpack.i.l.bf16 %v8246_v18  ;;  %7604 = vmatmul.mubr.msk.f32.gmra.mrb[44].mxu1 %vm4046_vm10, %v5051_v31  ;;  %7984 = vmatprep.subr.bf16.mxu1 %v7968_v62 }
 0xb84   : > { %7606 = vmatprep.mubr.msk.f32.mxu1 %vm4046_vm10, %v5053_v24  ;;  %7988 = vmatpush3.bf16.msra.mxu1 %v7968_v62 }
 0xb85   : > { %v7964_v43 = vpack.c.bf16 %v8248_v22, %v8247_v16  ;;  %7985 = vmatprep.subr.bf16.mxu1 %v7972_v5 }
 0xb86   : > { %v5069_v59 = vpop.permute.xlu1 %5068  ;;  %v5071_v30 = vpop.permute.xlu0 %5070 }
 0xb87   : > { %7607 = vmatmul.mubr.msk.f32.gmra.mrb[46].mxu1 %vm4046_vm10, %v5055_v46  ;;  %7965 = vmatprep.subr.bf16.mxu0 %v7964_v43 }
 0xb88   : > { %7609 = vmatprep.mubr.msk.f32.mxu1 %vm4046_vm10, %v5057_v58  ;;  %7967 = vmatpush3.bf16.msra.mxu0 %v7964_v43 }
 0xb89   : > { %7989 = vmatpush3.bf16.msra.mxu1 %v7972_v5  ;;  %7969 = vmatprep.subr.bf16.mxu0 %v7968_v62 }
 0xb8a   : > { %v8251_v8 = vpop.permute.xlu1 %8250  ;;  %v5073_v38 = vpop.permute.xlu0 %5072 }
 0xb8b   : > { %v8253_v23 = vunpack.i.h.bf16 %v8251_v8  ;;  %v8252_v53 = vunpack.i.l.bf16 %v8251_v8  ;;  %7610 = vmatmul.mubr.msk.f32.gmra.mrb[48].mxu1 %vm4046_vm10, %v5059_v10  ;;  %7708 = vmatmul.mubr.msk.f32.vlgmr.msra.gmra.mrb[56].mxu0 %vm4046_vm10, %v10926_v61 }
 0xb8c   : > { %7612 = vmatprep.mubr.msk.f32.mxu1 %vm4046_vm10, %v5061_v63  ;;  %7971 = vmatpush3.bf16.msra.mxu0 %v7968_v62 }
 0xb8d   : > { %v7976_v57 = vpack.c.bf16 %v8253_v23, %v8252_v53  ;;  %7973 = vmatprep.subr.bf16.mxu0 %v7972_v5  ;;  %7710 = vmatprep.mubr.msk.f32.mxu0 %vm4046_vm10, %v10940_v25 }
 0xb8e   : > { %v5075_v0 = vpop.permute.xlu1 %5074  ;;  %v5079_v48 = vpop.permute.xlu0 %5078 }
 0xb8f   : > { %7613 = vmatmul.mubr.msk.f32.gmra.mrb[50].mxu1 %vm4046_vm10, %v5063_v36  ;;  %7711 = vmatmul.mubr.msk.f32.gmra.mrb[58].mxu0 %vm4046_vm10, %v10956_v42 }
 0xb90   : > { %7986 = vmatprep.subr.bf16.mxu1 %v7976_v57  ;;  %7615 = vmatprep.mubr.msk.f32.mxu1 %vm4046_vm10, %v5065_v26 }
 0xb91   : > { %7975 = vmatpush3.bf16.msra.mxu0 %v7972_v5  ;;  %7990 = vmatpush3.bf16.msra.mxu1 %v7976_v57 }
 0xb92   : > { %7977 = vmatprep.subr.bf16.mxu0 %v7976_v57  ;;  %v5077_v61 = vpop.permute.xlu1 %5076  ;;  %v6114_v13 = vpop.permute.xlu0 %6113  ;;  %7713 = vmatprep.mubr.msk.f32.mxu0 %vm4046_vm10, %v10972_v4 }
 0xb93   : > { %7616 = vmatmul.mubr.msk.f32.gmra.mrb[52].mxu1 %vm4046_vm10, %v5067_v60  ;;  %7714 = vmatmul.mubr.msk.f32.gmra.mrb[60].mxu0 %vm4046_vm10, %v10986_v54 }
 0xb94   : > { %7618 = vmatprep.mubr.msk.f32.mxu1 %vm4046_vm10, %v5069_v59  ;;  %7716 = vmatprep.mubr.msk.f32.mxu0 %vm4046_vm10, %v10758_v39 }
 0xb95   : > { %7979 = vmatpush3.bf16.msra.mxu0 %v7976_v57 }
 0xb96   : > { %v6112_v25 = vpop.permute.xlu1 %6111  ;;  %v6118_v42 = vpop.permute.xlu0 %6117 }
 0xb97   : > { %7619 = vmatmul.mubr.msk.f32.gmra.mrb[54].mxu1 %vm4046_vm10, %v5071_v30  ;;  %7717 = vmatmul.mubr.msk.f32.gmra.mrb[62].mxu0 %vm4046_vm10, %v10748_v3 }
 0xb98   : > { %7621 = vmatprep.mubr.msk.f32.mxu1 %vm4046_vm10, %v5073_v38  ;;  %7719 = vmatprep.mubr.msk.f32.mxu0 %vm4046_vm10, %v10774_v56 }
 0xb9a   : > { %v6116_v4 = vpop.permute.xlu1 %6115  ;;  %v8256_v54 = vpop.permute.xlu0 %8255 }
 0xb9b   : > { %v8258_v41 = vunpack.i.h.bf16 %v8256_v54  ;;  %v8257_v9 = vunpack.i.l.bf16 %v8256_v54  ;;  %7622 = vmatmul.mubr.msk.f32.gmra.mrb[56].mxu1 %vm4046_vm10, %v5075_v0  ;;  %7720 = vmatmul.mubr.msk.f32.gmra.mrb[64].mxu0 %vm4046_vm10, %v10763_v11 }
 0xb9c   : > { %7624 = vmatprep.mubr.msk.f32.mxu1 %vm4046_vm10, %v5077_v61  ;;  %7722 = vmatprep.mubr.msk.f32.mxu0 %vm4046_vm10, %v10785_v52 }
 0xb9d   : > { %v7980_v3 = vpack.c.bf16 %v8258_v41, %v8257_v9 }
 0xb9e   : > { %v6120_v39 = vpop.permute.xlu1 %6119  ;;  %v6122_v31 = vpop.permute.xlu0 %6121 }
 0xb9f   : > { %7625 = vmatmul.mubr.msk.f32.gmra.mrb[58].mxu1 %vm4046_vm10, %v5079_v48  ;;  %7723 = vmatmul.mubr.msk.f32.gmra.mrb[66].mxu0 %vm4046_vm10, %v10790_v55 }
 0xba0   : > { %7981 = vmatprep.subr.bf16.mxu0 %v7980_v3  ;;  %7987 = vmatprep.subr.bf16.mxu1 %v7980_v3 }
 0xba1   : > { %7983 = vmatpush3.bf16.msra.mxu0 %v7980_v3  ;;  %7991 = vmatpush3.bf16.msra.mxu1 %v7980_v3 }
 0xba2   : > { %v6124_v56 = vpop.permute.xlu1 %6123  ;;  %v6126_v46 = vpop.permute.xlu0 %6125  ;;  %7725 = vmatprep.mubr.msk.f32.mxu0 %vm4046_vm10, %v10804_v35  ;;  %7780 = vmatprep.mubr.msk.f32.mxu1 %vm4046_vm10, %v6112_v25 }
 0xba3   : > { %7726 = vmatmul.mubr.msk.f32.gmra.mrb[68].mxu0 %vm4046_vm10, %v10809_v2 }
 0xba4   : > { %7781 = vmatmul.mubr.msk.f32.vlgmr.msra.gmra.mrb[60].mxu1 %vm4046_vm10, %v6114_v13  ;;  %7728 = vmatprep.mubr.msk.f32.mxu0 %vm4046_vm10, %v10818_v17 }
 0xba5   : > { %7783 = vmatprep.mubr.msk.f32.mxu1 %vm4046_vm10, %v6116_v4 }
 0xba6   : > { %v6128_v11 = vpop.permute.xlu1 %6127  ;;  %v6130_v52 = vpop.permute.xlu0 %6129 }
 0xba7   : > { %7729 = vmatmul.mubr.msk.f32.gmra.mrb[70].mxu0 %vm4046_vm10, %v10823_v32 }
 0xba8   : > { %7784 = vmatmul.mubr.msk.f32.gmra.mrb[62].mxu1 %vm4046_vm10, %v6118_v42  ;;  %7731 = vmatprep.mubr.msk.f32.mxu0 %vm4046_vm10, %v10834_v21 }
 0xba9   : > { %7786 = vmatprep.mubr.msk.f32.mxu1 %vm4046_vm10, %v6120_v39 }
 0xbaa   : > { %v6132_v55 = vpop.permute.xlu1 %6131  ;;  %v6134_v35 = vpop.permute.xlu0 %6133 }
 0xbab   : > { %7732 = vmatmul.mubr.msk.f32.gmra.mrb[72].mxu0 %vm4046_vm10, %v10839_v7 }
 0xbac   : > { %7787 = vmatmul.mubr.msk.f32.gmra.mrb[64].mxu1 %vm4046_vm10, %v6122_v31  ;;  %7734 = vmatprep.mubr.msk.f32.mxu0 %vm4046_vm10, %v10848_v51 }
 0xbad   : > { %7789 = vmatprep.mubr.msk.f32.mxu1 %vm4046_vm10, %v6124_v56 }
 0xbae   : > { %v6136_v2 = vpop.permute.xlu1 %6135  ;;  %v6138_v17 = vpop.permute.xlu0 %6137 }
 0xbaf   : > { %7735 = vmatmul.mubr.msk.f32.gmra.mrb[74].mxu0 %vm4046_vm10, %v10853_v28 }
 0xbb0   : > { %7790 = vmatmul.mubr.msk.f32.gmra.mrb[66].mxu1 %vm4046_vm10, %v6126_v46  ;;  %7737 = vmatprep.mubr.msk.f32.mxu0 %vm4046_vm10, %v10866_v34 }
 0xbb1   : > { %7792 = vmatprep.mubr.msk.f32.mxu1 %vm4046_vm10, %v6128_v11 }
 0xbb2   : > { %v6140_v32 = vpop.permute.xlu1 %6139  ;;  %v6142_v21 = vpop.permute.xlu0 %6141 }
 0xbb3   : > { %7738 = vmatmul.mubr.msk.f32.gmra.mrb[76].mxu0 %vm4046_vm10, %v10871_v40 }
 0xbb4   : > { %7793 = vmatmul.mubr.msk.f32.gmra.mrb[68].mxu1 %vm4046_vm10, %v6130_v52  ;;  %7740 = vmatprep.mubr.msk.f32.mxu0 %vm4046_vm10, %v10882_v33 }
 0xbb5   : > { %7795 = vmatprep.mubr.msk.f32.mxu1 %vm4046_vm10, %v6132_v55 }
 0xbb6   : > { %v6144_v7 = vpop.permute.xlu1 %6143  ;;  %v6146_v51 = vpop.permute.xlu0 %6145 }
 0xbb7   : > { %7741 = vmatmul.mubr.msk.f32.gmra.mrb[78].mxu0 %vm4046_vm10, %v10887_v6 }
 0xbb8   : > { %7796 = vmatmul.mubr.msk.f32.gmra.mrb[70].mxu1 %vm4046_vm10, %v6134_v35  ;;  %7743 = vmatprep.mubr.msk.f32.mxu0 %vm4046_vm10, %v10898_v27 }
 0xbb9   : > { %7798 = vmatprep.mubr.msk.f32.mxu1 %vm4046_vm10, %v6136_v2 }
 0xbba   : > { %v6148_v28 = vpop.permute.xlu1 %6147  ;;  %v6150_v34 = vpop.permute.xlu0 %6149 }
 0xbbb   : > { %7744 = vmatmul.mubr.msk.f32.gmra.mrb[80].mxu0 %vm4046_vm10, %v10903_v20 }
 0xbbc   : > { %7799 = vmatmul.mubr.msk.f32.gmra.mrb[72].mxu1 %vm4046_vm10, %v6138_v17  ;;  %7746 = vmatprep.mubr.msk.f32.mxu0 %vm4046_vm10, %v10916_v15 }
 0xbbd   : > { %7801 = vmatprep.mubr.msk.f32.mxu1 %vm4046_vm10, %v6140_v32 }
 0xbbe   : > { %v6100_v40 = vpop.permute.xlu1 %6099  ;;  %v6152_v33 = vpop.permute.xlu0 %6151 }
 0xbbf   : > { %7747 = vmatmul.mubr.msk.f32.gmra.mrb[82].mxu0 %vm4046_vm10, %v10931_v45 }
 0xbc0   : > { %7802 = vmatmul.mubr.msk.f32.gmra.mrb[74].mxu1 %vm4046_vm10, %v6142_v21  ;;  %7749 = vmatprep.mubr.msk.f32.mxu0 %vm4046_vm10, %v10947_v1  ;;  %v11172_v21 = vld [vmem:[#allocation8] ss:$0 sm:$0xff] }
 0xbc1   : > { %7804 = vmatprep.mubr.msk.f32.mxu1 %vm4046_vm10, %v6144_v7 }
 0xbc2   : > { %v6102_v6 = vpop.permute.xlu1 %6101  ;;  %v6154_v27 = vpop.permute.xlu0 %6153 }
 0xbc3   : > { %7750 = vmatmul.mubr.msk.f32.gmra.mrb[84].mxu0 %vm4046_vm10, %v10963_v49 }
 0xbc4   : > { %7805 = vmatmul.mubr.msk.f32.gmra.mrb[76].mxu1 %vm4046_vm10, %v6146_v51  ;;  %7752 = vmatprep.mubr.msk.f32.mxu0 %vm4046_vm10, %v10977_v50 }
 0xbc5   : > { %7807 = vmatprep.mubr.msk.f32.mxu1 %vm4046_vm10, %v6148_v28 }
 0xbc6   : > { %v6104_v20 = vpop.permute.xlu1 %6103 }
 0xbc7   : > { %v6156_v15 = vpop.permute.xlu0 %6155  ;;  %7753 = vmatmul.mubr.msk.f32.gmra.mrb[86].mxu0 %vm4046_vm10, %v10991_v44 }
 0xbc8   : > { %7808 = vmatmul.mubr.msk.f32.gmra.mrb[78].mxu1 %vm4046_vm10, %v6150_v34  ;;  %7771 = vmatprep.mubr.msk.f32.mxu0 %vm4046_vm10, %v6100_v40 }
 0xbc9   : > { %7810 = vmatprep.mubr.msk.f32.mxu1 %vm4046_vm10, %v6152_v33 }
 0xbca   : > { %v6106_v45 = vpop.permute.xlu1 %6105 }
 0xbcb   : > { %v6158_v1 = vpop.permute.xlu0 %6157  ;;  %7772 = vmatmul.mubr.msk.f32.vlgmr.msra.gmra.mrb[56].mxu0 %vm4046_vm10, %v6102_v6 }
 0xbcc   : > { %7811 = vmatmul.mubr.msk.f32.gmra.mrb[80].mxu1 %vm4046_vm10, %v6154_v27  ;;  %7774 = vmatprep.mubr.msk.f32.mxu0 %vm4046_vm10, %v6104_v20 }
 0xbcd   : > { %7813 = vmatprep.mubr.msk.f32.mxu1 %vm4046_vm10, %v6156_v15 }
 0xbce   : > { %v6108_v49 = vpop.permute.xlu1 %6107 }
 0xbcf   : > { %v6160_v50 = vpop.permute.xlu0 %6159  ;;  %7775 = vmatmul.mubr.msk.f32.gmra.mrb[58].mxu0 %vm4046_vm10, %v6106_v45 }
 0xbd0   : > { %7814 = vmatmul.mubr.msk.f32.gmra.mrb[82].mxu1 %vm4046_vm10, %v6158_v1  ;;  %7777 = vmatprep.mubr.msk.f32.mxu0 %vm4046_vm10, %v6108_v49 }
 0xbd1   : > { %7816 = vmatprep.mubr.msk.f32.mxu1 %vm4046_vm10, %v6160_v50 }
 0xbd2   : > { %v6110_v44 = vpop.permute.xlu1 %6109 }
 0xbd3   : > { %v6162_v24 = vpop.permute.xlu0 %6161  ;;  %7778 = vmatmul.mubr.msk.f32.gmra.mrb[60].mxu0 %vm4046_vm10, %v6110_v44 }
 0xbd4   : > { %7817 = vmatmul.mubr.msk.f32.gmra.mrb[84].mxu1 %vm4046_vm10, %v6162_v24 }
 0xc36   : > { %v11132_v10 = vpop.f32.mrb[28].mxu1 }
 0xc37   : > { %v11134_v58 = vpop.f32.mrb[29].mxu1 }
 0xc3a   : > { %v11136_v36 = vpop.f32.mrb[30].mxu1 }
 0xc3b   : > { %v11138_v63 = vpop.f32.mrb[31].mxu1 }
 0xc3e   : > { %v11140_v26 = vpop.f32.mrb[32].mxu1 }
 0xc3f   : > { %v11142_v37 = vpop.f32.mrb[33].mxu1 }
 0xc42   : > { %v7590_v19 = vpop.f32.mrb[34].mxu1 }
 0xc43   : > { %v5272_v12 = vpop.f32.mrb[35].mxu1 }
 0xc46   : > { %v7593_v47 = vpop.f32.mrb[36].mxu1 }
 0xc47   : > { %v5282_v14 = vpop.f32.mrb[37].mxu1 }
 0xc4a   : > { %v7596_v29 = vpop.f32.mrb[38].mxu1 }
 0xc4b   : > { %v5292_v62 = vpop.f32.mrb[39].mxu1 }
 0xc4e   : > { %v7599_v60 = vpop.f32.mrb[40].mxu1 }
 0xc4f   : > { %v5302_v18 = vpop.f32.mrb[41].mxu1 }
 0xc52   : > { %v7602_v5 = vpop.f32.mrb[42].mxu1 }
 0xc53   : > { %v5312_v22 = vpop.f32.mrb[43].mxu1 }
 0xc56   : > { %v7605_v16 = vpop.f32.mrb[44].mxu1 }
 0xc57   : > { %v5322_v43 = vpop.f32.mrb[45].mxu1 }
 0xc5a   : > { %v11144_v59 = vpop.f32.mrb[46].mxu1 }
 0xc5b   : > { %v11146_v30 = vpop.f32.mrb[47].mxu1 }
 0xc5e   : > { %v11148_v8 = vpop.f32.mrb[48].mxu1 }
 0xc5f   : > { %v11150_v38 = vpop.f32.mrb[49].mxu1 }
 0xc62   : > { %v11152_v23 = vpop.f32.mrb[50].mxu1 }
 0xc63   : > { %v11154_v53 = vpop.f32.mrb[51].mxu1 }
 0xc66   : > { %v11156_v57 = vpop.f32.mrb[52].mxu1 }
 0xc67   : > { %v11158_v0 = vpop.f32.mrb[53].mxu1 }
 0xc6a   : > { %v7718_v48 = vpop.f32.mrb[62].mxu0  ;;  %v11160_v61 = vpop.f32.mrb[54].mxu1 }
 0xc6b   : > { %v7998_v13 = vadd.f32 %v7718_v48, %v7590_v19  ;;  %v5938_v25 = vpop.f32.mrb[63].mxu0  ;;  %v11162_v42 = vpop.f32.mrb[55].mxu1 }
 0xc6c   : > { %v8000_v4 = vadd.f32 %v5938_v25, %v5272_v12 }
 0xc6e   : > { %v7721_v54 = vpop.f32.mrb[64].mxu0  ;;  %v11164_v41 = vpop.f32.mrb[56].mxu1 }
 0xc6f   : > { %v8002_v9 = vadd.f32 %v7721_v54, %v7593_v47  ;;  %v5948_v3 = vpop.f32.mrb[65].mxu0  ;;  %v11166_v39 = vpop.f32.mrb[57].mxu1 }
 0xc70   : > { %v8004_v31 = vadd.f32 %v5948_v3, %v5282_v14 }
 0xc72   : > { %v7724_v56 = vpop.f32.mrb[66].mxu0  ;;  %v11168_v46 = vpop.f32.mrb[58].mxu1 }
 0xc73   : > { %v8006_v11 = vadd.f32 %v7724_v56, %v7596_v29  ;;  %v5958_v52 = vpop.f32.mrb[67].mxu0  ;;  %v11170_v55 = vpop.f32.mrb[59].mxu1 }
 0xc74   : > { %v8008_v35 = vadd.f32 %v5958_v52, %v5292_v62 }
 0xc76   : > { %v7727_v2 = vpop.f32.mrb[68].mxu0 }
 0xc77   : > { %v8010_v17 = vadd.f32 %v7727_v2, %v7599_v60  ;;  %v7782_v32 = vpop.f32.mrb[60].mxu1  ;;  %v5968_v7 = vpop.f32.mrb[69].mxu0 }
 0xc78   : > { %v7999_v51 = vadd.f32 %v7998_v13, %v7782_v32  ;;  %v8012_v28 = vadd.f32 %v5968_v7, %v5302_v18  ;;  %v6347_v34 = vpop.f32.mrb[61].mxu1 }
 0xc79   : > { %v8001_v40 = vadd.f32 %v8000_v4, %v6347_v34 }
 0xc7a   : > { %v6522_v33 = vadd.f32 %v7999_v51, %v11172_v21  ;;  %v7730_v6 = vpop.f32.mrb[70].mxu0 }
 0xc7b   : > { %v6521_v27 = vadd.f32 %v8001_v40, %v11172_v21  ;;  %v8014_v20 = vadd.f32 %v7730_v6, %v7602_v5  ;;  %v7785_v15 = vpop.f32.mrb[62].mxu1  ;;  %v5978_v45 = vpop.f32.mrb[71].mxu0 }
 0xc7c   : > { %v6554_v1 = vsub.f32 0.0, %v6522_v33  ;;  %v8003_v49 = vadd.f32 %v8002_v9, %v7785_v15  ;;  %v8016_v50 = vadd.f32 %v5978_v45, %v5312_v22  ;;  %v6357_v44 = vpop.f32.mrb[63].mxu1 }
 0xc7d   : > { %v6553_v24 = vsub.f32 0.0, %v6521_v27  ;;  %v8005_v19 = vadd.f32 %v8004_v31, %v6357_v44 }
 0xc7e   : > { %v6593_v12 = vmul.f32 1.442695, %v6554_v1  ;;  %v6524_v47 = vadd.f32 %v8003_v49, %v11172_v21  ;;  %v7733_v14 = vpop.f32.mrb[72].mxu0 }
 0xc7f   : > { %v6591_v29 = vmul.f32 1.442695, %v6553_v24  ;;  %v6523_v62 = vadd.f32 %v8005_v19, %v11172_v21  ;;  %v8018_v60 = vadd.f32 %v7733_v14, %v7605_v16  ;;  %v7788_v18 = vpop.f32.mrb[64].mxu1  ;;  %v5988_v48 = vpop.f32.mrb[73].mxu0 }
 0xc80   : > { %8260 = vpow2.f32 %v6593_v12  ;;  %v6556_v5 = vsub.f32 0.0, %v6524_v47  ;;  %v8007_v13 = vadd.f32 %v8006_v11, %v7788_v18  ;;  %v8020_v25 = vadd.f32 %v5988_v48, %v5322_v43  ;;  %v6367_v4 = vpop.f32.mrb[65].mxu1 }
 0xc81   : > { %8262 = vpow2.f32 %v6591_v29  ;;  %v6555_v22 = vsub.f32 0.0, %v6523_v62  ;;  %v8009_v54 = vadd.f32 %v8008_v35, %v6367_v4 }
 0xc82   : > { %v6597_v9 = vmul.f32 1.442695, %v6556_v5  ;;  %v6526_v3 = vadd.f32 %v8007_v13, %v11172_v21  ;;  %v7736_v31 = vpop.f32.mrb[74].mxu0 }
 0xc83   : > { %v6595_v56 = vmul.f32 1.442695, %v6555_v22  ;;  %v6525_v52 = vadd.f32 %v8009_v54, %v11172_v21  ;;  %v11181_v2 = vadd.f32 %v7736_v31, %v11144_v59  ;;  %v7791_v16 = vpop.f32.mrb[66].mxu1  ;;  %v5998_v32 = vpop.f32.mrb[75].mxu0 }
 0xc84   : > { %8264 = vpow2.f32 %v6597_v9  ;;  %v6558_v7 = vsub.f32 0.0, %v6526_v3  ;;  %v8011_v11 = vadd.f32 %v8010_v17, %v7791_v16  ;;  %v11184_v43 = vadd.f32 %v5998_v32, %v11146_v30  ;;  %v6377_v51 = vpop.f32.mrb[67].mxu1 }
 0xc85   : > { %8266 = vpow2.f32 %v6595_v56  ;;  %v6557_v35 = vsub.f32 0.0, %v6525_v52  ;;  %v8013_v34 = vadd.f32 %v8012_v28, %v6377_v51 }
 0xc86   : > { %v6601_v40 = vmul.f32 1.442695, %v6558_v7  ;;  %v6528_v33 = vadd.f32 %v8011_v11, %v11172_v21  ;;  %v7739_v6 = vpop.f32.mrb[76].mxu0 }
 0xc87   : > { %v6599_v27 = vmul.f32 1.442695, %v6557_v35  ;;  %v6527_v59 = vadd.f32 %v8013_v34, %v11172_v21  ;;  %v11189_v15 = vadd.f32 %v7739_v6, %v11148_v8  ;;  %v7794_v45 = vpop.f32.mrb[68].mxu1  ;;  %v6008_v1 = vpop.f32.mrb[77].mxu0 }
 0xc88   : > { %8268 = vpow2.f32 %v6601_v40  ;;  %v6560_v17 = vsub.f32 0.0, %v6528_v33  ;;  %v8015_v30 = vadd.f32 %v8014_v20, %v7794_v45  ;;  %v11192_v49 = vadd.f32 %v6008_v1, %v11150_v38  ;;  %v6387_v44 = vpop.f32.mrb[69].mxu1 }
 0xc89   : > { %8270 = vpow2.f32 %v6599_v27  ;;  %v6559_v28 = vsub.f32 0.0, %v6527_v59  ;;  %v8017_v24 = vadd.f32 %v8016_v50, %v6387_v44 }
 0xc8a   : > { %v8261_v19 = vpop.eup %8260  ;;  %v6605_v12 = vmul.f32 1.442695, %v6560_v17  ;;  %v6530_v47 = vadd.f32 %v8015_v30, %v11172_v21  ;;  %v7742_v14 = vpop.f32.mrb[78].mxu0 }
 0xc8b   : > { %v8263_v29 = vpop.eup %8262  ;;  %v6650_v8 = vadd.f32 1.0, %v8261_v19  ;;  %v6603_v62 = vmul.f32 1.442695, %v6559_v28  ;;  %v6529_v18 = vadd.f32 %v8017_v24, %v11172_v21  ;;  %v11197_v48 = vadd.f32 %v7742_v14, %v11152_v23  ;;  %v7797_v20 = vpop.f32.mrb[70].mxu1 }
 0xc8c   : > { %v6018_v38 = vpop.f32.mrb[79].mxu0  ;;  %v6649_v5 = vadd.f32 1.0, %v8263_v29  ;;  %8272 = vpow2.f32 %v6605_v12  ;;  %v6562_v13 = vsub.f32 0.0, %v6530_v47  ;;  %v8019_v4 = vadd.f32 %v8018_v60, %v7797_v20  ;;  %v6397_v50 = vpop.f32.mrb[71].mxu1 }
 0xc8d   : > { %8274 = vrcp.f32 %v6650_v8  ;;  %v6561_v22 = vsub.f32 0.0, %v6529_v18  ;;  %v11200_v54 = vadd.f32 %v6018_v38, %v11154_v53  ;;  %v8021_v9 = vadd.f32 %v8020_v25, %v6397_v50 }
 0xc8e   : > { %v8265_v3 = vpop.eup %8264  ;;  %8276 = vrcp.f32 %v6649_v5  ;;  %v6609_v31 = vmul.f32 1.442695, %v6562_v13  ;;  %v6532_v56 = vadd.f32 %v8019_v4, %v11172_v21  ;;  %v7745_v23 = vpop.f32.mrb[80].mxu0 }
 0xc8f   : > { %v8267_v52 = vpop.eup %8266  ;;  %v6652_v16 = vadd.f32 1.0, %v8265_v3  ;;  %8278 = vpow2.f32 %v6603_v62  ;;  %v6607_v32 = vmul.f32 1.442695, %v6561_v22  ;;  %v6531_v7 = vadd.f32 %v8021_v9, %v11172_v21  ;;  %v7800_v60 = vpop.f32.mrb[72].mxu1 }
 0xc90   : > { %v6028_v11 = vpop.f32.mrb[81].mxu0  ;;  %v6651_v51 = vadd.f32 1.0, %v8267_v52  ;;  %8280 = vpow2.f32 %v6609_v31  ;;  %v6564_v35 = vsub.f32 0.0, %v6532_v56  ;;  %v11205_v53 = vadd.f32 %v7745_v23, %v11156_v57  ;;  %v6407_v25 = vpop.f32.mrb[73].mxu1 }
 0xc91   : > { %8282 = vrcp.f32 %v6652_v16  ;;  %v6563_v34 = vsub.f32 0.0, %v6531_v7  ;;  %v8023_v40 = vadd.f32 %v11181_v2, %v7800_v60  ;;  %v11209_v33 = vadd.f32 %v6028_v11, %v11158_v0 }
 0xc92   : > { %v8269_v6 = vpop.eup %8268  ;;  %8284 = vrcp.f32 %v6651_v51  ;;  %v6613_v27 = vmul.f32 1.442695, %v6564_v35  ;;  %v8025_v59 = vadd.f32 %v11184_v43, %v6407_v25  ;;  %v7748_v45 = vpop.f32.mrb[82].mxu0 }
 0xc93   : > { %v8271_v1 = vpop.eup %8270  ;;  %v6654_v17 = vadd.f32 1.0, %v8269_v6  ;;  %8286 = vpow2.f32 %v6607_v32  ;;  %v6611_v57 = vmul.f32 1.442695, %v6563_v34  ;;  %v6534_v30 = vadd.f32 %v8023_v40, %v11172_v21  ;;  %v7803_v44 = vpop.f32.mrb[74].mxu1 }
 0xc94   : > { %v6038_v28 = vpop.f32.mrb[83].mxu0  ;;  %v6653_v24 = vadd.f32 1.0, %v8271_v1  ;;  %8288 = vpow2.f32 %v6613_v27  ;;  %v6533_v0 = vadd.f32 %v8025_v59, %v11172_v21  ;;  %v11215_v2 = vadd.f32 %v7748_v45, %v11160_v61  ;;  %v6417_v19 = vpop.f32.mrb[75].mxu1 }
 0xc95   : > { %8290 = vrcp.f32 %v6654_v17  ;;  %v6566_v43 = vsub.f32 0.0, %v6534_v30  ;;  %v8027_v12 = vadd.f32 %v11189_v15, %v7803_v44  ;;  %v11226_v47 = vadd.f32 %v6038_v28, %v11162_v42 }
 0xc96   : > { %v8273_v14 = vpop.eup %8272  ;;  %8292 = vrcp.f32 %v6653_v24  ;;  %v6565_v29 = vsub.f32 0.0, %v6533_v0  ;;  %v8029_v61 = vadd.f32 %v11192_v49, %v6417_v19  ;;  %v7751_v8 = vpop.f32.mrb[84].mxu0 }
 0xc97   : > { %v8275_v62 = vpop.eup %8274  ;;  %v6656_v18 = vadd.f32 1.0, %v8273_v14  ;;  %8294 = vpow2.f32 %v6611_v57  ;;  %v6617_v20 = vmul.f32 1.442695, %v6566_v43  ;;  %v6536_v38 = vadd.f32 %v8027_v12, %v11172_v21  ;;  %v7806_v5 = vpop.f32.mrb[76].mxu1 }
 0xc98   : > { %v6048_v13 = vpop.f32.mrb[85].mxu0  ;;  %v8277_v4 = vpop.eup %8276  ;;  %6746 = vst.msk [vmem:[%s11222_s10 + $0x38] sm:$0xff] %vm573_vm0, %v8275_v62  ;;  %v6615_v42 = vmul.f32 1.442695, %v6565_v29  ;;  %v6535_v15 = vadd.f32 %v8029_v61, %v11172_v21  ;;  %v11234_v50 = vadd.f32 %v7751_v8, %v11164_v41  ;;  %v8031_v49 = vadd.f32 %v11197_v48, %v7806_v5 }
 0xc99   : > { %v6427_v22 = vpop.f32.mrb[77].mxu1  ;;  %v8279_v9 = vpop.eup %8278  ;;  %6745 = vst.msk [vmem:[%s11222_s10 + $0x30] sm:$0xff] %vm573_vm0, %v8277_v4  ;;  %8296 = vrcp.f32 %v6656_v18  ;;  %v6568_v3 = vsub.f32 0.0, %v6536_v38  ;;  %v11240_v31 = vadd.f32 %v6048_v13, %v11166_v39 }
 0xc9a   : > { %v8033_v56 = vadd.f32 %v11200_v54, %v6427_v22  ;;  %v8281_v23 = vpop.eup %8280  ;;  %v6655_v52 = vadd.f32 1.0, %v8279_v9  ;;  %8298 = vpow2.f32 %v6617_v20  ;;  %v6567_v16 = vsub.f32 0.0, %v6535_v15  ;;  %v7754_v32 = vpop.f32.mrb[86].mxu0 }
 0xc9b   : > { %v6538_v41 = vadd.f32 %v8031_v49, %v11172_v21  ;;  %v8283_v48 = vpop.eup %8282  ;;  %v6658_v7 = vadd.f32 1.0, %v8281_v23  ;;  %8300 = vpow2.f32 %v6615_v42  ;;  %v6621_v60 = vmul.f32 1.442695, %v6568_v3  ;;  %v7809_v51 = vpop.f32.mrb[78].mxu1 }
 0xc9c   : > { %v6537_v11 = vadd.f32 %v8033_v56, %v11172_v21  ;;  %v6058_v39 = vpop.f32.mrb[87].mxu0  ;;  %v8285_v35 = vpop.eup %8284  ;;  %6748 = vst.msk [vmem:[%s11222_s10 + $0x48] sm:$0xff] %vm573_vm0, %v8283_v48  ;;  %8302 = vrcp.f32 %v6655_v52  ;;  %v6619_v54 = vmul.f32 1.442695, %v6567_v16  ;;  %v11248_v34 = vadd.f32 %v7754_v32, %v11168_v46 }
 0xc9d   : > { %v6570_v25 = vsub.f32 0.0, %v6538_v41  ;;  %v6437_v40 = vpop.f32.mrb[79].mxu1  ;;  %v8287_v6 = vpop.eup %8286  ;;  %6747 = vst.msk [vmem:[%s11222_s10 + $0x40] sm:$0xff] %vm573_vm0, %v8285_v35  ;;  %8304 = vrcp.f32 %v6658_v7  ;;  %v8035_v59 = vadd.f32 %v11205_v53, %v7809_v51  ;;  %v11254_v45 = vadd.f32 %v6058_v39, %v11170_v55 }
 0xc9e   : > { %v6569_v27 = vsub.f32 0.0, %v6537_v11  ;;  %v8289_v1 = vpop.eup %8288  ;;  %v6657_v17 = vadd.f32 1.0, %v8287_v6  ;;  %8306 = vpow2.f32 %v6621_v60  ;;  %v8037_v30 = vadd.f32 %v11209_v33, %v6437_v40  ;;  %v7773_v46 = vpop.f32.mrb[56].mxu0 }
 0xc9f   : > { %v6625_v57 = vmul.f32 1.442695, %v6570_v25  ;;  %v8291_v44 = vpop.eup %8290  ;;  %v6660_v28 = vadd.f32 1.0, %v8289_v1  ;;  %8308 = vpow2.f32 %v6619_v54  ;;  %v6540_v0 = vadd.f32 %v8035_v59, %v11172_v21  ;;  %v7812_v19 = vpop.f32.mrb[80].mxu1 }
 0xca0   : > { %v6623_v24 = vmul.f32 1.442695, %v6569_v27  ;;  %v6317_v53 = vpop.f32.mrb[57].mxu0  ;;  %v8293_v43 = vpop.eup %8292  ;;  %6750 = vst.msk [vmem:[%s11222_s10 + $0x58] sm:$0xff] %vm573_vm0, %v8291_v44  ;;  %8310 = vrcp.f32 %v6657_v17  ;;  %v6539_v55 = vadd.f32 %v8037_v30, %v11172_v21  ;;  %v7992_v12 = vadd.f32 %v7773_v46, %v11132_v10 }
 0xca1   : > { %v8039_v33 = vadd.f32 %v11215_v2, %v7812_v19  ;;  %v6447_v14 = vpop.f32.mrb[81].mxu1  ;;  %v8295_v29 = vpop.eup %8294  ;;  %6749 = vst.msk [vmem:[%s11222_s10 + $0x50] sm:$0xff] %vm573_vm0, %v8293_v43  ;;  %8312 = vrcp.f32 %v6660_v28  ;;  %v6572_v61 = vsub.f32 0.0, %v6540_v0  ;;  %v7993_v8 = vadd.f32 %v6317_v53, %v11134_v58 }
 0xca2   : > { %v8041_v62 = vadd.f32 %v11226_v47, %v6447_v14  ;;  %v6659_v18 = vadd.f32 1.0, %v8295_v29  ;;  %8314 = vpow2.f32 %v6625_v57  ;;  %v6571_v20 = vsub.f32 0.0, %v6539_v55  ;;  %v7776_v5 = vpop.f32.mrb[58].mxu0 }
 0xca3   : > { %v6516_v38 = vadd.f32 %v7992_v12, %v11172_v21  ;;  %v8297_v10 = vpop.eup %8296  ;;  %8316 = vpow2.f32 %v6623_v24  ;;  %v6629_v2 = vmul.f32 1.442695, %v6572_v61  ;;  %v6542_v13 = vadd.f32 %v8039_v33, %v11172_v21  ;;  %v7815_v42 = vpop.f32.mrb[82].mxu1 }
 0xca4   : > { %v6515_v4 = vadd.f32 %v7993_v8, %v11172_v21  ;;  %v6327_v15 = vpop.f32.mrb[59].mxu0  ;;  %v8299_v49 = vpop.eup %8298  ;;  %6752 = vst.msk [vmem:[%s11222_s10 + $0x68] sm:$0xff] %vm573_vm0, %v8297_v10  ;;  %8318 = vrcp.f32 %v6659_v18  ;;  %v6627_v58 = vmul.f32 1.442695, %v6571_v20  ;;  %v6541_v22 = vadd.f32 %v8041_v62, %v11172_v21 }
 0xca5   : > { %v6548_v47 = vsub.f32 0.0, %v6516_v38  ;;  %v6457_v9 = vpop.f32.mrb[83].mxu1  ;;  %v8301_v3 = vpop.eup %8300  ;;  %v6662_v56 = vadd.f32 1.0, %v8299_v49  ;;  %8320 = vpow2.f32 %v6629_v2  ;;  %v6574_v23 = vsub.f32 0.0, %v6542_v13 }
 0xca6   : > { %v6547_v52 = vsub.f32 0.0, %v6515_v4  ;;  %v8303_v16 = vpop.eup %8302  ;;  %v6661_v41 = vadd.f32 1.0, %v8301_v3  ;;  %8322 = vpow2.f32 %v6627_v58  ;;  %v6573_v48 = vsub.f32 0.0, %v6541_v22  ;;  %v7779_v7 = vpop.f32.mrb[60].mxu0 }
 0xca7   : > { %v6581_v32 = vmul.f32 1.442695, %v6548_v47  ;;  %v8305_v60 = vpop.eup %8304  ;;  %6751 = vst.msk [vmem:[%s11222_s10 + $0x60] sm:$0xff] %vm573_vm0, %v8303_v16  ;;  %8324 = vrcp.f32 %v6662_v56  ;;  %v6633_v11 = vmul.f32 1.442695, %v6574_v23  ;;  %v7994_v39 = vadd.f32 %v7776_v5, %v11136_v36  ;;  %v7818_v35 = vpop.f32.mrb[84].mxu1 }
 0xca8   : > { %v6579_v51 = vmul.f32 1.442695, %v6547_v52  ;;  %v6337_v54 = vpop.f32.mrb[61].mxu0  ;;  %v8307_v25 = vpop.eup %8306  ;;  %6754 = vst.msk [vmem:[%s11222_s10 + $0x78] sm:$0xff] %vm573_vm0, %v8305_v60  ;;  %8326 = vrcp.f32 %v6661_v41  ;;  %v6631_v40 = vmul.f32 1.442695, %v6573_v48  ;;  %v8043_v6 = vadd.f32 %v11234_v50, %v7815_v42 }
 0xca9   : > { %v7995_v27 = vadd.f32 %v6327_v15, %v11138_v63  ;;  %v6467_v59 = vpop.f32.mrb[85].mxu1  ;;  %v8309_v1 = vpop.eup %8308  ;;  %v6664_v17 = vadd.f32 1.0, %v8307_v25  ;;  %8328 = vpow2.f32 %v6581_v32  ;;  %v6518_v57 = vadd.f32 %v7994_v39, %v11172_v21 }
 0xcaa   : > { %v8045_v36 = vadd.f32 %v11240_v31, %v6457_v9  ;;  %v8311_v30 = vpop.eup %8310  ;;  %v6663_v46 = vadd.f32 1.0, %v8309_v1  ;;  %8330 = vpow2.f32 %v6633_v11  ;;  %v6544_v44 = vadd.f32 %v8043_v6, %v11172_v21 }
 0xcab   : > { %v6517_v28 = vadd.f32 %v7995_v27, %v11172_v21  ;;  %v8313_v24 = vpop.eup %8312  ;;  %6753 = vst.msk [vmem:[%s11222_s10 + $0x70] sm:$0xff] %vm573_vm0, %v8311_v30  ;;  %8332 = vrcp.f32 %v6664_v17  ;;  %v6550_v63 = vsub.f32 0.0, %v6518_v57  ;;  %v7996_v0 = vadd.f32 %v7779_v7, %v11140_v26 }
 0xcac   : > { %v6543_v50 = vadd.f32 %v8045_v36, %v11172_v21  ;;  %v8315_v19 = vpop.eup %8314  ;;  %6756 = vst.msk [vmem:[%s11222_s10 + $0x88] sm:$0xff] %vm573_vm0, %v8313_v24  ;;  %8334 = vrcp.f32 %v6663_v46  ;;  %v6576_v31 = vsub.f32 0.0, %v6544_v44  ;;  %v8047_v53 = vadd.f32 %v11248_v34, %v7818_v35 }
 0xcad   : > { %v8317_v43 = vpop.eup %8316  ;;  %v6666_v55 = vadd.f32 1.0, %v8315_v19  ;;  %8336 = vpow2.f32 %v6579_v51  ;;  %v6585_v12 = vmul.f32 1.442695, %v6550_v63  ;;  %v6549_v33 = vsub.f32 0.0, %v6517_v28 }
 0xcae   : > { %v8319_v14 = vpop.eup %8318  ;;  %v6665_v29 = vadd.f32 1.0, %v8317_v43  ;;  %8338 = vpow2.f32 %v6631_v40  ;;  %v6575_v61 = vsub.f32 0.0, %v6543_v50  ;;  %v6637_v26 = vmul.f32 1.442695, %v6576_v31 }
 0xcaf   : > { %v8321_v8 = vpop.eup %8320  ;;  %6755 = vst.msk [vmem:[%s11222_s10 + $0x80] sm:$0xff] %vm573_vm0, %v8319_v14  ;;  %8340 = vrcp.f32 %v6666_v55  ;;  %v6520_v62 = vadd.f32 %v7996_v0, %v11172_v21  ;;  %v6546_v18 = vadd.f32 %v8047_v53, %v11172_v21  ;;  %v7997_v38 = vadd.f32 %v6337_v54, %v11142_v37 }
 0xcb0   : > { %v8323_v34 = vpop.eup %8322  ;;  %8342 = vrcp.f32 %v6665_v29  ;;  %v6668_v20 = vadd.f32 1.0, %v8321_v8  ;;  %v8049_v5 = vadd.f32 %v11254_v45, %v6467_v59  ;;  %v6583_v13 = vmul.f32 1.442695, %v6549_v33 }
 0xcb1   : > { %v8325_v10 = vpop.eup %8324  ;;  %v6667_v2 = vadd.f32 1.0, %v8323_v34  ;;  %8344 = vpow2.f32 %v6585_v12  ;;  %v6552_v4 = vsub.f32 0.0, %v6520_v62  ;;  %v6519_v15 = vadd.f32 %v7997_v38, %v11172_v21 }
 0xcb2   : > { %v8327_v42 = vpop.eup %8326  ;;  %6758 = vst.msk [vmem:[%s11222_s10 + $0x98] sm:$0xff] %vm573_vm0, %v8325_v10  ;;  %8346 = vrcp.f32 %v6668_v20  ;;  %v6545_v37 = vadd.f32 %v8049_v5, %v11172_v21  ;;  %v6635_v47 = vmul.f32 1.442695, %v6575_v61  ;;  %v6578_v22 = vsub.f32 0.0, %v6546_v18 }
 0xcb3   : > { %v8329_v49 = vpop.eup %8328  ;;  %6757 = vst.msk [vmem:[%s11222_s10 + $0x90] sm:$0xff] %vm573_vm0, %v8327_v42  ;;  %8348 = vrcp.f32 %v6667_v2  ;;  %v6589_v56 = vmul.f32 1.442695, %v6552_v4  ;;  %v6551_v23 = vsub.f32 0.0, %v6519_v15 }
 0xcb4   : > { %v8331_v45 = vpop.eup %8330  ;;  %v6644_v58 = vadd.f32 1.0, %v8329_v49  ;;  %8350 = vpow2.f32 %v6637_v26  ;;  %v6577_v21 = vsub.f32 0.0, %v6545_v37  ;;  %v6641_v48 = vmul.f32 1.442695, %v6578_v22 }
 0xcb5   : > { %v8333_v9 = vpop.eup %8332  ;;  %v6670_v3 = vadd.f32 1.0, %v8331_v45  ;;  %8352 = vpow2.f32 %v6583_v13  ;;  %v6587_v11 = vmul.f32 1.442695, %v6551_v23 }
 0xcb6   : > { %v8335_v52 = vpop.eup %8334  ;;  %6760 = vst.msk [vmem:[%s11222_s10 + $0xa8] sm:$0xff] %vm573_vm0, %v8333_v9  ;;  %8354 = vrcp.f32 %v6644_v58  ;;  %v6639_v35 = vmul.f32 1.442695, %v6577_v21 }
 0xcb7   : > { %v8337_v16 = vpop.eup %8336  ;;  %6759 = vst.msk [vmem:[%s11222_s10 + $0xa0] sm:$0xff] %vm573_vm0, %v8335_v52  ;;  %8356 = vrcp.f32 %v6670_v3 }
 0xcb8   : > { %v8339_v41 = vpop.eup %8338  ;;  %v6643_v32 = vadd.f32 1.0, %v8337_v16  ;;  %8358 = vpow2.f32 %v6635_v47 }
 0xcb9   : > { %v8341_v7 = vpop.eup %8340  ;;  %v6669_v60 = vadd.f32 1.0, %v8339_v41  ;;  %8360 = vpow2.f32 %v6589_v56 }
 0xcba   : > { %v8343_v51 = vpop.eup %8342  ;;  %6762 = vst.msk [vmem:[%s11222_s10 + $0xb8] sm:$0xff] %vm573_vm0, %v8341_v7  ;;  %8362 = vrcp.f32 %v6643_v32 }
 0xcbb   : > { %v8345_v39 = vpop.eup %8344  ;;  %6761 = vst.msk [vmem:[%s11222_s10 + $0xb0] sm:$0xff] %vm573_vm0, %v8343_v51  ;;  %8364 = vrcp.f32 %v6669_v60 }
 0xcbc   : > { %v8347_v54 = vpop.eup %8346  ;;  %v6646_v25 = vadd.f32 1.0, %v8345_v39  ;;  %8366 = vpow2.f32 %v6641_v48 }
 0xcbd   : > { %v8349_v40 = vpop.eup %8348  ;;  %6764 = vst.msk [vmem:[%s11222_s10 + $0xc8] sm:$0xff] %vm573_vm0, %v8347_v54  ;;  %8368 = vpow2.f32 %v6587_v11 }
 0xcbe   : > { %v8351_v6 = vpop.eup %8350  ;;  %6763 = vst.msk [vmem:[%s11222_s10 + $0xc0] sm:$0xff] %vm573_vm0, %v8349_v40  ;;  %8370 = vrcp.f32 %v6646_v25 }
 0xcbf   : > { %v8353_v27 = vpop.eup %8352  ;;  %v6672_v59 = vadd.f32 1.0, %v8351_v6  ;;  %8372 = vpow2.f32 %v6639_v35 }
 0xcc0   : > { %v8355_v1 = vpop.eup %8354  ;;  %v6645_v17 = vadd.f32 1.0, %v8353_v27 }
 0xcc1   : > { %v8357_v57 = vpop.eup %8356  ;;  %6740 = vst.msk [vmem:[%s11222_s10 + $0x8] sm:$0xff] %vm573_vm0, %v8355_v1  ;;  %8374 = vrcp.f32 %v6672_v59 }
 0xcc2   : > { %v8359_v36 = vpop.eup %8358  ;;  %6766 = vst.msk [vmem:[%s11222_s10 + $0xd8] sm:$0xff] %vm573_vm0, %v8357_v57  ;;  %8376 = vrcp.f32 %v6645_v17 }
 0xcc3   : > { %v8361_v30 = vpop.eup %8360  ;;  %v6671_v46 = vadd.f32 1.0, %v8359_v36 }
 0xcc4   : > { %v8363_v44 = vpop.eup %8362  ;;  %v6648_v28 = vadd.f32 1.0, %v8361_v30 }
 0xcc5   : > { %v8365_v24 = vpop.eup %8364  ;;  %6739 = vst.msk [vmem:[%s11222_s10] sm:$0xff] %vm573_vm0, %v8363_v44  ;;  %8378 = vrcp.f32 %v6671_v46 }
 0xcc6   : > { %v8367_v63 = vpop.eup %8366  ;;  %6765 = vst.msk [vmem:[%s11222_s10 + $0xd0] sm:$0xff] %vm573_vm0, %v8365_v24  ;;  %8380 = vrcp.f32 %v6648_v28 }
 0xcc7   : > { %v8369_v50 = vpop.eup %8368  ;;  %v6674_v0 = vadd.f32 1.0, %v8367_v63 }
 0xcc8   : > { %v8371_v19 = vpop.eup %8370  ;;  %v6647_v31 = vadd.f32 1.0, %v8369_v50 }
 0xcc9   : > { %v8373_v53 = vpop.eup %8372  ;;  %6742 = vst.msk [vmem:[%s11222_s10 + $0x18] sm:$0xff] %vm573_vm0, %v8371_v19  ;;  %8382 = vrcp.f32 %v6674_v0 }
 0xcca   : > { %8384 = vrcp.f32 %v6647_v31  ;;  %v6673_v43 = vadd.f32 1.0, %v8373_v53 }
 0xccb   : > { %v8375_v55 = vpop.eup %8374 }
 0xccc   : > { %v8377_v12 = vpop.eup %8376  ;;  %6768 = vst.msk [vmem:[%s11222_s10 + $0xe8] sm:$0xff] %vm573_vm0, %v8375_v55  ;;  %8386 = vrcp.f32 %v6673_v43 }
 0xccd   : > { %6741 = vst.msk [vmem:[%s11222_s10 + $0x10] sm:$0xff] %vm573_vm0, %v8377_v12 }
 0xccf   : > { %v8379_v33 = vpop.eup %8378 }
 0xcd0   : > { %v8381_v14 = vpop.eup %8380  ;;  %6767 = vst.msk [vmem:[%s11222_s10 + $0xe0] sm:$0xff] %vm573_vm0, %v8379_v33 }
 0xcd1   : > { %6744 = vst.msk [vmem:[%s11222_s10 + $0x28] sm:$0xff] %vm573_vm0, %v8381_v14 }
 0xcd3   : > { %v8383_v29 = vpop.eup %8382 }
 0xcd4   : > { %v8385_v61 = vpop.eup %8384  ;;  %6770 = vst.msk [vmem:[%s11222_s10 + $0xf8] sm:$0xff] %vm573_vm0, %v8383_v29 }
 0xcd5   : > { %6743 = vst.msk [vmem:[%s11222_s10 + $0x20] sm:$0xff] %vm573_vm0, %v8385_v61 }
 0xcd6   : > { %v8387_v8 = vpop.eup %8386 }
 0xcd7   : > { %6769 = vst.msk [vmem:[%s11222_s10 + $0xf0] sm:$0xff] %vm573_vm0, %v8387_v8 }
 0xcd8 PF: > { %s11405_s21 = sld [smem:[#allocation16_spill]] }
 0xcde   : > { %s29_s20 = sadd.s32 1, %s11405_s21  }
 0xcdf   : > { %p26_p9 = scmp.ge.s32.totalorder %s29_s20, 4  }
 0xce1   :  { %28 = sbr.rel (!%p26_p9) target bundleno = 5 (0x5), region = 123 }
 0xce8   :  { %6792 = vsyncpa [#allocation10], 1 }
 0xce9   :  { %6794 = vsyncpa [#allocation10 + $0x1], 1 }
 0xcea   :  { %6795 = vsyncpa [#allocation12], 1 }

</bundles_post_ra>
